<compile_context>
chip_gen: v6e
topology: v6e:2x2x1
jax: 0.10.0
libtpu: 0.0.40
codegen_flags: <defaults>
</compile_context>

<pallas_src>
import numpy as np
import jax
import jax.numpy as jnp
from jax.experimental import pallas as pl
from jax.experimental.pallas import tpu as pltpu


# ----------------------------------------------------------------------------
# helpers
# ----------------------------------------------------------------------------
def _rup(x, m):
    return ((x + m - 1) // m) * m


def _pad2d(a, rows, cols):
    r, c = a.shape
    if r == rows and c == cols:
        return a
    return jnp.pad(a, ((0, rows - r), (0, cols - c)))


_VMEM_LIMIT = 64 * 1024 * 1024   # <= physical VMEM on v5e/v6e/v7x, >> scoped default
_LN_EPS = 1e-5


def _erf_poly(x):
    """erf via Abramowitz & Stegun 7.1.26 (|err| <= 1.5e-7). Only exp/mul/add/select."""
    a1, a2, a3, a4, a5 = 0.254829592, -0.284496736, 1.421413741, -1.453152027, 1.061405429
    p = 0.3275911
    z = jnp.abs(x)
    t = 1.0 / (1.0 + p * z)
    poly = ((((a5 * t + a4) * t + a3) * t + a2) * t + a1) * t
    y = 1.0 - poly * jnp.exp(-z * z)
    return jnp.where(x >= 0, y, -y)


def _gelu_exact(x):
    """Exact-erf GELU (matches nn.GELU()) using the polynomial erf above."""
    return 0.5 * x * (1.0 + _erf_poly(x * 0.7071067811865476))


def _layernorm(x, k_true, g, b):
    """LayerNorm over the last dim; padded lanes are zero so sums stay exact."""
    mean = jnp.sum(x, axis=-1, keepdims=True) * (1.0 / k_true)
    var = jnp.sum(x * x, axis=-1, keepdims=True) * (1.0 / k_true) - mean * mean
    var = jnp.maximum(var, 0.0)
    xn = (x - mean) * jax.lax.rsqrt(var + _LN_EPS)
    return xn * g + b          # padded lanes: gamma=beta=0 -> stay zero


# ----------------------------------------------------------------------------
# Pallas kernel 1: generic fused  [LayerNorm] -> x @ W + b -> [GELU] -> [+res]
# ----------------------------------------------------------------------------
def _make_linear_kernel(k_true, act, has_ln, has_res):
    def kernel(*refs):
        x_ref, w_ref, b_ref = refs[0], refs[1], refs[2]
        idx = 3
        if has_ln:
            g_ref, be_ref = refs[idx], refs[idx + 1]
            idx += 2
        if has_res:
            r_ref = refs[idx]
            idx += 1
        o_ref = refs[idx]

        x = x_ref[...]                                    # (tm, Kp) f32
        if has_ln:
            x = _layernorm(x, k_true, g_ref[...], be_ref[...])
        # bf16 MXU inputs (weights pre-cast in wrapper), f32 accumulation.
        y = jnp.dot(x.astype(jnp.bfloat16), w_ref[...],
                    preferred_element_type=jnp.float32) + b_ref[...]
        if act == "gelu":
            y = _gelu_exact(y)
        if has_res:
            y = y + r_ref[...]
        o_ref[...] = y.astype(o_ref.dtype)
    return kernel


def pallas_linear(x2d, w, b, *, act="none", ln=None, res=None, tm=256):
    """y = [gelu]( [LN](x2d) @ w + b ) [+ res];  x2d (M,K), w (K,N), b (N,)."""
    M, K = x2d.shape
    N = w.shape[1]
    Kp, Np = _rup(K, 128), _rup(N, 128)       # lane-dense matmul / store widths
    tm_eff = min(tm, _rup(M, 8))              # big row tile, don't over-pad tiny M
    Mp = _rup(M, tm_eff)

    args = [
        _pad2d(x2d, Mp, Kp),
        _pad2d(w, Kp, Np).astype(jnp.bfloat16),
        _pad2d(b.reshape(1, -1), 1, Np).astype(jnp.float32),
    ]
    in_specs = [
        pl.BlockSpec((tm_eff, Kp), lambda i: (i, 0)),
        pl.BlockSpec((Kp, Np), lambda i: (0, 0)),         # resident bf16 weight
        pl.BlockSpec((1, Np), lambda i: (0, 0)),
    ]
    has_ln = ln is not None
    if has_ln:
        g, be = ln
        args += [_pad2d(g.reshape(1, -1), 1, Kp),
                 _pad2d(be.reshape(1, -1), 1, Kp)]
        in_specs += [pl.BlockSpec((1, Kp), lambda i: (0, 0)),
                     pl.BlockSpec((1, Kp), lambda i: (0, 0))]
    has_res = res is not None
    if has_res:
        args.append(_pad2d(res, Mp, Np))
        in_specs.append(pl.BlockSpec((tm_eff, Np), lambda i: (i, 0)))

    out = pl.pallas_call(
        _make_linear_kernel(K, act, has_ln, has_res),
        out_shape=jax.ShapeDtypeStruct((Mp, Np), jnp.float32),
        grid_spec=pltpu.PrefetchScalarGridSpec(
            num_scalar_prefetch=0,
            grid=(Mp // tm_eff,),
            in_specs=in_specs,
            out_specs=pl.BlockSpec((tm_eff, Np), lambda i: (i, 0)),
        ),
        compiler_params=pltpu.CompilerParams(
            dimension_semantics=("parallel",),
            vmem_limit_bytes=_VMEM_LIMIT,
        ),
    )(*args)
    return out[:M, :N]


# ----------------------------------------------------------------------------
# Pallas kernel 2: fused Residual(PreNorm(FeedForward))
#   out = x + ( GELU( LN(x) @ W1 + b1 ) @ W2 + b2 )        (dropout p=0 -> identity)
# ----------------------------------------------------------------------------
def _make_ffn_kernel(d_true):
    def kernel(x_ref, g_ref, be_ref, w1_ref, b1_ref, w2_ref, b2_ref, o_ref):
        x = x_ref[...]                                     # (tm, Dp) f32
        xn = _layernorm(x, d_true, g_ref[...], be_ref[...])
        h = jnp.dot(xn.astype(jnp.bfloat16), w1_ref[...],
                    preferred_element_type=jnp.float32) + b1_ref[...]
        h = _gelu_exact(h)
        y = jnp.dot(h.astype(jnp.bfloat16), w2_ref[...],
                    preferred_element_type=jnp.float32) + b2_ref[...]
        o_ref[...] = (y + x).astype(o_ref.dtype)           # residual
    return kernel


def pallas_ffn(x2d, gamma, beta, w1, b1, w2, b2, *, tm=256):
    M, D = x2d.shape
    H = w1.shape[1]
    Dp, Hp = _rup(D, 128), _rup(H, 128)
    tm_eff = min(tm, _rup(M, 8))
    Mp = _rup(M, tm_eff)
    out = pl.pallas_call(
        _make_ffn_kernel(D),
        out_shape=jax.ShapeDtypeStruct((Mp, Dp), jnp.float32),
        grid_spec=pltpu.PrefetchScalarGridSpec(
            num_scalar_prefetch=0,
            grid=(Mp // tm_eff,),
            in_specs=[
                pl.BlockSpec((tm_eff, Dp), lambda i: (i, 0)),
                pl.BlockSpec((1, Dp), lambda i: (0, 0)),
                pl.BlockSpec((1, Dp), lambda i: (0, 0)),
                pl.BlockSpec((Dp, Hp), lambda i: (0, 0)),   # resident bf16 W1
                pl.BlockSpec((1, Hp), lambda i: (0, 0)),
                pl.BlockSpec((Hp, Dp), lambda i: (0, 0)),   # resident bf16 W2
                pl.BlockSpec((1, Dp), lambda i: (0, 0)),
            ],
            out_specs=pl.BlockSpec((tm_eff, Dp), lambda i: (i, 0)),
        ),
        compiler_params=pltpu.CompilerParams(
            dimension_semantics=("parallel",),
            vmem_limit_bytes=_VMEM_LIMIT,
        ),
    )(
        _pad2d(x2d, Mp, Dp),
        _pad2d(gamma.reshape(1, -1), 1, Dp),
        _pad2d(beta.reshape(1, -1), 1, Dp),
        _pad2d(w1, Dp, Hp).astype(jnp.bfloat16),
        _pad2d(b1.reshape(1, -1), 1, Hp),
        _pad2d(w2, Hp, Dp).astype(jnp.bfloat16),
        _pad2d(b2.reshape(1, -1), 1, Dp),
    )
    return out[:M, :D]


# ----------------------------------------------------------------------------
# Pallas kernel 3: LSA attention core (diagonal-masked softmax attention).
# One (batch*head) per grid step; whole sequence resident in VMEM.
# ----------------------------------------------------------------------------
def _attn_kernel(scale_ref, q_ref, k_ref, v_ref, o_ref):
    q = q_ref[0].astype(jnp.bfloat16)                      # (N, dh)
    k = k_ref[0].astype(jnp.bfloat16)
    v = v_ref[0].astype(jnp.bfloat16)
    scale = scale_ref[0]                                   # exp(temperature), SMEM scalar
    dots = jnp.dot(q, k.T, preferred_element_type=jnp.float32) * scale
    n = dots.shape[-1]
    row = jax.lax.broadcasted_iota(jnp.int32, (n, n), 0)
    col = jax.lax.broadcasted_iota(jnp.int32, (n, n), 1)
    dots = jnp.where(row == col, -jnp.finfo(jnp.float32).max, dots)
    m = jnp.max(dots, axis=-1, keepdims=True)
    p = jnp.exp(dots - m)
    attn = p / jnp.sum(p, axis=-1, keepdims=True)
    out = jnp.dot(attn.astype(jnp.bfloat16), v, preferred_element_type=jnp.float32)
    o_ref[0] = out.astype(o_ref.dtype)


def pallas_attention(q, k, v, scale):
    BH, N, dh = q.shape
    scale_arr = jnp.reshape(scale.astype(jnp.float32), (1,))
    return pl.pallas_call(
        _attn_kernel,
        out_shape=jax.ShapeDtypeStruct((BH, N, dh), jnp.float32),
        grid_spec=pltpu.PrefetchScalarGridSpec(
            num_scalar_prefetch=0,
            grid=(BH,),
            in_specs=[
                pl.BlockSpec(memory_space=pltpu.MemorySpace.SMEM),   # temperature scale
                pl.BlockSpec((1, N, dh), lambda i: (i, 0, 0)),
                pl.BlockSpec((1, N, dh), lambda i: (i, 0, 0)),
                pl.BlockSpec((1, N, dh), lambda i: (i, 0, 0)),
            ],
            out_specs=pl.BlockSpec((1, N, dh), lambda i: (i, 0, 0)),
        ),
        compiler_params=pltpu.CompilerParams(
            dimension_semantics=("parallel",),
            vmem_limit_bytes=_VMEM_LIMIT,
        ),
    )(scale_arr, q, k, v)


# ----------------------------------------------------------------------------
# pure-JAX reference ops (identical bf16-input / f32-accumulate precision)
# ----------------------------------------------------------------------------
def jnp_linear(x2d, w, b, *, act="none", ln=None, res=None):
    x = x2d
    if ln is not None:
        g, be = ln
        mean = jnp.mean(x, axis=-1, keepdims=True)
        var = jnp.mean(jnp.square(x - mean), axis=-1, keepdims=True)
        x = (x - mean) * jax.lax.rsqrt(var + _LN_EPS) * g + be
    y = jnp.dot(x.astype(jnp.bfloat16), w.astype(jnp.bfloat16),
                preferred_element_type=jnp.float32) + b
    if act == "gelu":
        y = jax.nn.gelu(y, approximate=False)
    if res is not None:
        y = y + res
    return y


def jnp_ffn(x2d, gamma, beta, w1, b1, w2, b2):
    h = jnp_linear(x2d, w1, b1, act="gelu", ln=(gamma, beta))
    return jnp_linear(h, w2, b2, res=x2d)


def jnp_attention(q, k, v, scale):
    qb, kb, vb = (t.astype(jnp.bfloat16) for t in (q, k, v))
    dots = jnp.einsum("bnd,bmd->bnm", qb, kb,
                      preferred_element_type=jnp.float32) * scale
    n = dots.shape[-1]
    eye = jnp.eye(n, dtype=bool)[None, :, :]
    dots = jnp.where(eye, -jnp.finfo(jnp.float32).max, dots)
    attn = jax.nn.softmax(dots, axis=-1)
    return jnp.einsum("bnm,bmd->bnd", attn.astype(jnp.bfloat16), vb,
                      preferred_element_type=jnp.float32)


PALLAS_OPS = dict(linear=pallas_linear, ffn=pallas_ffn, attention=pallas_attention)
JNP_OPS = dict(linear=jnp_linear, ffn=jnp_ffn, attention=jnp_attention)


# ----------------------------------------------------------------------------
# shared JAX glue (data reshuffles / per-sample reductions; see TODO at top)
# ----------------------------------------------------------------------------
def gelu(x):
    return jax.nn.gelu(x, approximate=False)


def group_norm(x, gamma, beta, eps=1e-5):
    # GroupNorm(1, C) == per-sample normalization over (C, H, W)
    mean = jnp.mean(x, axis=(1, 2, 3), keepdims=True)
    var = jnp.mean(jnp.square(x - mean), axis=(1, 2, 3), keepdims=True)
    xn = (x - mean) * jax.lax.rsqrt(var + eps)
    return xn * gamma[None, :, None, None] + beta[None, :, None, None]


def max_pool4(x):
    B, C, H, W = x.shape
    return jnp.max(x.reshape(B, C, H // 4, 4, W // 4, 4), axis=(3, 5))


def _interp_axis(x, axis, new):
    old = x.shape[axis]
    if old == 1:
        return jnp.repeat(x, new, axis=axis)
    pos = jnp.arange(new, dtype=jnp.float32) * ((old - 1) / (new - 1))
    lo = jnp.floor(pos).astype(jnp.int32)
    hi = jnp.minimum(lo + 1, old - 1)
    frac = pos - lo.astype(jnp.float32)
    shape = [1] * x.ndim
    shape[axis] = new
    frac = frac.reshape(shape)
    return jnp.take(x, lo, axis=axis) * (1.0 - frac) + jnp.take(x, hi, axis=axis) * frac


def upsample2x(x):
    # nn.Upsample(scale_factor=2, mode='bilinear', align_corners=True)
    return _interp_axis(_interp_axis(x, 2, 2 * x.shape[2]), 3, 2 * x.shape[3])


def conv3x3(x, w, ops):
    # Conv2d(k=3, padding=1, bias=False) as im2col + (Pallas) matmul.
    B, C, H, W = x.shape
    Cout = w.shape[0]
    xp = jnp.pad(x, ((0, 0), (0, 0), (1, 1), (1, 1)))
    cols = jnp.stack([xp[:, :, di:di + H, dj:dj + W]
                      for di in range(3) for dj in range(3)], axis=2)   # (B,C,9,H,W)
    cols = cols.reshape(B, C * 9, H * W).transpose(0, 2, 1).reshape(B * H * W, C * 9)
    y = ops["linear"](cols, w.reshape(Cout, C * 9).T,
                      jnp.zeros((Cout,), jnp.float32))
    return y.reshape(B, H, W, Cout).transpose(0, 3, 1, 2)


def conv1x1(x, w, b, ops):
    B, C, H, W = x.shape
    Cout = w.shape[0]
    x2d = x.transpose(0, 2, 3, 1).reshape(B * H * W, C)
    y = ops["linear"](x2d, w.T, b)
    return y.reshape(B, H, W, Cout).transpose(0, 3, 1, 2)


# ----------------------------------------------------------------------------
# EnhancedUNet forward (module structure mirrored 1:1; dropout==0 -> identity)
# ----------------------------------------------------------------------------
def make_forward(cfg, ops):
    heads, dim_head, time_dim = cfg["heads"], cfg["dim_head"], cfg["time_dim"]
    inner = heads * dim_head

    def double_conv(p, x, residual=False):
        h = conv3x3(x, p["w1"], ops)
        h = gelu(group_norm(h, p["g1"], p["b1"]))
        h = conv3x3(h, p["w2"], ops)
        h = group_norm(h, p["g2"], p["b2"])
        return gelu(x + h) if residual else h

    def down_block(p, x, t_silu):
        x = max_pool4(x)
        x = double_conv(p["dc1"], x, residual=True)
        x = double_conv(p["dc2"], x)
        emb = ops["linear"](t_silu, p["emb_w"], p["emb_b"])
        return x + emb[:, :, None, None]

    def up_block(p, x, skip, t_silu):
        x = upsample2x(x)
        if skip is not None:
            x = jnp.concatenate([skip, x], axis=1)
        x = double_conv(p["dc1"], x, residual=True)
        x = double_conv(p["dc2"], x)
        emb = ops["linear"](t_silu, p["emb_w"], p["emb_b"])
        return x + emb[:, :, None, None]

    def transformer(p, x):
        B, C, H, W = x.shape
        N = H * W
        x2d = x.reshape(B, C, N).transpose(0, 2, 1).reshape(B * N, C)
        for layer in p["layers"]:
            a = layer["attn"]
            # Residual(PreNorm(LSA))  --  LayerNorm fused into the qkv projection.
            qkv = ops["linear"](x2d, a["wqkv"],
                                jnp.zeros((3 * inner,), jnp.float32),
                                ln=(a["ln_g"], a["ln_b"]))
            qkv = qkv.reshape(B, N, 3 * inner)

            def to_heads(z):
                return (z.reshape(B, N, heads, dim_head)
                         .transpose(0, 2, 1, 3)
                         .reshape(B * heads, N, dim_head))

            q = to_heads(qkv[..., :inner])
            k = to_heads(qkv[..., inner:2 * inner])
            v = to_heads(qkv[..., 2 * inner:])
            o = ops["attention"](q, k, v, jnp.exp(a["temperature"]))
            o = (o.reshape(B, heads, N, dim_head)
                  .transpose(0, 2, 1, 3)
                  .reshape(B * N, inner))
            x2d = ops["linear"](o, a["wo"], a["bo"], res=x2d)
            # Residual(PreNorm(FeedForward)) -- single fused Pallas kernel.
            f = layer["ff"]
            x2d = ops["ffn"](x2d, f["ln_g"], f["ln_b"],
                             f["w1"], f["b1"], f["w2"], f["b2"])
        return x2d.reshape(B, N, C).transpose(0, 2, 1).reshape(B, C, H, W)

    def pos_encoding(t):
        inv_freq = 1.0 / (10000.0 ** (jnp.arange(0, time_dim, 2, dtype=jnp.float32)
                                      / time_dim))
        ang = t * inv_freq[None, :]
        return jnp.concatenate([jnp.sin(ang), jnp.cos(ang)], axis=-1)

    def forward(params, x, t):
        t = t.astype(jnp.float32)[:, None]
        t_emb = pos_encoding(t)                   # (B, time_dim)
        t_silu = jax.nn.silu(t_emb)               # emb_layer = SiLU -> Linear

        x1 = gelu(group_norm(conv3x3(x, params["init_w"], ops),
                             params["init_g"], params["init_b"]))
        x2 = down_block(params["down0"], x1, t_silu)
        x2 = transformer(params["tr0"], x2)
        x3 = down_block(params["down1"], x2, t_silu)
        x3 = transformer(params["tr1"], x3)
        x3 = double_conv(params["bn0"], x3)
        x3 = double_conv(params["bn1"], x3)
        x3 = double_conv(params["bn2"], x3)
        y = up_block(params["up0"], x3, None, t_silu)
        y = up_block(params["up1"], y, x2, t_silu)
        y = up_block(params["up2"], y, None, t_silu)
        y = up_block(params["up3"], y, x1, t_silu)
        return conv1x1(y, params["last_w"], params["last_b"], ops)

    return forward


# ----------------------------------------------------------------------------
# deterministic synthetic parameters.
# Conv weights kept in PyTorch layout (Cout, Cin, 3, 3); Linear weights stored
# pre-transposed as (in, out) for row-major matmuls.
# ----------------------------------------------------------------------------
def init_params(key, cfg):
    ic, oc = cfg["input_channels"], cfg["out_channels"]
    dim, time_dim = cfg["dim"], cfg["time_dim"]
    heads, dim_head = cfg["heads"], cfg["dim_head"]
    mlp_ratio, depth = cfg["mlp_ratio"], cfg["depth"]
    dims = (dim // 32, dim // 16, dim // 8, dim // 4, dim // 2, dim)
    inner = heads * dim_head

    keys = iter(jax.random.split(key, 256))
    nk = lambda: next(keys)

    def conv_w(cin, cout):
        return jax.random.normal(nk(), (cout, cin, 3, 3), jnp.float32) / np.sqrt(9 * cin)

    def lin(cin, cout):
        w = jax.random.normal(nk(), (cin, cout), jnp.float32) / np.sqrt(cin)
        b = jax.random.normal(nk(), (cout,), jnp.float32) * 0.02
        return w, b

    def gn(c):
        return jnp.ones((c,), jnp.float32), jnp.zeros((c,), jnp.float32)

    def dconv(cin, cout, mid=None):
        mid = mid or cout
        g1, b1 = gn(mid)
        g2, b2 = gn(cout)
        return dict(w1=conv_w(cin, mid), g1=g1, b1=b1,
                    w2=conv_w(mid, cout), g2=g2, b2=b2)

    def down(cin, cout):
        ew, eb = lin(time_dim, cout)
        return dict(dc1=dconv(cin, cin), dc2=dconv(cin, cout), emb_w=ew, emb_b=eb)

    def up(cin, cout):
        ew, eb = lin(time_dim, cout)
        return dict(dc1=dconv(cin, cin), dc2=dconv(cin, cout, mid=cin // 2),
                    emb_w=ew, emb_b=eb)

    def transformer(d):
        layers = []
        for _ in range(depth):
            wqkv, _ = lin(d, 3 * inner)                       # to_qkv has bias=False
            wo, bo = lin(inner, d)
            ln_g, ln_b = gn(d)
            fg, fb = gn(d)
            w1, b1 = lin(d, mlp_ratio * d)
            w2, b2 = lin(mlp_ratio * d, d)
            layers.append(dict(
                attn=dict(ln_g=ln_g, ln_b=ln_b, wqkv=wqkv, wo=wo, bo=bo,
                          temperature=jnp.asarray(np.log(dim_head ** -0.5),
                                                  jnp.float32)),
                ff=dict(ln_g=fg, ln_b=fb, w1=w1, b1=b1, w2=w2, b2=b2)))
        return dict(layers=layers)

    init_g, init_b = gn(dims[0])
    last_w = jax.random.normal(nk(), (oc, dims[0]), jnp.float32) / np.sqrt(dims[0])
    last_b = jax.random.normal(nk(), (oc,), jnp.float32) * 0.02
    return dict(
        init_w=conv_w(ic, dims[0]), init_g=init_g, init_b=init_b,
        down0=down(dims[0], dims[2]),
        down1=down(dims[2], dims[3]),
        tr0=transformer(dims[2]),
        tr1=transformer(dims[3]),
        bn0=dconv(dims[3], dims[4]),
        bn1=dconv(dims[4], dims[4]),
        bn2=dconv(dims[4], dims[3]),
        up0=up(dims[3], dims[2]),
        up1=up(dims[3], dims[1]),
        up2=up(dims[1], dims[0]),
        up3=up(dims[1], dims[0]),
        last_w=last_w, last_b=last_b)


if __name__ == "__main__":
    # Small config consistent with EnhancedUNet(dim=64, time_dim=32); spatial 32x32
    # is the smallest size that survives two MaxPool(4) stages non-degenerately.
    cfg = dict(input_channels=1, out_channels=1, time_dim=32, dim=64,
               depth=1, heads=4, dim_head=64, mlp_ratio=4)
    B, H, W = 2, 32, 32

    key = jax.random.PRNGKey(0)
    kp, kx = jax.random.split(key)
    params = init_params(kp, cfg)
    x = jax.random.normal(kx, (B, cfg["input_channels"], H, W), jnp.float32)
    t = jnp.array([7, 142], dtype=jnp.int32)

    fwd_pallas = jax.jit(make_forward(cfg, PALLAS_OPS))
    fwd_ref = jax.jit(make_forward(cfg, JNP_OPS))

    out = fwd_pallas(params, x, t)
    jax.block_until_ready(out)

    ref = fwd_ref(params, x, t)
    jax.block_until_ready(ref)

    assert out.shape == (B, cfg["out_channels"], H, W), out.shape
    assert bool(jnp.all(jnp.isfinite(out))), "non-finite output"
    err = float(jnp.max(jnp.abs(out - ref)))
    assert err < 2e-2, f"mismatch vs pure-JAX reference: max abs err {err}"

    print("KERNEL_OK")
</pallas_src>

<mosaic_0001>
module attributes {stable_mosaic.version = 11 : i64} {
  func.func @kernel(%arg0: i32, %arg1: memref<256x128xf32, #tpu.memory_space<vmem>>, %arg2: memref<128x128xbf16, #tpu.memory_space<vmem>>, %arg3: memref<1x128xf32, #tpu.memory_space<vmem>>, %arg4: memref<256x128xf32, #tpu.memory_space<vmem>>) attributes {dimension_semantics = [#tpu.dimension_semantics<parallel>], iteration_bounds = array<i64: 8>, scalar_prefetch = 0 : i64, scratch_operands = 0 : i64, tpu.core_type = #tpu.core_type<tc>, window_params = [{transform_indices = @transform_0, window_bounds = array<i64: 256, 128>}, {pipeline_mode = #tpu.pipeline_mode<synchronous>, transform_indices = @transform_1, window_bounds = array<i64: 128, 128>}, {pipeline_mode = #tpu.pipeline_mode<synchronous>, transform_indices = @transform_2, window_bounds = array<i64: 1, 128>}, {transform_indices = @transform_3, window_bounds = array<i64: 256, 128>}]} {
    %c0 = arith.constant 0 : index
    %c0_0 = arith.constant 0 : index
    %0 = vector.load %arg1[%c0, %c0_0] : memref<256x128xf32, #tpu.memory_space<vmem>>, vector<256x128xf32>
    %1 = arith.truncf %0 : vector<256x128xf32> to vector<256x128xbf16>
    %c0_1 = arith.constant 0 : index
    %c0_2 = arith.constant 0 : index
    %2 = vector.load %arg2[%c0_1, %c0_2] : memref<128x128xbf16, #tpu.memory_space<vmem>>, vector<128x128xbf16>
    %cst = arith.constant dense<0.000000e+00> : vector<256x128xf32>
    %3 = tpu.matmul %1, %2, %cst {dimension_numbers = #tpu.dot_dimension_numbers<[1], [0], [0], [1], [0, 0, 1, 1], [], []>} : vector<256x128xbf16>, vector<128x128xbf16>, vector<256x128xf32> -> vector<256x128xf32>
    %c0_3 = arith.constant 0 : index
    %c0_4 = arith.constant 0 : index
    %4 = vector.load %arg3[%c0_3, %c0_4] : memref<1x128xf32, #tpu.memory_space<vmem>>, vector<1x128xf32>
    %5 = vector.broadcast %4 : vector<1x128xf32> to vector<256x128xf32>
    %6 = arith.addf %3, %5 : vector<256x128xf32>
    %c0_5 = arith.constant 0 : index
    %c0_6 = arith.constant 0 : index
    %7 = vector.load %arg4[%c0_5, %c0_6] : memref<256x128xf32, #tpu.memory_space<vmem>>, vector<256x128xf32>
    tpu.vector_store %arg4[%c0_5, %c0_6], %6 {strides = array<i32>} : memref<256x128xf32, #tpu.memory_space<vmem>>, vector<256x128xf32>,
    return
  }
  func.func @transform_0(%arg0: i32) -> (i32, i32) {
    %c0_i32 = arith.constant 0 : i32
    %c0_i32_0 = arith.constant 0 : i32
    return %arg0, %c0_i32 : i32, i32
  }
  func.func @transform_1(%arg0: i32) -> (i32, i32) {
    %c0_i32 = arith.constant 0 : i32
    %c0_i32_0 = arith.constant 0 : i32
    %c0_i32_1 = arith.constant 0 : i32
    return %c0_i32, %c0_i32_0 : i32, i32
  }
  func.func @transform_2(%arg0: i32) -> (i32, i32) {
    %c0_i32 = arith.constant 0 : i32
    %c0_i32_0 = arith.constant 0 : i32
    %c0_i32_1 = arith.constant 0 : i32
    return %c0_i32, %c0_i32_0 : i32, i32
  }
  func.func @transform_3(%arg0: i32) -> (i32, i32) {
    %c0_i32 = arith.constant 0 : i32
    %c0_i32_0 = arith.constant 0 : i32
    return %arg0, %c0_i32 : i32, i32
  }
}

module attributes {stable_mosaic.version = 11 : i64} {
  func.func @kernel(%arg0: i32, %arg1: memref<128x128xf32, #tpu.memory_space<vmem>>, %arg2: memref<128x128xbf16, #tpu.memory_space<vmem>>, %arg3: memref<1x128xf32, #tpu.memory_space<vmem>>, %arg4: memref<128x128xf32, #tpu.memory_space<vmem>>) attributes {dimension_semantics = [#tpu.dimension_semantics<parallel>], iteration_bounds = array<i64: 1>, scalar_prefetch = 0 : i64, scratch_operands = 0 : i64, tpu.core_type = #tpu.core_type<tc>, window_params = [{transform_indices = @transform_0, window_bounds = array<i64: 128, 128>}, {pipeline_mode = #tpu.pipeline_mode<synchronous>, transform_indices = @transform_1, window_bounds = array<i64: 128, 128>}, {pipeline_mode = #tpu.pipeline_mode<synchronous>, transform_indices = @transform_2, window_bounds = array<i64: 1, 128>}, {transform_indices = @transform_3, window_bounds = array<i64: 128, 128>}]} {
    %c0 = arith.constant 0 : index
    %c0_0 = arith.constant 0 : index
    %0 = vector.load %arg1[%c0, %c0_0] : memref<128x128xf32, #tpu.memory_space<vmem>>, vector<128x128xf32>
    %1 = arith.truncf %0 : vector<128x128xf32> to vector<128x128xbf16>
    %c0_1 = arith.constant 0 : index
    %c0_2 = arith.constant 0 : index
    %2 = vector.load %arg2[%c0_1, %c0_2] : memref<128x128xbf16, #tpu.memory_space<vmem>>, vector<128x128xbf16>
    %cst = arith.constant dense<0.000000e+00> : vector<128x128xf32>
    %3 = tpu.matmul %1, %2, %cst {dimension_numbers = #tpu.dot_dimension_numbers<[1], [0], [0], [1], [0, 0, 1, 1], [], []>} : vector<128x128xbf16>, vector<128x128xbf16>, vector<128x128xf32> -> vector<128x128xf32>
    %c0_3 = arith.constant 0 : index
    %c0_4 = arith.constant 0 : index
    %4 = vector.load %arg3[%c0_3, %c0_4] : memref<1x128xf32, #tpu.memory_space<vmem>>, vector<1x128xf32>
    %5 = vector.broadcast %4 : vector<1x128xf32> to vector<128x128xf32>
    %6 = arith.addf %3, %5 : vector<128x128xf32>
    %c0_5 = arith.constant 0 : index
    %c0_6 = arith.constant 0 : index
    %7 = vector.load %arg4[%c0_5, %c0_6] : memref<128x128xf32, #tpu.memory_space<vmem>>, vector<128x128xf32>
    tpu.vector_store %arg4[%c0_5, %c0_6], %6 {strides = array<i32>} : memref<128x128xf32, #tpu.memory_space<vmem>>, vector<128x128xf32>,
    return
  }
  func.func @transform_0(%arg0: i32) -> (i32, i32) {
    %c0_i32 = arith.constant 0 : i32
    %c0_i32_0 = arith.constant 0 : i32
    return %arg0, %c0_i32 : i32, i32
  }
  func.func @transform_1(%arg0: i32) -> (i32, i32) {
    %c0_i32 = arith.constant 0 : i32
    %c0_i32_0 = arith.constant 0 : i32
    %c0_i32_1 = arith.constant 0 : i32
    return %c0_i32, %c0_i32_0 : i32, i32
  }
  func.func @transform_2(%arg0: i32) -> (i32, i32) {
    %c0_i32 = arith.constant 0 : i32
    %c0_i32_0 = arith.constant 0 : i32
    %c0_i32_1 = arith.constant 0 : i32
    return %c0_i32, %c0_i32_0 : i32, i32
  }
  func.func @transform_3(%arg0: i32) -> (i32, i32) {
    %c0_i32 = arith.constant 0 : i32
    %c0_i32_0 = arith.constant 0 : i32
    return %arg0, %c0_i32 : i32, i32
  }
}

module attributes {stable_mosaic.version = 11 : i64} {
  func.func @kernel(%arg0: i32, %arg1: memref<8x128xf32, #tpu.memory_space<vmem>>, %arg2: memref<128x128xbf16, #tpu.memory_space<vmem>>, %arg3: memref<1x128xf32, #tpu.memory_space<vmem>>, %arg4: memref<8x128xf32, #tpu.memory_space<vmem>>) attributes {dimension_semantics = [#tpu.dimension_semantics<parallel>], iteration_bounds = array<i64: 1>, scalar_prefetch = 0 : i64, scratch_operands = 0 : i64, tpu.core_type = #tpu.core_type<tc>, window_params = [{transform_indices = @transform_0, window_bounds = array<i64: 8, 128>}, {pipeline_mode = #tpu.pipeline_mode<synchronous>, transform_indices = @transform_1, window_bounds = array<i64: 128, 128>}, {pipeline_mode = #tpu.pipeline_mode<synchronous>, transform_indices = @transform_2, window_bounds = array<i64: 1, 128>}, {transform_indices = @transform_3, window_bounds = array<i64: 8, 128>}]} {
    %c0 = arith.constant 0 : index
    %c0_0 = arith.constant 0 : index
    %0 = vector.load %arg1[%c0, %c0_0] : memref<8x128xf32, #tpu.memory_space<vmem>>, vector<8x128xf32>
    %1 = arith.truncf %0 : vector<8x128xf32> to vector<8x128xbf16>
    %c0_1 = arith.constant 0 : index
    %c0_2 = arith.constant 0 : index
    %2 = vector.load %arg2[%c0_1, %c0_2] : memref<128x128xbf16, #tpu.memory_space<vmem>>, vector<128x128xbf16>
    %cst = arith.constant dense<0.000000e+00> : vector<8x128xf32>
    %3 = tpu.matmul %1, %2, %cst {dimension_numbers = #tpu.dot_dimension_numbers<[1], [0], [0], [1], [0, 0, 1, 1], [], []>} : vector<8x128xbf16>, vector<128x128xbf16>, vector<8x128xf32> -> vector<8x128xf32>
    %c0_3 = arith.constant 0 : index
    %c0_4 = arith.constant 0 : index
    %4 = vector.load %arg3[%c0_3, %c0_4] : memref<1x128xf32, #tpu.memory_space<vmem>>, vector<1x128xf32>
    %5 = vector.broadcast %4 : vector<1x128xf32> to vector<8x128xf32>
    %6 = arith.addf %3, %5 : vector<8x128xf32>
    %c0_5 = arith.constant 0 : index
    %c0_6 = arith.constant 0 : index
    %7 = vector.load %arg4[%c0_5, %c0_6] : memref<8x128xf32, #tpu.memory_space<vmem>>, vector<8x128xf32>
    tpu.vector_store %arg4[%c0_5, %c0_6], %6 {strides = array<i32>} : memref<8x128xf32, #tpu.memory_space<vmem>>, vector<8x128xf32>,
    return
  }
  func.func @transform_0(%arg0: i32) -> (i32, i32) {
    %c0_i32 = arith.constant 0 : i32
    %c0_i32_0 = arith.constant 0 : i32
    return %arg0, %c0_i32 : i32, i32
  }
  func.func @transform_1(%arg0: i32) -> (i32, i32) {
    %c0_i32 = arith.constant 0 : i32
    %c0_i32_0 = arith.constant 0 : i32
    %c0_i32_1 = arith.constant 0 : i32
    return %c0_i32, %c0_i32_0 : i32, i32
  }
  func.func @transform_2(%arg0: i32) -> (i32, i32) {
    %c0_i32 = arith.constant 0 : i32
    %c0_i32_0 = arith.constant 0 : i32
    %c0_i32_1 = arith.constant 0 : i32
    return %c0_i32, %c0_i32_0 : i32, i32
  }
  func.func @transform_3(%arg0: i32) -> (i32, i32) {
    %c0_i32 = arith.constant 0 : i32
    %c0_i32_0 = arith.constant 0 : i32
    return %arg0, %c0_i32 : i32, i32
  }
}

module attributes {stable_mosaic.version = 11 : i64} {
  func.func @kernel(%arg0: i32, %arg1: memref<128x128xf32, #tpu.memory_space<vmem>>, %arg2: memref<128x768xbf16, #tpu.memory_space<vmem>>, %arg3: memref<1x768xf32, #tpu.memory_space<vmem>>, %arg4: memref<1x128xf32, #tpu.memory_space<vmem>>, %arg5: memref<1x128xf32, #tpu.memory_space<vmem>>, %arg6: memref<128x768xf32, #tpu.memory_space<vmem>>) attributes {dimension_semantics = [#tpu.dimension_semantics<parallel>], iteration_bounds = array<i64: 1>, scalar_prefetch = 0 : i64, scratch_operands = 0 : i64, tpu.core_type = #tpu.core_type<tc>, window_params = [{transform_indices = @transform_0, window_bounds = array<i64: 128, 128>}, {pipeline_mode = #tpu.pipeline_mode<synchronous>, transform_indices = @transform_1, window_bounds = array<i64: 128, 768>}, {pipeline_mode = #tpu.pipeline_mode<synchronous>, transform_indices = @transform_2, window_bounds = array<i64: 1, 768>}, {pipeline_mode = #tpu.pipeline_mode<synchronous>, transform_indices = @transform_3, window_bounds = array<i64: 1, 128>}, {pipeline_mode = #tpu.pipeline_mode<synchronous>, transform_indices = @transform_4, window_bounds = array<i64: 1, 128>}, {transform_indices = @transform_5, window_bounds = array<i64: 128, 768>}]} {
    %c0 = arith.constant 0 : index
    %c0_0 = arith.constant 0 : index
    %0 = vector.load %arg1[%c0, %c0_0] : memref<128x128xf32, #tpu.memory_space<vmem>>, vector<128x128xf32>
    %c0_1 = arith.constant 0 : index
    %c0_2 = arith.constant 0 : index
    %1 = vector.load %arg4[%c0_1, %c0_2] : memref<1x128xf32, #tpu.memory_space<vmem>>, vector<1x128xf32>
    %c0_3 = arith.constant 0 : index
    %c0_4 = arith.constant 0 : index
    %2 = vector.load %arg5[%c0_3, %c0_4] : memref<1x128xf32, #tpu.memory_space<vmem>>, vector<1x128xf32>
    %cst = arith.constant dense<0.000000e+00> : vector<128xf32>
    %3 = vector.multi_reduction <add>, %0, %cst [1] : vector<128x128xf32> to vector<128xf32>
    %4 = vector.shape_cast %3 : vector<128xf32> to vector<128x1xf32>
    %cst_5 = arith.constant 1.250000e-01 : f32
    %5 = vector.broadcast %cst_5 : f32 to vector<128x1xf32>
    %6 = arith.mulf %4, %5 : vector<128x1xf32>
    %7 = arith.mulf %0, %0 : vector<128x128xf32>
    %cst_6 = arith.constant dense<0.000000e+00> : vector<128xf32>
    %8 = vector.multi_reduction <add>, %7, %cst_6 [1] : vector<128x128xf32> to vector<128xf32>
    %9 = vector.shape_cast %8 : vector<128xf32> to vector<128x1xf32>
    %cst_7 = arith.constant 1.250000e-01 : f32
    %10 = vector.broadcast %cst_7 : f32 to vector<128x1xf32>
    %11 = arith.mulf %9, %10 : vector<128x1xf32>
    %12 = arith.mulf %6, %6 : vector<128x1xf32>
    %13 = arith.subf %11, %12 : vector<128x1xf32>
    %cst_8 = arith.constant 0.000000e+00 : f32
    %14 = vector.broadcast %cst_8 : f32 to vector<128x1xf32>
    %15 = arith.maximumf %13, %14 : vector<128x1xf32>
    %16 = vector.broadcast %6 : vector<128x1xf32> to vector<128x128xf32>
    %17 = arith.subf %0, %16 : vector<128x128xf32>
    %cst_9 = arith.constant 9.99999974E-6 : f32
    %18 = vector.broadcast %cst_9 : f32 to vector<128x1xf32>
    %19 = arith.addf %15, %18 : vector<128x1xf32>
    %20 = math.rsqrt %19 : vector<128x1xf32>
    %21 = vector.broadcast %20 : vector<128x1xf32> to vector<128x128xf32>
    %22 = arith.mulf %17, %21 : vector<128x128xf32>
    %23 = vector.broadcast %1 : vector<1x128xf32> to vector<128x128xf32>
    %24 = arith.mulf %22, %23 : vector<128x128xf32>
    %25 = vector.broadcast %2 : vector<1x128xf32> to vector<128x128xf32>
    %26 = arith.addf %24, %25 : vector<128x128xf32>
    %27 = arith.truncf %26 : vector<128x128xf32> to vector<128x128xbf16>
    %c0_10 = arith.constant 0 : index
    %c0_11 = arith.constant 0 : index
    %28 = vector.load %arg2[%c0_10, %c0_11] : memref<128x768xbf16, #tpu.memory_space<vmem>>, vector<128x768xbf16>
    %cst_12 = arith.constant dense<0.000000e+00> : vector<128x768xf32>
    %29 = tpu.matmul %27, %28, %cst_12 {dimension_numbers = #tpu.dot_dimension_numbers<[1], [0], [0], [1], [0, 0, 1, 1], [], []>} : vector<128x128xbf16>, vector<128x768xbf16>, vector<128x768xf32> -> vector<128x768xf32>
    %c0_13 = arith.constant 0 : index
    %c0_14 = arith.constant 0 : index
    %30 = vector.load %arg3[%c0_13, %c0_14] : memref<1x768xf32, #tpu.memory_space<vmem>>, vector<1x768xf32>
    %31 = vector.broadcast %30 : vector<1x768xf32> to vector<128x768xf32>
    %32 = arith.addf %29, %31 : vector<128x768xf32>
    %c0_15 = arith.constant 0 : index
    %c0_16 = arith.constant 0 : index
    %33 = vector.load %arg6[%c0_15, %c0_16] : memref<128x768xf32, #tpu.memory_space<vmem>>, vector<128x768xf32>
    tpu.vector_store %arg6[%c0_15, %c0_16], %32 {strides = array<i32>} : memref<128x768xf32, #tpu.memory_space<vmem>>, vector<128x768xf32>,
    return
  }
  func.func @transform_0(%arg0: i32) -> (i32, i32) {
    %c0_i32 = arith.constant 0 : i32
    %c0_i32_0 = arith.constant 0 : i32
    return %arg0, %c0_i32 : i32, i32
  }
  func.func @transform_1(%arg0: i32) -> (i32, i32) {
    %c0_i32 = arith.constant 0 : i32
    %c0_i32_0 = arith.constant 0 : i32
    %c0_i32_1 = arith.constant 0 : i32
    return %c0_i32, %c0_i32_0 : i32, i32
  }
  func.func @transform_2(%arg0: i32) -> (i32, i32) {
    %c0_i32 = arith.constant 0 : i32
    %c0_i32_0 = arith.constant 0 : i32
    %c0_i32_1 = arith.constant 0 : i32
    return %c0_i32, %c0_i32_0 : i32, i32
  }
  func.func @transform_3(%arg0: i32) -> (i32, i32) {
    %c0_i32 = arith.constant 0 : i32
    %c0_i32_0 = arith.constant 0 : i32
    %c0_i32_1 = arith.constant 0 : i32
    return %c0_i32, %c0_i32_0 : i32, i32
  }
  func.func @transform_4(%arg0: i32) -> (i32, i32) {
    %c0_i32 = arith.constant 0 : i32
    %c0_i32_0 = arith.constant 0 : i32
    %c0_i32_1 = arith.constant 0 : i32
    return %c0_i32, %c0_i32_0 : i32, i32
  }
  func.func @transform_5(%arg0: i32) -> (i32, i32) {
    %c0_i32 = arith.constant 0 : i32
    %c0_i32_0 = arith.constant 0 : i32
    return %arg0, %c0_i32 : i32, i32
  }
}

module attributes {stable_mosaic.version = 11 : i64} {
  func.func @_attn_kernel(%arg0: i32, %arg1: memref<1xf32, #tpu.memory_space<smem>>, %arg2: memref<1x64x64xf32, #tpu.memory_space<vmem>>, %arg3: memref<1x64x64xf32, #tpu.memory_space<vmem>>, %arg4: memref<1x64x64xf32, #tpu.memory_space<vmem>>, %arg5: memref<1x64x64xf32, #tpu.memory_space<vmem>>) attributes {dimension_semantics = [#tpu.dimension_semantics<parallel>], iteration_bounds = array<i64: 8>, scalar_prefetch = 0 : i64, scratch_operands = 0 : i64, tpu.core_type = #tpu.core_type<tc>, window_params = [{transform_indices = @transform_0, window_bounds = array<i64: 1>}, {transform_indices = @transform_1, window_bounds = array<i64: 1, 64, 64>}, {transform_indices = @transform_2, window_bounds = array<i64: 1, 64, 64>}, {transform_indices = @transform_3, window_bounds = array<i64: 1, 64, 64>}, {transform_indices = @transform_4, window_bounds = array<i64: 1, 64, 64>}]} {
    %c0 = arith.constant 0 : index
    %c0_0 = arith.constant 0 : index
    %c0_1 = arith.constant 0 : index
    %0 = vector.load %arg2[%c0, %c0_0, %c0_1] : memref<1x64x64xf32, #tpu.memory_space<vmem>>, vector<1x64x64xf32>
    %1 = vector.shape_cast %0 : vector<1x64x64xf32> to vector<64x64xf32>
    %2 = arith.truncf %1 : vector<64x64xf32> to vector<64x64xbf16>
    %c0_2 = arith.constant 0 : index
    %c0_3 = arith.constant 0 : index
    %c0_4 = arith.constant 0 : index
    %3 = vector.load %arg3[%c0_2, %c0_3, %c0_4] : memref<1x64x64xf32, #tpu.memory_space<vmem>>, vector<1x64x64xf32>
    %4 = vector.shape_cast %3 : vector<1x64x64xf32> to vector<64x64xf32>
    %5 = arith.truncf %4 : vector<64x64xf32> to vector<64x64xbf16>
    %c0_5 = arith.constant 0 : index
    %c0_6 = arith.constant 0 : index
    %c0_7 = arith.constant 0 : index
    %6 = vector.load %arg4[%c0_5, %c0_6, %c0_7] : memref<1x64x64xf32, #tpu.memory_space<vmem>>, vector<1x64x64xf32>
    %7 = vector.shape_cast %6 : vector<1x64x64xf32> to vector<64x64xf32>
    %8 = arith.truncf %7 : vector<64x64xf32> to vector<64x64xbf16>
    %c0_8 = arith.constant 0 : index
    %9 = memref.load %arg1[%c0_8] : memref<1xf32, #tpu.memory_space<smem>>
    %10 = tpu.transpose %5, [1, 0] : vector<64x64xbf16> -> vector<64x64xbf16>
    %cst = arith.constant dense<0.000000e+00> : vector<64x64xf32>
    %11 = tpu.matmul %2, %10, %cst {dimension_numbers = #tpu.dot_dimension_numbers<[1], [0], [0], [1], [0, 0, 1, 1], [], []>} : vector<64x64xbf16>, vector<64x64xbf16>, vector<64x64xf32> -> vector<64x64xf32>
    %12 = vector.broadcast %9 : f32 to vector<64x64xf32>
    %13 = arith.mulf %11, %12 : vector<64x64xf32>
    %14 = tpu.iota {dimensions = array<i32: 0>} : vector<64x64xi32>
    %15 = tpu.iota {dimensions = array<i32: 1>} : vector<64x64xi32>
    %16 = arith.cmpi eq, %14, %15 : vector<64x64xi32>
    %cst_9 = arith.constant -3.40282347E+38 : f32
    %17 = vector.broadcast %cst_9 : f32 to vector<64x64xf32>
    %18 = arith.select %16, %17, %13 : vector<64x64xi1>, vector<64x64xf32>
    %cst_10 = arith.constant dense<0xFF800000> : vector<64xf32>
    %19 = vector.multi_reduction <maximumf>, %18, %cst_10 [1] : vector<64x64xf32> to vector<64xf32>
    %20 = vector.shape_cast %19 : vector<64xf32> to vector<64x1xf32>
    %21 = vector.broadcast %20 : vector<64x1xf32> to vector<64x64xf32>
    %22 = arith.subf %18, %21 : vector<64x64xf32>
    %23 = math.exp %22 : vector<64x64xf32>
    %cst_11 = arith.constant dense<0.000000e+00> : vector<64xf32>
    %24 = vector.multi_reduction <add>, %23, %cst_11 [1] : vector<64x64xf32> to vector<64xf32>
    %25 = vector.shape_cast %24 : vector<64xf32> to vector<64x1xf32>
    %26 = vector.broadcast %25 : vector<64x1xf32> to vector<64x64xf32>
    %27 = arith.divf %23, %26 : vector<64x64xf32>
    %28 = arith.truncf %27 : vector<64x64xf32> to vector<64x64xbf16>
    %cst_12 = arith.constant dense<0.000000e+00> : vector<64x64xf32>
    %29 = tpu.matmul %28, %8, %cst_12 {dimension_numbers = #tpu.dot_dimension_numbers<[1], [0], [0], [1], [0, 0, 1, 1], [], []>} : vector<64x64xbf16>, vector<64x64xbf16>, vector<64x64xf32> -> vector<64x64xf32>
    %c0_13 = arith.constant 0 : index
    %c0_14 = arith.constant 0 : index
    %c0_15 = arith.constant 0 : index
    %30 = vector.load %arg5[%c0_13, %c0_14, %c0_15] : memref<1x64x64xf32, #tpu.memory_space<vmem>>, vector<1x64x64xf32>
    %31 = vector.shape_cast %30 : vector<1x64x64xf32> to vector<64x64xf32>
    %32 = vector.shape_cast %29 : vector<64x64xf32> to vector<1x64x64xf32>
    tpu.vector_store %arg5[%c0_13, %c0_14, %c0_15], %32 {strides = array<i32>} : memref<1x64x64xf32, #tpu.memory_space<vmem>>, vector<1x64x64xf32>,
    return
  }
  func.func @transform_0(%arg0: i32) -> i32 {
    %c0_i32 = arith.constant 0 : i32
    %c0_i32_0 = arith.constant 0 : i32
    return %c0_i32 : i32
  }
  func.func @transform_1(%arg0: i32) -> (i32, i32, i32) {
    %c0_i32 = arith.constant 0 : i32
    %c0_i32_0 = arith.constant 0 : i32
    %c0_i32_1 = arith.constant 0 : i32
    return %arg0, %c0_i32, %c0_i32_0 : i32, i32, i32
  }
  func.func @transform_2(%arg0: i32) -> (i32, i32, i32) {
    %c0_i32 = arith.constant 0 : i32
    %c0_i32_0 = arith.constant 0 : i32
    %c0_i32_1 = arith.constant 0 : i32
    return %arg0, %c0_i32, %c0_i32_0 : i32, i32, i32
  }
  func.func @transform_3(%arg0: i32) -> (i32, i32, i32) {
    %c0_i32 = arith.constant 0 : i32
    %c0_i32_0 = arith.constant 0 : i32
    %c0_i32_1 = arith.constant 0 : i32
    return %arg0, %c0_i32, %c0_i32_0 : i32, i32, i32
  }
  func.func @transform_4(%arg0: i32) -> (i32, i32, i32) {
    %c0_i32 = arith.constant 0 : i32
    %c0_i32_0 = arith.constant 0 : i32
    %c0_i32_1 = arith.constant 0 : i32
    return %arg0, %c0_i32, %c0_i32_0 : i32, i32, i32
  }
}

module attributes {stable_mosaic.version = 11 : i64} {
  func.func @kernel(%arg0: i32, %arg1: memref<128x256xf32, #tpu.memory_space<vmem>>, %arg2: memref<256x128xbf16, #tpu.memory_space<vmem>>, %arg3: memref<1x128xf32, #tpu.memory_space<vmem>>, %arg4: memref<128x128xf32, #tpu.memory_space<vmem>>, %arg5: memref<128x128xf32, #tpu.memory_space<vmem>>) attributes {dimension_semantics = [#tpu.dimension_semantics<parallel>], iteration_bounds = array<i64: 1>, scalar_prefetch = 0 : i64, scratch_operands = 0 : i64, tpu.core_type = #tpu.core_type<tc>, window_params = [{transform_indices = @transform_0, window_bounds = array<i64: 128, 256>}, {pipeline_mode = #tpu.pipeline_mode<synchronous>, transform_indices = @transform_1, window_bounds = array<i64: 256, 128>}, {pipeline_mode = #tpu.pipeline_mode<synchronous>, transform_indices = @transform_2, window_bounds = array<i64: 1, 128>}, {transform_indices = @transform_3, window_bounds = array<i64: 128, 128>}, {transform_indices = @transform_4, window_bounds = array<i64: 128, 128>}]} {
    %c0 = arith.constant 0 : index
    %c0_0 = arith.constant 0 : index
    %0 = vector.load %arg1[%c0, %c0_0] : memref<128x256xf32, #tpu.memory_space<vmem>>, vector<128x256xf32>
    %1 = arith.truncf %0 : vector<128x256xf32> to vector<128x256xbf16>
    %c0_1 = arith.constant 0 : index
    %c0_2 = arith.constant 0 : index
    %2 = vector.load %arg2[%c0_1, %c0_2] : memref<256x128xbf16, #tpu.memory_space<vmem>>, vector<256x128xbf16>
    %cst = arith.constant dense<0.000000e+00> : vector<128x128xf32>
    %3 = tpu.matmul %1, %2, %cst {dimension_numbers = #tpu.dot_dimension_numbers<[1], [0], [0], [1], [0, 0, 1, 1], [], []>} : vector<128x256xbf16>, vector<256x128xbf16>, vector<128x128xf32> -> vector<128x128xf32>
    %c0_3 = arith.constant 0 : index
    %c0_4 = arith.constant 0 : index
    %4 = vector.load %arg3[%c0_3, %c0_4] : memref<1x128xf32, #tpu.memory_space<vmem>>, vector<1x128xf32>
    %5 = vector.broadcast %4 : vector<1x128xf32> to vector<128x128xf32>
    %6 = arith.addf %3, %5 : vector<128x128xf32>
    %c0_5 = arith.constant 0 : index
    %c0_6 = arith.constant 0 : index
    %7 = vector.load %arg4[%c0_5, %c0_6] : memref<128x128xf32, #tpu.memory_space<vmem>>, vector<128x128xf32>
    %8 = arith.addf %6, %7 : vector<128x128xf32>
    %c0_7 = arith.constant 0 : index
    %c0_8 = arith.constant 0 : index
    %9 = vector.load %arg5[%c0_7, %c0_8] : memref<128x128xf32, #tpu.memory_space<vmem>>, vector<128x128xf32>
    tpu.vector_store %arg5[%c0_7, %c0_8], %8 {strides = array<i32>} : memref<128x128xf32, #tpu.memory_space<vmem>>, vector<128x128xf32>,
    return
  }
  func.func @transform_0(%arg0: i32) -> (i32, i32) {
    %c0_i32 = arith.constant 0 : i32
    %c0_i32_0 = arith.constant 0 : i32
    return %arg0, %c0_i32 : i32, i32
  }
  func.func @transform_1(%arg0: i32) -> (i32, i32) {
    %c0_i32 = arith.constant 0 : i32
    %c0_i32_0 = arith.constant 0 : i32
    %c0_i32_1 = arith.constant 0 : i32
    return %c0_i32, %c0_i32_0 : i32, i32
  }
  func.func @transform_2(%arg0: i32) -> (i32, i32) {
    %c0_i32 = arith.constant 0 : i32
    %c0_i32_0 = arith.constant 0 : i32
    %c0_i32_1 = arith.constant 0 : i32
    return %c0_i32, %c0_i32_0 : i32, i32
  }
  func.func @transform_3(%arg0: i32) -> (i32, i32) {
    %c0_i32 = arith.constant 0 : i32
    %c0_i32_0 = arith.constant 0 : i32
    return %arg0, %c0_i32 : i32, i32
  }
  func.func @transform_4(%arg0: i32) -> (i32, i32) {
    %c0_i32 = arith.constant 0 : i32
    %c0_i32_0 = arith.constant 0 : i32
    return %arg0, %c0_i32 : i32, i32
  }
}

module attributes {stable_mosaic.version = 11 : i64} {
  func.func @kernel(%arg0: i32, %arg1: memref<128x128xf32, #tpu.memory_space<vmem>>, %arg2: memref<1x128xf32, #tpu.memory_space<vmem>>, %arg3: memref<1x128xf32, #tpu.memory_space<vmem>>, %arg4: memref<128x128xbf16, #tpu.memory_space<vmem>>, %arg5: memref<1x128xf32, #tpu.memory_space<vmem>>, %arg6: memref<128x128xbf16, #tpu.memory_space<vmem>>, %arg7: memref<1x128xf32, #tpu.memory_space<vmem>>, %arg8: memref<128x128xf32, #tpu.memory_space<vmem>>) attributes {dimension_semantics = [#tpu.dimension_semantics<parallel>], iteration_bounds = array<i64: 1>, scalar_prefetch = 0 : i64, scratch_operands = 0 : i64, tpu.core_type = #tpu.core_type<tc>, window_params = [{transform_indices = @transform_0, window_bounds = array<i64: 128, 128>}, {pipeline_mode = #tpu.pipeline_mode<synchronous>, transform_indices = @transform_1, window_bounds = array<i64: 1, 128>}, {pipeline_mode = #tpu.pipeline_mode<synchronous>, transform_indices = @transform_2, window_bounds = array<i64: 1, 128>}, {pipeline_mode = #tpu.pipeline_mode<synchronous>, transform_indices = @transform_3, window_bounds = array<i64: 128, 128>}, {pipeline_mode = #tpu.pipeline_mode<synchronous>, transform_indices = @transform_4, window_bounds = array<i64: 1, 128>}, {pipeline_mode = #tpu.pipeline_mode<synchronous>, transform_indices = @transform_5, window_bounds = array<i64: 128, 128>}, {pipeline_mode = #tpu.pipeline_mode<synchronous>, transform_indices = @transform_6, window_bounds = array<i64: 1, 128>}, {transform_indices = @transform_7, window_bounds = array<i64: 128, 128>}]} {
    %c0 = arith.constant 0 : index
    %c0_0 = arith.constant 0 : index
    %0 = vector.load %arg1[%c0, %c0_0] : memref<128x128xf32, #tpu.memory_space<vmem>>, vector<128x128xf32>
    %c0_1 = arith.constant 0 : index
    %c0_2 = arith.constant 0 : index
    %1 = vector.load %arg2[%c0_1, %c0_2] : memref<1x128xf32, #tpu.memory_space<vmem>>, vector<1x128xf32>
    %c0_3 = arith.constant 0 : index
    %c0_4 = arith.constant 0 : index
    %2 = vector.load %arg3[%c0_3, %c0_4] : memref<1x128xf32, #tpu.memory_space<vmem>>, vector<1x128xf32>
    %cst = arith.constant dense<0.000000e+00> : vector<128xf32>
    %3 = vector.multi_reduction <add>, %0, %cst [1] : vector<128x128xf32> to vector<128xf32>
    %4 = vector.shape_cast %3 : vector<128xf32> to vector<128x1xf32>
    %cst_5 = arith.constant 1.250000e-01 : f32
    %5 = vector.broadcast %cst_5 : f32 to vector<128x1xf32>
    %6 = arith.mulf %4, %5 : vector<128x1xf32>
    %7 = arith.mulf %0, %0 : vector<128x128xf32>
    %cst_6 = arith.constant dense<0.000000e+00> : vector<128xf32>
    %8 = vector.multi_reduction <add>, %7, %cst_6 [1] : vector<128x128xf32> to vector<128xf32>
    %9 = vector.shape_cast %8 : vector<128xf32> to vector<128x1xf32>
    %cst_7 = arith.constant 1.250000e-01 : f32
    %10 = vector.broadcast %cst_7 : f32 to vector<128x1xf32>
    %11 = arith.mulf %9, %10 : vector<128x1xf32>
    %12 = arith.mulf %6, %6 : vector<128x1xf32>
    %13 = arith.subf %11, %12 : vector<128x1xf32>
    %cst_8 = arith.constant 0.000000e+00 : f32
    %14 = vector.broadcast %cst_8 : f32 to vector<128x1xf32>
    %15 = arith.maximumf %13, %14 : vector<128x1xf32>
    %16 = vector.broadcast %6 : vector<128x1xf32> to vector<128x128xf32>
    %17 = arith.subf %0, %16 : vector<128x128xf32>
    %cst_9 = arith.constant 9.99999974E-6 : f32
    %18 = vector.broadcast %cst_9 : f32 to vector<128x1xf32>
    %19 = arith.addf %15, %18 : vector<128x1xf32>
    %20 = math.rsqrt %19 : vector<128x1xf32>
    %21 = vector.broadcast %20 : vector<128x1xf32> to vector<128x128xf32>
    %22 = arith.mulf %17, %21 : vector<128x128xf32>
    %23 = vector.broadcast %1 : vector<1x128xf32> to vector<128x128xf32>
    %24 = arith.mulf %22, %23 : vector<128x128xf32>
    %25 = vector.broadcast %2 : vector<1x128xf32> to vector<128x128xf32>
    %26 = arith.addf %24, %25 : vector<128x128xf32>
    %27 = arith.truncf %26 : vector<128x128xf32> to vector<128x128xbf16>
    %c0_10 = arith.constant 0 : index
    %c0_11 = arith.constant 0 : index
    %28 = vector.load %arg4[%c0_10, %c0_11] : memref<128x128xbf16, #tpu.memory_space<vmem>>, vector<128x128xbf16>
    %cst_12 = arith.constant dense<0.000000e+00> : vector<128x128xf32>
    %29 = tpu.matmul %27, %28, %cst_12 {dimension_numbers = #tpu.dot_dimension_numbers<[1], [0], [0], [1], [0, 0, 1, 1], [], []>} : vector<128x128xbf16>, vector<128x128xbf16>, vector<128x128xf32> -> vector<128x128xf32>
    %c0_13 = arith.constant 0 : index
    %c0_14 = arith.constant 0 : index
    %30 = vector.load %arg5[%c0_13, %c0_14] : memref<1x128xf32, #tpu.memory_space<vmem>>, vector<1x128xf32>
    %31 = vector.broadcast %30 : vector<1x128xf32> to vector<128x128xf32>
    %32 = arith.addf %29, %31 : vector<128x128xf32>
    %cst_15 = arith.constant 5.000000e-01 : f32
    %33 = vector.broadcast %cst_15 : f32 to vector<128x128xf32>
    %34 = arith.mulf %33, %32 : vector<128x128xf32>
    %cst_16 = arith.constant 0.707106769 : f32
    %35 = vector.broadcast %cst_16 : f32 to vector<128x128xf32>
    %36 = arith.mulf %32, %35 : vector<128x128xf32>
    %37 = math.absf %36 : vector<128x128xf32>
    %cst_17 = arith.constant 0.327591091 : f32
    %38 = vector.broadcast %cst_17 : f32 to vector<128x128xf32>
    %39 = arith.mulf %38, %37 : vector<128x128xf32>
    %cst_18 = arith.constant 1.000000e+00 : f32
    %40 = vector.broadcast %cst_18 : f32 to vector<128x128xf32>
    %41 = arith.addf %40, %39 : vector<128x128xf32>
    %cst_19 = arith.constant 1.000000e+00 : f32
    %42 = vector.broadcast %cst_19 : f32 to vector<128x128xf32>
    %43 = arith.divf %42, %41 : vector<128x128xf32>
    %cst_20 = arith.constant 1.06140542 : f32
    %44 = vector.broadcast %cst_20 : f32 to vector<128x128xf32>
    %45 = arith.mulf %44, %43 : vector<128x128xf32>
    %cst_21 = arith.constant -1.45315206 : f32
    %46 = vector.broadcast %cst_21 : f32 to vector<128x128xf32>
    %47 = arith.addf %45, %46 : vector<128x128xf32>
    %48 = arith.mulf %47, %43 : vector<128x128xf32>
    %cst_22 = arith.constant 1.42141378 : f32
    %49 = vector.broadcast %cst_22 : f32 to vector<128x128xf32>
    %50 = arith.addf %48, %49 : vector<128x128xf32>
    %51 = arith.mulf %50, %43 : vector<128x128xf32>
    %cst_23 = arith.constant -0.284496725 : f32
    %52 = vector.broadcast %cst_23 : f32 to vector<128x128xf32>
    %53 = arith.addf %51, %52 : vector<128x128xf32>
    %54 = arith.mulf %53, %43 : vector<128x128xf32>
    %cst_24 = arith.constant 0.254829586 : f32
    %55 = vector.broadcast %cst_24 : f32 to vector<128x128xf32>
    %56 = arith.addf %54, %55 : vector<128x128xf32>
    %57 = arith.mulf %56, %43 : vector<128x128xf32>
    %cst_25 = arith.constant 0.000000e+00 : f32
    %58 = vector.broadcast %cst_25 : f32 to vector<128x128xf32>
    %59 = arith.subf %58, %37 : vector<128x128xf32>
    %60 = arith.mulf %59, %37 : vector<128x128xf32>
    %61 = math.exp %60 : vector<128x128xf32>
    %62 = arith.mulf %57, %61 : vector<128x128xf32>
    %cst_26 = arith.constant 1.000000e+00 : f32
    %63 = vector.broadcast %cst_26 : f32 to vector<128x128xf32>
    %64 = arith.subf %63, %62 : vector<128x128xf32>
    %cst_27 = arith.constant 0.000000e+00 : f32
    %65 = vector.broadcast %cst_27 : f32 to vector<128x128xf32>
    %66 = arith.cmpf oge, %36, %65 : vector<128x128xf32>
    %cst_28 = arith.constant 0.000000e+00 : f32
    %67 = vector.broadcast %cst_28 : f32 to vector<128x128xf32>
    %68 = arith.subf %67, %64 : vector<128x128xf32>
    %69 = arith.select %66, %64, %68 : vector<128x128xi1>, vector<128x128xf32>
    %cst_29 = arith.constant 1.000000e+00 : f32
    %70 = vector.broadcast %cst_29 : f32 to vector<128x128xf32>
    %71 = arith.addf %70, %69 : vector<128x128xf32>
    %72 = arith.mulf %34, %71 : vector<128x128xf32>
    %73 = arith.truncf %72 : vector<128x128xf32> to vector<128x128xbf16>
    %c0_30 = arith.constant 0 : index
    %c0_31 = arith.constant 0 : index
    %74 = vector.load %arg6[%c0_30, %c0_31] : memref<128x128xbf16, #tpu.memory_space<vmem>>, vector<128x128xbf16>
    %cst_32 = arith.constant dense<0.000000e+00> : vector<128x128xf32>
    %75 = tpu.matmul %73, %74, %cst_32 {dimension_numbers = #tpu.dot_dimension_numbers<[1], [0], [0], [1], [0, 0, 1, 1], [], []>} : vector<128x128xbf16>, vector<128x128xbf16>, vector<128x128xf32> -> vector<128x128xf32>
    %c0_33 = arith.constant 0 : index
    %c0_34 = arith.constant 0 : index
    %76 = vector.load %arg7[%c0_33, %c0_34] : memref<1x128xf32, #tpu.memory_space<vmem>>, vector<1x128xf32>
    %77 = vector.broadcast %76 : vector<1x128xf32> to vector<128x128xf32>
    %78 = arith.addf %75, %77 : vector<128x128xf32>
    %79 = arith.addf %78, %0 : vector<128x128xf32>
    %c0_35 = arith.constant 0 : index
    %c0_36 = arith.constant 0 : index
    %80 = vector.load %arg8[%c0_35, %c0_36] : memref<128x128xf32, #tpu.memory_space<vmem>>, vector<128x128xf32>
    tpu.vector_store %arg8[%c0_35, %c0_36], %79 {strides = array<i32>} : memref<128x128xf32, #tpu.memory_space<vmem>>, vector<128x128xf32>,
    return
  }
  func.func @transform_0(%arg0: i32) -> (i32, i32) {
    %c0_i32 = arith.constant 0 : i32
    %c0_i32_0 = arith.constant 0 : i32
    return %arg0, %c0_i32 : i32, i32
  }
  func.func @transform_1(%arg0: i32) -> (i32, i32) {
    %c0_i32 = arith.constant 0 : i32
    %c0_i32_0 = arith.constant 0 : i32
    %c0_i32_1 = arith.constant 0 : i32
    return %c0_i32, %c0_i32_0 : i32, i32
  }
  func.func @transform_2(%arg0: i32) -> (i32, i32) {
    %c0_i32 = arith.constant 0 : i32
    %c0_i32_0 = arith.constant 0 : i32
    %c0_i32_1 = arith.constant 0 : i32
    return %c0_i32, %c0_i32_0 : i32, i32
  }
  func.func @transform_3(%arg0: i32) -> (i32, i32) {
    %c0_i32 = arith.constant 0 : i32
    %c0_i32_0 = arith.constant 0 : i32
    %c0_i32_1 = arith.constant 0 : i32
    return %c0_i32, %c0_i32_0 : i32, i32
  }
  func.func @transform_4(%arg0: i32) -> (i32, i32) {
    %c0_i32 = arith.constant 0 : i32
    %c0_i32_0 = arith.constant 0 : i32
    %c0_i32_1 = arith.constant 0 : i32
    return %c0_i32, %c0_i32_0 : i32, i32
  }
  func.func @transform_5(%arg0: i32) -> (i32, i32) {
    %c0_i32 = arith.constant 0 : i32
    %c0_i32_0 = arith.constant 0 : i32
    %c0_i32_1 = arith.constant 0 : i32
    return %c0_i32, %c0_i32_0 : i32, i32
  }
  func.func @transform_6(%arg0: i32) -> (i32, i32) {
    %c0_i32 = arith.constant 0 : i32
    %c0_i32_0 = arith.constant 0 : i32
    %c0_i32_1 = arith.constant 0 : i32
    return %c0_i32, %c0_i32_0 : i32, i32
  }
  func.func @transform_7(%arg0: i32) -> (i32, i32) {
    %c0_i32 = arith.constant 0 : i32
    %c0_i32_0 = arith.constant 0 : i32
    return %arg0, %c0_i32 : i32, i32
  }
}

module attributes {stable_mosaic.version = 11 : i64} {
  func.func @kernel(%arg0: i32, %arg1: memref<8x256xf32, #tpu.memory_space<vmem>>, %arg2: memref<256x128xbf16, #tpu.memory_space<vmem>>, %arg3: memref<1x128xf32, #tpu.memory_space<vmem>>, %arg4: memref<8x128xf32, #tpu.memory_space<vmem>>) attributes {dimension_semantics = [#tpu.dimension_semantics<parallel>], iteration_bounds = array<i64: 1>, scalar_prefetch = 0 : i64, scratch_operands = 0 : i64, tpu.core_type = #tpu.core_type<tc>, window_params = [{transform_indices = @transform_0, window_bounds = array<i64: 8, 256>}, {pipeline_mode = #tpu.pipeline_mode<synchronous>, transform_indices = @transform_1, window_bounds = array<i64: 256, 128>}, {pipeline_mode = #tpu.pipeline_mode<synchronous>, transform_indices = @transform_2, window_bounds = array<i64: 1, 128>}, {transform_indices = @transform_3, window_bounds = array<i64: 8, 128>}]} {
    %c0 = arith.constant 0 : index
    %c0_0 = arith.constant 0 : index
    %0 = vector.load %arg1[%c0, %c0_0] : memref<8x256xf32, #tpu.memory_space<vmem>>, vector<8x256xf32>
    %1 = arith.truncf %0 : vector<8x256xf32> to vector<8x256xbf16>
    %c0_1 = arith.constant 0 : index
    %c0_2 = arith.constant 0 : index
    %2 = vector.load %arg2[%c0_1, %c0_2] : memref<256x128xbf16, #tpu.memory_space<vmem>>, vector<256x128xbf16>
    %cst = arith.constant dense<0.000000e+00> : vector<8x128xf32>
    %3 = tpu.matmul %1, %2, %cst {dimension_numbers = #tpu.dot_dimension_numbers<[1], [0], [0], [1], [0, 0, 1, 1], [], []>} : vector<8x256xbf16>, vector<256x128xbf16>, vector<8x128xf32> -> vector<8x128xf32>
    %c0_3 = arith.constant 0 : index
    %c0_4 = arith.constant 0 : index
    %4 = vector.load %arg3[%c0_3, %c0_4] : memref<1x128xf32, #tpu.memory_space<vmem>>, vector<1x128xf32>
    %5 = vector.broadcast %4 : vector<1x128xf32> to vector<8x128xf32>
    %6 = arith.addf %3, %5 : vector<8x128xf32>
    %c0_5 = arith.constant 0 : index
    %c0_6 = arith.constant 0 : index
    %7 = vector.load %arg4[%c0_5, %c0_6] : memref<8x128xf32, #tpu.memory_space<vmem>>, vector<8x128xf32>
    tpu.vector_store %arg4[%c0_5, %c0_6], %6 {strides = array<i32>} : memref<8x128xf32, #tpu.memory_space<vmem>>, vector<8x128xf32>,
    return
  }
  func.func @transform_0(%arg0: i32) -> (i32, i32) {
    %c0_i32 = arith.constant 0 : i32
    %c0_i32_0 = arith.constant 0 : i32
    return %arg0, %c0_i32 : i32, i32
  }
  func.func @transform_1(%arg0: i32) -> (i32, i32) {
    %c0_i32 = arith.constant 0 : i32
    %c0_i32_0 = arith.constant 0 : i32
    %c0_i32_1 = arith.constant 0 : i32
    return %c0_i32, %c0_i32_0 : i32, i32
  }
  func.func @transform_2(%arg0: i32) -> (i32, i32) {
    %c0_i32 = arith.constant 0 : i32
    %c0_i32_0 = arith.constant 0 : i32
    %c0_i32_1 = arith.constant 0 : i32
    return %c0_i32, %c0_i32_0 : i32, i32
  }
  func.func @transform_3(%arg0: i32) -> (i32, i32) {
    %c0_i32 = arith.constant 0 : i32
    %c0_i32_0 = arith.constant 0 : i32
    return %arg0, %c0_i32 : i32, i32
  }
}

module attributes {stable_mosaic.version = 11 : i64} {
  func.func @kernel(%arg0: i32, %arg1: memref<8x128xf32, #tpu.memory_space<vmem>>, %arg2: memref<128x768xbf16, #tpu.memory_space<vmem>>, %arg3: memref<1x768xf32, #tpu.memory_space<vmem>>, %arg4: memref<1x128xf32, #tpu.memory_space<vmem>>, %arg5: memref<1x128xf32, #tpu.memory_space<vmem>>, %arg6: memref<8x768xf32, #tpu.memory_space<vmem>>) attributes {dimension_semantics = [#tpu.dimension_semantics<parallel>], iteration_bounds = array<i64: 1>, scalar_prefetch = 0 : i64, scratch_operands = 0 : i64, tpu.core_type = #tpu.core_type<tc>, window_params = [{transform_indices = @transform_0, window_bounds = array<i64: 8, 128>}, {pipeline_mode = #tpu.pipeline_mode<synchronous>, transform_indices = @transform_1, window_bounds = array<i64: 128, 768>}, {pipeline_mode = #tpu.pipeline_mode<synchronous>, transform_indices = @transform_2, window_bounds = array<i64: 1, 768>}, {pipeline_mode = #tpu.pipeline_mode<synchronous>, transform_indices = @transform_3, window_bounds = array<i64: 1, 128>}, {pipeline_mode = #tpu.pipeline_mode<synchronous>, transform_indices = @transform_4, window_bounds = array<i64: 1, 128>}, {transform_indices = @transform_5, window_bounds = array<i64: 8, 768>}]} {
    %c0 = arith.constant 0 : index
    %c0_0 = arith.constant 0 : index
    %0 = vector.load %arg1[%c0, %c0_0] : memref<8x128xf32, #tpu.memory_space<vmem>>, vector<8x128xf32>
    %c0_1 = arith.constant 0 : index
    %c0_2 = arith.constant 0 : index
    %1 = vector.load %arg4[%c0_1, %c0_2] : memref<1x128xf32, #tpu.memory_space<vmem>>, vector<1x128xf32>
    %c0_3 = arith.constant 0 : index
    %c0_4 = arith.constant 0 : index
    %2 = vector.load %arg5[%c0_3, %c0_4] : memref<1x128xf32, #tpu.memory_space<vmem>>, vector<1x128xf32>
    %cst = arith.constant dense<0.000000e+00> : vector<8xf32>
    %3 = vector.multi_reduction <add>, %0, %cst [1] : vector<8x128xf32> to vector<8xf32>
    %4 = vector.shape_cast %3 : vector<8xf32> to vector<8x1xf32>
    %cst_5 = arith.constant 6.250000e-02 : f32
    %5 = vector.broadcast %cst_5 : f32 to vector<8x1xf32>
    %6 = arith.mulf %4, %5 : vector<8x1xf32>
    %7 = arith.mulf %0, %0 : vector<8x128xf32>
    %cst_6 = arith.constant dense<0.000000e+00> : vector<8xf32>
    %8 = vector.multi_reduction <add>, %7, %cst_6 [1] : vector<8x128xf32> to vector<8xf32>
    %9 = vector.shape_cast %8 : vector<8xf32> to vector<8x1xf32>
    %cst_7 = arith.constant 6.250000e-02 : f32
    %10 = vector.broadcast %cst_7 : f32 to vector<8x1xf32>
    %11 = arith.mulf %9, %10 : vector<8x1xf32>
    %12 = arith.mulf %6, %6 : vector<8x1xf32>
    %13 = arith.subf %11, %12 : vector<8x1xf32>
    %cst_8 = arith.constant 0.000000e+00 : f32
    %14 = vector.broadcast %cst_8 : f32 to vector<8x1xf32>
    %15 = arith.maximumf %13, %14 : vector<8x1xf32>
    %16 = vector.broadcast %6 : vector<8x1xf32> to vector<8x128xf32>
    %17 = arith.subf %0, %16 : vector<8x128xf32>
    %cst_9 = arith.constant 9.99999974E-6 : f32
    %18 = vector.broadcast %cst_9 : f32 to vector<8x1xf32>
    %19 = arith.addf %15, %18 : vector<8x1xf32>
    %20 = math.rsqrt %19 : vector<8x1xf32>
    %21 = vector.broadcast %20 : vector<8x1xf32> to vector<8x128xf32>
    %22 = arith.mulf %17, %21 : vector<8x128xf32>
    %23 = vector.broadcast %1 : vector<1x128xf32> to vector<8x128xf32>
    %24 = arith.mulf %22, %23 : vector<8x128xf32>
    %25 = vector.broadcast %2 : vector<1x128xf32> to vector<8x128xf32>
    %26 = arith.addf %24, %25 : vector<8x128xf32>
    %27 = arith.truncf %26 : vector<8x128xf32> to vector<8x128xbf16>
    %c0_10 = arith.constant 0 : index
    %c0_11 = arith.constant 0 : index
    %28 = vector.load %arg2[%c0_10, %c0_11] : memref<128x768xbf16, #tpu.memory_space<vmem>>, vector<128x768xbf16>
    %cst_12 = arith.constant dense<0.000000e+00> : vector<8x768xf32>
    %29 = tpu.matmul %27, %28, %cst_12 {dimension_numbers = #tpu.dot_dimension_numbers<[1], [0], [0], [1], [0, 0, 1, 1], [], []>} : vector<8x128xbf16>, vector<128x768xbf16>, vector<8x768xf32> -> vector<8x768xf32>
    %c0_13 = arith.constant 0 : index
    %c0_14 = arith.constant 0 : index
    %30 = vector.load %arg3[%c0_13, %c0_14] : memref<1x768xf32, #tpu.memory_space<vmem>>, vector<1x768xf32>
    %31 = vector.broadcast %30 : vector<1x768xf32> to vector<8x768xf32>
    %32 = arith.addf %29, %31 : vector<8x768xf32>
    %c0_15 = arith.constant 0 : index
    %c0_16 = arith.constant 0 : index
    %33 = vector.load %arg6[%c0_15, %c0_16] : memref<8x768xf32, #tpu.memory_space<vmem>>, vector<8x768xf32>
    tpu.vector_store %arg6[%c0_15, %c0_16], %32 {strides = array<i32>} : memref<8x768xf32, #tpu.memory_space<vmem>>, vector<8x768xf32>,
    return
  }
  func.func @transform_0(%arg0: i32) -> (i32, i32) {
    %c0_i32 = arith.constant 0 : i32
    %c0_i32_0 = arith.constant 0 : i32
    return %arg0, %c0_i32 : i32, i32
  }
  func.func @transform_1(%arg0: i32) -> (i32, i32) {
    %c0_i32 = arith.constant 0 : i32
    %c0_i32_0 = arith.constant 0 : i32
    %c0_i32_1 = arith.constant 0 : i32
    return %c0_i32, %c0_i32_0 : i32, i32
  }
  func.func @transform_2(%arg0: i32) -> (i32, i32) {
    %c0_i32 = arith.constant 0 : i32
    %c0_i32_0 = arith.constant 0 : i32
    %c0_i32_1 = arith.constant 0 : i32
    return %c0_i32, %c0_i32_0 : i32, i32
  }
  func.func @transform_3(%arg0: i32) -> (i32, i32) {
    %c0_i32 = arith.constant 0 : i32
    %c0_i32_0 = arith.constant 0 : i32
    %c0_i32_1 = arith.constant 0 : i32
    return %c0_i32, %c0_i32_0 : i32, i32
  }
  func.func @transform_4(%arg0: i32) -> (i32, i32) {
    %c0_i32 = arith.constant 0 : i32
    %c0_i32_0 = arith.constant 0 : i32
    %c0_i32_1 = arith.constant 0 : i32
    return %c0_i32, %c0_i32_0 : i32, i32
  }
  func.func @transform_5(%arg0: i32) -> (i32, i32) {
    %c0_i32 = arith.constant 0 : i32
    %c0_i32_0 = arith.constant 0 : i32
    return %arg0, %c0_i32 : i32, i32
  }
}

module attributes {stable_mosaic.version = 11 : i64} {
  func.func @_attn_kernel(%arg0: i32, %arg1: memref<1xf32, #tpu.memory_space<smem>>, %arg2: memref<1x4x64xf32, #tpu.memory_space<vmem>>, %arg3: memref<1x4x64xf32, #tpu.memory_space<vmem>>, %arg4: memref<1x4x64xf32, #tpu.memory_space<vmem>>, %arg5: memref<1x4x64xf32, #tpu.memory_space<vmem>>) attributes {dimension_semantics = [#tpu.dimension_semantics<parallel>], iteration_bounds = array<i64: 8>, scalar_prefetch = 0 : i64, scratch_operands = 0 : i64, tpu.core_type = #tpu.core_type<tc>, window_params = [{transform_indices = @transform_0, window_bounds = array<i64: 1>}, {transform_indices = @transform_1, window_bounds = array<i64: 1, 4, 64>}, {transform_indices = @transform_2, window_bounds = array<i64: 1, 4, 64>}, {transform_indices = @transform_3, window_bounds = array<i64: 1, 4, 64>}, {transform_indices = @transform_4, window_bounds = array<i64: 1, 4, 64>}]} {
    %c0 = arith.constant 0 : index
    %c0_0 = arith.constant 0 : index
    %c0_1 = arith.constant 0 : index
    %0 = vector.load %arg2[%c0, %c0_0, %c0_1] : memref<1x4x64xf32, #tpu.memory_space<vmem>>, vector<1x4x64xf32>
    %1 = vector.shape_cast %0 : vector<1x4x64xf32> to vector<4x64xf32>
    %2 = arith.truncf %1 : vector<4x64xf32> to vector<4x64xbf16>
    %c0_2 = arith.constant 0 : index
    %c0_3 = arith.constant 0 : index
    %c0_4 = arith.constant 0 : index
    %3 = vector.load %arg3[%c0_2, %c0_3, %c0_4] : memref<1x4x64xf32, #tpu.memory_space<vmem>>, vector<1x4x64xf32>
    %4 = vector.shape_cast %3 : vector<1x4x64xf32> to vector<4x64xf32>
    %5 = arith.truncf %4 : vector<4x64xf32> to vector<4x64xbf16>
    %c0_5 = arith.constant 0 : index
    %c0_6 = arith.constant 0 : index
    %c0_7 = arith.constant 0 : index
    %6 = vector.load %arg4[%c0_5, %c0_6, %c0_7] : memref<1x4x64xf32, #tpu.memory_space<vmem>>, vector<1x4x64xf32>
    %7 = vector.shape_cast %6 : vector<1x4x64xf32> to vector<4x64xf32>
    %8 = arith.truncf %7 : vector<4x64xf32> to vector<4x64xbf16>
    %c0_8 = arith.constant 0 : index
    %9 = memref.load %arg1[%c0_8] : memref<1xf32, #tpu.memory_space<smem>>
    %10 = tpu.transpose %5, [1, 0] : vector<4x64xbf16> -> vector<64x4xbf16>
    %cst = arith.constant dense<0.000000e+00> : vector<4x4xf32>
    %11 = tpu.matmul %2, %10, %cst {dimension_numbers = #tpu.dot_dimension_numbers<[1], [0], [0], [1], [0, 0, 1, 1], [], []>} : vector<4x64xbf16>, vector<64x4xbf16>, vector<4x4xf32> -> vector<4x4xf32>
    %12 = vector.broadcast %9 : f32 to vector<4x4xf32>
    %13 = arith.mulf %11, %12 : vector<4x4xf32>
    %14 = tpu.iota {dimensions = array<i32: 0>} : vector<4x4xi32>
    %15 = tpu.iota {dimensions = array<i32: 1>} : vector<4x4xi32>
    %16 = arith.cmpi eq, %14, %15 : vector<4x4xi32>
    %cst_9 = arith.constant -3.40282347E+38 : f32
    %17 = vector.broadcast %cst_9 : f32 to vector<4x4xf32>
    %18 = arith.select %16, %17, %13 : vector<4x4xi1>, vector<4x4xf32>
    %cst_10 = arith.constant dense<0xFF800000> : vector<4xf32>
    %19 = vector.multi_reduction <maximumf>, %18, %cst_10 [1] : vector<4x4xf32> to vector<4xf32>
    %20 = vector.shape_cast %19 : vector<4xf32> to vector<4x1xf32>
    %21 = vector.broadcast %20 : vector<4x1xf32> to vector<4x4xf32>
    %22 = arith.subf %18, %21 : vector<4x4xf32>
    %23 = math.exp %22 : vector<4x4xf32>
    %cst_11 = arith.constant dense<0.000000e+00> : vector<4xf32>
    %24 = vector.multi_reduction <add>, %23, %cst_11 [1] : vector<4x4xf32> to vector<4xf32>
    %25 = vector.shape_cast %24 : vector<4xf32> to vector<4x1xf32>
    %26 = vector.broadcast %25 : vector<4x1xf32> to vector<4x4xf32>
    %27 = arith.divf %23, %26 : vector<4x4xf32>
    %28 = arith.truncf %27 : vector<4x4xf32> to vector<4x4xbf16>
    %cst_12 = arith.constant dense<0.000000e+00> : vector<4x64xf32>
    %29 = tpu.matmul %28, %8, %cst_12 {dimension_numbers = #tpu.dot_dimension_numbers<[1], [0], [0], [1], [0, 0, 1, 1], [], []>} : vector<4x4xbf16>, vector<4x64xbf16>, vector<4x64xf32> -> vector<4x64xf32>
    %c0_13 = arith.constant 0 : index
    %c0_14 = arith.constant 0 : index
    %c0_15 = arith.constant 0 : index
    %30 = vector.load %arg5[%c0_13, %c0_14, %c0_15] : memref<1x4x64xf32, #tpu.memory_space<vmem>>, vector<1x4x64xf32>
    %31 = vector.shape_cast %30 : vector<1x4x64xf32> to vector<4x64xf32>
    %32 = vector.shape_cast %29 : vector<4x64xf32> to vector<1x4x64xf32>
    tpu.vector_store %arg5[%c0_13, %c0_14, %c0_15], %32 {strides = array<i32>} : memref<1x4x64xf32, #tpu.memory_space<vmem>>, vector<1x4x64xf32>,
    return
  }
  func.func @transform_0(%arg0: i32) -> i32 {
    %c0_i32 = arith.constant 0 : i32
    %c0_i32_0 = arith.constant 0 : i32
    return %c0_i32 : i32
  }
  func.func @transform_1(%arg0: i32) -> (i32, i32, i32) {
    %c0_i32 = arith.constant 0 : i32
    %c0_i32_0 = arith.constant 0 : i32
    %c0_i32_1 = arith.constant 0 : i32
    return %arg0, %c0_i32, %c0_i32_0 : i32, i32, i32
  }
  func.func @transform_2(%arg0: i32) -> (i32, i32, i32) {
    %c0_i32 = arith.constant 0 : i32
    %c0_i32_0 = arith.constant 0 : i32
    %c0_i32_1 = arith.constant 0 : i32
    return %arg0, %c0_i32, %c0_i32_0 : i32, i32, i32
  }
  func.func @transform_3(%arg0: i32) -> (i32, i32, i32) {
    %c0_i32 = arith.constant 0 : i32
    %c0_i32_0 = arith.constant 0 : i32
    %c0_i32_1 = arith.constant 0 : i32
    return %arg0, %c0_i32, %c0_i32_0 : i32, i32, i32
  }
  func.func @transform_4(%arg0: i32) -> (i32, i32, i32) {
    %c0_i32 = arith.constant 0 : i32
    %c0_i32_0 = arith.constant 0 : i32
    %c0_i32_1 = arith.constant 0 : i32
    return %arg0, %c0_i32, %c0_i32_0 : i32, i32, i32
  }
}

module attributes {stable_mosaic.version = 11 : i64} {
  func.func @kernel(%arg0: i32, %arg1: memref<8x256xf32, #tpu.memory_space<vmem>>, %arg2: memref<256x128xbf16, #tpu.memory_space<vmem>>, %arg3: memref<1x128xf32, #tpu.memory_space<vmem>>, %arg4: memref<8x128xf32, #tpu.memory_space<vmem>>, %arg5: memref<8x128xf32, #tpu.memory_space<vmem>>) attributes {dimension_semantics = [#tpu.dimension_semantics<parallel>], iteration_bounds = array<i64: 1>, scalar_prefetch = 0 : i64, scratch_operands = 0 : i64, tpu.core_type = #tpu.core_type<tc>, window_params = [{transform_indices = @transform_0, window_bounds = array<i64: 8, 256>}, {pipeline_mode = #tpu.pipeline_mode<synchronous>, transform_indices = @transform_1, window_bounds = array<i64: 256, 128>}, {pipeline_mode = #tpu.pipeline_mode<synchronous>, transform_indices = @transform_2, window_bounds = array<i64: 1, 128>}, {transform_indices = @transform_3, window_bounds = array<i64: 8, 128>}, {transform_indices = @transform_4, window_bounds = array<i64: 8, 128>}]} {
    %c0 = arith.constant 0 : index
    %c0_0 = arith.constant 0 : index
    %0 = vector.load %arg1[%c0, %c0_0] : memref<8x256xf32, #tpu.memory_space<vmem>>, vector<8x256xf32>
    %1 = arith.truncf %0 : vector<8x256xf32> to vector<8x256xbf16>
    %c0_1 = arith.constant 0 : index
    %c0_2 = arith.constant 0 : index
    %2 = vector.load %arg2[%c0_1, %c0_2] : memref<256x128xbf16, #tpu.memory_space<vmem>>, vector<256x128xbf16>
    %cst = arith.constant dense<0.000000e+00> : vector<8x128xf32>
    %3 = tpu.matmul %1, %2, %cst {dimension_numbers = #tpu.dot_dimension_numbers<[1], [0], [0], [1], [0, 0, 1, 1], [], []>} : vector<8x256xbf16>, vector<256x128xbf16>, vector<8x128xf32> -> vector<8x128xf32>
    %c0_3 = arith.constant 0 : index
    %c0_4 = arith.constant 0 : index
    %4 = vector.load %arg3[%c0_3, %c0_4] : memref<1x128xf32, #tpu.memory_space<vmem>>, vector<1x128xf32>
    %5 = vector.broadcast %4 : vector<1x128xf32> to vector<8x128xf32>
    %6 = arith.addf %3, %5 : vector<8x128xf32>
    %c0_5 = arith.constant 0 : index
    %c0_6 = arith.constant 0 : index
    %7 = vector.load %arg4[%c0_5, %c0_6] : memref<8x128xf32, #tpu.memory_space<vmem>>, vector<8x128xf32>
    %8 = arith.addf %6, %7 : vector<8x128xf32>
    %c0_7 = arith.constant 0 : index
    %c0_8 = arith.constant 0 : index
    %9 = vector.load %arg5[%c0_7, %c0_8] : memref<8x128xf32, #tpu.memory_space<vmem>>, vector<8x128xf32>
    tpu.vector_store %arg5[%c0_7, %c0_8], %8 {strides = array<i32>} : memref<8x128xf32, #tpu.memory_space<vmem>>, vector<8x128xf32>,
    return
  }
  func.func @transform_0(%arg0: i32) -> (i32, i32) {
    %c0_i32 = arith.constant 0 : i32
    %c0_i32_0 = arith.constant 0 : i32
    return %arg0, %c0_i32 : i32, i32
  }
  func.func @transform_1(%arg0: i32) -> (i32, i32) {
    %c0_i32 = arith.constant 0 : i32
    %c0_i32_0 = arith.constant 0 : i32
    %c0_i32_1 = arith.constant 0 : i32
    return %c0_i32, %c0_i32_0 : i32, i32
  }
  func.func @transform_2(%arg0: i32) -> (i32, i32) {
    %c0_i32 = arith.constant 0 : i32
    %c0_i32_0 = arith.constant 0 : i32
    %c0_i32_1 = arith.constant 0 : i32
    return %c0_i32, %c0_i32_0 : i32, i32
  }
  func.func @transform_3(%arg0: i32) -> (i32, i32) {
    %c0_i32 = arith.constant 0 : i32
    %c0_i32_0 = arith.constant 0 : i32
    return %arg0, %c0_i32 : i32, i32
  }
  func.func @transform_4(%arg0: i32) -> (i32, i32) {
    %c0_i32 = arith.constant 0 : i32
    %c0_i32_0 = arith.constant 0 : i32
    return %arg0, %c0_i32 : i32, i32
  }
}

module attributes {stable_mosaic.version = 11 : i64} {
  func.func @kernel(%arg0: i32, %arg1: memref<8x128xf32, #tpu.memory_space<vmem>>, %arg2: memref<1x128xf32, #tpu.memory_space<vmem>>, %arg3: memref<1x128xf32, #tpu.memory_space<vmem>>, %arg4: memref<128x128xbf16, #tpu.memory_space<vmem>>, %arg5: memref<1x128xf32, #tpu.memory_space<vmem>>, %arg6: memref<128x128xbf16, #tpu.memory_space<vmem>>, %arg7: memref<1x128xf32, #tpu.memory_space<vmem>>, %arg8: memref<8x128xf32, #tpu.memory_space<vmem>>) attributes {dimension_semantics = [#tpu.dimension_semantics<parallel>], iteration_bounds = array<i64: 1>, scalar_prefetch = 0 : i64, scratch_operands = 0 : i64, tpu.core_type = #tpu.core_type<tc>, window_params = [{transform_indices = @transform_0, window_bounds = array<i64: 8, 128>}, {pipeline_mode = #tpu.pipeline_mode<synchronous>, transform_indices = @transform_1, window_bounds = array<i64: 1, 128>}, {pipeline_mode = #tpu.pipeline_mode<synchronous>, transform_indices = @transform_2, window_bounds = array<i64: 1, 128>}, {pipeline_mode = #tpu.pipeline_mode<synchronous>, transform_indices = @transform_3, window_bounds = array<i64: 128, 128>}, {pipeline_mode = #tpu.pipeline_mode<synchronous>, transform_indices = @transform_4, window_bounds = array<i64: 1, 128>}, {pipeline_mode = #tpu.pipeline_mode<synchronous>, transform_indices = @transform_5, window_bounds = array<i64: 128, 128>}, {pipeline_mode = #tpu.pipeline_mode<synchronous>, transform_indices = @transform_6, window_bounds = array<i64: 1, 128>}, {transform_indices = @transform_7, window_bounds = array<i64: 8, 128>}]} {
    %c0 = arith.constant 0 : index
    %c0_0 = arith.constant 0 : index
    %0 = vector.load %arg1[%c0, %c0_0] : memref<8x128xf32, #tpu.memory_space<vmem>>, vector<8x128xf32>
    %c0_1 = arith.constant 0 : index
    %c0_2 = arith.constant 0 : index
    %1 = vector.load %arg2[%c0_1, %c0_2] : memref<1x128xf32, #tpu.memory_space<vmem>>, vector<1x128xf32>
    %c0_3 = arith.constant 0 : index
    %c0_4 = arith.constant 0 : index
    %2 = vector.load %arg3[%c0_3, %c0_4] : memref<1x128xf32, #tpu.memory_space<vmem>>, vector<1x128xf32>
    %cst = arith.constant dense<0.000000e+00> : vector<8xf32>
    %3 = vector.multi_reduction <add>, %0, %cst [1] : vector<8x128xf32> to vector<8xf32>
    %4 = vector.shape_cast %3 : vector<8xf32> to vector<8x1xf32>
    %cst_5 = arith.constant 6.250000e-02 : f32
    %5 = vector.broadcast %cst_5 : f32 to vector<8x1xf32>
    %6 = arith.mulf %4, %5 : vector<8x1xf32>
    %7 = arith.mulf %0, %0 : vector<8x128xf32>
    %cst_6 = arith.constant dense<0.000000e+00> : vector<8xf32>
    %8 = vector.multi_reduction <add>, %7, %cst_6 [1] : vector<8x128xf32> to vector<8xf32>
    %9 = vector.shape_cast %8 : vector<8xf32> to vector<8x1xf32>
    %cst_7 = arith.constant 6.250000e-02 : f32
    %10 = vector.broadcast %cst_7 : f32 to vector<8x1xf32>
    %11 = arith.mulf %9, %10 : vector<8x1xf32>
    %12 = arith.mulf %6, %6 : vector<8x1xf32>
    %13 = arith.subf %11, %12 : vector<8x1xf32>
    %cst_8 = arith.constant 0.000000e+00 : f32
    %14 = vector.broadcast %cst_8 : f32 to vector<8x1xf32>
    %15 = arith.maximumf %13, %14 : vector<8x1xf32>
    %16 = vector.broadcast %6 : vector<8x1xf32> to vector<8x128xf32>
    %17 = arith.subf %0, %16 : vector<8x128xf32>
    %cst_9 = arith.constant 9.99999974E-6 : f32
    %18 = vector.broadcast %cst_9 : f32 to vector<8x1xf32>
    %19 = arith.addf %15, %18 : vector<8x1xf32>
    %20 = math.rsqrt %19 : vector<8x1xf32>
    %21 = vector.broadcast %20 : vector<8x1xf32> to vector<8x128xf32>
    %22 = arith.mulf %17, %21 : vector<8x128xf32>
    %23 = vector.broadcast %1 : vector<1x128xf32> to vector<8x128xf32>
    %24 = arith.mulf %22, %23 : vector<8x128xf32>
    %25 = vector.broadcast %2 : vector<1x128xf32> to vector<8x128xf32>
    %26 = arith.addf %24, %25 : vector<8x128xf32>
    %27 = arith.truncf %26 : vector<8x128xf32> to vector<8x128xbf16>
    %c0_10 = arith.constant 0 : index
    %c0_11 = arith.constant 0 : index
    %28 = vector.load %arg4[%c0_10, %c0_11] : memref<128x128xbf16, #tpu.memory_space<vmem>>, vector<128x128xbf16>
    %cst_12 = arith.constant dense<0.000000e+00> : vector<8x128xf32>
    %29 = tpu.matmul %27, %28, %cst_12 {dimension_numbers = #tpu.dot_dimension_numbers<[1], [0], [0], [1], [0, 0, 1, 1], [], []>} : vector<8x128xbf16>, vector<128x128xbf16>, vector<8x128xf32> -> vector<8x128xf32>
    %c0_13 = arith.constant 0 : index
    %c0_14 = arith.constant 0 : index
    %30 = vector.load %arg5[%c0_13, %c0_14] : memref<1x128xf32, #tpu.memory_space<vmem>>, vector<1x128xf32>
    %31 = vector.broadcast %30 : vector<1x128xf32> to vector<8x128xf32>
    %32 = arith.addf %29, %31 : vector<8x128xf32>
    %cst_15 = arith.constant 5.000000e-01 : f32
    %33 = vector.broadcast %cst_15 : f32 to vector<8x128xf32>
    %34 = arith.mulf %33, %32 : vector<8x128xf32>
    %cst_16 = arith.constant 0.707106769 : f32
    %35 = vector.broadcast %cst_16 : f32 to vector<8x128xf32>
    %36 = arith.mulf %32, %35 : vector<8x128xf32>
    %37 = math.absf %36 : vector<8x128xf32>
    %cst_17 = arith.constant 0.327591091 : f32
    %38 = vector.broadcast %cst_17 : f32 to vector<8x128xf32>
    %39 = arith.mulf %38, %37 : vector<8x128xf32>
    %cst_18 = arith.constant 1.000000e+00 : f32
    %40 = vector.broadcast %cst_18 : f32 to vector<8x128xf32>
    %41 = arith.addf %40, %39 : vector<8x128xf32>
    %cst_19 = arith.constant 1.000000e+00 : f32
    %42 = vector.broadcast %cst_19 : f32 to vector<8x128xf32>
    %43 = arith.divf %42, %41 : vector<8x128xf32>
    %cst_20 = arith.constant 1.06140542 : f32
    %44 = vector.broadcast %cst_20 : f32 to vector<8x128xf32>
    %45 = arith.mulf %44, %43 : vector<8x128xf32>
    %cst_21 = arith.constant -1.45315206 : f32
    %46 = vector.broadcast %cst_21 : f32 to vector<8x128xf32>
    %47 = arith.addf %45, %46 : vector<8x128xf32>
    %48 = arith.mulf %47, %43 : vector<8x128xf32>
    %cst_22 = arith.constant 1.42141378 : f32
    %49 = vector.broadcast %cst_22 : f32 to vector<8x128xf32>
    %50 = arith.addf %48, %49 : vector<8x128xf32>
    %51 = arith.mulf %50, %43 : vector<8x128xf32>
    %cst_23 = arith.constant -0.284496725 : f32
    %52 = vector.broadcast %cst_23 : f32 to vector<8x128xf32>
    %53 = arith.addf %51, %52 : vector<8x128xf32>
    %54 = arith.mulf %53, %43 : vector<8x128xf32>
    %cst_24 = arith.constant 0.254829586 : f32
    %55 = vector.broadcast %cst_24 : f32 to vector<8x128xf32>
    %56 = arith.addf %54, %55 : vector<8x128xf32>
    %57 = arith.mulf %56, %43 : vector<8x128xf32>
    %cst_25 = arith.constant 0.000000e+00 : f32
    %58 = vector.broadcast %cst_25 : f32 to vector<8x128xf32>
    %59 = arith.subf %58, %37 : vector<8x128xf32>
    %60 = arith.mulf %59, %37 : vector<8x128xf32>
    %61 = math.exp %60 : vector<8x128xf32>
    %62 = arith.mulf %57, %61 : vector<8x128xf32>
    %cst_26 = arith.constant 1.000000e+00 : f32
    %63 = vector.broadcast %cst_26 : f32 to vector<8x128xf32>
    %64 = arith.subf %63, %62 : vector<8x128xf32>
    %cst_27 = arith.constant 0.000000e+00 : f32
    %65 = vector.broadcast %cst_27 : f32 to vector<8x128xf32>
    %66 = arith.cmpf oge, %36, %65 : vector<8x128xf32>
    %cst_28 = arith.constant 0.000000e+00 : f32
    %67 = vector.broadcast %cst_28 : f32 to vector<8x128xf32>
    %68 = arith.subf %67, %64 : vector<8x128xf32>
    %69 = arith.select %66, %64, %68 : vector<8x128xi1>, vector<8x128xf32>
    %cst_29 = arith.constant 1.000000e+00 : f32
    %70 = vector.broadcast %cst_29 : f32 to vector<8x128xf32>
    %71 = arith.addf %70, %69 : vector<8x128xf32>
    %72 = arith.mulf %34, %71 : vector<8x128xf32>
    %73 = arith.truncf %72 : vector<8x128xf32> to vector<8x128xbf16>
    %c0_30 = arith.constant 0 : index
    %c0_31 = arith.constant 0 : index
    %74 = vector.load %arg6[%c0_30, %c0_31] : memref<128x128xbf16, #tpu.memory_space<vmem>>, vector<128x128xbf16>
    %cst_32 = arith.constant dense<0.000000e+00> : vector<8x128xf32>
    %75 = tpu.matmul %73, %74, %cst_32 {dimension_numbers = #tpu.dot_dimension_numbers<[1], [0], [0], [1], [0, 0, 1, 1], [], []>} : vector<8x128xbf16>, vector<128x128xbf16>, vector<8x128xf32> -> vector<8x128xf32>
    %c0_33 = arith.constant 0 : index
    %c0_34 = arith.constant 0 : index
    %76 = vector.load %arg7[%c0_33, %c0_34] : memref<1x128xf32, #tpu.memory_space<vmem>>, vector<1x128xf32>
    %77 = vector.broadcast %76 : vector<1x128xf32> to vector<8x128xf32>
    %78 = arith.addf %75, %77 : vector<8x128xf32>
    %79 = arith.addf %78, %0 : vector<8x128xf32>
    %c0_35 = arith.constant 0 : index
    %c0_36 = arith.constant 0 : index
    %80 = vector.load %arg8[%c0_35, %c0_36] : memref<8x128xf32, #tpu.memory_space<vmem>>, vector<8x128xf32>
    tpu.vector_store %arg8[%c0_35, %c0_36], %79 {strides = array<i32>} : memref<8x128xf32, #tpu.memory_space<vmem>>, vector<8x128xf32>,
    return
  }
  func.func @transform_0(%arg0: i32) -> (i32, i32) {
    %c0_i32 = arith.constant 0 : i32
    %c0_i32_0 = arith.constant 0 : i32
    return %arg0, %c0_i32 : i32, i32
  }
  func.func @transform_1(%arg0: i32) -> (i32, i32) {
    %c0_i32 = arith.constant 0 : i32
    %c0_i32_0 = arith.constant 0 : i32
    %c0_i32_1 = arith.constant 0 : i32
    return %c0_i32, %c0_i32_0 : i32, i32
  }
  func.func @transform_2(%arg0: i32) -> (i32, i32) {
    %c0_i32 = arith.constant 0 : i32
    %c0_i32_0 = arith.constant 0 : i32
    %c0_i32_1 = arith.constant 0 : i32
    return %c0_i32, %c0_i32_0 : i32, i32
  }
  func.func @transform_3(%arg0: i32) -> (i32, i32) {
    %c0_i32 = arith.constant 0 : i32
    %c0_i32_0 = arith.constant 0 : i32
    %c0_i32_1 = arith.constant 0 : i32
    return %c0_i32, %c0_i32_0 : i32, i32
  }
  func.func @transform_4(%arg0: i32) -> (i32, i32) {
    %c0_i32 = arith.constant 0 : i32
    %c0_i32_0 = arith.constant 0 : i32
    %c0_i32_1 = arith.constant 0 : i32
    return %c0_i32, %c0_i32_0 : i32, i32
  }
  func.func @transform_5(%arg0: i32) -> (i32, i32) {
    %c0_i32 = arith.constant 0 : i32
    %c0_i32_0 = arith.constant 0 : i32
    %c0_i32_1 = arith.constant 0 : i32
    return %c0_i32, %c0_i32_0 : i32, i32
  }
  func.func @transform_6(%arg0: i32) -> (i32, i32) {
    %c0_i32 = arith.constant 0 : i32
    %c0_i32_0 = arith.constant 0 : i32
    %c0_i32_1 = arith.constant 0 : i32
    return %c0_i32, %c0_i32_0 : i32, i32
  }
  func.func @transform_7(%arg0: i32) -> (i32, i32) {
    %c0_i32 = arith.constant 0 : i32
    %c0_i32_0 = arith.constant 0 : i32
    return %arg0, %c0_i32 : i32, i32
  }
}

module attributes {stable_mosaic.version = 11 : i64} {
  func.func @kernel(%arg0: i32, %arg1: memref<8x384xf32, #tpu.memory_space<vmem>>, %arg2: memref<384x128xbf16, #tpu.memory_space<vmem>>, %arg3: memref<1x128xf32, #tpu.memory_space<vmem>>, %arg4: memref<8x128xf32, #tpu.memory_space<vmem>>) attributes {dimension_semantics = [#tpu.dimension_semantics<parallel>], iteration_bounds = array<i64: 1>, scalar_prefetch = 0 : i64, scratch_operands = 0 : i64, tpu.core_type = #tpu.core_type<tc>, window_params = [{transform_indices = @transform_0, window_bounds = array<i64: 8, 384>}, {pipeline_mode = #tpu.pipeline_mode<synchronous>, transform_indices = @transform_1, window_bounds = array<i64: 384, 128>}, {pipeline_mode = #tpu.pipeline_mode<synchronous>, transform_indices = @transform_2, window_bounds = array<i64: 1, 128>}, {transform_indices = @transform_3, window_bounds = array<i64: 8, 128>}]} {
    %c0 = arith.constant 0 : index
    %c0_0 = arith.constant 0 : index
    %0 = vector.load %arg1[%c0, %c0_0] : memref<8x384xf32, #tpu.memory_space<vmem>>, vector<8x384xf32>
    %1 = arith.truncf %0 : vector<8x384xf32> to vector<8x384xbf16>
    %c0_1 = arith.constant 0 : index
    %c0_2 = arith.constant 0 : index
    %2 = vector.load %arg2[%c0_1, %c0_2] : memref<384x128xbf16, #tpu.memory_space<vmem>>, vector<384x128xbf16>
    %cst = arith.constant dense<0.000000e+00> : vector<8x128xf32>
    %3 = tpu.matmul %1, %2, %cst {dimension_numbers = #tpu.dot_dimension_numbers<[1], [0], [0], [1], [0, 0, 1, 1], [], []>} : vector<8x384xbf16>, vector<384x128xbf16>, vector<8x128xf32> -> vector<8x128xf32>
    %c0_3 = arith.constant 0 : index
    %c0_4 = arith.constant 0 : index
    %4 = vector.load %arg3[%c0_3, %c0_4] : memref<1x128xf32, #tpu.memory_space<vmem>>, vector<1x128xf32>
    %5 = vector.broadcast %4 : vector<1x128xf32> to vector<8x128xf32>
    %6 = arith.addf %3, %5 : vector<8x128xf32>
    %c0_5 = arith.constant 0 : index
    %c0_6 = arith.constant 0 : index
    %7 = vector.load %arg4[%c0_5, %c0_6] : memref<8x128xf32, #tpu.memory_space<vmem>>, vector<8x128xf32>
    tpu.vector_store %arg4[%c0_5, %c0_6], %6 {strides = array<i32>} : memref<8x128xf32, #tpu.memory_space<vmem>>, vector<8x128xf32>,
    return
  }
  func.func @transform_0(%arg0: i32) -> (i32, i32) {
    %c0_i32 = arith.constant 0 : i32
    %c0_i32_0 = arith.constant 0 : i32
    return %arg0, %c0_i32 : i32, i32
  }
  func.func @transform_1(%arg0: i32) -> (i32, i32) {
    %c0_i32 = arith.constant 0 : i32
    %c0_i32_0 = arith.constant 0 : i32
    %c0_i32_1 = arith.constant 0 : i32
    return %c0_i32, %c0_i32_0 : i32, i32
  }
  func.func @transform_2(%arg0: i32) -> (i32, i32) {
    %c0_i32 = arith.constant 0 : i32
    %c0_i32_0 = arith.constant 0 : i32
    %c0_i32_1 = arith.constant 0 : i32
    return %c0_i32, %c0_i32_0 : i32, i32
  }
  func.func @transform_3(%arg0: i32) -> (i32, i32) {
    %c0_i32 = arith.constant 0 : i32
    %c0_i32_0 = arith.constant 0 : i32
    return %arg0, %c0_i32 : i32, i32
  }
}

module attributes {stable_mosaic.version = 11 : i64} {
  func.func @kernel(%arg0: i32, %arg1: memref<32x256xf32, #tpu.memory_space<vmem>>, %arg2: memref<256x128xbf16, #tpu.memory_space<vmem>>, %arg3: memref<1x128xf32, #tpu.memory_space<vmem>>, %arg4: memref<32x128xf32, #tpu.memory_space<vmem>>) attributes {dimension_semantics = [#tpu.dimension_semantics<parallel>], iteration_bounds = array<i64: 1>, scalar_prefetch = 0 : i64, scratch_operands = 0 : i64, tpu.core_type = #tpu.core_type<tc>, window_params = [{transform_indices = @transform_0, window_bounds = array<i64: 32, 256>}, {pipeline_mode = #tpu.pipeline_mode<synchronous>, transform_indices = @transform_1, window_bounds = array<i64: 256, 128>}, {pipeline_mode = #tpu.pipeline_mode<synchronous>, transform_indices = @transform_2, window_bounds = array<i64: 1, 128>}, {transform_indices = @transform_3, window_bounds = array<i64: 32, 128>}]} {
    %c0 = arith.constant 0 : index
    %c0_0 = arith.constant 0 : index
    %0 = vector.load %arg1[%c0, %c0_0] : memref<32x256xf32, #tpu.memory_space<vmem>>, vector<32x256xf32>
    %1 = arith.truncf %0 : vector<32x256xf32> to vector<32x256xbf16>
    %c0_1 = arith.constant 0 : index
    %c0_2 = arith.constant 0 : index
    %2 = vector.load %arg2[%c0_1, %c0_2] : memref<256x128xbf16, #tpu.memory_space<vmem>>, vector<256x128xbf16>
    %cst = arith.constant dense<0.000000e+00> : vector<32x128xf32>
    %3 = tpu.matmul %1, %2, %cst {dimension_numbers = #tpu.dot_dimension_numbers<[1], [0], [0], [1], [0, 0, 1, 1], [], []>} : vector<32x256xbf16>, vector<256x128xbf16>, vector<32x128xf32> -> vector<32x128xf32>
    %c0_3 = arith.constant 0 : index
    %c0_4 = arith.constant 0 : index
    %4 = vector.load %arg3[%c0_3, %c0_4] : memref<1x128xf32, #tpu.memory_space<vmem>>, vector<1x128xf32>
    %5 = vector.broadcast %4 : vector<1x128xf32> to vector<32x128xf32>
    %6 = arith.addf %3, %5 : vector<32x128xf32>
    %c0_5 = arith.constant 0 : index
    %c0_6 = arith.constant 0 : index
    %7 = vector.load %arg4[%c0_5, %c0_6] : memref<32x128xf32, #tpu.memory_space<vmem>>, vector<32x128xf32>
    tpu.vector_store %arg4[%c0_5, %c0_6], %6 {strides = array<i32>} : memref<32x128xf32, #tpu.memory_space<vmem>>, vector<32x128xf32>,
    return
  }
  func.func @transform_0(%arg0: i32) -> (i32, i32) {
    %c0_i32 = arith.constant 0 : i32
    %c0_i32_0 = arith.constant 0 : i32
    return %arg0, %c0_i32 : i32, i32
  }
  func.func @transform_1(%arg0: i32) -> (i32, i32) {
    %c0_i32 = arith.constant 0 : i32
    %c0_i32_0 = arith.constant 0 : i32
    %c0_i32_1 = arith.constant 0 : i32
    return %c0_i32, %c0_i32_0 : i32, i32
  }
  func.func @transform_2(%arg0: i32) -> (i32, i32) {
    %c0_i32 = arith.constant 0 : i32
    %c0_i32_0 = arith.constant 0 : i32
    %c0_i32_1 = arith.constant 0 : i32
    return %c0_i32, %c0_i32_0 : i32, i32
  }
  func.func @transform_3(%arg0: i32) -> (i32, i32) {
    %c0_i32 = arith.constant 0 : i32
    %c0_i32_0 = arith.constant 0 : i32
    return %arg0, %c0_i32 : i32, i32
  }
}

module attributes {stable_mosaic.version = 11 : i64} {
  func.func @kernel(%arg0: i32, %arg1: memref<32x128xf32, #tpu.memory_space<vmem>>, %arg2: memref<128x128xbf16, #tpu.memory_space<vmem>>, %arg3: memref<1x128xf32, #tpu.memory_space<vmem>>, %arg4: memref<32x128xf32, #tpu.memory_space<vmem>>) attributes {dimension_semantics = [#tpu.dimension_semantics<parallel>], iteration_bounds = array<i64: 1>, scalar_prefetch = 0 : i64, scratch_operands = 0 : i64, tpu.core_type = #tpu.core_type<tc>, window_params = [{transform_indices = @transform_0, window_bounds = array<i64: 32, 128>}, {pipeline_mode = #tpu.pipeline_mode<synchronous>, transform_indices = @transform_1, window_bounds = array<i64: 128, 128>}, {pipeline_mode = #tpu.pipeline_mode<synchronous>, transform_indices = @transform_2, window_bounds = array<i64: 1, 128>}, {transform_indices = @transform_3, window_bounds = array<i64: 32, 128>}]} {
    %c0 = arith.constant 0 : index
    %c0_0 = arith.constant 0 : index
    %0 = vector.load %arg1[%c0, %c0_0] : memref<32x128xf32, #tpu.memory_space<vmem>>, vector<32x128xf32>
    %1 = arith.truncf %0 : vector<32x128xf32> to vector<32x128xbf16>
    %c0_1 = arith.constant 0 : index
    %c0_2 = arith.constant 0 : index
    %2 = vector.load %arg2[%c0_1, %c0_2] : memref<128x128xbf16, #tpu.memory_space<vmem>>, vector<128x128xbf16>
    %cst = arith.constant dense<0.000000e+00> : vector<32x128xf32>
    %3 = tpu.matmul %1, %2, %cst {dimension_numbers = #tpu.dot_dimension_numbers<[1], [0], [0], [1], [0, 0, 1, 1], [], []>} : vector<32x128xbf16>, vector<128x128xbf16>, vector<32x128xf32> -> vector<32x128xf32>
    %c0_3 = arith.constant 0 : index
    %c0_4 = arith.constant 0 : index
    %4 = vector.load %arg3[%c0_3, %c0_4] : memref<1x128xf32, #tpu.memory_space<vmem>>, vector<1x128xf32>
    %5 = vector.broadcast %4 : vector<1x128xf32> to vector<32x128xf32>
    %6 = arith.addf %3, %5 : vector<32x128xf32>
    %c0_5 = arith.constant 0 : index
    %c0_6 = arith.constant 0 : index
    %7 = vector.load %arg4[%c0_5, %c0_6] : memref<32x128xf32, #tpu.memory_space<vmem>>, vector<32x128xf32>
    tpu.vector_store %arg4[%c0_5, %c0_6], %6 {strides = array<i32>} : memref<32x128xf32, #tpu.memory_space<vmem>>, vector<32x128xf32>,
    return
  }
  func.func @transform_0(%arg0: i32) -> (i32, i32) {
    %c0_i32 = arith.constant 0 : i32
    %c0_i32_0 = arith.constant 0 : i32
    return %arg0, %c0_i32 : i32, i32
  }
  func.func @transform_1(%arg0: i32) -> (i32, i32) {
    %c0_i32 = arith.constant 0 : i32
    %c0_i32_0 = arith.constant 0 : i32
    %c0_i32_1 = arith.constant 0 : i32
    return %c0_i32, %c0_i32_0 : i32, i32
  }
  func.func @transform_2(%arg0: i32) -> (i32, i32) {
    %c0_i32 = arith.constant 0 : i32
    %c0_i32_0 = arith.constant 0 : i32
    %c0_i32_1 = arith.constant 0 : i32
    return %c0_i32, %c0_i32_0 : i32, i32
  }
  func.func @transform_3(%arg0: i32) -> (i32, i32) {
    %c0_i32 = arith.constant 0 : i32
    %c0_i32_0 = arith.constant 0 : i32
    return %arg0, %c0_i32 : i32, i32
  }
}

module attributes {stable_mosaic.version = 11 : i64} {
  func.func @kernel(%arg0: i32, %arg1: memref<128x256xf32, #tpu.memory_space<vmem>>, %arg2: memref<256x128xbf16, #tpu.memory_space<vmem>>, %arg3: memref<1x128xf32, #tpu.memory_space<vmem>>, %arg4: memref<128x128xf32, #tpu.memory_space<vmem>>) attributes {dimension_semantics = [#tpu.dimension_semantics<parallel>], iteration_bounds = array<i64: 1>, scalar_prefetch = 0 : i64, scratch_operands = 0 : i64, tpu.core_type = #tpu.core_type<tc>, window_params = [{transform_indices = @transform_0, window_bounds = array<i64: 128, 256>}, {pipeline_mode = #tpu.pipeline_mode<synchronous>, transform_indices = @transform_1, window_bounds = array<i64: 256, 128>}, {pipeline_mode = #tpu.pipeline_mode<synchronous>, transform_indices = @transform_2, window_bounds = array<i64: 1, 128>}, {transform_indices = @transform_3, window_bounds = array<i64: 128, 128>}]} {
    %c0 = arith.constant 0 : index
    %c0_0 = arith.constant 0 : index
    %0 = vector.load %arg1[%c0, %c0_0] : memref<128x256xf32, #tpu.memory_space<vmem>>, vector<128x256xf32>
    %1 = arith.truncf %0 : vector<128x256xf32> to vector<128x256xbf16>
    %c0_1 = arith.constant 0 : index
    %c0_2 = arith.constant 0 : index
    %2 = vector.load %arg2[%c0_1, %c0_2] : memref<256x128xbf16, #tpu.memory_space<vmem>>, vector<256x128xbf16>
    %cst = arith.constant dense<0.000000e+00> : vector<128x128xf32>
    %3 = tpu.matmul %1, %2, %cst {dimension_numbers = #tpu.dot_dimension_numbers<[1], [0], [0], [1], [0, 0, 1, 1], [], []>} : vector<128x256xbf16>, vector<256x128xbf16>, vector<128x128xf32> -> vector<128x128xf32>
    %c0_3 = arith.constant 0 : index
    %c0_4 = arith.constant 0 : index
    %4 = vector.load %arg3[%c0_3, %c0_4] : memref<1x128xf32, #tpu.memory_space<vmem>>, vector<1x128xf32>
    %5 = vector.broadcast %4 : vector<1x128xf32> to vector<128x128xf32>
    %6 = arith.addf %3, %5 : vector<128x128xf32>
    %c0_5 = arith.constant 0 : index
    %c0_6 = arith.constant 0 : index
    %7 = vector.load %arg4[%c0_5, %c0_6] : memref<128x128xf32, #tpu.memory_space<vmem>>, vector<128x128xf32>
    tpu.vector_store %arg4[%c0_5, %c0_6], %6 {strides = array<i32>} : memref<128x128xf32, #tpu.memory_space<vmem>>, vector<128x128xf32>,
    return
  }
  func.func @transform_0(%arg0: i32) -> (i32, i32) {
    %c0_i32 = arith.constant 0 : i32
    %c0_i32_0 = arith.constant 0 : i32
    return %arg0, %c0_i32 : i32, i32
  }
  func.func @transform_1(%arg0: i32) -> (i32, i32) {
    %c0_i32 = arith.constant 0 : i32
    %c0_i32_0 = arith.constant 0 : i32
    %c0_i32_1 = arith.constant 0 : i32
    return %c0_i32, %c0_i32_0 : i32, i32
  }
  func.func @transform_2(%arg0: i32) -> (i32, i32) {
    %c0_i32 = arith.constant 0 : i32
    %c0_i32_0 = arith.constant 0 : i32
    %c0_i32_1 = arith.constant 0 : i32
    return %c0_i32, %c0_i32_0 : i32, i32
  }
  func.func @transform_3(%arg0: i32) -> (i32, i32) {
    %c0_i32 = arith.constant 0 : i32
    %c0_i32_0 = arith.constant 0 : i32
    return %arg0, %c0_i32 : i32, i32
  }
}

module attributes {stable_mosaic.version = 11 : i64} {
  func.func @kernel(%arg0: i32, %arg1: memref<256x128xf32, #tpu.memory_space<vmem>>, %arg2: memref<128x128xbf16, #tpu.memory_space<vmem>>, %arg3: memref<1x128xf32, #tpu.memory_space<vmem>>, %arg4: memref<256x128xf32, #tpu.memory_space<vmem>>) attributes {dimension_semantics = [#tpu.dimension_semantics<parallel>], iteration_bounds = array<i64: 2>, scalar_prefetch = 0 : i64, scratch_operands = 0 : i64, tpu.core_type = #tpu.core_type<tc>, window_params = [{transform_indices = @transform_0, window_bounds = array<i64: 256, 128>}, {pipeline_mode = #tpu.pipeline_mode<synchronous>, transform_indices = @transform_1, window_bounds = array<i64: 128, 128>}, {pipeline_mode = #tpu.pipeline_mode<synchronous>, transform_indices = @transform_2, window_bounds = array<i64: 1, 128>}, {transform_indices = @transform_3, window_bounds = array<i64: 256, 128>}]} {
    %c0 = arith.constant 0 : index
    %c0_0 = arith.constant 0 : index
    %0 = vector.load %arg1[%c0, %c0_0] : memref<256x128xf32, #tpu.memory_space<vmem>>, vector<256x128xf32>
    %1 = arith.truncf %0 : vector<256x128xf32> to vector<256x128xbf16>
    %c0_1 = arith.constant 0 : index
    %c0_2 = arith.constant 0 : index
    %2 = vector.load %arg2[%c0_1, %c0_2] : memref<128x128xbf16, #tpu.memory_space<vmem>>, vector<128x128xbf16>
    %cst = arith.constant dense<0.000000e+00> : vector<256x128xf32>
    %3 = tpu.matmul %1, %2, %cst {dimension_numbers = #tpu.dot_dimension_numbers<[1], [0], [0], [1], [0, 0, 1, 1], [], []>} : vector<256x128xbf16>, vector<128x128xbf16>, vector<256x128xf32> -> vector<256x128xf32>
    %c0_3 = arith.constant 0 : index
    %c0_4 = arith.constant 0 : index
    %4 = vector.load %arg3[%c0_3, %c0_4] : memref<1x128xf32, #tpu.memory_space<vmem>>, vector<1x128xf32>
    %5 = vector.broadcast %4 : vector<1x128xf32> to vector<256x128xf32>
    %6 = arith.addf %3, %5 : vector<256x128xf32>
    %c0_5 = arith.constant 0 : index
    %c0_6 = arith.constant 0 : index
    %7 = vector.load %arg4[%c0_5, %c0_6] : memref<256x128xf32, #tpu.memory_space<vmem>>, vector<256x128xf32>
    tpu.vector_store %arg4[%c0_5, %c0_6], %6 {strides = array<i32>} : memref<256x128xf32, #tpu.memory_space<vmem>>, vector<256x128xf32>,
    return
  }
  func.func @transform_0(%arg0: i32) -> (i32, i32) {
    %c0_i32 = arith.constant 0 : i32
    %c0_i32_0 = arith.constant 0 : i32
    return %arg0, %c0_i32 : i32, i32
  }
  func.func @transform_1(%arg0: i32) -> (i32, i32) {
    %c0_i32 = arith.constant 0 : i32
    %c0_i32_0 = arith.constant 0 : i32
    %c0_i32_1 = arith.constant 0 : i32
    return %c0_i32, %c0_i32_0 : i32, i32
  }
  func.func @transform_2(%arg0: i32) -> (i32, i32) {
    %c0_i32 = arith.constant 0 : i32
    %c0_i32_0 = arith.constant 0 : i32
    %c0_i32_1 = arith.constant 0 : i32
    return %c0_i32, %c0_i32_0 : i32, i32
  }
  func.func @transform_3(%arg0: i32) -> (i32, i32) {
    %c0_i32 = arith.constant 0 : i32
    %c0_i32_0 = arith.constant 0 : i32
    return %arg0, %c0_i32 : i32, i32
  }
}

</mosaic_0001>

<bundles_post_ra>
// kernel: forward.46
= control target key start
LH: loop header
LB: loop body
LE: loop exit
PB: predicated region body
PF: predicated region fallthrough
CT: control target
= control target key end

     0   :  { %s695_s12 = smov 0   ;;  %s848_s0 = inlined_call_operand.vmem [shape: f32[2048,128], index: 0, kind: input, shape index: {}]   ;;  %s849_s1 = inlined_call_operand.vmem [shape: bf16[128,128], index: 1, kind: input, shape index: {}]   ;;  %s850_s2 = inlined_call_operand.vmem [shape: f32[1,128], index: 2, kind: input, shape index: {}]   ;;  %s851_s3 = inlined_call_operand.vmem [shape: f32[2048,128], index: 3, kind: output, shape index: {}]  }
   0x1 LB: > { %s543_s13 = sadd.s32 4294967295, %s673_s12   ;;  %p547_p0 = scmp.ge.s32.totalorder %s673_s12, 1  ;;  %s673_s12 = sphi %s695_s12, %s13_s12  }
   0x2   : > { %p138_p1 = scmp.lt.s32.totalorder %s673_s12, 9 }
   0x4   : > { %p139_p2 = pnand %p547_p0, %p138_p1 }
   0x5   : > { %s548_s16 = sshll.u32 (!%p139_p2), %s543_s13, 5 }
   0x6   : > { %142 = sbr.rel (%p139_p2) target bundleno = 270 (0x10e), region = 32  ;;  %p163_p3 = scmp.lt.s32.totalorder (!%p139_p2), %s548_s16, 255 }
   0xb   : > { %v659_v0 = vld [vmem:[%s849_s1 + $0x38] sm:$0xff]   ;;  %v660_v1 = vld [vmem:[%s849_s1 + $0x30] sm:$0xff]   ;;  %s853_s16 = smov (!%p163_p3, %s548_s16), 255  ;;  %v661_v2 = vld [vmem:[%s849_s1 + $0x28] sm:$0xff]  }
   0xc   : > { %587 = vmatprep.subr.bf16.mxu0 %v659_v0  ;;  %635 = vmatprep.subr.bf16.mxu1 %v659_v0  ;;  %s549_s21 = sshll.u32 %s853_s16, 3  ;;  %v662_v3 = vld [vmem:[%s849_s1 + $0x20] sm:$0xff]   ;;  %v663_v10 = vld [vmem:[%s849_s1 + $0x18] sm:$0xff]   ;;  %v664_v11 = vld [vmem:[%s849_s1 + $0x10] sm:$0xff]  }
   0xd   : > { %588 = vmatpush3.bf16.msra.mxu0 %v659_v0  ;;  %643 = vmatpush3.bf16.msra.mxu1 %v659_v0  ;;  %s720_s24 = scalar_lea.vmem %s848_s0, %s549_s21  ;;  %v665_v12 = vld [vmem:[%s849_s1 + $0x8] sm:$0xff]   ;;  %v666_v13 = vld [vmem:[%s849_s1] sm:$0xff]   ;;  %s779_s13 = scalar_lea.vmem %s851_s3, %s549_s21 }
   0xe   : > { %589 = vmatprep.subr.bf16.mxu0 %v660_v1  ;;  %636 = vmatprep.subr.bf16.mxu1 %v660_v1  ;;  %v175_v4 = vld [vmem:[%s720_s24] sm:$0xff]  ;;  %v176_v5 = vld [vmem:[%s720_s24 + $0x8] sm:$0xff]  ;;  %v177_v14 = vld [vmem:[%s720_s24 + $0x10] sm:$0xff] }
   0xf   : > { %v191_v6 = vld [vmem:[%s720_s24 + $0x80] sm:$0xff]  ;;  %v207_v7 = vpack.c.bf16 %v176_v5, %v175_v4  ;;  %v192_v8 = vld [vmem:[%s720_s24 + $0x88] sm:$0xff]  ;;  %v178_v15 = vld [vmem:[%s720_s24 + $0x18] sm:$0xff] }
  0x10   : > { %v215_v9 = vpack.c.bf16 %v192_v8, %v191_v6  ;;  %v193_v16 = vld [vmem:[%s720_s24 + $0x90] sm:$0xff]  ;;  %v194_v17 = vld [vmem:[%s720_s24 + $0x98] sm:$0xff]  ;;  %v179_v18 = vld [vmem:[%s720_s24 + $0x20] sm:$0xff]  ;;  %v208_v22 = vpack.c.bf16 %v178_v15, %v177_v14 }
  0x11   : > { %590 = vmatpush3.bf16.msra.mxu0 %v660_v1  ;;  %644 = vmatpush3.bf16.msra.mxu1 %v660_v1  ;;  %v180_v19 = vld [vmem:[%s720_s24 + $0x28] sm:$0xff]  ;;  %v195_v20 = vld [vmem:[%s720_s24 + $0xa0] sm:$0xff]  ;;  %v216_v23 = vpack.c.bf16 %v194_v17, %v193_v16  ;;  %v181_v26 = vld [vmem:[%s720_s24 + $0x30] sm:$0xff] }
  0x12   : > { %591 = vmatprep.subr.bf16.mxu0 %v661_v2  ;;  %637 = vmatprep.subr.bf16.mxu1 %v661_v2  ;;  %v196_v21 = vld [vmem:[%s720_s24 + $0xa8] sm:$0xff]  ;;  %v209_v24 = vpack.c.bf16 %v180_v19, %v179_v18  ;;  %v182_v27 = vld [vmem:[%s720_s24 + $0x38] sm:$0xff]  ;;  %v197_v28 = vld [vmem:[%s720_s24 + $0xb0] sm:$0xff] }
  0x13   : > { %603 = vmatprep.mubr.bf16.mxu0 %v207_v7  ;;  %619 = vmatprep.mubr.bf16.mxu1 %v215_v9  ;;  %v217_v25 = vpack.c.bf16 %v196_v21, %v195_v20  ;;  %v198_v29 = vld [vmem:[%s720_s24 + $0xb8] sm:$0xff]  ;;  %v183_v30 = vld [vmem:[%s720_s24 + $0x40] sm:$0xff]  ;;  %v184_v31 = vld [vmem:[%s720_s24 + $0x48] sm:$0xff]  ;;  %v210_v34 = vpack.c.bf16 %v182_v27, %v181_v26 }
  0x14   : > { %v199_v32 = vld [vmem:[%s720_s24 + $0xc0] sm:$0xff]  ;;  %v200_v33 = vld [vmem:[%s720_s24 + $0xc8] sm:$0xff]  ;;  %v218_v35 = vpack.c.bf16 %v198_v29, %v197_v28  ;;  %v211_v36 = vpack.c.bf16 %v184_v31, %v183_v30  ;;  %v185_v38 = vld [vmem:[%s720_s24 + $0x50] sm:$0xff] }
  0x15   : > { %592 = vmatpush3.bf16.msra.mxu0 %v661_v2  ;;  %645 = vmatpush3.bf16.msra.mxu1 %v661_v2  ;;  %v219_v37 = vpack.c.bf16 %v200_v33, %v199_v32  ;;  %v186_v39 = vld [vmem:[%s720_s24 + $0x58] sm:$0xff]  ;;  %v201_v40 = vld [vmem:[%s720_s24 + $0xd0] sm:$0xff]  ;;  %v187_v42 = vld [vmem:[%s720_s24 + $0x60] sm:$0xff] }
  0x16   : > { %593 = vmatprep.subr.bf16.mxu0 %v662_v3  ;;  %638 = vmatprep.subr.bf16.mxu1 %v662_v3  ;;  %v202_v41 = vld [vmem:[%s720_s24 + $0xd8] sm:$0xff]  ;;  %v188_v43 = vld [vmem:[%s720_s24 + $0x68] sm:$0xff]  ;;  %v203_v44 = vld [vmem:[%s720_s24 + $0xe0] sm:$0xff]  ;;  %v212_v46 = vpack.c.bf16 %v186_v39, %v185_v38 }
  0x17   : > { %v204_v45 = vld [vmem:[%s720_s24 + $0xe8] sm:$0xff]  ;;  %v220_v47 = vpack.c.bf16 %v202_v41, %v201_v40  ;;  %v213_v48 = vpack.c.bf16 %v188_v43, %v187_v42  ;;  %v189_v50 = vld [vmem:[%s720_s24 + $0x70] sm:$0xff]  ;;  %v190_v51 = vld [vmem:[%s720_s24 + $0x78] sm:$0xff] }
  0x18   : > { %v221_v49 = vpack.c.bf16 %v204_v45, %v203_v44  ;;  %v205_v52 = vld [vmem:[%s720_s24 + $0xf0] sm:$0xff]  ;;  %v206_v53 = vld [vmem:[%s720_s24 + $0xf8] sm:$0xff]  ;;  %v214_v54 = vpack.c.bf16 %v190_v51, %v189_v50  ;;  %v772_v56 = vld [vmem:[%s850_s2] ss:$0 sm:$0xff] }
  0x19   : > { %594 = vmatpush3.bf16.msra.mxu0 %v662_v3  ;;  %646 = vmatpush3.bf16.msra.mxu1 %v662_v3  ;;  %v222_v55 = vpack.c.bf16 %v206_v53, %v205_v52 }
  0x1a   : > { %595 = vmatprep.subr.bf16.mxu0 %v663_v10  ;;  %639 = vmatprep.subr.bf16.mxu1 %v663_v10 }
  0x1d   : > { %596 = vmatpush3.bf16.msra.mxu0 %v663_v10  ;;  %647 = vmatpush3.bf16.msra.mxu1 %v663_v10 }
  0x1e   : > { %597 = vmatprep.subr.bf16.mxu0 %v664_v11  ;;  %640 = vmatprep.subr.bf16.mxu1 %v664_v11 }
  0x21   : > { %598 = vmatpush3.bf16.msra.mxu0 %v664_v11  ;;  %648 = vmatpush3.bf16.msra.mxu1 %v664_v11 }
  0x22   : > { %599 = vmatprep.subr.bf16.mxu0 %v665_v12  ;;  %641 = vmatprep.subr.bf16.mxu1 %v665_v12 }
  0x25   : > { %600 = vmatpush3.bf16.msra.mxu0 %v665_v12  ;;  %649 = vmatpush3.bf16.msra.mxu1 %v665_v12 }
  0x26   : > { %601 = vmatprep.subr.bf16.mxu0 %v666_v13  ;;  %642 = vmatprep.subr.bf16.mxu1 %v666_v13 }
  0x29   : > { %602 = vmatpush3.bf16.msra.mxu0 %v666_v13  ;;  %650 = vmatpush3.bf16.msra.mxu1 %v666_v13 }
  0x2c   : > { %604 = vmatmul.mubr.bf16.vlgmr.msra.gmra.mxu0 %v208_v22  ;;  %620 = vmatmul.mubr.bf16.vlgmr.msra.gmra.mxu1 %v216_v23 }
  0x2d   : > { %607 = vmatprep.mubr.bf16.mxu0 %v209_v24  ;;  %623 = vmatprep.mubr.bf16.mxu1 %v217_v25 }
  0x34   : > { %608 = vmatmul.mubr.bf16.gmra.mxu0 %v210_v34  ;;  %624 = vmatmul.mubr.bf16.gmra.mxu1 %v218_v35 }
  0x35   : > { %611 = vmatprep.mubr.bf16.mxu0 %v211_v36  ;;  %627 = vmatprep.mubr.bf16.mxu1 %v219_v37 }
  0x3c   : > { %612 = vmatmul.mubr.bf16.gmra.mxu0 %v212_v46  ;;  %628 = vmatmul.mubr.bf16.gmra.mxu1 %v220_v47 }
  0x3d   : > { %615 = vmatprep.mubr.bf16.mxu0 %v213_v48  ;;  %631 = vmatprep.mubr.bf16.mxu1 %v221_v49 }
  0x44   : > { %616 = vmatmul.mubr.bf16.gmra.mxu0 %v214_v54  ;;  %632 = vmatmul.mubr.bf16.gmra.mxu1 %v222_v55 }
  0xec   : > { %v605_v57 = vpop.f32.mrf.mxu0  ;;  %v621_v58 = vpop.f32.mrf.mxu1 }
  0xed   : > { %v337_v59 = vadd.f32 %v605_v57, %v772_v56  ;;  %v401_v60 = vadd.f32 %v621_v58, %v772_v56 }
  0xee   : > { %v328_v61 = vpop.f32.mrf.mxu0  ;;  %v392_v62 = vpop.f32.mrf.mxu1 }
  0xef   : > { %457 = vst [vmem:[%s779_s13 + $0x10] sm:$0xff] %v337_v59  ;;  %473 = vst [vmem:[%s779_s13 + $0x90] sm:$0xff] %v401_v60  ;;  %v329_v63 = vadd.f32 %v772_v56, %v328_v61  ;;  %v393_v0 = vadd.f32 %v772_v56, %v392_v62 }
  0xf0   : > { %v606_v1 = vpop.f32.mrf.mxu0  ;;  %v622_v2 = vpop.f32.mrf.mxu1 }
  0xf1   : > { %455 = vst [vmem:[%s779_s13] sm:$0xff] %v329_v63  ;;  %471 = vst [vmem:[%s779_s13 + $0x80] sm:$0xff] %v393_v0  ;;  %v340_v3 = vadd.f32 %v606_v1, %v772_v56  ;;  %v404_v4 = vadd.f32 %v622_v2, %v772_v56 }
  0xf2   : > { %v331_v5 = vpop.f32.mrf.mxu0  ;;  %v395_v6 = vpop.f32.mrf.mxu1 }
  0xf3   : > { %458 = vst [vmem:[%s779_s13 + $0x18] sm:$0xff] %v340_v3  ;;  %474 = vst [vmem:[%s779_s13 + $0x98] sm:$0xff] %v404_v4  ;;  %v332_v7 = vadd.f32 %v772_v56, %v331_v5  ;;  %v396_v8 = vadd.f32 %v772_v56, %v395_v6 }
  0xf4   : > { %v609_v9 = vpop.f32.mrf.mxu0  ;;  %v625_v10 = vpop.f32.mrf.mxu1 }
  0xf5   : > { %456 = vst [vmem:[%s779_s13 + $0x8] sm:$0xff] %v332_v7  ;;  %472 = vst [vmem:[%s779_s13 + $0x88] sm:$0xff] %v396_v8  ;;  %v353_v11 = vadd.f32 %v609_v9, %v772_v56  ;;  %v417_v12 = vadd.f32 %v625_v10, %v772_v56 }
  0xf6   : > { %v344_v13 = vpop.f32.mrf.mxu0  ;;  %v408_v14 = vpop.f32.mrf.mxu1 }
  0xf7   : > { %461 = vst [vmem:[%s779_s13 + $0x30] sm:$0xff] %v353_v11  ;;  %477 = vst [vmem:[%s779_s13 + $0xb0] sm:$0xff] %v417_v12  ;;  %v345_v15 = vadd.f32 %v772_v56, %v344_v13  ;;  %v409_v16 = vadd.f32 %v772_v56, %v408_v14 }
  0xf8   : > { %v610_v17 = vpop.f32.mrf.mxu0  ;;  %v626_v18 = vpop.f32.mrf.mxu1 }
  0xf9   : > { %459 = vst [vmem:[%s779_s13 + $0x20] sm:$0xff] %v345_v15  ;;  %475 = vst [vmem:[%s779_s13 + $0xa0] sm:$0xff] %v409_v16  ;;  %v356_v19 = vadd.f32 %v610_v17, %v772_v56  ;;  %v420_v20 = vadd.f32 %v626_v18, %v772_v56 }
  0xfa   : > { %v347_v21 = vpop.f32.mrf.mxu0  ;;  %v411_v22 = vpop.f32.mrf.mxu1 }
  0xfb   : > { %462 = vst [vmem:[%s779_s13 + $0x38] sm:$0xff] %v356_v19  ;;  %478 = vst [vmem:[%s779_s13 + $0xb8] sm:$0xff] %v420_v20  ;;  %v348_v23 = vadd.f32 %v772_v56, %v347_v21  ;;  %v412_v24 = vadd.f32 %v772_v56, %v411_v22 }
  0xfc   : > { %v613_v25 = vpop.f32.mrf.mxu0  ;;  %v629_v26 = vpop.f32.mrf.mxu1 }
  0xfd   : > { %460 = vst [vmem:[%s779_s13 + $0x28] sm:$0xff] %v348_v23  ;;  %476 = vst [vmem:[%s779_s13 + $0xa8] sm:$0xff] %v412_v24  ;;  %v369_v27 = vadd.f32 %v613_v25, %v772_v56  ;;  %v433_v28 = vadd.f32 %v629_v26, %v772_v56 }
  0xfe   : > { %v360_v29 = vpop.f32.mrf.mxu0  ;;  %v424_v30 = vpop.f32.mrf.mxu1 }
  0xff   : > { %465 = vst [vmem:[%s779_s13 + $0x50] sm:$0xff] %v369_v27  ;;  %481 = vst [vmem:[%s779_s13 + $0xd0] sm:$0xff] %v433_v28  ;;  %v361_v31 = vadd.f32 %v772_v56, %v360_v29  ;;  %v425_v32 = vadd.f32 %v772_v56, %v424_v30 }
 0x100   : > { %v614_v33 = vpop.f32.mrf.mxu0  ;;  %v630_v34 = vpop.f32.mrf.mxu1 }
 0x101   : > { %463 = vst [vmem:[%s779_s13 + $0x40] sm:$0xff] %v361_v31  ;;  %479 = vst [vmem:[%s779_s13 + $0xc0] sm:$0xff] %v425_v32  ;;  %v372_v35 = vadd.f32 %v614_v33, %v772_v56  ;;  %v436_v36 = vadd.f32 %v630_v34, %v772_v56 }
 0x102   : > { %v363_v37 = vpop.f32.mrf.mxu0  ;;  %v427_v38 = vpop.f32.mrf.mxu1 }
 0x103   : > { %466 = vst [vmem:[%s779_s13 + $0x58] sm:$0xff] %v372_v35  ;;  %482 = vst [vmem:[%s779_s13 + $0xd8] sm:$0xff] %v436_v36  ;;  %v364_v39 = vadd.f32 %v772_v56, %v363_v37  ;;  %v428_v40 = vadd.f32 %v772_v56, %v427_v38 }
 0x104   : > { %v617_v41 = vpop.f32.mrf.mxu0  ;;  %v633_v42 = vpop.f32.mrf.mxu1 }
 0x105   : > { %464 = vst [vmem:[%s779_s13 + $0x48] sm:$0xff] %v364_v39  ;;  %480 = vst [vmem:[%s779_s13 + $0xc8] sm:$0xff] %v428_v40  ;;  %v385_v43 = vadd.f32 %v617_v41, %v772_v56  ;;  %v449_v44 = vadd.f32 %v633_v42, %v772_v56 }
 0x106   : > { %v376_v45 = vpop.f32.mrf.mxu0  ;;  %v440_v46 = vpop.f32.mrf.mxu1 }
 0x107   : > { %469 = vst [vmem:[%s779_s13 + $0x70] sm:$0xff] %v385_v43  ;;  %485 = vst [vmem:[%s779_s13 + $0xf0] sm:$0xff] %v449_v44  ;;  %v377_v47 = vadd.f32 %v772_v56, %v376_v45  ;;  %v441_v48 = vadd.f32 %v772_v56, %v440_v46 }
 0x108   : > { %v618_v49 = vpop.f32.mrf.mxu0  ;;  %v634_v50 = vpop.f32.mrf.mxu1 }
 0x109   : > { %467 = vst [vmem:[%s779_s13 + $0x60] sm:$0xff] %v377_v47  ;;  %483 = vst [vmem:[%s779_s13 + $0xe0] sm:$0xff] %v441_v48  ;;  %v388_v51 = vadd.f32 %v618_v49, %v772_v56  ;;  %v452_v52 = vadd.f32 %v634_v50, %v772_v56 }
 0x10a   : > { %v379_v53 = vpop.f32.mrf.mxu0  ;;  %v443_v54 = vpop.f32.mrf.mxu1 }
 0x10b   : > { %470 = vst [vmem:[%s779_s13 + $0x78] sm:$0xff] %v388_v51  ;;  %486 = vst [vmem:[%s779_s13 + $0xf8] sm:$0xff] %v452_v52  ;;  %v380_v55 = vadd.f32 %v772_v56, %v379_v53  ;;  %v444_v57 = vadd.f32 %v772_v56, %v443_v54 }
 0x10d   : > { %468 = vst [vmem:[%s779_s13 + $0x68] sm:$0xff] %v380_v55  ;;  %484 = vst [vmem:[%s779_s13 + $0xe8] sm:$0xff] %v444_v57 }
 0x10e PF: > { %s13_s12 = sadd.s32 1, %s673_s12  }
 0x10f   : > { %p10_p4 = scmp.ge.s32.totalorder %s13_s12, 10  }
 0x111   :  { %12 = sbr.rel (!%p10_p4) target bundleno = 1 (0x1), region = 62 }

// kernel: forward.47
= control target key start
LH: loop header
LB: loop body
LE: loop exit
PB: predicated region body
PF: predicated region fallthrough
CT: control target
= control target key end

     0   :  { %s451_s1 = inlined_call_operand.vmem [shape: bf16[128,128], index: 1, kind: input, shape index: {}]   ;;  %s452_s0 = inlined_call_operand.vmem [shape: f32[128,128], index: 0, kind: input, shape index: {}]   ;;  %s453_s2 = inlined_call_operand.vmem [shape: f32[1,128], index: 2, kind: input, shape index: {}]   ;;  %s454_s3 = inlined_call_operand.vmem [shape: f32[128,128], index: 3, kind: output, shape index: {}]  }
   0x1   :  { %v300_v0 = vld [vmem:[%s451_s1 + $0x38] sm:$0xff]   ;;  %v301_v1 = vld [vmem:[%s451_s1 + $0x30] sm:$0xff]   ;;  %v302_v2 = vld [vmem:[%s451_s1 + $0x28] sm:$0xff]  }
   0x2   :  { %252 = vmatprep.subr.bf16.mxu0 %v300_v0  ;;  %284 = vmatprep.subr.bf16.mxu1 %v300_v0  ;;  %v303_v3 = vld [vmem:[%s451_s1 + $0x20] sm:$0xff]   ;;  %v16_v5 = vld [vmem:[%s452_s0 + $0x8] sm:$0xff]  ;;  %v304_v10 = vld [vmem:[%s451_s1 + $0x18] sm:$0xff]  }
   0x3   :  { %253 = vmatpush3.bf16.msra.mxu0 %v300_v0  ;;  %292 = vmatpush3.bf16.msra.mxu1 %v300_v0  ;;  %v15_v4 = vld [vmem:[%s452_s0] sm:$0xff]  ;;  %v24_v8 = vld [vmem:[%s452_s0 + $0x48] sm:$0xff]  ;;  %v305_v11 = vld [vmem:[%s451_s1 + $0x10] sm:$0xff]  }
   0x4   :  { %254 = vmatprep.subr.bf16.mxu0 %v301_v1  ;;  %285 = vmatprep.subr.bf16.mxu1 %v301_v1  ;;  %v23_v6 = vld [vmem:[%s452_s0 + $0x40] sm:$0xff]  ;;  %v31_v7 = vpack.c.bf16 %v16_v5, %v15_v4  ;;  %v306_v12 = vld [vmem:[%s451_s1 + $0x8] sm:$0xff]   ;;  %v17_v14 = vld [vmem:[%s452_s0 + $0x10] sm:$0xff] }
   0x5   :  { %v35_v9 = vpack.c.bf16 %v24_v8, %v23_v6  ;;  %v307_v13 = vld [vmem:[%s451_s1] sm:$0xff]   ;;  %v18_v15 = vld [vmem:[%s452_s0 + $0x18] sm:$0xff]  ;;  %v25_v16 = vld [vmem:[%s452_s0 + $0x50] sm:$0xff] }
   0x6   :  { %268 = vmatprep.mubr.bf16.mxu0 %v31_v7  ;;  %v26_v17 = vld [vmem:[%s452_s0 + $0x58] sm:$0xff]  ;;  %v19_v18 = vld [vmem:[%s452_s0 + $0x20] sm:$0xff]  ;;  %v20_v19 = vld [vmem:[%s452_s0 + $0x28] sm:$0xff]  ;;  %v32_v22 = vpack.c.bf16 %v18_v15, %v17_v14 }
   0x7   :  { %255 = vmatpush3.bf16.msra.mxu0 %v301_v1  ;;  %293 = vmatpush3.bf16.msra.mxu1 %v301_v1  ;;  %v27_v20 = vld [vmem:[%s452_s0 + $0x60] sm:$0xff]  ;;  %v28_v21 = vld [vmem:[%s452_s0 + $0x68] sm:$0xff]  ;;  %v36_v23 = vpack.c.bf16 %v26_v17, %v25_v16  ;;  %v33_v24 = vpack.c.bf16 %v20_v19, %v19_v18  ;;  %v21_v26 = vld [vmem:[%s452_s0 + $0x30] sm:$0xff] }
   0x8   :  { %256 = vmatprep.subr.bf16.mxu0 %v302_v2  ;;  %286 = vmatprep.subr.bf16.mxu1 %v302_v2  ;;  %v37_v25 = vpack.c.bf16 %v28_v21, %v27_v20  ;;  %v22_v27 = vld [vmem:[%s452_s0 + $0x38] sm:$0xff]  ;;  %v29_v28 = vld [vmem:[%s452_s0 + $0x70] sm:$0xff]  ;;  %v227_v32 = vld [vmem:[%s453_s2] ss:$0 sm:$0xff] }
   0x9   :  { %276 = vmatprep.mubr.bf16.mxu1 %v35_v9  ;;  %v30_v29 = vld [vmem:[%s452_s0 + $0x78] sm:$0xff]  ;;  %v34_v30 = vpack.c.bf16 %v22_v27, %v21_v26 }
   0xa   :  { %v38_v31 = vpack.c.bf16 %v30_v29, %v29_v28 }
   0xb   :  { %257 = vmatpush3.bf16.msra.mxu0 %v302_v2  ;;  %294 = vmatpush3.bf16.msra.mxu1 %v302_v2 }
   0xc   :  { %258 = vmatprep.subr.bf16.mxu0 %v303_v3  ;;  %287 = vmatprep.subr.bf16.mxu1 %v303_v3 }
   0xf   :  { %259 = vmatpush3.bf16.msra.mxu0 %v303_v3  ;;  %295 = vmatpush3.bf16.msra.mxu1 %v303_v3 }
  0x10   :  { %260 = vmatprep.subr.bf16.mxu0 %v304_v10  ;;  %288 = vmatprep.subr.bf16.mxu1 %v304_v10 }
  0x13   :  { %261 = vmatpush3.bf16.msra.mxu0 %v304_v10  ;;  %296 = vmatpush3.bf16.msra.mxu1 %v304_v10 }
  0x14   :  { %262 = vmatprep.subr.bf16.mxu0 %v305_v11  ;;  %289 = vmatprep.subr.bf16.mxu1 %v305_v11 }
  0x17   :  { %263 = vmatpush3.bf16.msra.mxu0 %v305_v11  ;;  %297 = vmatpush3.bf16.msra.mxu1 %v305_v11 }
  0x18   :  { %264 = vmatprep.subr.bf16.mxu0 %v306_v12  ;;  %290 = vmatprep.subr.bf16.mxu1 %v306_v12 }
  0x1b   :  { %265 = vmatpush3.bf16.msra.mxu0 %v306_v12  ;;  %298 = vmatpush3.bf16.msra.mxu1 %v306_v12 }
  0x1c   :  { %266 = vmatprep.subr.bf16.mxu0 %v307_v13  ;;  %291 = vmatprep.subr.bf16.mxu1 %v307_v13 }
  0x1f   :  { %267 = vmatpush3.bf16.msra.mxu0 %v307_v13  ;;  %299 = vmatpush3.bf16.msra.mxu1 %v307_v13 }
  0x22   :  { %269 = vmatmul.mubr.bf16.vlgmr.msra.gmra.mxu0 %v32_v22  ;;  %277 = vmatmul.mubr.bf16.vlgmr.msra.gmra.mxu1 %v36_v23 }
  0x23   :  { %272 = vmatprep.mubr.bf16.mxu0 %v33_v24  ;;  %280 = vmatprep.mubr.bf16.mxu1 %v37_v25 }
  0x2a   :  { %273 = vmatmul.mubr.bf16.gmra.mxu0 %v34_v30  ;;  %281 = vmatmul.mubr.bf16.gmra.mxu1 %v38_v31 }
  0xe2   :  { %v270_v33 = vpop.f32.mrf.mxu0  ;;  %v278_v34 = vpop.f32.mrf.mxu1 }
  0xe3   :  { %v153_v35 = vadd.f32 %v270_v33, %v227_v32  ;;  %v185_v36 = vadd.f32 %v278_v34, %v227_v32 }
  0xe4   :  { %v144_v37 = vpop.f32.mrf.mxu0  ;;  %v176_v38 = vpop.f32.mrf.mxu1 }
  0xe5   :  { %209 = vst [vmem:[%s454_s3 + $0x10] sm:$0xff] %v153_v35  ;;  %217 = vst [vmem:[%s454_s3 + $0x50] sm:$0xff] %v185_v36  ;;  %v145_v39 = vadd.f32 %v227_v32, %v144_v37  ;;  %v177_v40 = vadd.f32 %v227_v32, %v176_v38 }
  0xe6   :  { %v271_v41 = vpop.f32.mrf.mxu0  ;;  %v279_v42 = vpop.f32.mrf.mxu1 }
  0xe7   :  { %207 = vst [vmem:[%s454_s3] sm:$0xff] %v145_v39  ;;  %215 = vst [vmem:[%s454_s3 + $0x40] sm:$0xff] %v177_v40  ;;  %v156_v43 = vadd.f32 %v271_v41, %v227_v32  ;;  %v188_v44 = vadd.f32 %v279_v42, %v227_v32 }
  0xe8   :  { %v147_v45 = vpop.f32.mrf.mxu0  ;;  %v179_v46 = vpop.f32.mrf.mxu1 }
  0xe9   :  { %210 = vst [vmem:[%s454_s3 + $0x18] sm:$0xff] %v156_v43  ;;  %218 = vst [vmem:[%s454_s3 + $0x58] sm:$0xff] %v188_v44  ;;  %v148_v47 = vadd.f32 %v227_v32, %v147_v45  ;;  %v180_v48 = vadd.f32 %v227_v32, %v179_v46 }
  0xea   :  { %v274_v49 = vpop.f32.mrf.mxu0  ;;  %v282_v50 = vpop.f32.mrf.mxu1 }
  0xeb   :  { %208 = vst [vmem:[%s454_s3 + $0x8] sm:$0xff] %v148_v47  ;;  %216 = vst [vmem:[%s454_s3 + $0x48] sm:$0xff] %v180_v48  ;;  %v169_v51 = vadd.f32 %v274_v49, %v227_v32  ;;  %v201_v52 = vadd.f32 %v282_v50, %v227_v32 }
  0xec   :  { %v160_v53 = vpop.f32.mrf.mxu0  ;;  %v192_v54 = vpop.f32.mrf.mxu1 }
  0xed   :  { %213 = vst [vmem:[%s454_s3 + $0x30] sm:$0xff] %v169_v51  ;;  %221 = vst [vmem:[%s454_s3 + $0x70] sm:$0xff] %v201_v52  ;;  %v161_v55 = vadd.f32 %v227_v32, %v160_v53  ;;  %v193_v56 = vadd.f32 %v227_v32, %v192_v54 }
  0xee   :  { %v275_v57 = vpop.f32.mrf.mxu0  ;;  %v283_v58 = vpop.f32.mrf.mxu1 }
  0xef   :  { %211 = vst [vmem:[%s454_s3 + $0x20] sm:$0xff] %v161_v55  ;;  %219 = vst [vmem:[%s454_s3 + $0x60] sm:$0xff] %v193_v56  ;;  %v172_v59 = vadd.f32 %v275_v57, %v227_v32  ;;  %v204_v60 = vadd.f32 %v283_v58, %v227_v32 }
  0xf0   :  { %v163_v61 = vpop.f32.mrf.mxu0  ;;  %v195_v62 = vpop.f32.mrf.mxu1 }
  0xf1   :  { %214 = vst [vmem:[%s454_s3 + $0x38] sm:$0xff] %v172_v59  ;;  %222 = vst [vmem:[%s454_s3 + $0x78] sm:$0xff] %v204_v60  ;;  %v164_v63 = vadd.f32 %v227_v32, %v163_v61  ;;  %v196_v0 = vadd.f32 %v227_v32, %v195_v62 }
  0xf3   :  { %212 = vst [vmem:[%s454_s3 + $0x28] sm:$0xff] %v164_v63  ;;  %220 = vst [vmem:[%s454_s3 + $0x68] sm:$0xff] %v196_v0 }

// kernel: forward.51
= control target key start
LH: loop header
LB: loop body
LE: loop exit
PB: predicated region body
PF: predicated region fallthrough
CT: control target
= control target key end

     0   :  { %v181_v0 = vmov 0.0   ;;  %vm182_vm0 = vmmov 0   ;;  %s236_s1 = inlined_call_operand.vmem [shape: bf16[128,128], index: 1, kind: input, shape index: {}]   ;;  %s237_s0 = inlined_call_operand.vmem [shape: f32[8,128], index: 0, kind: input, shape index: {}]   ;;  %s238_s2 = inlined_call_operand.vmem [shape: f32[1,128], index: 2, kind: input, shape index: {}]   ;;  %s239_s3 = inlined_call_operand.vmem [shape: f32[8,128], index: 3, kind: output, shape index: {}]  }
   0x1   :  { %151 = vmatprep.subr.bf16.mxu0 %v181_v0  ;;  %v173_v1 = vld [vmem:[%s236_s1 + $0x38] sm:$0xff]   ;;  %167 = vmatprep.mubr.msk.bf16.mxu0 %vm182_vm0, %v181_v0  ;;  %v174_v2 = vld [vmem:[%s236_s1 + $0x30] sm:$0xff]   ;;  %v175_v3 = vld [vmem:[%s236_s1 + $0x28] sm:$0xff]  }
   0x2   :  { %152 = vmatpush3.bf16.msra.mxu0 %v173_v1  ;;  %v176_v4 = vld [vmem:[%s236_s1 + $0x20] sm:$0xff]   ;;  %v177_v5 = vld [vmem:[%s236_s1 + $0x18] sm:$0xff]   ;;  %v178_v6 = vld [vmem:[%s236_s1 + $0x10] sm:$0xff]  }
   0x3   :  { %153 = vmatprep.subr.bf16.mxu0 %v181_v0  ;;  %v179_v7 = vld [vmem:[%s236_s1 + $0x8] sm:$0xff]   ;;  %v180_v8 = vld [vmem:[%s236_s1] sm:$0xff]  }
   0x4   :  { %v15_v9 = vld [vmem:[%s237_s0] sm:$0xff] }
   0x5   :  { %v16_v10 = vpack.c.bf16 %v15_v9, %v15_v9  ;;  %v133_v11 = vld [vmem:[%s238_s2] ss:$0 sm:$0xff] }
   0x6   :  { %154 = vmatpush3.bf16.msra.mxu0 %v174_v2 }
   0x7   :  { %155 = vmatprep.subr.bf16.mxu0 %v181_v0 }
   0xa   :  { %156 = vmatpush3.bf16.msra.mxu0 %v175_v3 }
   0xb   :  { %157 = vmatprep.subr.bf16.mxu0 %v181_v0 }
   0xe   :  { %158 = vmatpush3.bf16.msra.mxu0 %v176_v4 }
   0xf   :  { %159 = vmatprep.subr.bf16.mxu0 %v181_v0 }
  0x12   :  { %160 = vmatpush3.bf16.msra.mxu0 %v177_v5 }
  0x13   :  { %161 = vmatprep.subr.bf16.mxu0 %v181_v0 }
  0x16   :  { %162 = vmatpush3.bf16.msra.mxu0 %v178_v6 }
  0x17   :  { %163 = vmatprep.subr.bf16.mxu0 %v181_v0 }
  0x1a   :  { %164 = vmatpush3.bf16.msra.mxu0 %v179_v7 }
  0x1b   :  { %165 = vmatprep.subr.bf16.mxu0 %v181_v0 }
  0x1e   :  { %166 = vmatpush3.bf16.msra.mxu0 %v180_v8 }
  0x21   :  { %168 = vmatmul.mubr.bf16.vlgmr.msra.gmra.mxu0 %v16_v10 }
  0xe1   :  { %v122_v12 = vpop.f32.mrf.mxu0 }
  0xe2   :  { %v123_v13 = vadd.f32 %v133_v11, %v122_v12 }
  0xe3   :  { %v169_v14 = vpop.f32.mrf.mxu0 }
  0xe4   :  { %128 = vst [vmem:[%s239_s3] sm:$0xff] %v123_v13 }
  0xe5   :  { %v125_v15 = vpop.f32.mrf.mxu0 }
  0xe7   :  { %v170_v16 = vpop.f32.mrf.mxu0 }

// kernel: forward.52
= control target key start
LH: loop header
LB: loop body
LE: loop exit
PB: predicated region body
PF: predicated region fallthrough
CT: control target
= control target key end

     0   :  { %v1245_v44 = vmov 0   ;;  %s2145_s0 = inlined_call_operand.vmem [shape: f32[128,128], index: 0, kind: input, shape index: {}]   ;;  %s2146_s1 = inlined_call_operand.vmem [shape: bf16[128,768], index: 1, kind: input, shape index: {}]   ;;  %s2147_s3 = inlined_call_operand.vmem [shape: f32[1,128], index: 3, kind: input, shape index: {}]   ;;  %s2148_s4 = inlined_call_operand.vmem [shape: f32[1,128], index: 4, kind: input, shape index: {}]   ;;  %s2149_s2 = inlined_call_operand.vmem [shape: f32[1,768], index: 2, kind: input, shape index: {}]   ;;  %s2150_s5 = inlined_call_operand.vmem [shape: f32[128,768], index: 5, kind: output, shape index: {}]  }
   0x1   :  { %v1279_v0 = vld [vmem:[%s2145_s0 + $0x40] sm:$0xff]  ;;  %v1291_v2 = vld [vmem:[%s2145_s0 + $0x48] sm:$0xff]  ;;  %v1311_v8 = vld [vmem:[%s2145_s0 + $0x18] sm:$0xff]  ;;  %667 = vmatprep.mubr.bf16.mxu0 %v1245_v44  ;;  %707 = vmatprep.mubr.bf16.mxu1 %v1245_v44 }
   0x2   :  { %v1284_v1 = vld [vmem:[%s2145_s0] sm:$0xff]  ;;  %55 = vadd.xlane.f32.xlu1 %v1279_v0  ;;  %v1296_v3 = vld [vmem:[%s2145_s0 + $0x8] sm:$0xff]  ;;  %v96_v6 = vmul.f32 %v1291_v2, %v1291_v2  ;;  %v95_v7 = vmul.f32 %v1279_v0, %v1279_v0  ;;  %v1316_v9 = vld [vmem:[%s2145_s0 + $0x10] sm:$0xff]  ;;  %v90_v15 = vmul.f32 %v1311_v8, %v1311_v8 }
   0x3   :  { %39 = vadd.xlane.f32.xlu0 %v1284_v1  ;;  %v88_v4 = vmul.f32 %v1296_v3, %v1296_v3  ;;  %v87_v5 = vmul.f32 %v1284_v1, %v1284_v1  ;;  %v1141_v10 = vld [vmem:[%s2146_s1 + $0x154] ss:$24 sps:$4 sm:$0xff]   ;;  %v1324_v11 = vld [vmem:[%s2145_s0 + $0x58] sm:$0xff]  ;;  %v1143_v13 = vld [vmem:[%s2146_s1 + $0x150] ss:$24 sps:$4 sm:$0xff]   ;;  %v89_v16 = vmul.f32 %v1316_v9, %v1316_v9 }
   0x4   :  { %v1329_v12 = vld [vmem:[%s2145_s0 + $0x50] sm:$0xff]  ;;  %635 = vmatprep.subr.bf16.mxu0 %v1141_v10  ;;  %1124 = vmatprep.subr.bf16.mxu1 %v1141_v10  ;;  %v1144_v14 = vld [vmem:[%s2146_s1 + $0x124] ss:$24 sps:$4 sm:$0xff]   ;;  %v1146_v17 = vld [vmem:[%s2146_s1 + $0x120] ss:$24 sps:$4 sm:$0xff]   ;;  %v98_v19 = vmul.f32 %v1324_v11, %v1324_v11 }
   0x5   :  { %636 = vmatpush1.bf16.msra.mxu0 %v1143_v13  ;;  %1132 = vmatpush1.bf16.msra.mxu1 %v1143_v13  ;;  %v1147_v18 = vld [vmem:[%s2146_s1 + $0xf4] ss:$24 sps:$4 sm:$0xff]   ;;  %v97_v20 = vmul.f32 %v1329_v12, %v1329_v12  ;;  %v1149_v21 = vld [vmem:[%s2146_s1 + $0xf0] ss:$24 sps:$4 sm:$0xff]   ;;  %v1366_v23 = vld [vmem:[%s2145_s0 + $0x20] sm:$0xff] }
   0x6   :  { %57 = vadd.xlane.f32.xlu1 %v1291_v2  ;;  %637 = vmatprep.subr.bf16.mxu0 %v1144_v14  ;;  %v1361_v22 = vld [vmem:[%s2145_s0 + $0x28] sm:$0xff]  ;;  %v1150_v24 = vld [vmem:[%s2146_s1 + $0xc4] ss:$24 sps:$4 sm:$0xff]   ;;  %v1152_v25 = vld [vmem:[%s2146_s1 + $0xc0] ss:$24 sps:$4 sm:$0xff]   ;;  %v91_v32 = vmul.f32 %v1366_v23, %v1366_v23 }
   0x7   :  { %41 = vadd.xlane.f32.xlu0 %v1296_v3  ;;  %1125 = vmatprep.subr.bf16.mxu1 %v1144_v14  ;;  %v1153_v26 = vld [vmem:[%s2146_s1 + $0x94] ss:$24 sps:$4 sm:$0xff]   ;;  %v1155_v27 = vld [vmem:[%s2146_s1 + $0x90] ss:$24 sps:$4 sm:$0xff]   ;;  %v1390_v29 = vld [vmem:[%s2145_s0 + $0x60] sm:$0xff]  ;;  %v92_v31 = vmul.f32 %v1361_v22, %v1361_v22 }
   0x8   :  { %v1385_v28 = vld [vmem:[%s2145_s0 + $0x68] sm:$0xff]  ;;  %v1156_v30 = vld [vmem:[%s2146_s1 + $0x64] ss:$24 sps:$4 sm:$0xff]   ;;  %v1158_v33 = vld [vmem:[%s2146_s1 + $0x60] ss:$24 sps:$4 sm:$0xff]   ;;  %v99_v36 = vmul.f32 %v1390_v29, %v1390_v29 }
   0x9   :  { %638 = vmatpush1.bf16.msra.mxu0 %v1146_v17  ;;  %1133 = vmatpush1.bf16.msra.mxu1 %v1146_v17  ;;  %v1159_v34 = vld [vmem:[%s2146_s1 + $0x34] ss:$24 sps:$4 sm:$0xff]   ;;  %v100_v35 = vmul.f32 %v1385_v28, %v1385_v28  ;;  %v1161_v37 = vld [vmem:[%s2146_s1 + $0x30] ss:$24 sps:$4 sm:$0xff]   ;;  %v1162_v38 = vld [vmem:[%s2146_s1 + $0x4] ss:$24 sps:$4 sm:$0xff]  }
   0xa   :  { %105 = vadd.xlane.f32.xlu1 %v88_v4  ;;  %639 = vmatprep.subr.bf16.mxu0 %v1147_v18  ;;  %v1164_v39 = vld [vmem:[%s2146_s1] ss:$24 sps:$4 sm:$0xff]   ;;  %v1428_v41 = vld [vmem:[%s2145_s0 + $0x30] sm:$0xff]  ;;  %v1167_v49 = vld [vmem:[%s2146_s1 + $0x164] ss:$24 sps:$4 sm:$0xff]  }
   0xb   :  { %103 = vadd.xlane.f32.xlu0 %v87_v5  ;;  %1126 = vmatprep.subr.bf16.mxu1 %v1147_v18  ;;  %v1423_v40 = vld [vmem:[%s2145_s0 + $0x38] sm:$0xff]  ;;  %v1440_v43 = vld [vmem:[%s2145_s0 + $0x70] sm:$0xff]  ;;  %v93_v46 = vmul.f32 %v1428_v41, %v1428_v41 }
   0xc   :  { %v1435_v42 = vld [vmem:[%s2145_s0 + $0x78] sm:$0xff]  ;;  %v94_v45 = vmul.f32 %v1423_v40, %v1423_v40  ;;  %v101_v48 = vmul.f32 %v1440_v43, %v1440_v43 }
   0xd   :  { %640 = vmatpush1.bf16.msra.mxu0 %v1149_v21  ;;  %1134 = vmatpush1.bf16.msra.mxu1 %v1149_v21  ;;  %v102_v47 = vmul.f32 %v1435_v42, %v1435_v42  ;;  %v1170_v50 = vld [vmem:[%s2146_s1 + $0x15c] ss:$24 sps:$4 sm:$0xff]  }
   0xe   :  { %121 = vadd.xlane.f32.xlu1 %v96_v6  ;;  %641 = vmatprep.subr.bf16.mxu0 %v1150_v24 }
   0xf   :  { %119 = vadd.xlane.f32.xlu0 %v95_v7  ;;  %1127 = vmatprep.subr.bf16.mxu1 %v1150_v24 }
  0x11   :  { %642 = vmatpush1.bf16.msra.mxu0 %v1152_v25  ;;  %1135 = vmatpush1.bf16.msra.mxu1 %v1152_v25 }
  0x12   :  { %45 = vadd.xlane.f32.xlu1 %v1311_v8  ;;  %643 = vmatprep.subr.bf16.mxu0 %v1153_v26 }
  0x13   :  { %43 = vadd.xlane.f32.xlu0 %v1316_v9  ;;  %1128 = vmatprep.subr.bf16.mxu1 %v1153_v26 }
  0x15   :  { %644 = vmatpush1.bf16.msra.mxu0 %v1155_v27  ;;  %1136 = vmatpush1.bf16.msra.mxu1 %v1155_v27 }
  0x16   :  { %61 = vadd.xlane.f32.xlu1 %v1324_v11  ;;  %645 = vmatprep.subr.bf16.mxu0 %v1156_v30 }
  0x17   :  { %59 = vadd.xlane.f32.xlu0 %v1329_v12  ;;  %1129 = vmatprep.subr.bf16.mxu1 %v1156_v30 }
  0x19   :  { %646 = vmatpush1.bf16.msra.mxu0 %v1158_v33  ;;  %1137 = vmatpush1.bf16.msra.mxu1 %v1158_v33 }
  0x1a   :  { %109 = vadd.xlane.f32.xlu1 %v90_v15  ;;  %647 = vmatprep.subr.bf16.mxu0 %v1159_v34 }
  0x1b   :  { %107 = vadd.xlane.f32.xlu0 %v89_v16  ;;  %1130 = vmatprep.subr.bf16.mxu1 %v1159_v34 }
  0x1d   :  { %648 = vmatpush1.bf16.msra.mxu0 %v1161_v37  ;;  %1138 = vmatpush1.bf16.msra.mxu1 %v1161_v37 }
  0x1e   :  { %125 = vadd.xlane.f32.xlu1 %v98_v19  ;;  %649 = vmatprep.subr.bf16.mxu0 %v1162_v38 }
  0x1f   :  { %123 = vadd.xlane.f32.xlu0 %v97_v20  ;;  %1131 = vmatprep.subr.bf16.mxu1 %v1162_v38 }
  0x21   :  { %650 = vmatpush1.bf16.msra.mxu0 %v1164_v39  ;;  %1139 = vmatpush1.bf16.msra.mxu1 %v1164_v39 }
  0x22   :  { %49 = vadd.xlane.f32.xlu1 %v1361_v22  ;;  %861 = vmatprep.subr.bf16.mxu0 %v1167_v49 }
  0x23   :  { %47 = vadd.xlane.f32.xlu0 %v1366_v23  ;;  %748 = vmatprep.subr.bf16.mxu1 %v1170_v50 }
  0x26   :  { %65 = vadd.xlane.f32.xlu1 %v1385_v28 }
  0x27   :  { %63 = vadd.xlane.f32.xlu0 %v1390_v29 }
  0x2a   :  { %113 = vadd.xlane.f32.xlu1 %v92_v31 }
  0x2b   :  { %111 = vadd.xlane.f32.xlu0 %v91_v32 }
  0x2e   :  { %129 = vadd.xlane.f32.xlu1 %v100_v35 }
  0x2f   :  { %127 = vadd.xlane.f32.xlu0 %v99_v36 }
  0x32   :  { %53 = vadd.xlane.f32.xlu1 %v1423_v40 }
  0x33   :  { %51 = vadd.xlane.f32.xlu0 %v1428_v41 }
  0x36   :  { %69 = vadd.xlane.f32.xlu1 %v1435_v42 }
  0x37   :  { %67 = vadd.xlane.f32.xlu0 %v1440_v43 }
  0x3a   :  { %117 = vadd.xlane.f32.xlu1 %v94_v45 }
  0x3b   :  { %115 = vadd.xlane.f32.xlu0 %v93_v46 }
  0x3e   :  { %133 = vadd.xlane.f32.xlu1 %v102_v47 }
  0x3f   :  { %131 = vadd.xlane.f32.xlu0 %v101_v48 }
  0x8b   :  { %v56_v51 = vpop.xlane.xlu1 %55 }
  0x8c   :  { %v40_v52 = vpop.xlane.xlu0 %39  ;;  %v1464_v57 = vmul.f32 0.125, %v56_v51 }
  0x8d   :  { %v1460_v55 = vmul.f32 0.125, %v40_v52 }
  0x8e   :  { %v159_v7 = vmul.f32 %v1464_v57, %v1464_v57 }
  0x8f   :  { %v58_v53 = vpop.xlane.xlu1 %57  ;;  %v151_v61 = vmul.f32 %v1460_v55, %v1460_v55 }
  0x90   :  { %v42_v54 = vpop.xlane.xlu0 %41  ;;  %v1466_v58 = vmul.f32 0.125, %v58_v53 }
  0x91   :  { %v1462_v56 = vmul.f32 0.125, %v42_v54 }
  0x92   :  { %v160_v10 = vmul.f32 %v1466_v58, %v1466_v58 }
  0x93   :  { %v106_v59 = vpop.xlane.xlu1 %105  ;;  %v152_v62 = vmul.f32 %v1462_v56, %v1462_v56 }
  0x94   :  { %v104_v60 = vpop.xlane.xlu0 %103  ;;  %v136_v63 = vmul.f32 0.125, %v106_v59 }
  0x95   :  { %v135_v4 = vmul.f32 0.125, %v104_v60 }
  0x96   :  { %v168_v5 = vsub.f32 %v136_v63, %v152_v62 }
  0x97   :  { %v167_v6 = vsub.f32 %v135_v4, %v151_v61  ;;  %v122_v13 = vpop.xlane.xlu1 %121 }
  0x98   :  { %v120_v14 = vpop.xlane.xlu0 %119  ;;  %v184_v15 = vmax.f32 %v168_v5, 0.0  ;;  %v144_v17 = vmul.f32 0.125, %v122_v13  ;;  %v199_v5 = vsub.f32 %v1284_v1, %v1460_v55 }
  0x99   :  { %v183_v16 = vmax.f32 %v167_v6, 0.0  ;;  %v143_v18 = vmul.f32 0.125, %v120_v14  ;;  %v200_v6 = vsub.f32 %v1296_v3, %v1462_v56  ;;  %v1504_v3 = vld [vmem:[%s2148_s4] ss:$0 sm:$0xff] }
  0x9a   :  { %v216_v19 = vadd.f32 1e-05, %v184_v15  ;;  %v176_v21 = vsub.f32 %v144_v17, %v160_v10 }
  0x9b   :  { %v215_v20 = vadd.f32 1e-05, %v183_v16  ;;  %v175_v24 = vsub.f32 %v143_v18, %v159_v7  ;;  %v46_v25 = vpop.xlane.xlu1 %45  ;;  %v1499_v16 = vld [vmem:[%s2147_s3] ss:$0 sm:$0xff] }
  0x9c   :  { %v44_v26 = vpop.xlane.xlu0 %43  ;;  %1213 = vrsqrt.f32 %v216_v19  ;;  %v192_v27 = vmax.f32 %v176_v21, 0.0  ;;  %v1476_v35 = vmul.f32 0.125, %v46_v25 }
  0x9d   :  { %v191_v30 = vmax.f32 %v175_v24, 0.0  ;;  %1215 = vrsqrt.f32 %v215_v20  ;;  %v1478_v36 = vmul.f32 0.125, %v44_v26  ;;  %v207_v26 = vsub.f32 %v1279_v0, %v1464_v57  ;;  %v1165_v0 = vld [vmem:[%s2146_s1 + $0x160] ss:$24 sps:$4 sm:$0xff]  }
  0x9e   :  { %v224_v31 = vadd.f32 1e-05, %v192_v27  ;;  %v154_v46 = vmul.f32 %v1476_v35, %v1476_v35 }
  0x9f   :  { %v223_v32 = vadd.f32 1e-05, %v191_v30  ;;  %v62_v33 = vpop.xlane.xlu1 %61  ;;  %v153_v47 = vmul.f32 %v1478_v36, %v1478_v36 }
  0xa0   :  { %v60_v34 = vpop.xlane.xlu0 %59  ;;  %1217 = vrsqrt.f32 %v224_v31  ;;  %v1480_v37 = vmul.f32 0.125, %v62_v33  ;;  %v208_v31 = vsub.f32 %v1291_v2, %v1466_v58  ;;  %v1173_v58 = vld [vmem:[%s2146_s1 + $0x134] ss:$24 sps:$4 sm:$0xff]  }
  0xa1   :  { %1219 = vrsqrt.f32 %v223_v32  ;;  %v1482_v38 = vmul.f32 0.125, %v60_v34 }
  0xa2   :  { %v162_v52 = vmul.f32 %v1480_v37, %v1480_v37 }
  0xa3   :  { %v110_v39 = vpop.xlane.xlu1 %109  ;;  %v161_v53 = vmul.f32 %v1482_v38, %v1482_v38 }
  0xa4   :  { %v108_v45 = vpop.xlane.xlu0 %107  ;;  %v138_v48 = vmul.f32 0.125, %v110_v39 }
  0xa5   :  { %v137_v49 = vmul.f32 0.125, %v108_v45 }
  0xa6   :  { %v170_v50 = vsub.f32 %v138_v48, %v154_v46 }
  0xa7   :  { %v169_v51 = vsub.f32 %v137_v49, %v153_v47  ;;  %v126_v54 = vpop.xlane.xlu1 %125 }
  0xa8   :  { %v124_v59 = vpop.xlane.xlu0 %123  ;;  %v186_v60 = vmax.f32 %v170_v50, 0.0  ;;  %v146_v62 = vmul.f32 0.125, %v126_v54 }
  0xa9   :  { %v185_v61 = vmax.f32 %v169_v51, 0.0  ;;  %v145_v63 = vmul.f32 0.125, %v124_v59  ;;  %v1214_v4 = vpop.eup %1213 }
  0xaa   :  { %v1216_v7 = vpop.eup %1215  ;;  %v218_v10 = vadd.f32 1e-05, %v186_v60  ;;  %v178_v14 = vsub.f32 %v146_v62, %v162_v52  ;;  %v248_v20 = vmul.f32 %v1214_v4, %v200_v6  ;;  %v1171_v62 = vld [vmem:[%s2146_s1 + $0x130] ss:$24 sps:$4 sm:$0xff]  }
  0xab   :  { %v217_v13 = vadd.f32 1e-05, %v185_v61  ;;  %v177_v15 = vsub.f32 %v145_v63, %v161_v53  ;;  %v50_v17 = vpop.xlane.xlu1 %49  ;;  %v247_v19 = vmul.f32 %v1216_v7, %v199_v5  ;;  %v1179_v5 = vld [vmem:[%s2146_s1 + $0x104] ss:$24 sps:$4 sm:$0xff]  }
  0xac   :  { %v48_v18 = vpop.xlane.xlu0 %47  ;;  %1221 = vrsqrt.f32 %v218_v10  ;;  %v194_v21 = vmax.f32 %v178_v14, 0.0  ;;  %v270_v24 = vmul.f32 %v1499_v16, %v248_v20  ;;  %v1514_v45 = vmul.f32 0.125, %v50_v17  ;;  %v1168_v10 = vld [vmem:[%s2146_s1 + $0x158] ss:$24 sps:$4 sm:$0xff]  }
  0xad   :  { %v193_v1 = vmax.f32 %v177_v15, 0.0  ;;  %v1218_v55 = vpop.eup %1217  ;;  %1223 = vrsqrt.f32 %v217_v13  ;;  %v269_v56 = vmul.f32 %v1499_v16, %v247_v19  ;;  %v1516_v46 = vmul.f32 0.125, %v48_v18  ;;  %v1176_v19 = vld [vmem:[%s2146_s1 + $0x12c] ss:$24 sps:$4 sm:$0xff]  }
  0xae   :  { %v1220_v25 = vpop.eup %1219  ;;  %v226_v27 = vadd.f32 1e-05, %v194_v21  ;;  %v292_v39 = vadd.f32 %v1504_v3, %v270_v24  ;;  %v256_v2 = vmul.f32 %v1218_v55, %v208_v31  ;;  %v156_v54 = vmul.f32 %v1514_v45, %v1514_v45 }
  0xaf   :  { %v225_v30 = vadd.f32 1e-05, %v193_v1  ;;  %v66_v32 = vpop.xlane.xlu1 %65  ;;  %v291_v34 = vadd.f32 %v1504_v3, %v269_v56  ;;  %v255_v47 = vmul.f32 %v1220_v25, %v207_v26  ;;  %v155_v59 = vmul.f32 %v1516_v46, %v1516_v46  ;;  %v1177_v56 = vld [vmem:[%s2146_s1 + $0x100] ss:$24 sps:$4 sm:$0xff]  }
  0xb0   :  { %v64_v33 = vpop.xlane.xlu0 %63  ;;  %1225 = vrsqrt.f32 %v226_v27  ;;  %v1526_v48 = vmul.f32 0.125, %v66_v32  ;;  %v278_v53 = vmul.f32 %v1499_v16, %v256_v2  ;;  %v202_v25 = vsub.f32 %v1311_v8, %v1476_v35  ;;  %v1185_v27 = vld [vmem:[%s2146_s1 + $0xd4] ss:$24 sps:$4 sm:$0xff]   ;;  %v1174_v8 = vld [vmem:[%s2146_s1 + $0x128] ss:$24 sps:$4 sm:$0xff]  }
  0xb1   :  { %1227 = vrsqrt.f32 %v225_v30  ;;  %v1521_v57 = vpack.c.bf16 %v292_v39, %v291_v34  ;;  %v1528_v49 = vmul.f32 0.125, %v64_v33  ;;  %v277_v52 = vmul.f32 %v1499_v16, %v255_v47  ;;  %v1182_v47 = vld [vmem:[%s2146_s1 + $0xfc] ss:$24 sps:$4 sm:$0xff]  }
  0xb2   :  { %v300_v4 = vadd.f32 %v1504_v3, %v278_v53  ;;  %v164_v13 = vmul.f32 %v1526_v48, %v1526_v48  ;;  %v201_v26 = vsub.f32 %v1316_v9, %v1478_v36  ;;  %v1191_v53 = vld [vmem:[%s2146_s1 + $0xa4] ss:$24 sps:$4 sm:$0xff]  }
  0xb3   :  { %668 = vmatmul.mubr.bf16.vlgmr.msra.gmra.mxu0 %v1521_v57  ;;  %v114_v50 = vpop.xlane.xlu1 %113  ;;  %v299_v63 = vadd.f32 %v1504_v3, %v277_v52  ;;  %v163_v14 = vmul.f32 %v1528_v49, %v1528_v49 }
  0xb4   :  { %v112_v51 = vpop.xlane.xlu0 %111  ;;  %v140_v60 = vmul.f32 0.125, %v114_v50  ;;  %677 = vmatprep.mubr.bf16.mxu0 %v1245_v44  ;;  %862 = vmatpush1.bf16.msra.mxu0 %v1165_v0 }
  0xb5   :  { %v139_v61 = vmul.f32 0.125, %v112_v51  ;;  %863 = vmatprep.subr.bf16.mxu0 %v1173_v58  ;;  %v1553_v15 = vpack.c.bf16 %v300_v4, %v299_v63  ;;  %v1183_v58 = vld [vmem:[%s2146_s1 + $0xd0] ss:$24 sps:$4 sm:$0xff]   ;;  %v210_v63 = vsub.f32 %v1324_v11, %v1480_v37  ;;  %v1189_v11 = vld [vmem:[%s2146_s1 + $0xa0] ss:$24 sps:$4 sm:$0xff]  }
  0xb6   :  { %v172_v6 = vsub.f32 %v140_v60, %v156_v54 }
  0xb7   :  { %v171_v7 = vsub.f32 %v139_v61, %v155_v59  ;;  %v130_v17 = vpop.xlane.xlu1 %129  ;;  %708 = vmatmul.mubr.bf16.vlgmr.msra.gmra.mxu1 %v1553_v15  ;;  %v209_v59 = vsub.f32 %v1329_v12, %v1482_v38  ;;  %v1188_v12 = vld [vmem:[%s2146_s1 + $0xcc] ss:$24 sps:$4 sm:$0xff]  }
  0xb8   :  { %v128_v18 = vpop.xlane.xlu0 %127  ;;  %v188_v20 = vmax.f32 %v172_v6, 0.0  ;;  %v148_v1 = vmul.f32 0.125, %v130_v17  ;;  %864 = vmatpush1.bf16.msra.mxu0 %v1171_v62  ;;  %717 = vmatprep.mubr.bf16.mxu1 %v1245_v44  ;;  %v1180_v62 = vld [vmem:[%s2146_s1 + $0xf8] ss:$24 sps:$4 sm:$0xff]   ;;  %v1197_v17 = vld [vmem:[%s2146_s1 + $0x74] ss:$24 sps:$4 sm:$0xff]  }
  0xb9   :  { %v187_v21 = vmax.f32 %v171_v7, 0.0  ;;  %v147_v55 = vmul.f32 0.125, %v128_v18  ;;  %v1222_v24 = vpop.eup %1221  ;;  %865 = vmatprep.subr.bf16.mxu0 %v1179_v5  ;;  %749 = vmatpush1.bf16.msra.mxu1 %v1168_v10  ;;  %v1186_v18 = vld [vmem:[%s2146_s1 + $0xc8] ss:$24 sps:$4 sm:$0xff]  }
  0xba   :  { %v1224_v30 = vpop.eup %1223  ;;  %v220_v31 = vadd.f32 1e-05, %v188_v20  ;;  %v180_v33 = vsub.f32 %v148_v1, %v164_v13  ;;  %v250_v39 = vmul.f32 %v1222_v24, %v202_v25  ;;  %750 = vmatprep.subr.bf16.mxu1 %v1176_v19  ;;  %v1194_v24 = vld [vmem:[%s2146_s1 + $0x9c] ss:$24 sps:$4 sm:$0xff]  }
  0xbb   :  { %v219_v32 = vadd.f32 1e-05, %v187_v21  ;;  %v179_v34 = vsub.f32 %v147_v55, %v163_v14  ;;  %v54_v9 = vpop.xlane.xlu1 %53  ;;  %v249_v36 = vmul.f32 %v1224_v30, %v201_v26 }
  0xbc   :  { %v52_v35 = vpop.xlane.xlu0 %51  ;;  %1229 = vrsqrt.f32 %v220_v31  ;;  %v196_v0 = vmax.f32 %v180_v33, 0.0  ;;  %866 = vmatpush1.bf16.msra.mxu0 %v1177_v56  ;;  %v272_v52 = vmul.f32 %v1499_v16, %v250_v39  ;;  %v1596_v38 = vmul.f32 0.125, %v54_v9  ;;  %v1195_v31 = vld [vmem:[%s2146_s1 + $0x70] ss:$24 sps:$4 sm:$0xff]  }
  0xbd   :  { %v195_v2 = vmax.f32 %v179_v34, 0.0  ;;  %v1226_v50 = vpop.eup %1225  ;;  %1231 = vrsqrt.f32 %v219_v32  ;;  %v271_v51 = vmul.f32 %v1499_v16, %v249_v36  ;;  %867 = vmatprep.subr.bf16.mxu0 %v1185_v27  ;;  %751 = vmatpush1.bf16.msra.mxu1 %v1174_v8  ;;  %v1598_v10 = vmul.f32 0.125, %v52_v35  ;;  %v1203_v34 = vld [vmem:[%s2146_s1 + $0x44] ss:$24 sps:$4 sm:$0xff]   ;;  %v1192_v35 = vld [vmem:[%s2146_s1 + $0x98] ss:$24 sps:$4 sm:$0xff]  }
  0xbe   :  { %v1228_v54 = vpop.eup %1227  ;;  %v228_v60 = vadd.f32 1e-05, %v196_v0  ;;  %v294_v7 = vadd.f32 %v1504_v3, %v272_v52  ;;  %752 = vmatprep.subr.bf16.mxu1 %v1182_v47  ;;  %v258_v14 = vmul.f32 %v1226_v50, %v210_v63  ;;  %v158_v25 = vmul.f32 %v1596_v38, %v1596_v38 }
  0xbf   :  { %v227_v61 = vadd.f32 1e-05, %v195_v2  ;;  %v70_v4 = vpop.xlane.xlu1 %69  ;;  %v293_v6 = vadd.f32 %v1504_v3, %v271_v51  ;;  %v257_v13 = vmul.f32 %v1228_v54, %v209_v59  ;;  %v157_v26 = vmul.f32 %v1598_v10, %v1598_v10  ;;  %v1201_v54 = vld [vmem:[%s2146_s1 + $0x40] ss:$24 sps:$4 sm:$0xff]  }
  0xc0   :  { %v68_v5 = vpop.xlane.xlu0 %67  ;;  %1233 = vrsqrt.f32 %v228_v60  ;;  %868 = vmatpush1.bf16.msra.mxu0 %v1183_v58  ;;  %v1611_v19 = vmul.f32 0.125, %v70_v4  ;;  %v280_v56 = vmul.f32 %v1499_v16, %v258_v14  ;;  %v1200_v58 = vld [vmem:[%s2146_s1 + $0x6c] ss:$24 sps:$4 sm:$0xff]   ;;  %v204_v60 = vsub.f32 %v1361_v22, %v1514_v45  ;;  %v1198_v22 = vld [vmem:[%s2146_s1 + $0x68] ss:$24 sps:$4 sm:$0xff]  }
  0xc1   :  { %1235 = vrsqrt.f32 %v227_v61  ;;  %v1603_v37 = vpack.c.bf16 %v294_v7, %v293_v6  ;;  %869 = vmatprep.subr.bf16.mxu0 %v1191_v53  ;;  %753 = vmatpush1.bf16.msra.mxu1 %v1180_v62  ;;  %v1613_v20 = vmul.f32 0.125, %v68_v5  ;;  %v279_v55 = vmul.f32 %v1499_v16, %v257_v13  ;;  %v1209_v62 = vld [vmem:[%s2146_s1 + $0x14] ss:$24 sps:$4 sm:$0xff]   ;;  %v1207_v14 = vld [vmem:[%s2146_s1 + $0x10] ss:$24 sps:$4 sm:$0xff]  }
  0xc2   :  { %754 = vmatprep.subr.bf16.mxu1 %v1188_v12  ;;  %v302_v33 = vadd.f32 %v1504_v3, %v280_v56  ;;  %v166_v36 = vmul.f32 %v1611_v19, %v1611_v19  ;;  %v203_v61 = vsub.f32 %v1366_v23, %v1516_v46  ;;  %v1206_v46 = vld [vmem:[%s2146_s1 + $0x3c] ss:$24 sps:$4 sm:$0xff]   ;;  %v212_v12 = vsub.f32 %v1385_v28, %v1526_v48 }
  0xc3   :  { %678 = vmatmul.mubr.bf16.gmra.mxu0 %v1603_v37  ;;  %v118_v21 = vpop.xlane.xlu1 %117  ;;  %v301_v32 = vadd.f32 %v1504_v3, %v279_v55  ;;  %v165_v39 = vmul.f32 %v1613_v20, %v1613_v20 }
  0xc4   :  { %v116_v1 = vpop.xlane.xlu0 %115  ;;  %v142_v27 = vmul.f32 0.125, %v118_v21  ;;  %687 = vmatprep.mubr.bf16.mxu0 %v1245_v44  ;;  %870 = vmatpush1.bf16.msra.mxu0 %v1189_v11 }
  0xc5   :  { %v141_v30 = vmul.f32 0.125, %v116_v1  ;;  %871 = vmatprep.subr.bf16.mxu0 %v1197_v17  ;;  %755 = vmatpush1.bf16.msra.mxu1 %v1186_v18  ;;  %v1641_v47 = vpack.c.bf16 %v302_v33, %v301_v32  ;;  %v211_v18 = vsub.f32 %v1390_v29, %v1528_v49  ;;  %v1212_v49 = vld [vmem:[%s2146_s1 + $0xc] ss:$24 sps:$4 sm:$0xff]   ;;  %v1210_v33 = vld [vmem:[%s2146_s1 + $0x8] ss:$24 sps:$4 sm:$0xff]  }
  0xc6   :  { %v174_v8 = vsub.f32 %v142_v27, %v158_v25  ;;  %756 = vmatprep.subr.bf16.mxu1 %v1194_v24  ;;  %v1204_v24 = vld [vmem:[%s2146_s1 + $0x38] ss:$24 sps:$4 sm:$0xff]  }
  0xc7   :  { %v173_v9 = vsub.f32 %v141_v30, %v157_v26  ;;  %v134_v0 = vpop.xlane.xlu1 %133  ;;  %718 = vmatmul.mubr.bf16.gmra.mxu1 %v1641_v47 }
  0xc8   :  { %v132_v2 = vpop.xlane.xlu0 %131  ;;  %v190_v50 = vmax.f32 %v174_v8, 0.0  ;;  %v150_v52 = vmul.f32 0.125, %v134_v0  ;;  %872 = vmatpush1.bf16.msra.mxu0 %v1195_v31  ;;  %727 = vmatprep.mubr.bf16.mxu1 %v1245_v44 }
  0xc9   :  { %v189_v51 = vmax.f32 %v173_v9, 0.0  ;;  %v149_v53 = vmul.f32 0.125, %v132_v2  ;;  %v1230_v59 = vpop.eup %1229  ;;  %873 = vmatprep.subr.bf16.mxu0 %v1203_v34  ;;  %757 = vmatpush1.bf16.msra.mxu1 %v1192_v35  ;;  %v206_v9 = vsub.f32 %v1423_v40, %v1596_v38 }
  0xca   :  { %v1232_v63 = vpop.eup %1231  ;;  %v222_v4 = vadd.f32 1e-05, %v190_v50  ;;  %v182_v6 = vsub.f32 %v150_v52, %v166_v36  ;;  %v252_v45 = vmul.f32 %v1230_v59, %v204_v60  ;;  %758 = vmatprep.subr.bf16.mxu1 %v1200_v58  ;;  %v205_v36 = vsub.f32 %v1428_v41, %v1598_v10 }
  0xcb   :  { %v221_v5 = vadd.f32 1e-05, %v189_v51  ;;  %v181_v7 = vsub.f32 %v149_v53, %v165_v39  ;;  %v251_v23 = vmul.f32 %v1232_v63, %v203_v61  ;;  %v214_v58 = vsub.f32 %v1435_v42, %v1611_v19 }
  0xcc   :  { %1237 = vrsqrt.f32 %v222_v4  ;;  %v198_v13 = vmax.f32 %v182_v6, 0.0  ;;  %874 = vmatpush1.bf16.msra.mxu0 %v1201_v54  ;;  %v274_v1 = vmul.f32 %v1499_v16, %v252_v45  ;;  %v213_v52 = vsub.f32 %v1440_v43, %v1613_v20 }
  0xcd   :  { %v197_v11 = vmax.f32 %v181_v7, 0.0  ;;  %v1234_v17 = vpop.eup %1233  ;;  %1239 = vrsqrt.f32 %v221_v5  ;;  %v273_v21 = vmul.f32 %v1499_v16, %v251_v23  ;;  %875 = vmatprep.subr.bf16.mxu0 %v1209_v62  ;;  %759 = vmatpush1.bf16.msra.mxu1 %v1198_v22 }
  0xce   :  { %v1236_v55 = vpop.eup %1235  ;;  %v230_v28 = vadd.f32 1e-05, %v198_v13  ;;  %v260_v56 = vmul.f32 %v1234_v17, %v212_v12  ;;  %v296_v26 = vadd.f32 %v1504_v3, %v274_v1  ;;  %760 = vmatprep.subr.bf16.mxu1 %v1206_v46 }
  0xcf   :  { %v229_v48 = vadd.f32 1e-05, %v197_v11  ;;  %v295_v25 = vadd.f32 %v1504_v3, %v273_v21  ;;  %v259_v29 = vmul.f32 %v1236_v55, %v211_v18 }
  0xd0   :  { %1241 = vrsqrt.f32 %v230_v28  ;;  %v282_v27 = vmul.f32 %v1499_v16, %v260_v56  ;;  %876 = vmatpush1.bf16.msra.mxu0 %v1207_v14 }
  0xd1   :  { %1243 = vrsqrt.f32 %v229_v48  ;;  %v309_v30 = vpack.c.bf16 %v296_v26, %v295_v25  ;;  %v281_v31 = vmul.f32 %v1499_v16, %v259_v29  ;;  %761 = vmatpush1.bf16.msra.mxu1 %v1204_v24 }
  0xd2   :  { %v304_v32 = vadd.f32 %v1504_v3, %v282_v27  ;;  %762 = vmatprep.subr.bf16.mxu1 %v1212_v49 }
  0xd3   :  { %688 = vmatmul.mubr.bf16.gmra.mxu0 %v309_v30  ;;  %v303_v34 = vadd.f32 %v1504_v3, %v281_v31 }
  0xd4   :  { %697 = vmatprep.mubr.bf16.mxu0 %v1245_v44 }
  0xd5   :  { %v313_v8 = vpack.c.bf16 %v304_v32, %v303_v34  ;;  %763 = vmatpush1.bf16.msra.mxu1 %v1210_v33 }
  0xd7   :  { %728 = vmatmul.mubr.bf16.gmra.mxu1 %v313_v8 }
  0xd8   :  { %737 = vmatprep.mubr.bf16.mxu1 %v1245_v44 }
  0xd9   :  { %v1238_v35 = vpop.eup %1237 }
  0xda   :  { %v1240_v39 = vpop.eup %1239  ;;  %v254_v0 = vmul.f32 %v1238_v35, %v206_v9 }
  0xdb   :  { %v253_v2 = vmul.f32 %v1240_v39, %v205_v36 }
  0xdc   :  { %v276_v50 = vmul.f32 %v1499_v16, %v254_v0 }
  0xdd   :  { %v1242_v51 = vpop.eup %1241  ;;  %v275_v40 = vmul.f32 %v1499_v16, %v253_v2 }
  0xde   :  { %v1244_v38 = vpop.eup %1243  ;;  %v298_v53 = vadd.f32 %v1504_v3, %v276_v50  ;;  %v262_v54 = vmul.f32 %v1242_v51, %v214_v58 }
  0xdf   :  { %v297_v41 = vadd.f32 %v1504_v3, %v275_v40  ;;  %v261_v10 = vmul.f32 %v1244_v38, %v213_v52 }
  0xe0   :  { %v284_v59 = vmul.f32 %v1499_v16, %v262_v54 }
  0xe1   :  { %v310_v60 = vpack.c.bf16 %v298_v53, %v297_v41  ;;  %v283_v42 = vmul.f32 %v1499_v16, %v261_v10  ;;  %v365_v16 = vlaneseq }
  0xe2   :  { %v306_v19 = vadd.f32 %v1504_v3, %v284_v59 }
  0xe3   :  { %698 = vmatmul.mubr.bf16.gmra.mxu0 %v310_v60  ;;  %v305_v61 = vadd.f32 %v1504_v3, %v283_v42  ;;  %v1730_v3 = vshrl.u32 %v365_v16, 7 }
  0xe4   :  { %893 = vmatprep.mubr.bf16.mxu0 %v1245_v44 }
  0xe5   :  { %v314_v43 = vpack.c.bf16 %v306_v19, %v305_v61  ;;  %v383_v10 = vsub.s32 4, %v1730_v3  ;;  %v387_v42 = vsub.s32 5, %v1730_v3 }
  0xe7   :  { %738 = vmatmul.mubr.bf16.gmra.mxu1 %v314_v43 }
  0xe8   :  { %780 = vmatprep.mubr.bf16.mxu1 %v1245_v44 }
  0xeb   :  { %894 = vmatmul.mubr.bf16.vlgmr.msra.gmra.mxu0 %v1521_v57 }
  0xec   :  { %903 = vmatprep.mubr.bf16.mxu0 %v1245_v44 }
  0xef   :  { %781 = vmatmul.mubr.bf16.vlgmr.msra.gmra.mxu1 %v1521_v57  ;;  %v367_v57 = vsub.s32 0, %v1730_v3 }
  0xf0   :  { %790 = vmatprep.mubr.bf16.mxu1 %v1245_v44 }
  0xf3   :  { %904 = vmatmul.mubr.bf16.gmra.mxu0 %v1603_v37 }
  0xf4   :  { %913 = vmatprep.mubr.bf16.mxu0 %v1245_v44 }
  0xf7   :  { %791 = vmatmul.mubr.bf16.gmra.mxu1 %v1603_v37  ;;  %v371_v37 = vsub.s32 1, %v1730_v3 }
  0xf8   :  { %800 = vmatprep.mubr.bf16.mxu1 %v1245_v44 }
  0xfb   :  { %914 = vmatmul.mubr.bf16.gmra.mxu0 %v309_v30 }
  0xfc   :  { %923 = vmatprep.mubr.bf16.mxu0 %v1245_v44 }
  0xff   :  { %801 = vmatmul.mubr.bf16.gmra.mxu1 %v309_v30 }
 0x100   :  { %810 = vmatprep.mubr.bf16.mxu1 %v1245_v44 }
 0x103   :  { %924 = vmatmul.mubr.bf16.gmra.mxu0 %v310_v60 }
 0x104   :  { %933 = vmatprep.mubr.bf16.mxu0 %v1245_v44 }
 0x107   :  { %811 = vmatmul.mubr.bf16.gmra.mxu1 %v310_v60 }
 0x108   :  { %820 = vmatprep.mubr.bf16.mxu1 %v1245_v44 }
 0x10b   :  { %934 = vmatmul.mubr.bf16.gmra.mxu0 %v1553_v15 }
 0x10c   :  { %943 = vmatprep.mubr.bf16.mxu0 %v1245_v44 }
 0x10f   :  { %821 = vmatmul.mubr.bf16.gmra.mxu1 %v1553_v15  ;;  %v1736_v15 = vld [vmem:[%s2149_s2] sm:$0x3f] }
 0x110   :  { %830 = vmatprep.mubr.bf16.mxu1 %v1245_v44  ;;  %v1740_v20 = vrot.slane %v1736_v15, %v367_v57  ;;  %v1854_v57 = vrot.slane %v1736_v15, %v383_v10 }
 0x113   :  { %944 = vmatmul.mubr.bf16.gmra.mxu0 %v1641_v47 }
 0x114   :  { %953 = vmatprep.mubr.bf16.mxu0 %v1245_v44 }
 0x117   :  { %831 = vmatmul.mubr.bf16.gmra.mxu1 %v1641_v47  ;;  %v1743_v47 = vrot.slane %v1736_v15, %v371_v37  ;;  %v375_v37 = vsub.s32 2, %v1730_v3 }
 0x118   :  { %840 = vmatprep.mubr.bf16.mxu1 %v1245_v44 }
 0x11b   :  { %954 = vmatmul.mubr.bf16.gmra.mxu0 %v313_v8 }
 0x11c   :  { %963 = vmatprep.mubr.bf16.mxu0 %v1245_v44 }
 0x11f   :  { %841 = vmatmul.mubr.bf16.gmra.mxu1 %v313_v8 }
 0x120   :  { %850 = vmatprep.mubr.bf16.mxu1 %v1245_v44 }
 0x123   :  { %964 = vmatmul.mubr.bf16.gmra.mxu0 %v314_v43 }
 0x127   :  { %851 = vmatmul.mubr.bf16.gmra.mxu1 %v314_v43 }
 0x173   :  { %v669_v44 = vpop.f32.mrf.mxu0 }
 0x174   :  { %v670_v62 = vadd.f32 %v669_v44, %v1740_v20 }
 0x175   :  { %v671_v63 = vpop.f32.mrf.mxu0 }
 0x176   :  { %974 = vst [vmem:[%s2150_s5] sm:$0xff] %v670_v62  ;;  %v672_v4 = vadd.f32 %v671_v63, %v1743_v47 }
 0x177   :  { %v673_v5 = vpop.f32.mrf.mxu0  ;;  %v709_v7 = vpop.f32.mrf.mxu1 }
 0x178   :  { %975 = vst [vmem:[%s2150_s5 + $0x8] sm:$0xff] %v672_v4  ;;  %v674_v6 = vadd.f32 %v673_v5, %v1740_v20  ;;  %v710_v23 = vadd.f32 %v709_v7, %v1740_v20  ;;  %v1866_v5 = vrot.slane %v1736_v15, %v387_v42 }
 0x179   :  { %v675_v22 = vpop.f32.mrf.mxu0  ;;  %v711_v46 = vpop.f32.mrf.mxu1 }
 0x17a   :  { %980 = vst [vmem:[%s2150_s5 + $0x30] sm:$0xff] %v674_v6  ;;  %v676_v45 = vadd.f32 %v675_v22, %v1743_v47  ;;  %1022 = vst [vmem:[%s2150_s5 + $0x180] sm:$0xff] %v710_v23  ;;  %v712_v12 = vadd.f32 %v711_v46, %v1743_v47  ;;  %v379_v6 = vsub.s32 3, %v1730_v3  ;;  %v1878_v46 = vrot.slane %v1736_v15, %v375_v37 }
 0x17b   :  { %v713_v13 = vpop.f32.mrf.mxu1 }
 0x17c   :  { %981 = vst [vmem:[%s2150_s5 + $0x38] sm:$0xff] %v676_v45  ;;  %1023 = vst [vmem:[%s2150_s5 + $0x188] sm:$0xff] %v712_v12  ;;  %v714_v11 = vadd.f32 %v713_v13, %v1740_v20 }
 0x17d   :  { %v715_v14 = vpop.f32.mrf.mxu1 }
 0x17e   :  { %1028 = vst [vmem:[%s2150_s5 + $0x1b0] sm:$0xff] %v714_v11  ;;  %v716_v17 = vadd.f32 %v715_v14, %v1743_v47 }
 0x180   :  { %1029 = vst [vmem:[%s2150_s5 + $0x1b8] sm:$0xff] %v716_v17 }
 0x183   :  { %v679_v18 = vpop.f32.mrf.mxu0 }
 0x184   :  { %v680_v21 = vadd.f32 %v679_v18, %v1740_v20 }
 0x185   :  { %v681_v1 = vpop.f32.mrf.mxu0 }
 0x186   :  { %986 = vst [vmem:[%s2150_s5 + $0x60] sm:$0xff] %v680_v21  ;;  %v682_v55 = vadd.f32 %v681_v1, %v1743_v47 }
 0x187   :  { %v683_v28 = vpop.f32.mrf.mxu0  ;;  %v719_v56 = vpop.f32.mrf.mxu1 }
 0x188   :  { %987 = vst [vmem:[%s2150_s5 + $0x68] sm:$0xff] %v682_v55  ;;  %v684_v48 = vadd.f32 %v683_v28, %v1740_v20  ;;  %v720_v25 = vadd.f32 %v719_v56, %v1740_v20 }
 0x189   :  { %v685_v24 = vpop.f32.mrf.mxu0  ;;  %v721_v29 = vpop.f32.mrf.mxu1 }
 0x18a   :  { %992 = vst [vmem:[%s2150_s5 + $0x90] sm:$0xff] %v684_v48  ;;  %v686_v26 = vadd.f32 %v685_v24, %v1743_v47  ;;  %1034 = vst [vmem:[%s2150_s5 + $0x1e0] sm:$0xff] %v720_v25  ;;  %v722_v49 = vadd.f32 %v721_v29, %v1743_v47 }
 0x18b   :  { %v723_v27 = vpop.f32.mrf.mxu1 }
 0x18c   :  { %993 = vst [vmem:[%s2150_s5 + $0x98] sm:$0xff] %v686_v26  ;;  %1035 = vst [vmem:[%s2150_s5 + $0x1e8] sm:$0xff] %v722_v49  ;;  %v724_v30 = vadd.f32 %v723_v27, %v1740_v20 }
 0x18d   :  { %v725_v31 = vpop.f32.mrf.mxu1 }
 0x18e   :  { %1040 = vst [vmem:[%s2150_s5 + $0x210] sm:$0xff] %v724_v30  ;;  %v726_v32 = vadd.f32 %v725_v31, %v1743_v47 }
 0x190   :  { %1041 = vst [vmem:[%s2150_s5 + $0x218] sm:$0xff] %v726_v32 }
 0x193   :  { %v689_v33 = vpop.f32.mrf.mxu0 }
 0x194   :  { %v690_v34 = vadd.f32 %v689_v33, %v1740_v20 }
 0x195   :  { %v691_v8 = vpop.f32.mrf.mxu0 }
 0x196   :  { %998 = vst [vmem:[%s2150_s5 + $0xc0] sm:$0xff] %v690_v34  ;;  %v692_v9 = vadd.f32 %v691_v8, %v1743_v47 }
 0x197   :  { %v693_v35 = vpop.f32.mrf.mxu0  ;;  %v729_v36 = vpop.f32.mrf.mxu1 }
 0x198   :  { %999 = vst [vmem:[%s2150_s5 + $0xc8] sm:$0xff] %v692_v9  ;;  %v694_v39 = vadd.f32 %v693_v35, %v1740_v20  ;;  %v730_v0 = vadd.f32 %v729_v36, %v1740_v20 }
 0x199   :  { %v695_v2 = vpop.f32.mrf.mxu0  ;;  %v731_v58 = vpop.f32.mrf.mxu1 }
 0x19a   :  { %1004 = vst [vmem:[%s2150_s5 + $0xf0] sm:$0xff] %v694_v39  ;;  %1046 = vst [vmem:[%s2150_s5 + $0x240] sm:$0xff] %v730_v0  ;;  %v696_v50 = vadd.f32 %v695_v2, %v1743_v47  ;;  %v732_v51 = vadd.f32 %v731_v58, %v1743_v47 }
 0x19b   :  { %v733_v52 = vpop.f32.mrf.mxu1 }
 0x19c   :  { %1005 = vst [vmem:[%s2150_s5 + $0xf8] sm:$0xff] %v696_v50  ;;  %1047 = vst [vmem:[%s2150_s5 + $0x248] sm:$0xff] %v732_v51  ;;  %v734_v40 = vadd.f32 %v733_v52, %v1740_v20 }
 0x19d   :  { %v735_v38 = vpop.f32.mrf.mxu1 }
 0x19e   :  { %1052 = vst [vmem:[%s2150_s5 + $0x270] sm:$0xff] %v734_v40  ;;  %v736_v53 = vadd.f32 %v735_v38, %v1743_v47 }
 0x1a0   :  { %1053 = vst [vmem:[%s2150_s5 + $0x278] sm:$0xff] %v736_v53 }
 0x1a3   :  { %v699_v54 = vpop.f32.mrf.mxu0 }
 0x1a4   :  { %v700_v41 = vadd.f32 %v699_v54, %v1740_v20 }
 0x1a5   :  { %v701_v59 = vpop.f32.mrf.mxu0 }
 0x1a6   :  { %1010 = vst [vmem:[%s2150_s5 + $0x120] sm:$0xff] %v700_v41  ;;  %v702_v60 = vadd.f32 %v701_v59, %v1743_v47 }
 0x1a7   :  { %v703_v19 = vpop.f32.mrf.mxu0  ;;  %v739_v61 = vpop.f32.mrf.mxu1 }
 0x1a8   :  { %1011 = vst [vmem:[%s2150_s5 + $0x128] sm:$0xff] %v702_v60  ;;  %v704_v43 = vadd.f32 %v703_v19, %v1740_v20  ;;  %v740_v16 = vadd.f32 %v739_v61, %v1740_v20 }
 0x1a9   :  { %v705_v44 = vpop.f32.mrf.mxu0  ;;  %v741_v62 = vpop.f32.mrf.mxu1 }
 0x1aa   :  { %1016 = vst [vmem:[%s2150_s5 + $0x150] sm:$0xff] %v704_v43  ;;  %1058 = vst [vmem:[%s2150_s5 + $0x2a0] sm:$0xff] %v740_v16  ;;  %v706_v63 = vadd.f32 %v705_v44, %v1743_v47  ;;  %v742_v4 = vadd.f32 %v741_v62, %v1743_v47 }
 0x1ab   :  { %v743_v7 = vpop.f32.mrf.mxu1  ;;  %v895_v22 = vpop.f32.mrf.mxu0 }
 0x1ac   :  { %1017 = vst [vmem:[%s2150_s5 + $0x158] sm:$0xff] %v706_v63  ;;  %1059 = vst [vmem:[%s2150_s5 + $0x2a8] sm:$0xff] %v742_v4  ;;  %v744_v23 = vadd.f32 %v743_v7, %v1740_v20  ;;  %v896_v45 = vadd.f32 %v895_v22, %v1854_v57  ;;  %v1889_v20 = vrot.slane %v1736_v15, %v379_v6 }
 0x1ad   :  { %v745_v12 = vpop.f32.mrf.mxu1  ;;  %v897_v13 = vpop.f32.mrf.mxu0 }
 0x1ae   :  { %1064 = vst [vmem:[%s2150_s5 + $0x2d0] sm:$0xff] %v744_v23  ;;  %978 = vst [vmem:[%s2150_s5 + $0x20] sm:$0xff] %v896_v45  ;;  %v746_v3 = vadd.f32 %v745_v12, %v1743_v47  ;;  %v898_v11 = vadd.f32 %v897_v13, %v1866_v5 }
 0x1af   :  { %v782_v14 = vpop.f32.mrf.mxu1  ;;  %v899_v17 = vpop.f32.mrf.mxu0 }
 0x1b0   :  { %1065 = vst [vmem:[%s2150_s5 + $0x2d8] sm:$0xff] %v746_v3  ;;  %979 = vst [vmem:[%s2150_s5 + $0x28] sm:$0xff] %v898_v11  ;;  %v783_v18 = vadd.f32 %v782_v14, %v1878_v46  ;;  %v900_v21 = vadd.f32 %v899_v17, %v1854_v57 }
 0x1b1   :  { %v784_v47 = vpop.f32.mrf.mxu1  ;;  %v901_v1 = vpop.f32.mrf.mxu0 }
 0x1b2   :  { %976 = vst [vmem:[%s2150_s5 + $0x10] sm:$0xff] %v783_v18  ;;  %984 = vst [vmem:[%s2150_s5 + $0x50] sm:$0xff] %v900_v21  ;;  %v785_v15 = vadd.f32 %v784_v47, %v1889_v20  ;;  %v902_v55 = vadd.f32 %v901_v1, %v1866_v5 }
 0x1b3   :  { %v786_v28 = vpop.f32.mrf.mxu1  ;;  %v905_v48 = vpop.f32.mrf.mxu0 }
 0x1b4   :  { %977 = vst [vmem:[%s2150_s5 + $0x18] sm:$0xff] %v785_v15  ;;  %985 = vst [vmem:[%s2150_s5 + $0x58] sm:$0xff] %v902_v55  ;;  %v787_v56 = vadd.f32 %v786_v28, %v1878_v46  ;;  %v906_v24 = vadd.f32 %v905_v48, %v1854_v57 }
 0x1b5   :  { %v788_v25 = vpop.f32.mrf.mxu1  ;;  %v907_v26 = vpop.f32.mrf.mxu0 }
 0x1b6   :  { %982 = vst [vmem:[%s2150_s5 + $0x40] sm:$0xff] %v787_v56  ;;  %990 = vst [vmem:[%s2150_s5 + $0x80] sm:$0xff] %v906_v24  ;;  %v789_v29 = vadd.f32 %v788_v25, %v1889_v20  ;;  %v908_v49 = vadd.f32 %v907_v26, %v1866_v5 }
 0x1b7   :  { %v792_v27 = vpop.f32.mrf.mxu1  ;;  %v909_v30 = vpop.f32.mrf.mxu0 }
 0x1b8   :  { %983 = vst [vmem:[%s2150_s5 + $0x48] sm:$0xff] %v789_v29  ;;  %991 = vst [vmem:[%s2150_s5 + $0x88] sm:$0xff] %v908_v49  ;;  %v793_v31 = vadd.f32 %v792_v27, %v1878_v46  ;;  %v910_v32 = vadd.f32 %v909_v30, %v1854_v57 }
 0x1b9   :  { %v794_v33 = vpop.f32.mrf.mxu1  ;;  %v911_v34 = vpop.f32.mrf.mxu0 }
 0x1ba   :  { %988 = vst [vmem:[%s2150_s5 + $0x70] sm:$0xff] %v793_v31  ;;  %996 = vst [vmem:[%s2150_s5 + $0xb0] sm:$0xff] %v910_v32  ;;  %v795_v8 = vadd.f32 %v794_v33, %v1889_v20  ;;  %v912_v9 = vadd.f32 %v911_v34, %v1866_v5 }
 0x1bb   :  { %v796_v35 = vpop.f32.mrf.mxu1  ;;  %v915_v36 = vpop.f32.mrf.mxu0 }
 0x1bc   :  { %989 = vst [vmem:[%s2150_s5 + $0x78] sm:$0xff] %v795_v8  ;;  %997 = vst [vmem:[%s2150_s5 + $0xb8] sm:$0xff] %v912_v9  ;;  %v797_v39 = vadd.f32 %v796_v35, %v1878_v46  ;;  %v916_v0 = vadd.f32 %v915_v36, %v1854_v57 }
 0x1bd   :  { %v798_v2 = vpop.f32.mrf.mxu1  ;;  %v917_v58 = vpop.f32.mrf.mxu0 }
 0x1be   :  { %994 = vst [vmem:[%s2150_s5 + $0xa0] sm:$0xff] %v797_v39  ;;  %1002 = vst [vmem:[%s2150_s5 + $0xe0] sm:$0xff] %v916_v0  ;;  %v799_v50 = vadd.f32 %v798_v2, %v1889_v20  ;;  %v918_v51 = vadd.f32 %v917_v58, %v1866_v5 }
 0x1bf   :  { %v802_v52 = vpop.f32.mrf.mxu1  ;;  %v919_v40 = vpop.f32.mrf.mxu0 }
 0x1c0   :  { %995 = vst [vmem:[%s2150_s5 + $0xa8] sm:$0xff] %v799_v50  ;;  %1003 = vst [vmem:[%s2150_s5 + $0xe8] sm:$0xff] %v918_v51  ;;  %v803_v38 = vadd.f32 %v802_v52, %v1878_v46  ;;  %v920_v53 = vadd.f32 %v919_v40, %v1854_v57 }
 0x1c1   :  { %v804_v54 = vpop.f32.mrf.mxu1  ;;  %v921_v41 = vpop.f32.mrf.mxu0 }
 0x1c2   :  { %1000 = vst [vmem:[%s2150_s5 + $0xd0] sm:$0xff] %v803_v38  ;;  %1008 = vst [vmem:[%s2150_s5 + $0x110] sm:$0xff] %v920_v53  ;;  %v805_v10 = vadd.f32 %v804_v54, %v1889_v20  ;;  %v922_v59 = vadd.f32 %v921_v41, %v1866_v5 }
 0x1c3   :  { %v806_v60 = vpop.f32.mrf.mxu1  ;;  %v925_v42 = vpop.f32.mrf.mxu0 }
 0x1c4   :  { %1001 = vst [vmem:[%s2150_s5 + $0xd8] sm:$0xff] %v805_v10  ;;  %1009 = vst [vmem:[%s2150_s5 + $0x118] sm:$0xff] %v922_v59  ;;  %v807_v19 = vadd.f32 %v806_v60, %v1878_v46  ;;  %v926_v61 = vadd.f32 %v925_v42, %v1854_v57 }
 0x1c5   :  { %v808_v43 = vpop.f32.mrf.mxu1  ;;  %v927_v16 = vpop.f32.mrf.mxu0 }
 0x1c6   :  { %1006 = vst [vmem:[%s2150_s5 + $0x100] sm:$0xff] %v807_v19  ;;  %1014 = vst [vmem:[%s2150_s5 + $0x140] sm:$0xff] %v926_v61  ;;  %v809_v37 = vadd.f32 %v808_v43, %v1889_v20  ;;  %v928_v44 = vadd.f32 %v927_v16, %v1866_v5 }
 0x1c7   :  { %v812_v62 = vpop.f32.mrf.mxu1  ;;  %v929_v63 = vpop.f32.mrf.mxu0 }
 0x1c8   :  { %1007 = vst [vmem:[%s2150_s5 + $0x108] sm:$0xff] %v809_v37  ;;  %1015 = vst [vmem:[%s2150_s5 + $0x148] sm:$0xff] %v928_v44  ;;  %v813_v4 = vadd.f32 %v812_v62, %v1878_v46  ;;  %v930_v6 = vadd.f32 %v929_v63, %v1854_v57 }
 0x1c9   :  { %v814_v7 = vpop.f32.mrf.mxu1  ;;  %v931_v22 = vpop.f32.mrf.mxu0 }
 0x1ca   :  { %1012 = vst [vmem:[%s2150_s5 + $0x130] sm:$0xff] %v813_v4  ;;  %1020 = vst [vmem:[%s2150_s5 + $0x170] sm:$0xff] %v930_v6  ;;  %v815_v23 = vadd.f32 %v814_v7, %v1889_v20  ;;  %v932_v45 = vadd.f32 %v931_v22, %v1866_v5 }
 0x1cb   :  { %v816_v12 = vpop.f32.mrf.mxu1  ;;  %v935_v13 = vpop.f32.mrf.mxu0 }
 0x1cc   :  { %1013 = vst [vmem:[%s2150_s5 + $0x138] sm:$0xff] %v815_v23  ;;  %1021 = vst [vmem:[%s2150_s5 + $0x178] sm:$0xff] %v932_v45  ;;  %v817_v3 = vadd.f32 %v816_v12, %v1878_v46  ;;  %v936_v11 = vadd.f32 %v935_v13, %v1854_v57 }
 0x1cd   :  { %v818_v14 = vpop.f32.mrf.mxu1  ;;  %v937_v17 = vpop.f32.mrf.mxu0 }
 0x1ce   :  { %1018 = vst [vmem:[%s2150_s5 + $0x160] sm:$0xff] %v817_v3  ;;  %1026 = vst [vmem:[%s2150_s5 + $0x1a0] sm:$0xff] %v936_v11  ;;  %v819_v18 = vadd.f32 %v818_v14, %v1889_v20  ;;  %v938_v21 = vadd.f32 %v937_v17, %v1866_v5 }
 0x1cf   :  { %v822_v47 = vpop.f32.mrf.mxu1  ;;  %v939_v1 = vpop.f32.mrf.mxu0 }
 0x1d0   :  { %1019 = vst [vmem:[%s2150_s5 + $0x168] sm:$0xff] %v819_v18  ;;  %1027 = vst [vmem:[%s2150_s5 + $0x1a8] sm:$0xff] %v938_v21  ;;  %v823_v15 = vadd.f32 %v822_v47, %v1878_v46  ;;  %v940_v55 = vadd.f32 %v939_v1, %v1854_v57 }
 0x1d1   :  { %v824_v28 = vpop.f32.mrf.mxu1  ;;  %v941_v48 = vpop.f32.mrf.mxu0 }
 0x1d2   :  { %1024 = vst [vmem:[%s2150_s5 + $0x190] sm:$0xff] %v823_v15  ;;  %1032 = vst [vmem:[%s2150_s5 + $0x1d0] sm:$0xff] %v940_v55  ;;  %v825_v56 = vadd.f32 %v824_v28, %v1889_v20  ;;  %v942_v24 = vadd.f32 %v941_v48, %v1866_v5 }
 0x1d3   :  { %v826_v25 = vpop.f32.mrf.mxu1  ;;  %v945_v26 = vpop.f32.mrf.mxu0 }
 0x1d4   :  { %1025 = vst [vmem:[%s2150_s5 + $0x198] sm:$0xff] %v825_v56  ;;  %1033 = vst [vmem:[%s2150_s5 + $0x1d8] sm:$0xff] %v942_v24  ;;  %v827_v29 = vadd.f32 %v826_v25, %v1878_v46  ;;  %v946_v49 = vadd.f32 %v945_v26, %v1854_v57 }
 0x1d5   :  { %v828_v27 = vpop.f32.mrf.mxu1  ;;  %v947_v30 = vpop.f32.mrf.mxu0 }
 0x1d6   :  { %1030 = vst [vmem:[%s2150_s5 + $0x1c0] sm:$0xff] %v827_v29  ;;  %1038 = vst [vmem:[%s2150_s5 + $0x200] sm:$0xff] %v946_v49  ;;  %v829_v31 = vadd.f32 %v828_v27, %v1889_v20  ;;  %v948_v32 = vadd.f32 %v947_v30, %v1866_v5 }
 0x1d7   :  { %v832_v33 = vpop.f32.mrf.mxu1  ;;  %v949_v34 = vpop.f32.mrf.mxu0 }
 0x1d8   :  { %1031 = vst [vmem:[%s2150_s5 + $0x1c8] sm:$0xff] %v829_v31  ;;  %1039 = vst [vmem:[%s2150_s5 + $0x208] sm:$0xff] %v948_v32  ;;  %v833_v8 = vadd.f32 %v832_v33, %v1878_v46  ;;  %v950_v9 = vadd.f32 %v949_v34, %v1854_v57 }
 0x1d9   :  { %v834_v35 = vpop.f32.mrf.mxu1  ;;  %v951_v36 = vpop.f32.mrf.mxu0 }
 0x1da   :  { %1036 = vst [vmem:[%s2150_s5 + $0x1f0] sm:$0xff] %v833_v8  ;;  %1044 = vst [vmem:[%s2150_s5 + $0x230] sm:$0xff] %v950_v9  ;;  %v835_v39 = vadd.f32 %v834_v35, %v1889_v20  ;;  %v952_v0 = vadd.f32 %v951_v36, %v1866_v5 }
 0x1db   :  { %v836_v2 = vpop.f32.mrf.mxu1  ;;  %v955_v58 = vpop.f32.mrf.mxu0 }
 0x1dc   :  { %1037 = vst [vmem:[%s2150_s5 + $0x1f8] sm:$0xff] %v835_v39  ;;  %1045 = vst [vmem:[%s2150_s5 + $0x238] sm:$0xff] %v952_v0  ;;  %v837_v50 = vadd.f32 %v836_v2, %v1878_v46  ;;  %v956_v51 = vadd.f32 %v955_v58, %v1854_v57 }
 0x1dd   :  { %v838_v52 = vpop.f32.mrf.mxu1  ;;  %v957_v40 = vpop.f32.mrf.mxu0 }
 0x1de   :  { %1042 = vst [vmem:[%s2150_s5 + $0x220] sm:$0xff] %v837_v50  ;;  %1050 = vst [vmem:[%s2150_s5 + $0x260] sm:$0xff] %v956_v51  ;;  %v839_v38 = vadd.f32 %v838_v52, %v1889_v20  ;;  %v958_v53 = vadd.f32 %v957_v40, %v1866_v5 }
 0x1df   :  { %v842_v54 = vpop.f32.mrf.mxu1  ;;  %v959_v41 = vpop.f32.mrf.mxu0 }
 0x1e0   :  { %1043 = vst [vmem:[%s2150_s5 + $0x228] sm:$0xff] %v839_v38  ;;  %1051 = vst [vmem:[%s2150_s5 + $0x268] sm:$0xff] %v958_v53  ;;  %v843_v10 = vadd.f32 %v842_v54, %v1878_v46  ;;  %v960_v59 = vadd.f32 %v959_v41, %v1854_v57 }
 0x1e1   :  { %v844_v60 = vpop.f32.mrf.mxu1  ;;  %v961_v42 = vpop.f32.mrf.mxu0 }
 0x1e2   :  { %1048 = vst [vmem:[%s2150_s5 + $0x250] sm:$0xff] %v843_v10  ;;  %1056 = vst [vmem:[%s2150_s5 + $0x290] sm:$0xff] %v960_v59  ;;  %v845_v19 = vadd.f32 %v844_v60, %v1889_v20  ;;  %v962_v61 = vadd.f32 %v961_v42, %v1866_v5 }
 0x1e3   :  { %v846_v43 = vpop.f32.mrf.mxu1  ;;  %v965_v16 = vpop.f32.mrf.mxu0 }
 0x1e4   :  { %1049 = vst [vmem:[%s2150_s5 + $0x258] sm:$0xff] %v845_v19  ;;  %1057 = vst [vmem:[%s2150_s5 + $0x298] sm:$0xff] %v962_v61  ;;  %v847_v37 = vadd.f32 %v846_v43, %v1878_v46  ;;  %v966_v44 = vadd.f32 %v965_v16, %v1854_v57 }
 0x1e5   :  { %v848_v62 = vpop.f32.mrf.mxu1  ;;  %v967_v63 = vpop.f32.mrf.mxu0 }
 0x1e6   :  { %1054 = vst [vmem:[%s2150_s5 + $0x280] sm:$0xff] %v847_v37  ;;  %1062 = vst [vmem:[%s2150_s5 + $0x2c0] sm:$0xff] %v966_v44  ;;  %v849_v4 = vadd.f32 %v848_v62, %v1889_v20  ;;  %v968_v6 = vadd.f32 %v967_v63, %v1866_v5 }
 0x1e7   :  { %v852_v7 = vpop.f32.mrf.mxu1  ;;  %v969_v22 = vpop.f32.mrf.mxu0 }
 0x1e8   :  { %1055 = vst [vmem:[%s2150_s5 + $0x288] sm:$0xff] %v849_v4  ;;  %1063 = vst [vmem:[%s2150_s5 + $0x2c8] sm:$0xff] %v968_v6  ;;  %v853_v23 = vadd.f32 %v852_v7, %v1878_v46  ;;  %v970_v45 = vadd.f32 %v969_v22, %v1854_v57 }
 0x1e9   :  { %v854_v12 = vpop.f32.mrf.mxu1  ;;  %v971_v13 = vpop.f32.mrf.mxu0 }
 0x1ea   :  { %1060 = vst [vmem:[%s2150_s5 + $0x2b0] sm:$0xff] %v853_v23  ;;  %1068 = vst [vmem:[%s2150_s5 + $0x2f0] sm:$0xff] %v970_v45  ;;  %v855_v3 = vadd.f32 %v854_v12, %v1889_v20  ;;  %v972_v11 = vadd.f32 %v971_v13, %v1866_v5 }
 0x1eb   :  { %v856_v14 = vpop.f32.mrf.mxu1 }
 0x1ec   :  { %1061 = vst [vmem:[%s2150_s5 + $0x2b8] sm:$0xff] %v855_v3  ;;  %1069 = vst [vmem:[%s2150_s5 + $0x2f8] sm:$0xff] %v972_v11  ;;  %v857_v57 = vadd.f32 %v856_v14, %v1878_v46 }
 0x1ed   :  { %v858_v17 = vpop.f32.mrf.mxu1 }
 0x1ee   :  { %1066 = vst [vmem:[%s2150_s5 + $0x2e0] sm:$0xff] %v857_v57  ;;  %v859_v18 = vadd.f32 %v858_v17, %v1889_v20 }
 0x1f0   :  { %1067 = vst [vmem:[%s2150_s5 + $0x2e8] sm:$0xff] %v859_v18 }

// kernel: forward.53
= control target key start
LH: loop header
LB: loop body
LE: loop exit
PB: predicated region body
PF: predicated region fallthrough
CT: control target
= control target key end

     0   :  { %s814_s17 = smov 0   ;;  %s913_s0 = inlined_call_operand.<no memory space> [shape: f32[1], index: 0, kind: input, shape index: {}]   ;;  %s914_s1 = inlined_call_operand.vmem [shape: f32[8,64,64], index: 1, kind: input, shape index: {}]   ;;  %s915_s2 = inlined_call_operand.vmem [shape: f32[8,64,64], index: 2, kind: input, shape index: {}]   ;;  %s916_s3 = inlined_call_operand.vmem [shape: f32[8,64,64], index: 3, kind: input, shape index: {}]   ;;  %s917_s4 = inlined_call_operand.vmem [shape: f32[8,64,64], index: 4, kind: output, shape index: {}]  }
   0x1   :  { %9 = sst [smem:[#allocation2]] %s913_s0 }
   0x2 LB: > { %s659_s18 = sadd.s32 4294967295, %s784_s17   ;;  %p663_p0 = scmp.ge.s32.totalorder %s784_s17, 1  ;;  %s784_s17 = sphi %s814_s17, %s15_s17  }
   0x3   : > { %p183_p1 = scmp.lt.s32.totalorder %s784_s17, 9 }
   0x5   : > { %p184_p2 = pnand %p663_p0, %p183_p1 }
   0x6   : > { %p219_p3 = scmp.lt.s32.totalorder (!%p184_p2), %s659_s18, 7  ;;  %s276_s25 = sld [smem:[#allocation2]] (!%p184_p2) }
   0x7   : > { %187 = sbr.rel (%p184_p2) target bundleno = 779 (0x30b), region = 36 }
   0xc   : > { %s919_s18 = smov (!%p219_p3, %s659_s18), 7  ;;  %vm277_vm0 = vcmask 523264   ;;  %v376_v28 = vlaneseq  ;;  %v367_v32 = vstv %s276_s25 }
   0xd   : > { %s822_s19 = sshll.u32 %s919_s18, 6 }
   0xe   : > { %s228_s21 = scalar_lea.vmem %s915_s2, %s822_s19  ;;  %s832_s24 = scalar_lea.vmem %s914_s1, %s822_s19  ;;  %v377_v29 = vshrl.u32 %v376_v28, 7  ;;  %v386_v31 = vand.u32 127, %v376_v28 }
   0xf   : > { %v258_v0 = vld [vmem:[%s228_s21 + $0x30] sm:$0xff]  ;;  %v259_v1 = vld [vmem:[%s228_s21 + $0x38] sm:$0xff]  ;;  %v256_v2 = vld [vmem:[%s228_s21 + $0x20] sm:$0xff]  ;;  %s233_s28 = scalar_lea.vmem %s916_s3, %s822_s19  ;;  %s238_s5 = scalar_lea.vmem %s917_s4, %s822_s19 }
  0x10   : > { %v263_v3 = vpack.c.bf16 %v259_v1, %v258_v0  ;;  %v257_v4 = vld [vmem:[%s228_s21 + $0x28] sm:$0xff]  ;;  %v240_v6 = vld [vmem:[%s832_s24] sm:$0xff]  ;;  %v254_v10 = vld [vmem:[%s228_s21 + $0x10] sm:$0xff]  ;;  %v379_v30 = vadd.s32 16, %v377_v29  ;;  %v380_v34 = vadd.s32 24, %v377_v29  ;;  %vm387_vm2 = vcmp.eq.s32.totalorder %v377_v29, %v386_v31 }
  0x11   : > { %v262_v5 = vpack.c.bf16 %v257_v4, %v256_v2  ;;  %v241_v8 = vld [vmem:[%s832_s24 + $0x8] sm:$0xff]  ;;  %v255_v11 = vld [vmem:[%s228_s21 + $0x18] sm:$0xff]  ;;  %v252_v14 = vld [vmem:[%s228_s21] sm:$0xff]  ;;  %v378_v37 = vadd.s32 8, %v377_v29  ;;  %v381_v46 = vadd.s32 32, %v377_v29  ;;  %v383_v51 = vadd.s32 48, %v377_v29 }
  0x12   : > { %734 = vmatprep.subr.msk.bf16.mxu0 %vm277_vm0, %v263_v3  ;;  %v300_v7 = vsel %vm277_vm0, %v263_v3, 0  ;;  %v248_v9 = vpack.c.bf16 %v241_v8, %v240_v6  ;;  %v261_v13 = vpack.c.bf16 %v255_v11, %v254_v10  ;;  %v253_v15 = vld [vmem:[%s228_s21 + $0x8] sm:$0xff]  ;;  %v242_v19 = vld [vmem:[%s832_s24 + $0x10] sm:$0xff]  ;;  %v243_v20 = vld [vmem:[%s832_s24 + $0x18] sm:$0xff]  ;;  %vm389_vm1 = vcmp.eq.s32.totalorder %v379_v30, %v386_v31 }
  0x13   : > { %703 = vmatpush3.bf16.xpose.msra.mxu0 %v300_v7  ;;  %v297_v12 = vsel %vm277_vm0, %v262_v5, 0  ;;  %v260_v17 = vpack.c.bf16 %v253_v15, %v252_v14  ;;  %v244_v21 = vld [vmem:[%s832_s24 + $0x20] sm:$0xff]  ;;  %v245_v22 = vld [vmem:[%s832_s24 + $0x28] sm:$0xff]  ;;  %v249_v23 = vpack.c.bf16 %v243_v20, %v242_v19  ;;  %v246_v25 = vld [vmem:[%s832_s24 + $0x30] sm:$0xff]  ;;  %vm390_vm3 = vcmp.eq.s32.totalorder %v380_v34, %v386_v31 }
  0x14   : > { %735 = vmatprep.subr.msk.bf16.mxu0 %vm277_vm0, %v262_v5  ;;  %710 = vmatprep.mubr.msk.bf16.mxu0 %vm277_vm0, %v248_v9  ;;  %v294_v16 = vsel %vm277_vm0, %v261_v13, 0  ;;  %v250_v24 = vpack.c.bf16 %v245_v22, %v244_v21  ;;  %v247_v26 = vld [vmem:[%s832_s24 + $0x38] sm:$0xff]  ;;  %vm388_vm4 = vcmp.eq.s32.totalorder %v378_v37, %v386_v31  ;;  %vm391_vm5 = vcmp.eq.s32.totalorder %v381_v46, %v386_v31 }
  0x15   : > { %v291_v18 = vsel %vm277_vm0, %v260_v17, 0  ;;  %v251_v27 = vpack.c.bf16 %v247_v26, %v246_v25  ;;  %v382_v55 = vadd.s32 40, %v377_v29  ;;  %vm393_vm6 = vcmp.eq.s32.totalorder %v383_v51, %v386_v31  ;;  %v269_v51 = vld [vmem:[%s233_s28 + $0x28] sm:$0xff] }
  0x16   : > { %v384_v59 = vadd.s32 56, %v377_v29 }
  0x17   : > { %vm392_vm7 = vcmp.eq.s32.totalorder %v382_v55, %v386_v31 }
  0x18   : > { %vm394_vm8 = vcmp.eq.s32.totalorder %v384_v59, %v386_v31 }
  0x1b   : > { %705 = vmatpush3.bf16.xpose.msra.mxu0 %v297_v12 }
  0x1c   : > { %736 = vmatprep.subr.msk.bf16.mxu0 %vm277_vm0, %v261_v13 }
  0x23   : > { %707 = vmatpush3.bf16.xpose.msra.mxu0 %v294_v16 }
  0x24   : > { %737 = vmatprep.subr.msk.bf16.mxu0 %vm277_vm0, %v260_v17 }
  0x2b   : > { %709 = vmatpush3.bf16.xpose.msra.mxu0 %v291_v18 }
  0x32   : > { %711 = vmatmul.mubr.msk.bf16.vlgmr.msra.gmra.mxu0 %vm277_vm0, %v249_v23 }
  0x33   : > { %714 = vmatprep.mubr.msk.bf16.mxu0 %vm277_vm0, %v250_v24 }
  0x3a   : > { %715 = vmatmul.mubr.msk.bf16.gmra.mxu0 %vm277_vm0, %v251_v27 }
  0xf2   : > { %v712_v33 = vpop.f32.mrf.mxu0 }
  0xf3   : > { %v370_v35 = vmul.f32 %v712_v33, %v367_v32 }
  0xf4   : > { %v336_v36 = vpop.f32.mrf.mxu0 }
  0xf5   : > { %v368_v38 = vmul.f32 %v367_v32, %v336_v36  ;;  %v397_v39 = vsel %vm389_vm1, -3.4028235e+38, %v370_v35 }
  0xf6   : > { %v713_v40 = vpop.f32.mrf.mxu0  ;;  %v409_v41 = vsel %vm277_vm0, %v397_v39, -inf }
  0xf7   : > { %v371_v42 = vmul.f32 %v713_v40, %v367_v32  ;;  %410 = vmax.xlane.f32.xlu1 %v409_v41  ;;  %v395_v43 = vsel %vm387_vm2, -3.4028235e+38, %v368_v38 }
  0xf8   : > { %v339_v44 = vpop.f32.mrf.mxu0  ;;  %v403_v45 = vsel %vm277_vm0, %v395_v43, -inf }
  0xf9   : > { %v369_v47 = vmul.f32 %v367_v32, %v339_v44  ;;  %404 = vmax.xlane.f32.xlu0 %v403_v45  ;;  %v398_v48 = vsel %vm390_vm3, -3.4028235e+38, %v371_v42 }
  0xfa   : > { %v716_v49 = vpop.f32.mrf.mxu0  ;;  %v412_v50 = vsel %vm277_vm0, %v398_v48, -inf }
  0xfb   : > { %413 = vmax.xlane.f32.xlu1 %v412_v50  ;;  %v396_v52 = vsel %vm388_vm4, -3.4028235e+38, %v369_v47  ;;  %v374_v56 = vmul.f32 %v716_v49, %v367_v32  ;;  %v270_v47 = vld [vmem:[%s233_s28 + $0x30] sm:$0xff]  ;;  %v268_v50 = vld [vmem:[%s233_s28 + $0x20] sm:$0xff] }
  0xfc   : > { %v352_v53 = vpop.f32.mrf.mxu0  ;;  %v406_v54 = vsel %vm277_vm0, %v396_v52, -inf }
  0xfd   : > { %v372_v57 = vmul.f32 %v367_v32, %v352_v53  ;;  %407 = vmax.xlane.f32.xlu0 %v406_v54  ;;  %v401_v1 = vsel %vm393_vm6, -3.4028235e+38, %v374_v56  ;;  %v266_v53 = vld [vmem:[%s233_s28 + $0x10] sm:$0xff]  ;;  %v267_v54 = vld [vmem:[%s233_s28 + $0x18] sm:$0xff]  ;;  %v264_v56 = vld [vmem:[%s233_s28] sm:$0xff] }
  0xfe   : > { %v717_v58 = vpop.f32.mrf.mxu0  ;;  %v421_v3 = vsel %vm277_vm0, %v401_v1, -inf  ;;  %v273_v55 = vpack.c.bf16 %v267_v54, %v266_v53 }
  0xff   : > { %v399_v60 = vsel %vm391_vm5, -3.4028235e+38, %v372_v57  ;;  %v375_v63 = vmul.f32 %v717_v58, %v367_v32  ;;  %v265_v57 = vld [vmem:[%s233_s28 + $0x8] sm:$0xff] }
 0x100   : > { %v355_v61 = vpop.f32.mrf.mxu0  ;;  %v415_v62 = vsel %vm277_vm0, %v399_v60, -inf  ;;  %v272_v58 = vpack.c.bf16 %v265_v57, %v264_v56 }
 0x101   : > { %v373_v0 = vmul.f32 %v367_v32, %v355_v61  ;;  %416 = vmax.xlane.f32.xlu0 %v415_v62  ;;  %v402_v5 = vsel %vm394_vm8, -3.4028235e+38, %v375_v63 }
 0x102   : > { %v424_v6 = vsel %vm277_vm0, %v402_v5, -inf }
 0x103   : > { %v400_v2 = vsel %vm392_vm7, -3.4028235e+38, %v373_v0 }
 0x104   : > { %v418_v4 = vsel %vm277_vm0, %v400_v2, -inf }
 0x105   : > { %422 = vmax.xlane.f32.xlu0 %v421_v3  ;;  %419 = vmax.xlane.f32.xlu1 %v418_v4 }
 0x109   : > { %425 = vmax.xlane.f32.xlu1 %v424_v6 }
 0x180   : > { %v411_v7 = vpop.xlane.xlu1 %410 }
 0x181   : > { %v429_v8 = vsub.f32 %v397_v39, %v411_v7 }
 0x182   : > { %v405_v9 = vpop.xlane.xlu0 %404 }
 0x183   : > { %v427_v10 = vsub.f32 %v395_v43, %v405_v9  ;;  %v439_v12 = vmul.f32 1.442695, %v429_v8 }
 0x184   : > { %v414_v11 = vpop.xlane.xlu1 %413 }
 0x185   : > { %v435_v13 = vmul.f32 1.442695, %v427_v10  ;;  %v430_v14 = vsub.f32 %v398_v48, %v414_v11  ;;  %v271_v48 = vld [vmem:[%s233_s28 + $0x38] sm:$0xff] }
 0x186   : > { %v408_v15 = vpop.xlane.xlu0 %407  ;;  %v275_v49 = vpack.c.bf16 %v271_v48, %v270_v47 }
 0x187   : > { %746 = vpow2.f32 %v435_v13  ;;  %v428_v16 = vsub.f32 %v396_v52, %v408_v15  ;;  %v441_v17 = vmul.f32 1.442695, %v430_v14  ;;  %v274_v52 = vpack.c.bf16 %v269_v51, %v268_v50 }
 0x188   : > { %748 = vpow2.f32 %v439_v12  ;;  %718 = vmatprep.subr.bf16.mxu1 %v275_v49 }
 0x189   : > { %v437_v18 = vmul.f32 1.442695, %v428_v16  ;;  %719 = vmatpush3.bf16.msra.mxu1 %v275_v49 }
 0x18a   : > { %v417_v19 = vpop.xlane.xlu0 %416  ;;  %720 = vmatprep.subr.bf16.mxu1 %v274_v52 }
 0x18b   : > { %750 = vpow2.f32 %v437_v18  ;;  %v431_v20 = vsub.f32 %v399_v60, %v417_v19 }
 0x18c   : > { %752 = vpow2.f32 %v441_v17 }
 0x18d   : > { %v443_v21 = vmul.f32 1.442695, %v431_v20  ;;  %721 = vmatpush3.bf16.msra.mxu1 %v274_v52 }
 0x18e   : > { %v423_v22 = vpop.xlane.xlu0 %422  ;;  %v420_v23 = vpop.xlane.xlu1 %419  ;;  %722 = vmatprep.subr.bf16.mxu1 %v273_v55 }
 0x18f   : > { %754 = vpow2.f32 %v443_v21  ;;  %v433_v24 = vsub.f32 %v401_v1, %v423_v22  ;;  %v432_v25 = vsub.f32 %v400_v2, %v420_v23 }
 0x191   : > { %v447_v26 = vmul.f32 1.442695, %v433_v24  ;;  %v445_v27 = vmul.f32 1.442695, %v432_v25  ;;  %723 = vmatpush3.bf16.msra.mxu1 %v273_v55 }
 0x192   : > { %v426_v28 = vpop.xlane.xlu1 %425  ;;  %724 = vmatprep.subr.bf16.mxu1 %v272_v58 }
 0x193   : > { %756 = vpow2.f32 %v447_v26  ;;  %v434_v29 = vsub.f32 %v402_v5, %v426_v28 }
 0x194   : > { %v862_v30 = vpop.eup %746  ;;  %758 = vpow2.f32 %v445_v27 }
 0x195   : > { %v449_v31 = vmul.f32 1.442695, %v434_v29  ;;  %v451_v32 = vsel %vm277_vm0, %v862_v30, 0.0  ;;  %v866_v33 = vpop.eup %748  ;;  %725 = vmatpush3.bf16.msra.mxu1 %v272_v58 }
 0x196   : > { %452 = vadd.xlane.f32.xlu0 %v451_v32  ;;  %v457_v35 = vsel %vm277_vm0, %v866_v33, 0.0 }
 0x197   : > { %760 = vpow2.f32 %v449_v31 }
 0x198   : > { %v751_v34 = vpop.eup %750 }
 0x199   : > { %v454_v36 = vsel %vm277_vm0, %v751_v34, 0.0  ;;  %v871_v37 = vpop.eup %752 }
 0x19a   : > { %458 = vadd.xlane.f32.xlu0 %v457_v35  ;;  %455 = vadd.xlane.f32.xlu1 %v454_v36  ;;  %v460_v40 = vsel %vm277_vm0, %v871_v37, 0.0 }
 0x19c   : > { %v873_v38 = vpop.eup %754 }
 0x19d   : > { %v463_v39 = vsel %vm277_vm0, %v873_v38, 0.0 }
 0x19e   : > { %464 = vadd.xlane.f32.xlu0 %v463_v39  ;;  %461 = vadd.xlane.f32.xlu1 %v460_v40 }
 0x1a0   : > { %v879_v41 = vpop.eup %756 }
 0x1a1   : > { %v759_v42 = vpop.eup %758  ;;  %v469_v43 = vsel %vm277_vm0, %v879_v41, 0.0 }
 0x1a2   : > { %470 = vadd.xlane.f32.xlu0 %v469_v43  ;;  %v466_v44 = vsel %vm277_vm0, %v759_v42, 0.0 }
 0x1a3   : > { %467 = vadd.xlane.f32.xlu1 %v466_v44 }
 0x1a4   : > { %v761_v45 = vpop.eup %760 }
 0x1a5   : > { %v472_v46 = vsel %vm277_vm0, %v761_v45, 0.0 }
 0x1a7   : > { %473 = vadd.xlane.f32.xlu1 %v472_v46 }
 0x21f   : > { %v453_v59 = vpop.xlane.xlu0 %452 }
 0x220   : > { %762 = vrcp.f32 %v453_v59 }
 0x223   : > { %v459_v60 = vpop.xlane.xlu0 %458  ;;  %v456_v61 = vpop.xlane.xlu1 %455 }
 0x224   : > { %764 = vrcp.f32 %v456_v61 }
 0x225   : > { %766 = vrcp.f32 %v459_v60 }
 0x227   : > { %v465_v62 = vpop.xlane.xlu0 %464  ;;  %v462_v63 = vpop.xlane.xlu1 %461 }
 0x228   : > { %768 = vrcp.f32 %v462_v63 }
 0x229   : > { %770 = vrcp.f32 %v465_v62 }
 0x22b   : > { %v471_v0 = vpop.xlane.xlu0 %470 }
 0x22c   : > { %v468_v1 = vpop.xlane.xlu1 %467 }
 0x22d   : > { %772 = vrcp.f32 %v468_v1  ;;  %v763_v2 = vpop.eup %762 }
 0x22e   : > { %774 = vrcp.f32 %v471_v0  ;;  %v476_v5 = vmul.f32 %v763_v2, %v862_v30 }
 0x230   : > { %v474_v3 = vpop.xlane.xlu1 %473 }
 0x231   : > { %776 = vrcp.f32 %v474_v3  ;;  %v765_v4 = vpop.eup %764 }
 0x232   : > { %v478_v6 = vmul.f32 %v765_v4, %v751_v34  ;;  %v767_v7 = vpop.eup %766 }
 0x233   : > { %v480_v10 = vmul.f32 %v767_v7, %v866_v33 }
 0x234   : > { %v491_v8 = vpack.c.bf16 %v478_v6, %v476_v5 }
 0x235   : > { %v769_v9 = vpop.eup %768 }
 0x236   : > { %726 = vmatprep.mubr.msk.bf16.mxu1 %vm277_vm0, %v491_v8  ;;  %v482_v11 = vmul.f32 %v769_v9, %v871_v37  ;;  %v771_v12 = vpop.eup %770 }
 0x237   : > { %v484_v15 = vmul.f32 %v771_v12, %v873_v38 }
 0x238   : > { %v492_v13 = vpack.c.bf16 %v482_v11, %v480_v10 }
 0x23a   : > { %v773_v14 = vpop.eup %772  ;;  %727 = vmatmul.mubr.msk.bf16.vlgmr.msra.gmra.mxu1 %vm277_vm0, %v492_v13 }
 0x23b   : > { %v486_v16 = vmul.f32 %v773_v14, %v759_v42  ;;  %v775_v17 = vpop.eup %774 }
 0x23c   : > { %v488_v20 = vmul.f32 %v775_v17, %v879_v41 }
 0x23d   : > { %v493_v18 = vpack.c.bf16 %v486_v16, %v484_v15 }
 0x23e   : > { %v777_v19 = vpop.eup %776 }
 0x23f   : > { %730 = vmatprep.mubr.msk.bf16.mxu1 %vm277_vm0, %v493_v18  ;;  %v490_v21 = vmul.f32 %v777_v19, %v761_v45 }
 0x241   : > { %v494_v22 = vpack.c.bf16 %v490_v21, %v488_v20 }
 0x243   : > { %731 = vmatmul.mubr.msk.bf16.gmra.mxu1 %vm277_vm0, %v494_v22 }
 0x2fa   : > { %v728_v23 = vpop.f32.mrf.mxu1 }
 0x2fb   : > { %574 = vst.msk [vmem:[%s238_s5 + $0x10] sm:$0xff] %vm277_vm0, %v728_v23 }
 0x2fc   : > { %v541_v24 = vpop.f32.mrf.mxu1 }
 0x2fd   : > { %572 = vst.msk [vmem:[%s238_s5] sm:$0xff] %vm277_vm0, %v541_v24 }
 0x2fe   : > { %v729_v25 = vpop.f32.mrf.mxu1 }
 0x2ff   : > { %575 = vst.msk [vmem:[%s238_s5 + $0x18] sm:$0xff] %vm277_vm0, %v729_v25 }
 0x300   : > { %v544_v26 = vpop.f32.mrf.mxu1 }
 0x301   : > { %573 = vst.msk [vmem:[%s238_s5 + $0x8] sm:$0xff] %vm277_vm0, %v544_v26 }
 0x303   : > { %v732_v27 = vpop.f32.mrf.mxu1 }
 0x304   : > { %578 = vst.msk [vmem:[%s238_s5 + $0x30] sm:$0xff] %vm277_vm0, %v732_v27 }
 0x305   : > { %v557_v28 = vpop.f32.mrf.mxu1 }
 0x306   : > { %576 = vst.msk [vmem:[%s238_s5 + $0x20] sm:$0xff] %vm277_vm0, %v557_v28 }
 0x307   : > { %v733_v29 = vpop.f32.mrf.mxu1 }
 0x308   : > { %579 = vst.msk [vmem:[%s238_s5 + $0x38] sm:$0xff] %vm277_vm0, %v733_v29 }
 0x309   : > { %v560_v30 = vpop.f32.mrf.mxu1 }
 0x30a   : > { %577 = vst.msk [vmem:[%s238_s5 + $0x28] sm:$0xff] %vm277_vm0, %v560_v30 }
 0x30b PF: > { %s15_s17 = sadd.s32 1, %s784_s17  }
 0x30c   : > { %p12_p4 = scmp.ge.s32.totalorder %s15_s17, 10  }
 0x30e   :  { %14 = sbr.rel (!%p12_p4) target bundleno = 2 (0x2), region = 72 }

// kernel: forward.54
= control target key start
LH: loop header
LB: loop body
LE: loop exit
PB: predicated region body
PF: predicated region fallthrough
CT: control target
= control target key end

     0   :  { %s749_s1 = inlined_call_operand.vmem [shape: bf16[256,128], index: 1, kind: input, shape index: {}]   ;;  %s750_s0 = inlined_call_operand.vmem [shape: f32[128,256], index: 0, kind: input, shape index: {}]   ;;  %s751_s2 = inlined_call_operand.vmem [shape: f32[1,128], index: 2, kind: input, shape index: {}]   ;;  %s752_s3 = inlined_call_operand.vmem [shape: f32[128,128], index: 3, kind: input, shape index: {}]   ;;  %s753_s4 = inlined_call_operand.vmem [shape: f32[128,128], index: 4, kind: output, shape index: {}]  }
   0x1   :  { %v447_v0 = vld [vmem:[%s749_s1 + $0x78] sm:$0xff]   ;;  %v449_v2 = vld [vmem:[%s749_s1 + $0x70] sm:$0xff]   ;;  %v451_v4 = vld [vmem:[%s749_s1 + $0x68] sm:$0xff]  }
   0x2   :  { %v448_v1 = vld [vmem:[%s749_s1 + $0x38] sm:$0xff]   ;;  %367 = vmatprep.subr.bf16.mxu0 %v447_v0  ;;  %431 = vmatprep.subr.bf16.mxu1 %v447_v0  ;;  %v450_v3 = vld [vmem:[%s749_s1 + $0x30] sm:$0xff]   ;;  %v452_v5 = vld [vmem:[%s749_s1 + $0x28] sm:$0xff]  }
   0x3   :  { %368 = vmatpush3.bf16.msra.mxu0 %v448_v1  ;;  %439 = vmatpush3.bf16.msra.mxu1 %v448_v1  ;;  %v453_v6 = vld [vmem:[%s749_s1 + $0x60] sm:$0xff]   ;;  %v455_v8 = vld [vmem:[%s749_s1 + $0x58] sm:$0xff]   ;;  %v457_v10 = vld [vmem:[%s749_s1 + $0x50] sm:$0xff]  }
   0x4   :  { %369 = vmatprep.subr.bf16.mxu0 %v449_v2  ;;  %432 = vmatprep.subr.bf16.mxu1 %v449_v2  ;;  %v454_v7 = vld [vmem:[%s749_s1 + $0x20] sm:$0xff]   ;;  %v456_v9 = vld [vmem:[%s749_s1 + $0x18] sm:$0xff]   ;;  %v19_v11 = vld [vmem:[%s750_s0 + $0x8] sm:$0xff] }
   0x5   :  { %v21_v12 = vld [vmem:[%s750_s0 + $0x18] sm:$0xff]  ;;  %v35_v13 = vld [vmem:[%s750_s0 + $0x88] sm:$0xff]  ;;  %v458_v17 = vld [vmem:[%s749_s1 + $0x10] sm:$0xff]  }
   0x6   :  { %v51_v14 = vpack.c.bf16 %v21_v12, %v19_v11  ;;  %v37_v15 = vld [vmem:[%s750_s0 + $0x98] sm:$0xff]  ;;  %v459_v18 = vld [vmem:[%s749_s1 + $0x48] sm:$0xff]   ;;  %v461_v20 = vld [vmem:[%s749_s1 + $0x40] sm:$0xff]  }
   0x7   :  { %370 = vmatpush3.bf16.msra.mxu0 %v450_v3  ;;  %440 = vmatpush3.bf16.msra.mxu1 %v450_v3  ;;  %v59_v16 = vpack.c.bf16 %v37_v15, %v35_v13  ;;  %v460_v19 = vld [vmem:[%s749_s1 + $0x8] sm:$0xff]   ;;  %v462_v21 = vld [vmem:[%s749_s1] sm:$0xff]   ;;  %v20_v23 = vld [vmem:[%s750_s0 + $0x10] sm:$0xff] }
   0x8   :  { %371 = vmatprep.subr.bf16.mxu0 %v451_v4  ;;  %433 = vmatprep.subr.bf16.mxu1 %v451_v4  ;;  %v18_v22 = vld [vmem:[%s750_s0] sm:$0xff]  ;;  %v36_v25 = vld [vmem:[%s750_s0 + $0x90] sm:$0xff]  ;;  %v23_v26 = vld [vmem:[%s750_s0 + $0x28] sm:$0xff] }
   0x9   :  { %233 = vmatprep.mubr.bf16.mxu0 %v51_v14  ;;  %265 = vmatprep.mubr.bf16.mxu1 %v59_v16  ;;  %v34_v24 = vld [vmem:[%s750_s0 + $0x80] sm:$0xff]  ;;  %v25_v27 = vld [vmem:[%s750_s0 + $0x38] sm:$0xff]  ;;  %v39_v28 = vld [vmem:[%s750_s0 + $0xa8] sm:$0xff]  ;;  %v50_v30 = vpack.c.bf16 %v20_v23, %v18_v22 }
   0xa   :  { %v41_v29 = vld [vmem:[%s750_s0 + $0xb8] sm:$0xff]  ;;  %v58_v31 = vpack.c.bf16 %v36_v25, %v34_v24  ;;  %v53_v32 = vpack.c.bf16 %v25_v27, %v23_v26  ;;  %v22_v34 = vld [vmem:[%s750_s0 + $0x20] sm:$0xff]  ;;  %v24_v35 = vld [vmem:[%s750_s0 + $0x30] sm:$0xff] }
   0xb   :  { %372 = vmatpush3.bf16.msra.mxu0 %v452_v5  ;;  %441 = vmatpush3.bf16.msra.mxu1 %v452_v5  ;;  %v61_v33 = vpack.c.bf16 %v41_v29, %v39_v28  ;;  %v38_v36 = vld [vmem:[%s750_s0 + $0xa0] sm:$0xff]  ;;  %v40_v37 = vld [vmem:[%s750_s0 + $0xb0] sm:$0xff]  ;;  %v27_v38 = vld [vmem:[%s750_s0 + $0x48] sm:$0xff]  ;;  %v52_v42 = vpack.c.bf16 %v24_v35, %v22_v34 }
   0xc   :  { %373 = vmatprep.subr.bf16.mxu0 %v453_v6  ;;  %434 = vmatprep.subr.bf16.mxu1 %v453_v6  ;;  %v29_v39 = vld [vmem:[%s750_s0 + $0x58] sm:$0xff]  ;;  %v43_v40 = vld [vmem:[%s750_s0 + $0xc8] sm:$0xff]  ;;  %v60_v43 = vpack.c.bf16 %v40_v37, %v38_v36  ;;  %v26_v46 = vld [vmem:[%s750_s0 + $0x40] sm:$0xff] }
   0xd   :  { %v45_v41 = vld [vmem:[%s750_s0 + $0xd8] sm:$0xff]  ;;  %v55_v44 = vpack.c.bf16 %v29_v39, %v27_v38  ;;  %v28_v47 = vld [vmem:[%s750_s0 + $0x50] sm:$0xff]  ;;  %v42_v48 = vld [vmem:[%s750_s0 + $0xc0] sm:$0xff] }
   0xe   :  { %v63_v45 = vpack.c.bf16 %v45_v41, %v43_v40  ;;  %v44_v49 = vld [vmem:[%s750_s0 + $0xd0] sm:$0xff]  ;;  %v31_v50 = vld [vmem:[%s750_s0 + $0x68] sm:$0xff]  ;;  %v33_v51 = vld [vmem:[%s750_s0 + $0x78] sm:$0xff]  ;;  %v54_v54 = vpack.c.bf16 %v28_v47, %v26_v46 }
   0xf   :  { %374 = vmatpush3.bf16.msra.mxu0 %v454_v7  ;;  %442 = vmatpush3.bf16.msra.mxu1 %v454_v7  ;;  %v47_v52 = vld [vmem:[%s750_s0 + $0xe8] sm:$0xff]  ;;  %v49_v53 = vld [vmem:[%s750_s0 + $0xf8] sm:$0xff]  ;;  %v62_v55 = vpack.c.bf16 %v44_v49, %v42_v48  ;;  %v57_v56 = vpack.c.bf16 %v33_v51, %v31_v50  ;;  %v30_v58 = vld [vmem:[%s750_s0 + $0x60] sm:$0xff] }
  0x10   :  { %375 = vmatprep.subr.bf16.mxu0 %v455_v8  ;;  %435 = vmatprep.subr.bf16.mxu1 %v455_v8  ;;  %v65_v57 = vpack.c.bf16 %v49_v53, %v47_v52  ;;  %v32_v59 = vld [vmem:[%s750_s0 + $0x70] sm:$0xff]  ;;  %v46_v60 = vld [vmem:[%s750_s0 + $0xe0] sm:$0xff] }
  0x11   :  { %v48_v61 = vld [vmem:[%s750_s0 + $0xf0] sm:$0xff]  ;;  %v56_v62 = vpack.c.bf16 %v32_v59, %v30_v58  ;;  %v635_v2 = vld [vmem:[%s751_s2] ss:$0 sm:$0xff] }
  0x12   :  { %v64_v63 = vpack.c.bf16 %v48_v61, %v46_v60  ;;  %v298_v7 = vld [vmem:[%s752_s3] sm:$0xff] }
  0x13   :  { %376 = vmatpush3.bf16.msra.mxu0 %v456_v9  ;;  %443 = vmatpush3.bf16.msra.mxu1 %v456_v9  ;;  %v306_v8 = vld [vmem:[%s752_s3 + $0x40] sm:$0xff] }
  0x14   :  { %377 = vmatprep.subr.bf16.mxu0 %v457_v10  ;;  %436 = vmatprep.subr.bf16.mxu1 %v457_v10 }
  0x17   :  { %378 = vmatpush3.bf16.msra.mxu0 %v458_v17  ;;  %444 = vmatpush3.bf16.msra.mxu1 %v458_v17 }
  0x18   :  { %379 = vmatprep.subr.bf16.mxu0 %v459_v18  ;;  %437 = vmatprep.subr.bf16.mxu1 %v459_v18 }
  0x1b   :  { %380 = vmatpush3.bf16.msra.mxu0 %v460_v19  ;;  %445 = vmatpush3.bf16.msra.mxu1 %v460_v19  ;;  %v299_v19 = vld [vmem:[%s752_s3 + $0x8] sm:$0xff] }
  0x1c   :  { %381 = vmatprep.subr.bf16.mxu0 %v461_v20  ;;  %438 = vmatprep.subr.bf16.mxu1 %v461_v20  ;;  %v307_v20 = vld [vmem:[%s752_s3 + $0x48] sm:$0xff] }
  0x1f   :  { %382 = vmatpush3.bf16.msra.mxu0 %v462_v21  ;;  %446 = vmatpush3.bf16.msra.mxu1 %v462_v21 }
  0x22   :  { %234 = vmatmul.mubr.bf16.vlgmr.msra.gmra.mxu0 %v50_v30  ;;  %266 = vmatmul.mubr.bf16.vlgmr.msra.gmra.mxu1 %v58_v31  ;;  %v300_v31 = vld [vmem:[%s752_s3 + $0x10] sm:$0xff] }
  0x23   :  { %241 = vmatprep.mubr.bf16.mxu0 %v53_v32  ;;  %273 = vmatprep.mubr.bf16.mxu1 %v61_v33  ;;  %v308_v32 = vld [vmem:[%s752_s3 + $0x50] sm:$0xff] }
  0x2a   :  { %242 = vmatmul.mubr.bf16.gmra.mxu0 %v52_v42  ;;  %274 = vmatmul.mubr.bf16.gmra.mxu1 %v60_v43  ;;  %v301_v43 = vld [vmem:[%s752_s3 + $0x18] sm:$0xff] }
  0x2b   :  { %249 = vmatprep.mubr.bf16.mxu0 %v55_v44  ;;  %281 = vmatprep.mubr.bf16.mxu1 %v63_v45  ;;  %v309_v44 = vld [vmem:[%s752_s3 + $0x58] sm:$0xff] }
  0x32   :  { %250 = vmatmul.mubr.bf16.gmra.mxu0 %v54_v54  ;;  %282 = vmatmul.mubr.bf16.gmra.mxu1 %v62_v55  ;;  %v302_v55 = vld [vmem:[%s752_s3 + $0x20] sm:$0xff] }
  0x33   :  { %257 = vmatprep.mubr.bf16.mxu0 %v57_v56  ;;  %289 = vmatprep.mubr.bf16.mxu1 %v65_v57  ;;  %v310_v56 = vld [vmem:[%s752_s3 + $0x60] sm:$0xff] }
  0x3a   :  { %258 = vmatmul.mubr.bf16.gmra.mxu0 %v56_v62  ;;  %290 = vmatmul.mubr.bf16.gmra.mxu1 %v64_v63 }
  0xe2   :  { %v383_v0 = vpop.f32.mrf.mxu0  ;;  %v407_v1 = vpop.f32.mrf.mxu1 }
  0xe4   :  { %v384_v3 = vpop.f32.mrf.mxu0  ;;  %v408_v4 = vpop.f32.mrf.mxu1 }
  0xe5   :  { %v385_v5 = vadd.f32 %v384_v3, %v383_v0  ;;  %v409_v6 = vadd.f32 %v408_v4, %v407_v1  ;;  %v303_v4 = vld [vmem:[%s752_s3 + $0x28] sm:$0xff] }
  0xe6   :  { %v386_v9 = vpop.f32.mrf.mxu0  ;;  %v410_v10 = vpop.f32.mrf.mxu1 }
  0xe7   :  { %v236_v11 = vadd.f32 %v385_v5, %v635_v2  ;;  %v268_v12 = vadd.f32 %v409_v6, %v635_v2  ;;  %v311_v5 = vld [vmem:[%s752_s3 + $0x68] sm:$0xff] }
  0xe8   :  { %v387_v13 = vpop.f32.mrf.mxu0  ;;  %v411_v14 = vpop.f32.mrf.mxu1 }
  0xe9   :  { %v314_v15 = vadd.f32 %v298_v7, %v236_v11  ;;  %v322_v16 = vadd.f32 %v306_v8, %v268_v12  ;;  %v388_v17 = vadd.f32 %v387_v13, %v386_v9  ;;  %v412_v18 = vadd.f32 %v411_v14, %v410_v10 }
  0xea   :  { %v389_v21 = vpop.f32.mrf.mxu0  ;;  %v413_v22 = vpop.f32.mrf.mxu1 }
  0xeb   :  { %330 = vst [vmem:[%s753_s4] sm:$0xff] %v314_v15  ;;  %338 = vst [vmem:[%s753_s4 + $0x40] sm:$0xff] %v322_v16  ;;  %v239_v23 = vadd.f32 %v388_v17, %v635_v2  ;;  %v271_v24 = vadd.f32 %v412_v18, %v635_v2  ;;  %v304_v16 = vld [vmem:[%s752_s3 + $0x30] sm:$0xff] }
  0xec   :  { %v390_v25 = vpop.f32.mrf.mxu0  ;;  %v414_v26 = vpop.f32.mrf.mxu1  ;;  %v312_v17 = vld [vmem:[%s752_s3 + $0x70] sm:$0xff] }
  0xed   :  { %v315_v27 = vadd.f32 %v299_v19, %v239_v23  ;;  %v323_v28 = vadd.f32 %v307_v20, %v271_v24  ;;  %v391_v29 = vadd.f32 %v390_v25, %v389_v21  ;;  %v415_v30 = vadd.f32 %v414_v26, %v413_v22 }
  0xee   :  { %v392_v33 = vpop.f32.mrf.mxu0  ;;  %v416_v34 = vpop.f32.mrf.mxu1 }
  0xef   :  { %331 = vst [vmem:[%s753_s4 + $0x8] sm:$0xff] %v315_v27  ;;  %339 = vst [vmem:[%s753_s4 + $0x48] sm:$0xff] %v323_v28  ;;  %v244_v35 = vadd.f32 %v391_v29, %v635_v2  ;;  %v276_v36 = vadd.f32 %v415_v30, %v635_v2  ;;  %v305_v28 = vld [vmem:[%s752_s3 + $0x38] sm:$0xff] }
  0xf0   :  { %v393_v37 = vpop.f32.mrf.mxu0  ;;  %v417_v38 = vpop.f32.mrf.mxu1  ;;  %v313_v29 = vld [vmem:[%s752_s3 + $0x78] sm:$0xff] }
  0xf1   :  { %v316_v39 = vadd.f32 %v300_v31, %v244_v35  ;;  %v324_v40 = vadd.f32 %v308_v32, %v276_v36  ;;  %v394_v41 = vadd.f32 %v393_v37, %v392_v33  ;;  %v418_v42 = vadd.f32 %v417_v38, %v416_v34 }
  0xf2   :  { %v395_v45 = vpop.f32.mrf.mxu0  ;;  %v419_v46 = vpop.f32.mrf.mxu1 }
  0xf3   :  { %332 = vst [vmem:[%s753_s4 + $0x10] sm:$0xff] %v316_v39  ;;  %340 = vst [vmem:[%s753_s4 + $0x50] sm:$0xff] %v324_v40  ;;  %v247_v47 = vadd.f32 %v394_v41, %v635_v2  ;;  %v279_v48 = vadd.f32 %v418_v42, %v635_v2 }
  0xf4   :  { %v396_v49 = vpop.f32.mrf.mxu0  ;;  %v420_v50 = vpop.f32.mrf.mxu1 }
  0xf5   :  { %v317_v51 = vadd.f32 %v301_v43, %v247_v47  ;;  %v325_v52 = vadd.f32 %v309_v44, %v279_v48  ;;  %v397_v53 = vadd.f32 %v396_v49, %v395_v45  ;;  %v421_v54 = vadd.f32 %v420_v50, %v419_v46 }
  0xf6   :  { %v398_v57 = vpop.f32.mrf.mxu0  ;;  %v422_v58 = vpop.f32.mrf.mxu1 }
  0xf7   :  { %333 = vst [vmem:[%s753_s4 + $0x18] sm:$0xff] %v317_v51  ;;  %341 = vst [vmem:[%s753_s4 + $0x58] sm:$0xff] %v325_v52  ;;  %v252_v59 = vadd.f32 %v397_v53, %v635_v2  ;;  %v284_v60 = vadd.f32 %v421_v54, %v635_v2 }
  0xf8   :  { %v399_v61 = vpop.f32.mrf.mxu0  ;;  %v423_v62 = vpop.f32.mrf.mxu1 }
  0xf9   :  { %v318_v63 = vadd.f32 %v302_v55, %v252_v59  ;;  %v326_v0 = vadd.f32 %v310_v56, %v284_v60  ;;  %v400_v1 = vadd.f32 %v399_v61, %v398_v57  ;;  %v424_v3 = vadd.f32 %v423_v62, %v422_v58 }
  0xfa   :  { %v401_v6 = vpop.f32.mrf.mxu0  ;;  %v425_v7 = vpop.f32.mrf.mxu1 }
  0xfb   :  { %334 = vst [vmem:[%s753_s4 + $0x20] sm:$0xff] %v318_v63  ;;  %342 = vst [vmem:[%s753_s4 + $0x60] sm:$0xff] %v326_v0  ;;  %v255_v8 = vadd.f32 %v400_v1, %v635_v2  ;;  %v287_v9 = vadd.f32 %v424_v3, %v635_v2 }
  0xfc   :  { %v402_v10 = vpop.f32.mrf.mxu0  ;;  %v426_v11 = vpop.f32.mrf.mxu1 }
  0xfd   :  { %v319_v12 = vadd.f32 %v303_v4, %v255_v8  ;;  %v327_v13 = vadd.f32 %v311_v5, %v287_v9  ;;  %v403_v14 = vadd.f32 %v402_v10, %v401_v6  ;;  %v427_v15 = vadd.f32 %v426_v11, %v425_v7 }
  0xfe   :  { %v404_v18 = vpop.f32.mrf.mxu0  ;;  %v428_v19 = vpop.f32.mrf.mxu1 }
  0xff   :  { %335 = vst [vmem:[%s753_s4 + $0x28] sm:$0xff] %v319_v12  ;;  %343 = vst [vmem:[%s753_s4 + $0x68] sm:$0xff] %v327_v13  ;;  %v260_v20 = vadd.f32 %v403_v14, %v635_v2  ;;  %v292_v21 = vadd.f32 %v427_v15, %v635_v2 }
 0x100   :  { %v405_v22 = vpop.f32.mrf.mxu0  ;;  %v429_v23 = vpop.f32.mrf.mxu1 }
 0x101   :  { %v320_v24 = vadd.f32 %v304_v16, %v260_v20  ;;  %v328_v25 = vadd.f32 %v312_v17, %v292_v21  ;;  %v406_v26 = vadd.f32 %v405_v22, %v404_v18  ;;  %v430_v27 = vadd.f32 %v429_v23, %v428_v19 }
 0x103   :  { %336 = vst [vmem:[%s753_s4 + $0x30] sm:$0xff] %v320_v24  ;;  %344 = vst [vmem:[%s753_s4 + $0x70] sm:$0xff] %v328_v25  ;;  %v263_v30 = vadd.f32 %v406_v26, %v635_v2  ;;  %v295_v31 = vadd.f32 %v430_v27, %v635_v2 }
 0x105   :  { %v321_v32 = vadd.f32 %v305_v28, %v263_v30  ;;  %v329_v33 = vadd.f32 %v313_v29, %v295_v31 }
 0x107   :  { %337 = vst [vmem:[%s753_s4 + $0x38] sm:$0xff] %v321_v32  ;;  %345 = vst [vmem:[%s753_s4 + $0x78] sm:$0xff] %v329_v33 }

// kernel: forward.55
= control target key start
LH: loop header
LB: loop body
LE: loop exit
PB: predicated region body
PF: predicated region fallthrough
CT: control target
= control target key end

     0   :  { %s2257_s0 = inlined_call_operand.vmem [shape: f32[128,128], index: 0, kind: input, shape index: {}]   ;;  %s2258_s3 = inlined_call_operand.vmem [shape: bf16[128,128], index: 3, kind: input, shape index: {}]   ;;  %s2259_s1 = inlined_call_operand.vmem [shape: f32[1,128], index: 1, kind: input, shape index: {}]   ;;  %s2260_s2 = inlined_call_operand.vmem [shape: f32[1,128], index: 2, kind: input, shape index: {}]   ;;  %s2261_s5 = inlined_call_operand.vmem [shape: bf16[128,128], index: 5, kind: input, shape index: {}]   ;;  %s2262_s4 = inlined_call_operand.vmem [shape: f32[1,128], index: 4, kind: input, shape index: {}]   ;;  %s2263_s6 = inlined_call_operand.vmem [shape: f32[1,128], index: 6, kind: input, shape index: {}]   ;;  %s2264_s7 = inlined_call_operand.vmem [shape: f32[128,128], index: 7, kind: output, shape index: {}]  }
   0x1   :  { %v1420_v0 = vld [vmem:[%s2257_s0 + $0x10] sm:$0xff]  ;;  %v1425_v1 = vld [vmem:[%s2257_s0] sm:$0xff]  ;;  %v1432_v2 = vld [vmem:[%s2257_s0 + $0x18] sm:$0xff] }
   0x2   :  { %49 = vadd.xlane.f32.xlu1 %v1420_v0  ;;  %45 = vadd.xlane.f32.xlu0 %v1425_v1  ;;  %v1437_v3 = vld [vmem:[%s2257_s0 + $0x8] sm:$0xff]  ;;  %v93_v5 = vmul.f32 %v1425_v1, %v1425_v1  ;;  %v96_v6 = vmul.f32 %v1432_v2, %v1432_v2  ;;  %v95_v7 = vmul.f32 %v1420_v0, %v1420_v0  ;;  %v1457_v9 = vld [vmem:[%s2257_s0 + $0x20] sm:$0xff]  ;;  %v1464_v10 = vld [vmem:[%s2257_s0 + $0x38] sm:$0xff] }
   0x3   :  { %v94_v4 = vmul.f32 %v1437_v3, %v1437_v3  ;;  %v1452_v8 = vld [vmem:[%s2257_s0 + $0x28] sm:$0xff]  ;;  %v1469_v11 = vld [vmem:[%s2257_s0 + $0x30] sm:$0xff]  ;;  %v1249_v12 = vld [vmem:[%s2258_s3 + $0x38] sm:$0xff]   ;;  %v97_v14 = vmul.f32 %v1457_v9, %v1457_v9  ;;  %v100_v16 = vmul.f32 %v1464_v10, %v1464_v10 }
   0x4   :  { %v98_v13 = vmul.f32 %v1452_v8, %v1452_v8  ;;  %1185 = vmatprep.subr.bf16.mxu0 %v1249_v12  ;;  %v1250_v15 = vld [vmem:[%s2258_s3 + $0x30] sm:$0xff]   ;;  %v99_v17 = vmul.f32 %v1469_v11, %v1469_v11  ;;  %v1251_v18 = vld [vmem:[%s2258_s3 + $0x28] sm:$0xff]   ;;  %v1498_v20 = vld [vmem:[%s2257_s0 + $0x40] sm:$0xff] }
   0x5   :  { %1186 = vmatpush3.bf16.msra.mxu0 %v1249_v12  ;;  %v1493_v19 = vld [vmem:[%s2257_s0 + $0x48] sm:$0xff]  ;;  %v1252_v21 = vld [vmem:[%s2258_s3 + $0x20] sm:$0xff]   ;;  %v1508_v22 = vld [vmem:[%s2257_s0 + $0x58] sm:$0xff]  ;;  %v101_v26 = vmul.f32 %v1498_v20, %v1498_v20 }
   0x6   :  { %51 = vadd.xlane.f32.xlu1 %v1432_v2  ;;  %47 = vadd.xlane.f32.xlu0 %v1437_v3  ;;  %v1513_v23 = vld [vmem:[%s2257_s0 + $0x50] sm:$0xff]  ;;  %v1253_v24 = vld [vmem:[%s2258_s3 + $0x18] sm:$0xff]   ;;  %v102_v25 = vmul.f32 %v1493_v19, %v1493_v19  ;;  %v104_v28 = vmul.f32 %v1508_v22, %v1508_v22  ;;  %v1255_v30 = vld [vmem:[%s2258_s3 + $0x8] sm:$0xff]  }
   0x7   :  { %1187 = vmatprep.subr.bf16.mxu0 %v1250_v15  ;;  %v1254_v27 = vld [vmem:[%s2258_s3 + $0x10] sm:$0xff]   ;;  %v103_v29 = vmul.f32 %v1513_v23, %v1513_v23  ;;  %v1537_v31 = vld [vmem:[%s2257_s0 + $0x68] sm:$0xff]  ;;  %v1542_v32 = vld [vmem:[%s2257_s0 + $0x60] sm:$0xff] }
   0x8   :  { %v1256_v33 = vld [vmem:[%s2258_s3] sm:$0xff]   ;;  %v1552_v34 = vld [vmem:[%s2257_s0 + $0x78] sm:$0xff]  ;;  %v1557_v35 = vld [vmem:[%s2257_s0 + $0x70] sm:$0xff]  ;;  %v106_v36 = vmul.f32 %v1537_v31, %v1537_v31  ;;  %v105_v37 = vmul.f32 %v1542_v32, %v1542_v32 }
   0x9   :  { %1188 = vmatpush3.bf16.msra.mxu0 %v1250_v15  ;;  %v108_v38 = vmul.f32 %v1552_v34, %v1552_v34  ;;  %v107_v39 = vmul.f32 %v1557_v35, %v1557_v35 }
   0xa   :  { %111 = vadd.xlane.f32.xlu1 %v94_v4  ;;  %109 = vadd.xlane.f32.xlu0 %v93_v5 }
   0xb   :  { %1189 = vmatprep.subr.bf16.mxu0 %v1251_v18 }
   0xd   :  { %1190 = vmatpush3.bf16.msra.mxu0 %v1251_v18 }
   0xe   :  { %115 = vadd.xlane.f32.xlu1 %v96_v6  ;;  %113 = vadd.xlane.f32.xlu0 %v95_v7 }
   0xf   :  { %1191 = vmatprep.subr.bf16.mxu0 %v1252_v21 }
  0x11   :  { %1192 = vmatpush3.bf16.msra.mxu0 %v1252_v21 }
  0x12   :  { %55 = vadd.xlane.f32.xlu1 %v1452_v8  ;;  %53 = vadd.xlane.f32.xlu0 %v1457_v9 }
  0x13   :  { %1193 = vmatprep.subr.bf16.mxu0 %v1253_v24 }
  0x15   :  { %1194 = vmatpush3.bf16.msra.mxu0 %v1253_v24 }
  0x16   :  { %59 = vadd.xlane.f32.xlu1 %v1464_v10  ;;  %57 = vadd.xlane.f32.xlu0 %v1469_v11 }
  0x17   :  { %1195 = vmatprep.subr.bf16.mxu0 %v1254_v27 }
  0x19   :  { %1196 = vmatpush3.bf16.msra.mxu0 %v1254_v27 }
  0x1a   :  { %119 = vadd.xlane.f32.xlu1 %v98_v13  ;;  %117 = vadd.xlane.f32.xlu0 %v97_v14 }
  0x1b   :  { %1197 = vmatprep.subr.bf16.mxu0 %v1255_v30 }
  0x1d   :  { %1198 = vmatpush3.bf16.msra.mxu0 %v1255_v30 }
  0x1e   :  { %123 = vadd.xlane.f32.xlu1 %v100_v16  ;;  %121 = vadd.xlane.f32.xlu0 %v99_v17 }
  0x1f   :  { %1199 = vmatprep.subr.bf16.mxu0 %v1256_v33 }
  0x21   :  { %1200 = vmatpush3.bf16.msra.mxu0 %v1256_v33 }
  0x22   :  { %63 = vadd.xlane.f32.xlu1 %v1493_v19  ;;  %61 = vadd.xlane.f32.xlu0 %v1498_v20 }
  0x26   :  { %67 = vadd.xlane.f32.xlu1 %v1508_v22  ;;  %65 = vadd.xlane.f32.xlu0 %v1513_v23 }
  0x2a   :  { %127 = vadd.xlane.f32.xlu1 %v102_v25  ;;  %125 = vadd.xlane.f32.xlu0 %v101_v26 }
  0x2e   :  { %131 = vadd.xlane.f32.xlu1 %v104_v28  ;;  %129 = vadd.xlane.f32.xlu0 %v103_v29 }
  0x32   :  { %71 = vadd.xlane.f32.xlu1 %v1537_v31  ;;  %69 = vadd.xlane.f32.xlu0 %v1542_v32 }
  0x36   :  { %75 = vadd.xlane.f32.xlu1 %v1552_v34  ;;  %73 = vadd.xlane.f32.xlu0 %v1557_v35 }
  0x3a   :  { %135 = vadd.xlane.f32.xlu1 %v106_v36  ;;  %133 = vadd.xlane.f32.xlu0 %v105_v37 }
  0x3e   :  { %139 = vadd.xlane.f32.xlu1 %v108_v38  ;;  %137 = vadd.xlane.f32.xlu0 %v107_v39 }
  0x8b   :  { %v50_v40 = vpop.xlane.xlu1 %49  ;;  %v46_v41 = vpop.xlane.xlu0 %45 }
  0x8c   :  { %v1569_v44 = vmul.f32 0.125, %v46_v41  ;;  %v1573_v46 = vmul.f32 0.125, %v50_v40 }
  0x8e   :  { %v157_v50 = vmul.f32 %v1569_v44, %v1569_v44  ;;  %v159_v56 = vmul.f32 %v1573_v46, %v1573_v46 }
  0x8f   :  { %v52_v42 = vpop.xlane.xlu1 %51  ;;  %v48_v43 = vpop.xlane.xlu0 %47 }
  0x90   :  { %v1571_v45 = vmul.f32 0.125, %v48_v43  ;;  %v1575_v47 = vmul.f32 0.125, %v52_v42 }
  0x92   :  { %v158_v51 = vmul.f32 %v1571_v45, %v1571_v45  ;;  %v160_v57 = vmul.f32 %v1575_v47, %v1575_v47 }
  0x93   :  { %v112_v48 = vpop.xlane.xlu1 %111  ;;  %v110_v49 = vpop.xlane.xlu0 %109 }
  0x94   :  { %v142_v52 = vmul.f32 0.125, %v112_v48  ;;  %v141_v53 = vmul.f32 0.125, %v110_v49 }
  0x96   :  { %v174_v54 = vsub.f32 %v142_v52, %v158_v51  ;;  %v173_v55 = vsub.f32 %v141_v53, %v157_v50  ;;  %v205_v53 = vsub.f32 %v1425_v1, %v1569_v44 }
  0x97   :  { %v116_v58 = vpop.xlane.xlu1 %115  ;;  %v114_v59 = vpop.xlane.xlu0 %113 }
  0x98   :  { %v190_v60 = vmax.f32 %v174_v54, 0.0  ;;  %v189_v61 = vmax.f32 %v173_v55, 0.0  ;;  %v144_v62 = vmul.f32 0.125, %v116_v58  ;;  %v143_v63 = vmul.f32 0.125, %v114_v59 }
  0x99   :  { %v206_v54 = vsub.f32 %v1437_v3, %v1571_v45  ;;  %v1613_v3 = vld [vmem:[%s2260_s2] ss:$0 sm:$0xff] }
  0x9a   :  { %v222_v4 = vadd.f32 1e-05, %v190_v60  ;;  %v221_v5 = vadd.f32 1e-05, %v189_v61  ;;  %v176_v6 = vsub.f32 %v144_v62, %v160_v57  ;;  %v175_v7 = vsub.f32 %v143_v63, %v159_v56  ;;  %v1608_v60 = vld [vmem:[%s2259_s1] ss:$0 sm:$0xff] }
  0x9b   :  { %v56_v12 = vpop.xlane.xlu1 %55  ;;  %v54_v13 = vpop.xlane.xlu0 %53 }
  0x9c   :  { %1265 = vrsqrt.f32 %v222_v4  ;;  %v192_v14 = vmax.f32 %v176_v6, 0.0  ;;  %v191_v15 = vmax.f32 %v175_v7, 0.0  ;;  %v1585_v24 = vmul.f32 0.125, %v56_v12 }
  0x9d   :  { %1267 = vrsqrt.f32 %v221_v5  ;;  %v1587_v25 = vmul.f32 0.125, %v54_v13  ;;  %v207_v12 = vsub.f32 %v1420_v0, %v1573_v46 }
  0x9e   :  { %v224_v16 = vadd.f32 1e-05, %v192_v14  ;;  %v223_v17 = vadd.f32 1e-05, %v191_v15  ;;  %v162_v30 = vmul.f32 %v1585_v24, %v1585_v24  ;;  %v208_v15 = vsub.f32 %v1432_v2, %v1575_v47 }
  0x9f   :  { %v60_v18 = vpop.xlane.xlu1 %59  ;;  %v58_v21 = vpop.xlane.xlu0 %57  ;;  %v161_v33 = vmul.f32 %v1587_v25, %v1587_v25 }
  0xa0   :  { %1269 = vrsqrt.f32 %v224_v16  ;;  %v1589_v26 = vmul.f32 0.125, %v60_v18  ;;  %v1591_v27 = vmul.f32 0.125, %v58_v21 }
  0xa1   :  { %1271 = vrsqrt.f32 %v223_v17 }
  0xa2   :  { %v164_v40 = vmul.f32 %v1589_v26, %v1589_v26  ;;  %v163_v41 = vmul.f32 %v1591_v27, %v1591_v27 }
  0xa3   :  { %v120_v28 = vpop.xlane.xlu1 %119  ;;  %v118_v29 = vpop.xlane.xlu0 %117 }
  0xa4   :  { %v146_v36 = vmul.f32 0.125, %v120_v28  ;;  %v145_v37 = vmul.f32 0.125, %v118_v29 }
  0xa6   :  { %v178_v38 = vsub.f32 %v146_v36, %v162_v30  ;;  %v177_v39 = vsub.f32 %v145_v37, %v161_v33 }
  0xa7   :  { %v124_v42 = vpop.xlane.xlu1 %123  ;;  %v122_v43 = vpop.xlane.xlu0 %121 }
  0xa8   :  { %v194_v48 = vmax.f32 %v178_v38, 0.0  ;;  %v193_v49 = vmax.f32 %v177_v39, 0.0  ;;  %v148_v50 = vmul.f32 0.125, %v124_v42  ;;  %v147_v51 = vmul.f32 0.125, %v122_v43 }
  0xa9   :  { %v1266_v52 = vpop.eup %1265 }
  0xaa   :  { %v1268_v55 = vpop.eup %1267  ;;  %v226_v56 = vadd.f32 1e-05, %v194_v48  ;;  %v225_v57 = vadd.f32 1e-05, %v193_v49  ;;  %v180_v58 = vsub.f32 %v148_v50, %v164_v40  ;;  %v179_v59 = vsub.f32 %v147_v51, %v163_v41 }
  0xab   :  { %v64_v61 = vpop.xlane.xlu1 %63  ;;  %v62_v62 = vpop.xlane.xlu0 %61  ;;  %v253_v63 = vmul.f32 %v1268_v55, %v205_v53  ;;  %v254_v4 = vmul.f32 %v1266_v52, %v206_v54 }
  0xac   :  { %1273 = vrsqrt.f32 %v226_v56  ;;  %v196_v5 = vmax.f32 %v180_v58, 0.0  ;;  %v195_v1 = vmax.f32 %v179_v59, 0.0  ;;  %v1623_v28 = vmul.f32 0.125, %v64_v61 }
  0xad   :  { %v1270_v44 = vpop.eup %1269  ;;  %1275 = vrsqrt.f32 %v225_v57  ;;  %v275_v45 = vmul.f32 %v1608_v60, %v253_v63  ;;  %v276_v6 = vmul.f32 %v1608_v60, %v254_v4  ;;  %v1625_v29 = vmul.f32 0.125, %v62_v62 }
  0xae   :  { %v1272_v7 = vpop.eup %1271  ;;  %v228_v13 = vadd.f32 1e-05, %v196_v5  ;;  %v227_v14 = vadd.f32 1e-05, %v195_v1  ;;  %v256_v0 = vmul.f32 %v1270_v44, %v208_v15  ;;  %v166_v39 = vmul.f32 %v1623_v28, %v1623_v28 }
  0xaf   :  { %v68_v16 = vpop.xlane.xlu1 %67  ;;  %v66_v17 = vpop.xlane.xlu0 %65  ;;  %v297_v18 = vadd.f32 %v1613_v3, %v275_v45  ;;  %v298_v21 = vadd.f32 %v1613_v3, %v276_v6  ;;  %v255_v30 = vmul.f32 %v1272_v7, %v207_v12  ;;  %v165_v40 = vmul.f32 %v1625_v29, %v1625_v29 }
  0xb0   :  { %1277 = vrsqrt.f32 %v228_v13  ;;  %v1627_v46 = vmul.f32 0.125, %v68_v16  ;;  %v1629_v36 = vmul.f32 0.125, %v66_v17  ;;  %v278_v38 = vmul.f32 %v1608_v60, %v256_v0 }
  0xb1   :  { %1279 = vrsqrt.f32 %v227_v14  ;;  %v313_v33 = vpack.c.bf16 %v298_v21, %v297_v18  ;;  %v277_v37 = vmul.f32 %v1608_v60, %v255_v30  ;;  %v210_v62 = vsub.f32 %v1452_v8, %v1585_v24 }
  0xb2   :  { %v300_v48 = vadd.f32 %v1613_v3, %v278_v38  ;;  %v168_v51 = vmul.f32 %v1627_v46, %v1627_v46  ;;  %v167_v52 = vmul.f32 %v1629_v36, %v1629_v36  ;;  %v209_v63 = vsub.f32 %v1457_v9, %v1587_v25 }
  0xb3   :  { %1201 = vmatprep.mubr.bf16.mxu0 %v313_v33  ;;  %v128_v2 = vpop.xlane.xlu1 %127  ;;  %v126_v47 = vpop.xlane.xlu0 %125  ;;  %v299_v43 = vadd.f32 %v1613_v3, %v277_v37  ;;  %v211_v25 = vsub.f32 %v1469_v11, %v1591_v27  ;;  %v212_v21 = vsub.f32 %v1464_v10, %v1589_v26 }
  0xb4   :  { %v150_v41 = vmul.f32 0.125, %v128_v2  ;;  %v149_v42 = vmul.f32 0.125, %v126_v47 }
  0xb5   :  { %v314_v53 = vpack.c.bf16 %v300_v48, %v299_v43 }
  0xb6   :  { %v182_v49 = vsub.f32 %v150_v41, %v166_v39  ;;  %v181_v50 = vsub.f32 %v149_v42, %v165_v40 }
  0xb7   :  { %v132_v54 = vpop.xlane.xlu1 %131  ;;  %v130_v55 = vpop.xlane.xlu0 %129  ;;  %1202 = vmatmul.mubr.bf16.vlgmr.msra.gmra.mxu0 %v314_v53 }
  0xb8   :  { %v198_v56 = vmax.f32 %v182_v49, 0.0  ;;  %v197_v57 = vmax.f32 %v181_v50, 0.0  ;;  %v152_v58 = vmul.f32 0.125, %v132_v54  ;;  %v151_v59 = vmul.f32 0.125, %v130_v55 }
  0xb9   :  { %v1274_v61 = vpop.eup %1273 }
  0xba   :  { %v1276_v4 = vpop.eup %1275  ;;  %v230_v5 = vadd.f32 1e-05, %v198_v56  ;;  %v229_v1 = vadd.f32 1e-05, %v197_v57  ;;  %v184_v44 = vsub.f32 %v152_v58, %v168_v51  ;;  %v183_v45 = vsub.f32 %v151_v59, %v167_v52 }
  0xbb   :  { %v72_v6 = vpop.xlane.xlu1 %71  ;;  %v70_v7 = vpop.xlane.xlu0 %69  ;;  %v257_v12 = vmul.f32 %v1276_v4, %v209_v63  ;;  %v258_v13 = vmul.f32 %v1274_v61, %v210_v62 }
  0xbc   :  { %1281 = vrsqrt.f32 %v230_v5  ;;  %v200_v14 = vmax.f32 %v184_v44, 0.0  ;;  %v199_v15 = vmax.f32 %v183_v45, 0.0  ;;  %v1655_v47 = vmul.f32 0.125, %v72_v6 }
  0xbd   :  { %v1278_v16 = vpop.eup %1277  ;;  %1283 = vrsqrt.f32 %v229_v1  ;;  %v279_v8 = vmul.f32 %v1608_v60, %v257_v12  ;;  %v280_v24 = vmul.f32 %v1608_v60, %v258_v13  ;;  %v1657_v37 = vmul.f32 0.125, %v70_v7 }
  0xbe   :  { %v1280_v9 = vpop.eup %1279  ;;  %v232_v17 = vadd.f32 1e-05, %v200_v14  ;;  %v231_v18 = vadd.f32 1e-05, %v199_v15  ;;  %v260_v11 = vmul.f32 %v1278_v16, %v212_v21  ;;  %v170_v43 = vmul.f32 %v1655_v47, %v1655_v47 }
  0xbf   :  { %v76_v30 = vpop.xlane.xlu1 %75  ;;  %v74_v33 = vpop.xlane.xlu0 %73  ;;  %v301_v0 = vadd.f32 %v1613_v3, %v279_v8  ;;  %v302_v2 = vadd.f32 %v1613_v3, %v280_v24  ;;  %v259_v38 = vmul.f32 %v1280_v9, %v211_v25  ;;  %v169_v48 = vmul.f32 %v1657_v37, %v1657_v37 }
  0xc0   :  { %1285 = vrsqrt.f32 %v232_v17  ;;  %v1659_v27 = vmul.f32 0.125, %v76_v30  ;;  %v1661_v40 = vmul.f32 0.125, %v74_v33  ;;  %v282_v42 = vmul.f32 %v1608_v60, %v260_v11 }
  0xc1   :  { %1287 = vrsqrt.f32 %v231_v18  ;;  %v315_v39 = vpack.c.bf16 %v302_v2, %v301_v0  ;;  %v281_v41 = vmul.f32 %v1608_v60, %v259_v38  ;;  %v214_v1 = vsub.f32 %v1493_v19, %v1623_v28 }
  0xc2   :  { %v304_v52 = vadd.f32 %v1613_v3, %v282_v42  ;;  %v172_v55 = vmul.f32 %v1659_v27, %v1659_v27  ;;  %v171_v56 = vmul.f32 %v1661_v40, %v1661_v40  ;;  %v213_v44 = vsub.f32 %v1498_v20, %v1625_v29 }
  0xc3   :  { %1205 = vmatprep.mubr.bf16.mxu0 %v315_v39  ;;  %v136_v10 = vpop.xlane.xlu1 %135  ;;  %v134_v26 = vpop.xlane.xlu0 %133  ;;  %v303_v51 = vadd.f32 %v1613_v3, %v281_v41  ;;  %v216_v16 = vsub.f32 %v1508_v22, %v1627_v46  ;;  %v215_v19 = vsub.f32 %v1513_v23, %v1629_v36  ;;  %v218_v38 = vsub.f32 %v1537_v31, %v1655_v47 }
  0xc4   :  { %v154_v49 = vmul.f32 0.125, %v136_v10  ;;  %v153_v50 = vmul.f32 0.125, %v134_v26  ;;  %v217_v11 = vsub.f32 %v1542_v32, %v1657_v37  ;;  %v220_v42 = vsub.f32 %v1552_v34, %v1659_v27 }
  0xc5   :  { %v316_v57 = vpack.c.bf16 %v304_v52, %v303_v51 }
  0xc6   :  { %v186_v53 = vsub.f32 %v154_v49, %v170_v43  ;;  %v185_v54 = vsub.f32 %v153_v50, %v169_v48  ;;  %v219_v49 = vsub.f32 %v1557_v35, %v1661_v40  ;;  %v1257_v40 = vld [vmem:[%s2261_s5 + $0x38] sm:$0xff]  }
  0xc7   :  { %v140_v58 = vpop.xlane.xlu1 %139  ;;  %v138_v59 = vpop.xlane.xlu0 %137  ;;  %1206 = vmatmul.mubr.bf16.gmra.mxu0 %v316_v57  ;;  %1217 = vmatprep.subr.bf16.mxu1 %v1257_v40  ;;  %v1262_v57 = vld [vmem:[%s2261_s5 + $0x10] sm:$0xff]  }
  0xc8   :  { %v202_v61 = vmax.f32 %v186_v53, 0.0  ;;  %v201_v62 = vmax.f32 %v185_v54, 0.0  ;;  %v156_v63 = vmul.f32 0.125, %v140_v58  ;;  %v155_v4 = vmul.f32 0.125, %v138_v59  ;;  %1218 = vmatpush3.bf16.msra.mxu1 %v1257_v40  ;;  %v1263_v58 = vld [vmem:[%s2261_s5 + $0x8] sm:$0xff]   ;;  %v1264_v59 = vld [vmem:[%s2261_s5] sm:$0xff]  }
  0xc9   :  { %v1282_v5 = vpop.eup %1281 }
  0xca   :  { %v1284_v45 = vpop.eup %1283  ;;  %v234_v6 = vadd.f32 1e-05, %v202_v61  ;;  %v233_v7 = vadd.f32 1e-05, %v201_v62  ;;  %v188_v12 = vsub.f32 %v156_v63, %v172_v55  ;;  %v187_v13 = vsub.f32 %v155_v4, %v171_v56  ;;  %v1258_v55 = vld [vmem:[%s2261_s5 + $0x30] sm:$0xff]   ;;  %v1261_v56 = vld [vmem:[%s2261_s5 + $0x18] sm:$0xff]  }
  0xcb   :  { %v261_v14 = vmul.f32 %v1284_v45, %v213_v44  ;;  %v262_v15 = vmul.f32 %v1282_v5, %v214_v1  ;;  %1219 = vmatprep.subr.bf16.mxu1 %v1258_v55  ;;  %v1734_v61 = vld [vmem:[%s2262_s4] ss:$0 sm:$0xff] }
  0xcc   :  { %1289 = vrsqrt.f32 %v234_v6  ;;  %v204_v8 = vmax.f32 %v188_v12, 0.0  ;;  %v203_v24 = vmax.f32 %v187_v13, 0.0  ;;  %1220 = vmatpush3.bf16.msra.mxu1 %v1258_v55 }
  0xcd   :  { %v1286_v9 = vpop.eup %1285  ;;  %1291 = vrsqrt.f32 %v233_v7  ;;  %v283_v20 = vmul.f32 %v1608_v60, %v261_v14  ;;  %v284_v28 = vmul.f32 %v1608_v60, %v262_v15 }
  0xce   :  { %v1288_v29 = vpop.eup %1287  ;;  %v236_v25 = vadd.f32 1e-05, %v204_v8  ;;  %v235_v17 = vadd.f32 1e-05, %v203_v24  ;;  %v264_v18 = vmul.f32 %v1286_v9, %v216_v16 }
  0xcf   :  { %v305_v21 = vadd.f32 %v1613_v3, %v283_v20  ;;  %v306_v22 = vadd.f32 %v1613_v3, %v284_v28  ;;  %v263_v46 = vmul.f32 %v1288_v29, %v215_v19 }
  0xd0   :  { %1293 = vrsqrt.f32 %v236_v25  ;;  %v286_v30 = vmul.f32 %v1608_v60, %v264_v18 }
  0xd1   :  { %1295 = vrsqrt.f32 %v235_v17  ;;  %v317_v33 = vpack.c.bf16 %v306_v22, %v305_v21  ;;  %v285_v23 = vmul.f32 %v1608_v60, %v263_v46 }
  0xd2   :  { %v308_v36 = vadd.f32 %v1613_v3, %v286_v30 }
  0xd3   :  { %1209 = vmatprep.mubr.bf16.mxu0 %v317_v33  ;;  %v307_v0 = vadd.f32 %v1613_v3, %v285_v23 }
  0xd5   :  { %v318_v2 = vpack.c.bf16 %v308_v36, %v307_v0 }
  0xd7   :  { %1210 = vmatmul.mubr.bf16.gmra.mxu0 %v318_v2 }
  0xd9   :  { %v1290_v39 = vpop.eup %1289 }
  0xda   :  { %v1292_v10 = vpop.eup %1291  ;;  %v266_v26 = vmul.f32 %v1290_v39, %v218_v38 }
  0xdb   :  { %v265_v41 = vmul.f32 %v1292_v10, %v217_v11 }
  0xdc   :  { %v288_v43 = vmul.f32 %v1608_v60, %v266_v26 }
  0xdd   :  { %v1294_v48 = vpop.eup %1293  ;;  %v287_v50 = vmul.f32 %v1608_v60, %v265_v41 }
  0xde   :  { %v1296_v51 = vpop.eup %1295  ;;  %v310_v31 = vadd.f32 %v1613_v3, %v288_v43  ;;  %v268_v47 = vmul.f32 %v1294_v48, %v220_v42 }
  0xdf   :  { %v309_v32 = vadd.f32 %v1613_v3, %v287_v50  ;;  %v267_v37 = vmul.f32 %v1296_v51, %v219_v49 }
  0xe0   :  { %v290_v52 = vmul.f32 %v1608_v60, %v268_v47 }
  0xe1   :  { %v319_v53 = vpack.c.bf16 %v310_v31, %v309_v32  ;;  %v289_v34 = vmul.f32 %v1608_v60, %v267_v37  ;;  %v1259_v60 = vld [vmem:[%s2261_s5 + $0x28] sm:$0xff]  }
  0xe2   :  { %v312_v27 = vadd.f32 %v1613_v3, %v290_v52  ;;  %1221 = vmatprep.subr.bf16.mxu1 %v1259_v60 }
  0xe3   :  { %1213 = vmatprep.mubr.bf16.mxu0 %v319_v53  ;;  %v311_v54 = vadd.f32 %v1613_v3, %v289_v34  ;;  %1222 = vmatpush3.bf16.msra.mxu1 %v1259_v60  ;;  %v1260_v3 = vld [vmem:[%s2261_s5 + $0x20] sm:$0xff]  }
  0xe4   :  { %1223 = vmatprep.subr.bf16.mxu1 %v1260_v3 }
  0xe5   :  { %v320_v35 = vpack.c.bf16 %v312_v27, %v311_v54 }
  0xe7   :  { %1214 = vmatmul.mubr.bf16.gmra.mxu0 %v320_v35  ;;  %1224 = vmatpush3.bf16.msra.mxu1 %v1260_v3 }
  0xe8   :  { %1225 = vmatprep.subr.bf16.mxu1 %v1261_v56 }
  0xeb   :  { %1226 = vmatpush3.bf16.msra.mxu1 %v1261_v56 }
  0xec   :  { %1227 = vmatprep.subr.bf16.mxu1 %v1262_v57 }
  0xef   :  { %1228 = vmatpush3.bf16.msra.mxu1 %v1262_v57 }
  0xf0   :  { %1229 = vmatprep.subr.bf16.mxu1 %v1263_v58 }
  0xf3   :  { %1230 = vmatpush3.bf16.msra.mxu1 %v1263_v58 }
  0xf4   :  { %1231 = vmatprep.subr.bf16.mxu1 %v1264_v59 }
  0xf7   :  { %1232 = vmatpush3.bf16.msra.mxu1 %v1264_v59 }
 0x177   :  { %v1203_v62 = vpop.f32.mrf.mxu0 }
 0x178   :  { %v1737_v63 = vadd.f32 %v1203_v62, %v1734_v61 }
 0x179   :  { %v426_v4 = vpop.f32.mrf.mxu0 }
 0x17a   :  { %v1740_v5 = vmul.f32 0.70710677, %v1737_v63  ;;  %v1788_v2 = vadd.f32 %v1734_v61, %v426_v4 }
 0x17b   :  { %v1204_v1 = vpop.f32.mrf.mxu0 }
 0x17c   :  { %v523_v44 = vand.u32 2147483647, %v1740_v5  ;;  %v1744_v45 = vadd.f32 %v1204_v1, %v1734_v61  ;;  %v1798_v43 = vmul.f32 0.70710677, %v1788_v2  ;;  %vm843_vm0 = vcmp.ge.f32.partialorder %v1740_v5, 0.0 }
 0x17d   :  { %v429_v16 = vpop.f32.mrf.mxu0 }
 0x17e   :  { %v539_v6 = vmul.f32 0.3275911, %v523_v44  ;;  %v1747_v7 = vmul.f32 0.70710677, %v1744_v45  ;;  %v747_v32 = vsub.f32 0.0, %v523_v44  ;;  %v1820_v3 = vadd.f32 %v1734_v61, %v429_v16 }
 0x17f   :  { %v521_v53 = vand.u32 2147483647, %v1798_v43  ;;  %vm841_vm6 = vcmp.ge.f32.partialorder %v1798_v43, 0.0 }
 0x180   :  { %v555_v12 = vadd.f32 1.0, %v539_v6  ;;  %v1750_v13 = vand.u32 2147483647, %v1747_v7  ;;  %v763_v60 = vmul.f32 %v747_v32, %v523_v44  ;;  %vm844_vm1 = vcmp.ge.f32.partialorder %v1747_v7, 0.0 }
 0x181   :  { %v537_v57 = vmul.f32 0.3275911, %v521_v53  ;;  %v745_v44 = vsub.f32 0.0, %v521_v53 }
 0x182   :  { %1297 = vrcp.f32 %v555_v12  ;;  %v540_v14 = vmul.f32 0.3275911, %v1750_v13  ;;  %v748_v59 = vsub.f32 0.0, %v1750_v13 }
 0x184   :  { %v556_v15 = vadd.f32 1.0, %v540_v14  ;;  %v781_v14 = vmul.f32 1.442695, %v763_v60 }
 0x186   :  { %1299 = vrcp.f32 %v556_v15  ;;  %v1840_v15 = vmul.f32 0.70710677, %v1820_v3 }
 0x187   :  { %v1207_v8 = vpop.f32.mrf.mxu0 }
 0x188   :  { %v1754_v24 = vadd.f32 %v1207_v8, %v1734_v61  ;;  %v553_v8 = vadd.f32 1.0, %v537_v57  ;;  %vm842_vm7 = vcmp.ge.f32.partialorder %v1840_v15, 0.0 }
 0x189   :  { %v442_v9 = vpop.f32.mrf.mxu0 }
 0x18a   :  { %v1757_v19 = vmul.f32 0.70710677, %v1754_v24  ;;  %v1760_v20 = vadd.f32 %v1734_v61, %v442_v9 }
 0x18b   :  { %v1208_v28 = vpop.f32.mrf.mxu0 }
 0x18c   :  { %v1763_v29 = vand.u32 2147483647, %v1757_v19  ;;  %v1766_v25 = vadd.f32 %v1208_v28, %v1734_v61  ;;  %v1769_v17 = vmul.f32 0.70710677, %v1760_v20  ;;  %v764_v28 = vmul.f32 %v748_v59, %v1750_v13 }
 0x18d   :  { %v445_v18 = vpop.f32.mrf.mxu0  ;;  %vm847_vm2 = vcmp.ge.f32.partialorder %v1757_v19, 0.0 }
 0x18e   :  { %v543_v21 = vmul.f32 0.3275911, %v1763_v29  ;;  %v1773_v22 = vmul.f32 0.70710677, %v1766_v25  ;;  %v1778_v30 = vand.u32 2147483647, %v1769_v17  ;;  %v1781_v33 = vadd.f32 %v1734_v61, %v445_v18 }
 0x18f   :  { %v1775_v46 = vpop.eup %1297  ;;  %vm845_vm3 = vcmp.ge.f32.partialorder %v1769_v17, 0.0 }
 0x190   :  { %v603_v23 = vmul.f32 1.0614054, %v1775_v46  ;;  %v559_v36 = vadd.f32 1.0, %v543_v21  ;;  %v1785_v0 = vand.u32 2147483647, %v1773_v22  ;;  %vm848_vm4 = vcmp.ge.f32.partialorder %v1773_v22, 0.0 }
 0x191   :  { %v541_v38 = vmul.f32 0.3275911, %v1778_v30  ;;  %v1793_v26 = vmul.f32 0.70710677, %v1781_v33 }
 0x192   :  { %1301 = vrcp.f32 %v559_v36  ;;  %v544_v39 = vmul.f32 0.3275911, %v1785_v0  ;;  %v619_v11 = vadd.f32 -1.4531521, %v603_v23 }
 0x193   :  { %v557_v10 = vadd.f32 1.0, %v541_v38  ;;  %v1795_v41 = vpop.eup %1299  ;;  %v1802_v50 = vand.u32 2147483647, %v1793_v26  ;;  %vm846_vm5 = vcmp.ge.f32.partialorder %v1793_v26, 0.0 }
 0x194   :  { %v560_v42 = vadd.f32 1.0, %v544_v39  ;;  %v604_v48 = vmul.f32 1.0614054, %v1795_v41  ;;  %v635_v51 = vmul.f32 %v1775_v46, %v619_v11 }
 0x195   :  { %1303 = vrcp.f32 %v557_v10  ;;  %v542_v37 = vmul.f32 0.3275911, %v1802_v50 }
 0x196   :  { %1305 = vrcp.f32 %v560_v42  ;;  %v620_v34 = vadd.f32 -1.4531521, %v604_v48  ;;  %v651_v35 = vadd.f32 1.4214138, %v635_v51  ;;  %v761_v42 = vmul.f32 %v745_v44, %v521_v53 }
 0x197   :  { %v1211_v49 = vpop.f32.mrf.mxu0  ;;  %v558_v54 = vadd.f32 1.0, %v542_v37  ;;  %v522_v48 = vand.u32 2147483647, %v1840_v15  ;;  %v783_v51 = vmul.f32 1.442695, %v764_v28  ;;  %v751_v37 = vsub.f32 0.0, %v1763_v29 }
 0x198   :  { %v1806_v31 = vadd.f32 %v1211_v49, %v1734_v61  ;;  %v636_v58 = vmul.f32 %v1795_v41, %v620_v34  ;;  %v667_v1 = vmul.f32 %v1775_v46, %v651_v35  ;;  %v777_v57 = vmul.f32 1.442695, %v761_v42 }
 0x199   :  { %v458_v47 = vpop.f32.mrf.mxu0  ;;  %1307 = vrcp.f32 %v558_v54  ;;  %v746_v59 = vsub.f32 0.0, %v522_v48 }
 0x19a   :  { %2272 = vst [vmem:[#allocation2_spill] sm:$0xff] %v1806_v31  ;;  %v1810_v52 = vadd.f32 %v1734_v61, %v458_v47  ;;  %v1814_v40 = vmul.f32 0.70710677, %v1806_v31  ;;  %v652_v9 = vadd.f32 1.4214138, %v636_v58  ;;  %1309 = vpow2.f32 %v781_v14 }
 0x19b   :  { %v1212_v27 = vpop.f32.mrf.mxu0  ;;  %v683_v39 = vadd.f32 -0.28449672, %v667_v1  ;;  %1311 = vrcp.f32 %v553_v8  ;;  %v538_v58 = vmul.f32 0.3275911, %v522_v48  ;;  %v749_v8 = vsub.f32 0.0, %v1778_v30 }
 0x19c   :  { %v1817_v55 = vadd.f32 %v1212_v27, %v1734_v61  ;;  %v1823_v56 = vmul.f32 0.70710677, %v1810_v52  ;;  %v1834_v6 = vand.u32 2147483647, %v1814_v40  ;;  %v668_v49 = vmul.f32 %v1795_v41, %v652_v9 }
 0x19d   :  { %v699_v54 = vmul.f32 %v1775_v46, %v683_v39  ;;  %v461_v53 = vpop.f32.mrf.mxu0  ;;  %1313 = vpow2.f32 %v783_v51  ;;  %v767_v9 = vmul.f32 %v751_v37, %v1763_v29  ;;  %vm851_vm11 = vcmp.ge.f32.partialorder %v1814_v40, 0.0 }
 0x19e   :  { %v1828_v62 = vand.u32 2147483647, %v1823_v56  ;;  %v1837_v12 = vmul.f32 0.70710677, %v1817_v55  ;;  %v547_v10 = vmul.f32 0.3275911, %v1834_v6 }
 0x19f   :  { %v1830_v4 = vpop.eup %1301  ;;  %v684_v44 = vadd.f32 -0.28449672, %v668_v49  ;;  %vm849_vm9 = vcmp.ge.f32.partialorder %v1823_v56, 0.0 }
 0x1a0   :  { %v607_v16 = vmul.f32 1.0614054, %v1830_v4  ;;  %v545_v23 = vmul.f32 0.3275911, %v1828_v62  ;;  %v1848_v36 = vand.u32 2147483647, %v1837_v12 }
 0x1a1   :  { %v563_v60 = vadd.f32 1.0, %v547_v10  ;;  %v752_v10 = vsub.f32 0.0, %v1785_v0  ;;  %vm852_vm10 = vcmp.ge.f32.partialorder %v1837_v12, 0.0 }
 0x1a2   :  { %v1844_v18 = vpop.eup %1303  ;;  %v623_v21 = vadd.f32 -1.4531521, %v607_v16  ;;  %v561_v34 = vadd.f32 1.0, %v545_v23  ;;  %v548_v27 = vmul.f32 0.3275911, %v1848_v36 }
 0x1a3   :  { %v1850_v38 = vpop.eup %1305  ;;  %v605_v11 = vmul.f32 1.0614054, %v1844_v18  ;;  %v715_v23 = vadd.f32 0.2548296, %v699_v54 }
 0x1a4   :  { %v608_v13 = vmul.f32 1.0614054, %v1850_v38  ;;  %v639_v47 = vmul.f32 %v1830_v4, %v623_v21  ;;  %1315 = vrcp.f32 %v561_v34  ;;  %v564_v28 = vadd.f32 1.0, %v548_v27 }
 0x1a5   :  { %v621_v32 = vadd.f32 -1.4531521, %v605_v11  ;;  %v1866_v21 = vadd.f32 %v1734_v61, %v461_v53  ;;  %1317 = vrcp.f32 %v563_v60  ;;  %v554_v11 = vadd.f32 1.0, %v538_v58 }
 0x1a6   :  { %v624_v35 = vadd.f32 -1.4531521, %v608_v13  ;;  %v1861_v1 = vpop.eup %1307  ;;  %v655_v14 = vadd.f32 1.4214138, %v639_v47  ;;  %1319 = vpow2.f32 %v777_v57  ;;  %v700_v13 = vmul.f32 %v1795_v41, %v684_v44 }
 0x1a7   :  { %v637_v16 = vmul.f32 %v1844_v18, %v621_v32  ;;  %v606_v42 = vmul.f32 1.0614054, %v1861_v1  ;;  %v1875_v51 = vmul.f32 0.70710677, %v1866_v21  ;;  %v762_v47 = vmul.f32 %v746_v59, %v522_v48  ;;  %v1310_v57 = vpop.eup %1309 }
 0x1a8   :  { %v640_v39 = vmul.f32 %v1850_v38, %v624_v35  ;;  %v671_v29 = vmul.f32 %v1830_v4, %v655_v14  ;;  %v789_v32 = vmul.f32 1.442695, %v767_v9  ;;  %1321 = vrcp.f32 %v564_v28 }
 0x1a9   :  { %v653_v49 = vadd.f32 1.4214138, %v637_v16  ;;  %v731_v37 = vmul.f32 %v1775_v46, %v715_v23  ;;  %v765_v34 = vmul.f32 %v749_v8, %v1778_v30  ;;  %v1880_v54 = vand.u32 2147483647, %v1875_v51 }
 0x1aa   :  { %v656_v27 = vadd.f32 1.4214138, %v640_v39  ;;  %1323 = vrcp.f32 %v554_v11  ;;  %v768_v35 = vmul.f32 %v752_v10, %v1785_v0  ;;  %v622_v60 = vadd.f32 -1.4531521, %v606_v42  ;;  %v1894_v10 = vpop.eup %1311 }
 0x1ab   :  { %v750_v53 = vsub.f32 0.0, %v1802_v50  ;;  %v716_v58 = vadd.f32 0.2548296, %v700_v13  ;;  %v687_v44 = vadd.f32 -0.28449672, %v671_v29  ;;  %v669_v48 = vmul.f32 %v1844_v18, %v653_v49  ;;  %v1314_v29 = vpop.eup %1313 }
 0x1ac   :  { %v546_v59 = vmul.f32 0.3275911, %v1880_v54  ;;  %v1887_v46 = vmul.f32 0.5, %v1737_v63  ;;  %v779_v30 = vmul.f32 1.442695, %v762_v47  ;;  %1325 = vpow2.f32 %v789_v32 }
 0x1ad   :  { %v755_v14 = vsub.f32 0.0, %v1834_v6  ;;  %v811_v16 = vmul.f32 %v1310_v57, %v731_v37  ;;  %v785_v9 = vmul.f32 1.442695, %v765_v34  ;;  %v672_v0 = vmul.f32 %v1850_v38, %v656_v27  ;;  %v1215_v27 = vpop.f32.mrf.mxu0 }
 0x1ae   :  { %v562_v28 = vadd.f32 1.0, %v546_v59  ;;  %v791_v23 = vmul.f32 1.442695, %v768_v35  ;;  %v638_v8 = vmul.f32 %v1861_v1, %v622_v60  ;;  %v766_v39 = vmul.f32 %v750_v53, %v1802_v50 }
 0x1af   :  { %v753_v11 = vsub.f32 0.0, %v1828_v62  ;;  %v732_v63 = vmul.f32 %v1795_v41, %v716_v58  ;;  %v703_v42 = vmul.f32 %v1830_v4, %v687_v44  ;;  %v685_v13 = vadd.f32 -0.28449672, %v669_v48 }
 0x1b0   :  { %1327 = vrcp.f32 %v562_v28  ;;  %v1900_v49 = vmul.f32 0.5, %v1788_v2  ;;  %v1903_v47 = vmul.f32 0.5, %v1744_v45  ;;  %v771_v50 = vmul.f32 %v755_v14, %v1834_v6 }
 0x1b1   :  { %1329 = vpow2.f32 %v779_v30  ;;  %v1906_v32 = vpop.eup %1315  ;;  %v827_v37 = vsub.f32 1.0, %v811_v16  ;;  %v1909_v41 = vmul.f32 0.5, %v1820_v3  ;;  %v688_v34 = vadd.f32 -0.28449672, %v672_v0 }
 0x1b2   :  { %1331 = vpow2.f32 %v785_v9  ;;  %v1911_v35 = vpop.eup %1317  ;;  %v1914_v2 = vmul.f32 0.5, %v1754_v24  ;;  %v654_v45 = vadd.f32 1.4214138, %v638_v8  ;;  %v769_v60 = vmul.f32 %v753_v11, %v1828_v62 }
 0x1b3   :  { %1333 = vpow2.f32 %v791_v23  ;;  %v1917_v53 = vpop.eup %1319  ;;  %v812_v6 = vmul.f32 %v1314_v29, %v732_v63  ;;  %v719_v57 = vadd.f32 0.2548296, %v703_v42  ;;  %v701_v58 = vmul.f32 %v1844_v18, %v685_v13  ;;  %v474_v23 = vpop.f32.mrf.mxu0 }
 0x1b4   :  { %v787_v3 = vmul.f32 1.442695, %v766_v39  ;;  %v1921_v44 = vmul.f32 0.5, %v1760_v20  ;;  %v797_v48 = vmul.f32 1.442695, %v771_v50  ;;  %v1925_v24 = vadd.f32 %v1215_v27, %v1734_v61 }
 0x1b5   :  { %v609_v59 = vmul.f32 1.0614054, %v1906_v32  ;;  %v1927_v30 = vpop.eup %1321  ;;  %v859_v14 = vsub.f32 0.0, %v827_v37  ;;  %v704_v62 = vmul.f32 %v1850_v38, %v688_v34  ;;  %v1931_v16 = vmul.f32 0.5, %v1781_v33 }
 0x1b6   :  { %2273 = vst [vmem:[#allocation3_spill] sm:$0xff] %v1925_v24  ;;  %v611_v9 = vmul.f32 1.0614054, %v1911_v35  ;;  %v670_v20 = vmul.f32 %v1861_v1, %v654_v45  ;;  %v793_v0 = vmul.f32 1.442695, %v769_v60  ;;  %v756_v28 = vsub.f32 0.0, %v1848_v36 }
 0x1b7   :  { %v1938_v8 = vmul.f32 1.0614054, %v1894_v10  ;;  %v1940_v39 = vpop.eup %1323  ;;  %v828_v11 = vsub.f32 1.0, %v812_v6  ;;  %v735_v63 = vmul.f32 %v1830_v4, %v719_v57  ;;  %v717_v33 = vadd.f32 0.2548296, %v701_v58 }
 0x1b8   :  { %1335 = vpow2.f32 %v787_v3  ;;  %v625_v42 = vadd.f32 -1.4531521, %v609_v59  ;;  %v612_v13 = vmul.f32 1.0614054, %v1927_v30  ;;  %v1945_v29 = vmul.f32 0.70710677, %v1925_v24  ;;  %v1216_v24 = vpop.f32.mrf.mxu0 }
 0x1b9   :  { %1337 = vpow2.f32 %v797_v48  ;;  %v1326_v50 = vpop.eup %1325  ;;  %v875_v34 = vsel %vm843_vm0, %v827_v37, %v859_v14  ;;  %v720_v27 = vadd.f32 0.2548296, %v704_v62  ;;  %v627_v45 = vadd.f32 -1.4531521, %v611_v9 }
 0x1ba   :  { %2274 = vst [vmem:[#allocation4_spill] sm:$0xff] %v1945_v29  ;;  %v1950_v60 = vadd.f32 %v1734_v61, %v474_v23  ;;  %v686_v6 = vadd.f32 -0.28449672, %v670_v20  ;;  %1339 = vpow2.f32 %v793_v0  ;;  %v772_v4 = vmul.f32 %v756_v28, %v1848_v36 }
 0x1bb   :  { %v1954_v57 = vand.u32 2147483647, %v1945_v29  ;;  %v860_v58 = vsub.f32 0.0, %v828_v11  ;;  %v815_v3 = vmul.f32 %v1326_v50, %v735_v63  ;;  %v733_v48 = vmul.f32 %v1844_v18, %v717_v33 }
 0x1bc   :  { %2275 = vst [vmem:[#allocation5_spill] sm:$0xff] %v1950_v60  ;;  %v1958_v59 = vmul.f32 0.70710677, %v1950_v60  ;;  %v891_v37 = vadd.f32 1.0, %v875_v34  ;;  %v641_v14 = vmul.f32 %v1906_v32, %v625_v42  ;;  %v628_v62 = vadd.f32 -1.4531521, %v612_v13 }
 0x1bd   :  { %v1960_v5 = vpop.eup %1327  ;;  %v551_v9 = vmul.f32 0.3275911, %v1954_v57  ;;  %v736_v36 = vmul.f32 %v1850_v38, %v720_v27  ;;  %v643_v0 = vmul.f32 %v1911_v35, %v627_v45  ;;  %v754_v18 = vsub.f32 0.0, %v1880_v54 }
 0x1be   :  { %2276 = vst [vmem:[#allocation6_spill] sm:$0xff] %v1958_v59  ;;  %v1964_v20 = vpop.eup %1329  ;;  %v610_v28 = vmul.f32 1.0614054, %v1960_v5  ;;  %v702_v63 = vmul.f32 %v1861_v1, %v686_v6  ;;  %v799_v33 = vmul.f32 1.442695, %v772_v4  ;;  %v876_v38 = vsel %vm844_vm1, %v828_v11, %v860_v58 }
 0x1bf   :  { %v1332_v23 = vpop.eup %1331  ;;  %v567_v42 = vadd.f32 1.0, %v551_v9  ;;  %v1973_v13 = vand.u32 2147483647, %v1958_v59  ;;  %v831_v34 = vsub.f32 1.0, %v815_v3  ;;  %v657_v60 = vadd.f32 1.4214138, %v641_v14 }
 0x1c0   :  { %v1334_v50 = vpop.eup %1333  ;;  %v813_v27 = vmul.f32 %v1332_v23, %v733_v48  ;;  %v626_v45 = vadd.f32 -1.4531521, %v610_v28  ;;  %v644_v29 = vmul.f32 %v1927_v30, %v628_v62  ;;  %v659_v4 = vadd.f32 1.4214138, %v643_v0  ;;  %v477_v28 = vpop.f32.mrf.mxu0 }
 0x1c1   :  { %1341 = vrcp.f32 %v567_v42  ;;  %v549_v31 = vmul.f32 0.3275911, %v1973_v13  ;;  %v1979_v6 = vmul.f32 %v1334_v50, %v736_v36  ;;  %v770_v59 = vmul.f32 %v754_v18, %v1880_v54 }
 0x1c2   :  { %v642_v9 = vmul.f32 %v1960_v5, %v626_v45  ;;  %v1984_v7 = vmul.f32 %v891_v37, %v1887_v46  ;;  %v718_v11 = vadd.f32 0.2548296, %v702_v63  ;;  %1343 = vpow2.f32 %v799_v33 }
 0x1c3   :  { %v565_v58 = vadd.f32 1.0, %v549_v31  ;;  %v892_v3 = vadd.f32 1.0, %v876_v38  ;;  %v863_v48 = vsub.f32 0.0, %v831_v34  ;;  %v829_v14 = vsub.f32 1.0, %v813_v27 }
 0x1c4   :  { %v658_v62 = vadd.f32 1.4214138, %v642_v9  ;;  %v673_v0 = vmul.f32 %v1906_v32, %v657_v60  ;;  %v660_v23 = vadd.f32 1.4214138, %v644_v29  ;;  %v1989_v54 = vadd.f32 %v1216_v24, %v1734_v61 }
 0x1c5   :  { %v1336_v36 = vpop.eup %1335  ;;  %1345 = vrcp.f32 %v565_v58  ;;  %v832_v37 = vsub.f32 1.0, %v1979_v6  ;;  %v675_v18 = vmul.f32 %v1911_v35, %v659_v4  ;;  %v795_v63 = vmul.f32 1.442695, %v770_v59 }
 0x1c6   :  { %2277 = vst [vmem:[#allocation7_spill] sm:$0xff] %v1989_v54  ;;  %v1991_v46 = vpop.eup %1337  ;;  %v674_v31 = vmul.f32 %v1960_v5, %v658_v62  ;;  %v734_v33 = vmul.f32 %v1861_v1, %v718_v11  ;;  %v1998_v42 = vmul.f32 0.70710677, %v1989_v54  ;;  %v2001_v29 = vadd.f32 %v1734_v61, %v477_v28 }
 0x1c7   :  { %v602_v24 = vmul.f32 1.0614054, %v1940_v39  ;;  %v2004_v60 = vpop.eup %1339  ;;  %v2007_v50 = vmul.f32 %v892_v3, %v1903_v47  ;;  %v2011_v38 = vsel %vm847_vm2, %v831_v34, %v863_v48  ;;  %v861_v59 = vsub.f32 0.0, %v829_v14 }
 0x1c8   :  { %2278 = vst [vmem:[#allocation8_spill] sm:$0xff] %v2001_v29  ;;  %v690_v1 = vadd.f32 -0.28449672, %v674_v31  ;;  %v689_v27 = vadd.f32 -0.28449672, %v673_v0  ;;  %v676_v45 = vmul.f32 %v1927_v30, %v660_v23  ;;  %1347 = vpow2.f32 %v795_v63 }
 0x1c9   :  { %v2016_v61 = vand.u32 2147483647, %v1998_v42  ;;  %v2019_v6 = vmul.f32 0.70710677, %v2001_v29  ;;  %v691_v4 = vadd.f32 -0.28449672, %v675_v18  ;;  %v814_v9 = vmul.f32 %v1336_v36, %v734_v33 }
 0x1ca   :  { %v617_v47 = vadd.f32 -1.4531521, %v1938_v8  ;;  %v618_v19 = vadd.f32 -1.4531521, %v602_v24  ;;  %v864_v34 = vsub.f32 0.0, %v832_v37  ;;  %v877_v3 = vsel %vm845_vm3, %v829_v14, %v861_v59 }
 0x1cb   :  { %v552_v11 = vmul.f32 0.3275911, %v2016_v61  ;;  %v2024_v58 = vand.u32 2147483647, %v2019_v6  ;;  %v706_v48 = vmul.f32 %v1960_v5, %v690_v1  ;;  %v705_v0 = vmul.f32 %v1906_v32, %v689_v27 }
 0x1cc   :  { %v633_v62 = vmul.f32 %v1894_v10, %v617_v47  ;;  %v634_v28 = vmul.f32 %v1940_v39, %v618_v19  ;;  %v692_v8 = vadd.f32 -0.28449672, %v676_v45  ;;  %v707_v31 = vmul.f32 %v1911_v35, %v691_v4 }
 0x1cd   :  { %v568_v23 = vadd.f32 1.0, %v552_v11  ;;  %v550_v36 = vmul.f32 0.3275911, %v2024_v58  ;;  %v757_v63 = vsub.f32 0.0, %v1973_v13  ;;  %v830_v33 = vsub.f32 1.0, %v814_v9 }
 0x1ce   :  { %v2033_v18 = vpop.eup %1341  ;;  %v649_v17 = vadd.f32 1.4214138, %v633_v62  ;;  %v650_v14 = vadd.f32 1.4214138, %v634_v28  ;;  %v722_v27 = vadd.f32 0.2548296, %v706_v48  ;;  %v2048_v9 = vsel %vm848_vm4, %v832_v37, %v864_v34 }
 0x1cf   :  { %v615_v24 = vmul.f32 1.0614054, %v2033_v18  ;;  %1349 = vrcp.f32 %v568_v23  ;;  %v566_v59 = vadd.f32 1.0, %v550_v36  ;;  %v2039_v1 = vpop.eup %1343  ;;  %v759_v45 = vsub.f32 0.0, %v1954_v57 }
 0x1d0   :  { %v665_v47 = vmul.f32 %v1894_v10, %v649_v17  ;;  %v666_v4 = vmul.f32 %v1940_v39, %v650_v14  ;;  %v2044_v19 = vadd.f32 1.0, %v877_v3  ;;  %v721_v11 = vadd.f32 0.2548296, %v705_v0 }
 0x1d1   :  { %v631_v62 = vadd.f32 -1.4531521, %v615_v24  ;;  %v708_v23 = vmul.f32 %v1927_v30, %v692_v8  ;;  %v773_v48 = vmul.f32 %v757_v63, %v1973_v13  ;;  %1351 = vrcp.f32 %v566_v59 }
 0x1d2   :  { %v2050_v28 = vpop.eup %1345  ;;  %v681_v36 = vadd.f32 -0.28449672, %v665_v47  ;;  %v723_v54 = vadd.f32 0.2548296, %v707_v31  ;;  %v682_v14 = vadd.f32 -0.28449672, %v666_v4  ;;  %v738_v22 = vmul.f32 %v1960_v5, %v722_v27 }
 0x1d3   :  { %v647_v17 = vmul.f32 %v2033_v18, %v631_v62  ;;  %v613_v3 = vmul.f32 1.0614054, %v2050_v28  ;;  %v862_v29 = vsub.f32 0.0, %v830_v33  ;;  %v775_v37 = vmul.f32 %v759_v45, %v1954_v57 }
 0x1d4   :  { %v697_v34 = vmul.f32 %v1894_v10, %v681_v36  ;;  %v760_v8 = vsub.f32 0.0, %v2016_v61  ;;  %v698_v13 = vmul.f32 %v1940_v39, %v682_v14  ;;  %v737_v31 = vmul.f32 %v1906_v32, %v721_v11 }
 0x1d5   :  { %v663_v0 = vadd.f32 1.4214138, %v647_v17  ;;  %v629_v24 = vadd.f32 -1.4531521, %v613_v3  ;;  %v724_v63 = vadd.f32 0.2548296, %v708_v23  ;;  %v1348_v62 = vpop.eup %1347  ;;  %v878_v4 = vsel %vm846_vm5, %v830_v33, %v862_v29 }
 0x1d6   :  { %v801_v59 = vmul.f32 1.442695, %v773_v48  ;;  %v713_v47 = vadd.f32 0.2548296, %v697_v34  ;;  %v758_v27 = vsub.f32 0.0, %v2024_v58  ;;  %v739_v36 = vmul.f32 %v1911_v35, %v723_v54 }
 0x1d7   :  { %v679_v5 = vmul.f32 %v2033_v18, %v663_v0  ;;  %v645_v57 = vmul.f32 %v2050_v28, %v629_v24  ;;  %v714_v45 = vadd.f32 0.2548296, %v698_v13  ;;  %v818_v17 = vmul.f32 %v1348_v62, %v738_v22 }
 0x1d8   :  { %v729_v32 = vmul.f32 %v1894_v10, %v713_v47  ;;  %v805_v11 = vmul.f32 1.442695, %v775_v37  ;;  %v776_v48 = vmul.f32 %v760_v8, %v2016_v61  ;;  %v817_v14 = vmul.f32 %v2004_v60, %v737_v31 }
 0x1d9   :  { %v661_v23 = vadd.f32 1.4214138, %v645_v57  ;;  %v730_v3 = vmul.f32 %v1940_v39, %v714_v45  ;;  %v740_v34 = vmul.f32 %v1927_v30, %v724_v63  ;;  %1353 = vpow2.f32 %v801_v59 }
 0x1da   :  { %v809_v26 = vmul.f32 %v1917_v53, %v729_v32  ;;  %vm850_vm8 = vcmp.ge.f32.partialorder %v1875_v51, 0.0  ;;  %v695_v35 = vadd.f32 -0.28449672, %v679_v5  ;;  %v774_v54 = vmul.f32 %v758_v27, %v2024_v58 }
 0x1db   :  { %v677_v10 = vmul.f32 %v2050_v28, %v661_v23  ;;  %v810_v29 = vmul.f32 %v1964_v20, %v730_v3  ;;  %v894_v61 = vadd.f32 1.0, %v878_v4  ;;  %v2083_v39 = vmul.f32 %v1991_v46, %v739_v36 }
 0x1dc   :  { %v2080_v33 = vpop.eup %1349  ;;  %v834_v60 = vsub.f32 1.0, %v818_v17  ;;  %v825_v30 = vsub.f32 1.0, %v809_v26  ;;  %1355 = vpow2.f32 %v805_v11  ;;  %v807_v37 = vmul.f32 1.442695, %v776_v48 }
 0x1dd   :  { %v693_v53 = vadd.f32 -0.28449672, %v677_v10  ;;  %v616_v22 = vmul.f32 1.0614054, %v2080_v33  ;;  %v833_v0 = vsub.f32 1.0, %v817_v14  ;;  %v2088_v58 = vmul.f32 %v2039_v1, %v740_v34 }
 0x1de   :  { %v826_v20 = vsub.f32 1.0, %v810_v29  ;;  %v857_v24 = vsub.f32 0.0, %v825_v30  ;;  %v2090_v8 = vpop.eup %1351  ;;  %v711_v46 = vmul.f32 %v2033_v18, %v695_v35  ;;  %v803_v63 = vmul.f32 1.442695, %v774_v54 }
 0x1df   :  { %v709_v13 = vmul.f32 %v2050_v28, %v693_v53  ;;  %v632_v31 = vadd.f32 -1.4531521, %v616_v22  ;;  %v866_v59 = vsub.f32 0.0, %v834_v60  ;;  %v614_v47 = vmul.f32 1.0614054, %v2090_v8 }
 0x1e0   :  { %v858_v62 = vsub.f32 0.0, %v826_v20  ;;  %v873_v5 = vsel %vm841_vm6, %v825_v30, %v857_v24  ;;  %1357 = vpow2.f32 %v807_v37  ;;  %v910_v45 = vmul.f32 %v894_v61, %v1931_v16 }
 0x1e1   :  { %v725_v57 = vadd.f32 0.2548296, %v709_v13  ;;  %v648_v1 = vmul.f32 %v2080_v33, %v632_v31  ;;  %v889_v27 = vadd.f32 1.0, %v873_v5  ;;  %v865_v4 = vsub.f32 0.0, %v833_v0 }
 0x1e2   :  { %v630_v36 = vadd.f32 -1.4531521, %v614_v47  ;;  %v874_v17 = vsel %vm842_vm7, %v826_v20, %v858_v62  ;;  %v909_v32 = vmul.f32 %v2044_v19, %v1921_v44  ;;  %v727_v11 = vadd.f32 0.2548296, %v711_v46 }
 0x1e3   :  { %v664_v23 = vadd.f32 1.4214138, %v648_v1  ;;  %v890_v48 = vadd.f32 1.0, %v874_v17  ;;  %v882_v43 = vsel %vm850_vm8, %v834_v60, %v866_v59  ;;  %v741_v3 = vmul.f32 %v2050_v28, %v725_v57 }
 0x1e4   :  { %v646_v14 = vmul.f32 %v2090_v8, %v630_v36  ;;  %1359 = vpow2.f32 %v803_v63  ;;  %v836_v16 = vsub.f32 1.0, %v2088_v58  ;;  %v905_v15 = vmul.f32 %v889_v27, %v1900_v49 }
 0x1e5   :  { %v680_v34 = vmul.f32 %v2080_v33, %v664_v23  ;;  %v906_v26 = vmul.f32 %v890_v48, %v1909_v41  ;;  %v835_v44 = vsub.f32 1.0, %v2083_v39  ;;  %v881_v19 = vsel %vm849_vm9, %v833_v0, %v865_v4  ;;  %v2280_v23 = vld [vmem:[#allocation6_spill] sm:$0xff] }
 0x1e6   :  { %v662_v51 = vadd.f32 1.4214138, %v646_v14  ;;  %v923_v35 = vpack.c.bf16 %v910_v45, %v909_v32  ;;  %v1354_v10 = vpop.eup %1353  ;;  %v898_v28 = vadd.f32 1.0, %v882_v43  ;;  %v743_v54 = vmul.f32 %v2033_v18, %v727_v11 }
 0x1e7   :  { %v696_v29 = vadd.f32 -0.28449672, %v680_v34  ;;  %v921_v61 = vpack.c.bf16 %v906_v26, %v905_v15  ;;  %v896_v60 = vadd.f32 1.0, %v2048_v9  ;;  %v821_v30 = vmul.f32 %v1354_v10, %v741_v3  ;;  %v2281_v34 = vld [vmem:[#allocation4_spill] sm:$0xff] }
 0x1e8   :  { %v678_v49 = vmul.f32 %v2090_v8, %v662_v51  ;;  %v922_v41 = vpack.c.bf16 %v2007_v50, %v1984_v7  ;;  %v897_v39 = vadd.f32 1.0, %v881_v19  ;;  %v868_v53 = vsub.f32 0.0, %v836_v16 }
 0x1e9   :  { %v498_v56 = vmul.f32 0.5, %v1866_v21  ;;  %v712_v22 = vmul.f32 %v2080_v33, %v696_v29  ;;  %1233 = vmatprep.mubr.bf16.mxu1 %v921_v61  ;;  %v1356_v37 = vpop.eup %1355  ;;  %v895_v18 = vadd.f32 1.0, %v2011_v38  ;;  %v496_v0 = vmul.f32 0.5, %v1766_v25 }
 0x1ea   :  { %v497_v9 = vmul.f32 0.5, %v1810_v52  ;;  %v694_v58 = vadd.f32 -0.28449672, %v678_v49  ;;  %1234 = vmatmul.mubr.bf16.vlgmr.msra.gmra.mxu1 %v922_v41  ;;  %v867_v20 = vsub.f32 0.0, %v835_v44  ;;  %v823_v46 = vmul.f32 %v1356_v37, %v743_v54  ;;  %v2285_v41 = vld [vmem:[#allocation3_spill] sm:$0xff] }
 0x1eb   :  { %v914_v24 = vmul.f32 %v898_v28, %v498_v56  ;;  %v728_v7 = vadd.f32 0.2548296, %v712_v22  ;;  %1237 = vmatprep.mubr.bf16.mxu1 %v923_v35  ;;  %v912_v50 = vmul.f32 %v896_v60, %v496_v0  ;;  %v837_v21 = vsub.f32 1.0, %v821_v30  ;;  %v2282_v35 = vld [vmem:[#allocation5_spill] sm:$0xff]  ;;  %v2283_v28 = vld [vmem:[#allocation8_spill] sm:$0xff] }
 0x1ec   :  { %v710_v13 = vmul.f32 %v2090_v8, %v694_v58  ;;  %v913_v31 = vmul.f32 %v897_v39, %v497_v9  ;;  %v884_v63 = vsel %vm852_vm10, %v836_v16, %v868_v53  ;;  %v911_v52 = vmul.f32 %v895_v18, %v1914_v2  ;;  %v2279_v2 = vld [vmem:[#allocation2_spill] sm:$0xff]  ;;  %v1361_v58 = vld [vmem:[%s2257_s0 + $0x10] sm:$0xff] }
 0x1ed   :  { %v744_v38 = vmul.f32 %v2080_v33, %v728_v7  ;;  %v1358_v25 = vpop.eup %1357  ;;  %v883_v47 = vsel %vm851_vm11, %v835_v44, %v867_v20  ;;  %v839_v62 = vsub.f32 1.0, %v823_v46  ;;  %v900_v1 = vadd.f32 1.0, %v884_v63  ;;  %v2143_v37 = vld [vmem:[%s2263_s6] ss:$0 sm:$0xff] }
 0x1ee   :  { %v726_v59 = vadd.f32 0.2548296, %v710_v13  ;;  %v925_v57 = vpack.c.bf16 %v914_v24, %v913_v31  ;;  %v869_v27 = vsub.f32 0.0, %v837_v21  ;;  %v924_v45 = vpack.c.bf16 %v912_v50, %v911_v52  ;;  %v1362_v7 = vld [vmem:[%s2257_s0] sm:$0xff]  ;;  %v1363_v31 = vld [vmem:[%s2257_s0 + $0x18] sm:$0xff]  ;;  %v1364_v52 = vld [vmem:[%s2257_s0 + $0x8] sm:$0xff] }
 0x1ef   :  { %v824_v5 = vmul.f32 %v1358_v25, %v744_v38  ;;  %v899_v17 = vadd.f32 1.0, %v883_v47  ;;  %v500_v33 = vmul.f32 0.5, %v1817_v55  ;;  %v499_v11 = vmul.f32 0.5, %v2279_v2 }
 0x1f0   :  { %v742_v12 = vmul.f32 %v2090_v8, %v726_v59  ;;  %v871_v40 = vsub.f32 0.0, %v839_v62  ;;  %vm853_vm12 = vcmp.ge.f32.partialorder %v2280_v23, 0.0  ;;  %vm856_vm13 = vcmp.ge.f32.partialorder %v1998_v42, 0.0  ;;  %v2284_v42 = vld [vmem:[#allocation7_spill] sm:$0xff] }
 0x1f1   :  { %v1360_v4 = vpop.eup %1359  ;;  %v840_v36 = vsub.f32 1.0, %v824_v5  ;;  %v916_v43 = vmul.f32 %v900_v1, %v500_v33  ;;  %v885_v3 = vsel %vm853_vm12, %v837_v21, %v869_v27  ;;  %v915_v16 = vmul.f32 %v899_v17, %v499_v11  ;;  %v1365_v5 = vld [vmem:[%s2257_s0 + $0x30] sm:$0xff]  ;;  %v1367_v17 = vld [vmem:[%s2257_s0 + $0x38] sm:$0xff]  ;;  %v1368_v11 = vld [vmem:[%s2257_s0 + $0x28] sm:$0xff] }
 0x1f2   :  { %v822_v32 = vmul.f32 %v1360_v4, %v742_v12  ;;  %1238 = vmatmul.mubr.bf16.gmra.mxu1 %v924_v45  ;;  %vm855_vm14 = vcmp.ge.f32.partialorder %v2281_v34, 0.0  ;;  %v901_v26 = vadd.f32 1.0, %v885_v3  ;;  %vm854_vm15 = vcmp.ge.f32.partialorder %v2019_v6, 0.0  ;;  %v1366_v12 = vld [vmem:[%s2257_s0 + $0x20] sm:$0xff] }
 0x1f3   :  { %v872_v48 = vsub.f32 0.0, %v840_v36  ;;  %1241 = vmatprep.mubr.bf16.mxu1 %v925_v57  ;;  %v887_v55 = vsel %vm855_vm14, %v839_v62, %v871_v40  ;;  %v926_v51 = vpack.c.bf16 %v916_v43, %v915_v16  ;;  %v501_v10 = vmul.f32 0.5, %v2282_v35  ;;  %v1369_v43 = vld [vmem:[%s2257_s0 + $0x50] sm:$0xff]  ;;  %v1370_v16 = vld [vmem:[%s2257_s0 + $0x40] sm:$0xff]  ;;  %v1372_v35 = vld [vmem:[%s2257_s0 + $0x48] sm:$0xff] }
 0x1f4   :  { %v838_v8 = vsub.f32 1.0, %v822_v32  ;;  %v502_v54 = vmul.f32 0.5, %v2283_v28  ;;  %v903_v61 = vadd.f32 1.0, %v887_v55  ;;  %v504_v60 = vmul.f32 0.5, %v2284_v42 }
 0x1f5   :  { %v888_v14 = vsel %vm856_vm13, %v840_v36, %v872_v48  ;;  %v917_v30 = vmul.f32 %v901_v26, %v501_v10  ;;  %v503_v39 = vmul.f32 0.5, %v2285_v41  ;;  %v1371_v26 = vld [vmem:[%s2257_s0 + $0x58] sm:$0xff] }
 0x1f6   :  { %v870_v15 = vsub.f32 0.0, %v838_v8  ;;  %v904_v44 = vadd.f32 1.0, %v888_v14 }
 0x1f7   :  { %v919_v22 = vmul.f32 %v903_v61, %v503_v39 }
 0x1f8   :  { %v886_v19 = vsel %vm854_vm15, %v838_v8, %v870_v15  ;;  %v920_v53 = vmul.f32 %v904_v44, %v504_v60 }
 0x1f9   :  { %v902_v29 = vadd.f32 1.0, %v886_v19 }
 0x1fa   :  { %1242 = vmatmul.mubr.bf16.gmra.mxu1 %v926_v51  ;;  %v928_v6 = vpack.c.bf16 %v920_v53, %v919_v22  ;;  %v1375_v53 = vld [vmem:[%s2257_s0 + $0x78] sm:$0xff] }
 0x1fb   :  { %v918_v49 = vmul.f32 %v902_v29, %v502_v54  ;;  %v1373_v29 = vld [vmem:[%s2257_s0 + $0x70] sm:$0xff] }
 0x1fd   :  { %v927_v56 = vpack.c.bf16 %v918_v49, %v917_v30  ;;  %v1374_v30 = vld [vmem:[%s2257_s0 + $0x60] sm:$0xff] }
 0x1ff   :  { %1245 = vmatprep.mubr.bf16.mxu1 %v927_v56 }
 0x202   :  { %1246 = vmatmul.mubr.bf16.gmra.mxu1 %v928_v6  ;;  %v1376_v6 = vld [vmem:[%s2257_s0 + $0x68] sm:$0xff] }
 0x2aa   :  { %v1235_v18 = vpop.f32.mrf.mxu1 }
 0x2ab   :  { %v1043_v0 = vadd.f32 %v1235_v18, %v2143_v37 }
 0x2ac   :  { %v1034_v9 = vpop.f32.mrf.mxu1 }
 0x2ad   :  { %v1099_v20 = vadd.f32 %v1361_v58, %v1043_v0  ;;  %v1035_v24 = vadd.f32 %v2143_v37, %v1034_v9 }
 0x2ae   :  { %v1236_v46 = vpop.f32.mrf.mxu1 }
 0x2af   :  { %1115 = vst [vmem:[%s2264_s7 + $0x10] sm:$0xff] %v1099_v20  ;;  %v1097_v50 = vadd.f32 %v1362_v7, %v1035_v24  ;;  %v1046_v21 = vadd.f32 %v1236_v46, %v2143_v37 }
 0x2b0   :  { %v1037_v13 = vpop.f32.mrf.mxu1 }
 0x2b1   :  { %1113 = vst [vmem:[%s2264_s7] sm:$0xff] %v1097_v50  ;;  %v1100_v63 = vadd.f32 %v1363_v31, %v1046_v21  ;;  %v1038_v38 = vadd.f32 %v2143_v37, %v1037_v13 }
 0x2b2   :  { %v1239_v25 = vpop.f32.mrf.mxu1 }
 0x2b3   :  { %1116 = vst [vmem:[%s2264_s7 + $0x18] sm:$0xff] %v1100_v63  ;;  %v1098_v59 = vadd.f32 %v1364_v52, %v1038_v38  ;;  %v1059_v47 = vadd.f32 %v1239_v25, %v2143_v37 }
 0x2b4   :  { %v1050_v62 = vpop.f32.mrf.mxu1 }
 0x2b5   :  { %1114 = vst [vmem:[%s2264_s7 + $0x8] sm:$0xff] %v1098_v59  ;;  %v1103_v57 = vadd.f32 %v1365_v5, %v1059_v47  ;;  %v1051_v1 = vadd.f32 %v2143_v37, %v1050_v62 }
 0x2b6   :  { %v1240_v27 = vpop.f32.mrf.mxu1 }
 0x2b7   :  { %1119 = vst [vmem:[%s2264_s7 + $0x30] sm:$0xff] %v1103_v57  ;;  %v1101_v45 = vadd.f32 %v1366_v12, %v1051_v1  ;;  %v1062_v4 = vadd.f32 %v1240_v27, %v2143_v37 }
 0x2b8   :  { %v1053_v36 = vpop.f32.mrf.mxu1 }
 0x2b9   :  { %1117 = vst [vmem:[%s2264_s7 + $0x20] sm:$0xff] %v1101_v45  ;;  %v1104_v33 = vadd.f32 %v1367_v17, %v1062_v4  ;;  %v1054_v32 = vadd.f32 %v2143_v37, %v1053_v36 }
 0x2ba   :  { %v1243_v2 = vpop.f32.mrf.mxu1 }
 0x2bb   :  { %1120 = vst [vmem:[%s2264_s7 + $0x38] sm:$0xff] %v1104_v33  ;;  %v1102_v40 = vadd.f32 %v1368_v11, %v1054_v32  ;;  %v1075_v23 = vadd.f32 %v1243_v2, %v2143_v37 }
 0x2bc   :  { %v1066_v48 = vpop.f32.mrf.mxu1 }
 0x2bd   :  { %1118 = vst [vmem:[%s2264_s7 + $0x28] sm:$0xff] %v1102_v40  ;;  %v1107_v3 = vadd.f32 %v1369_v43, %v1075_v23  ;;  %v1067_v8 = vadd.f32 %v2143_v37, %v1066_v48 }
 0x2be   :  { %v1244_v14 = vpop.f32.mrf.mxu1 }
 0x2bf   :  { %1123 = vst [vmem:[%s2264_s7 + $0x50] sm:$0xff] %v1107_v3  ;;  %v1105_v34 = vadd.f32 %v1370_v16, %v1067_v8  ;;  %v1078_v15 = vadd.f32 %v1244_v14, %v2143_v37 }
 0x2c0   :  { %v1069_v55 = vpop.f32.mrf.mxu1 }
 0x2c1   :  { %1121 = vst [vmem:[%s2264_s7 + $0x40] sm:$0xff] %v1105_v34  ;;  %v1108_v44 = vadd.f32 %v1371_v26, %v1078_v15  ;;  %v1070_v19 = vadd.f32 %v2143_v37, %v1069_v55 }
 0x2c2   :  { %v1247_v51 = vpop.f32.mrf.mxu1 }
 0x2c3   :  { %1124 = vst [vmem:[%s2264_s7 + $0x58] sm:$0xff] %v1108_v44  ;;  %v1106_v10 = vadd.f32 %v1372_v35, %v1070_v19  ;;  %v1091_v28 = vadd.f32 %v1247_v51, %v2143_v37 }
 0x2c4   :  { %v1082_v54 = vpop.f32.mrf.mxu1 }
 0x2c5   :  { %1122 = vst [vmem:[%s2264_s7 + $0x48] sm:$0xff] %v1106_v10  ;;  %v1111_v61 = vadd.f32 %v1373_v29, %v1091_v28  ;;  %v1083_v42 = vadd.f32 %v2143_v37, %v1082_v54 }
 0x2c6   :  { %v1248_v60 = vpop.f32.mrf.mxu1 }
 0x2c7   :  { %1127 = vst [vmem:[%s2264_s7 + $0x70] sm:$0xff] %v1111_v61  ;;  %v1109_v49 = vadd.f32 %v1374_v30, %v1083_v42  ;;  %v1094_v41 = vadd.f32 %v1248_v60, %v2143_v37 }
 0x2c8   :  { %v1085_v39 = vpop.f32.mrf.mxu1 }
 0x2c9   :  { %1125 = vst [vmem:[%s2264_s7 + $0x60] sm:$0xff] %v1109_v49  ;;  %v1112_v56 = vadd.f32 %v1375_v53, %v1094_v41  ;;  %v1086_v22 = vadd.f32 %v2143_v37, %v1085_v39 }
 0x2cb   :  { %1128 = vst [vmem:[%s2264_s7 + $0x78] sm:$0xff] %v1112_v56  ;;  %v1110_v18 = vadd.f32 %v1376_v6, %v1086_v22 }
 0x2cd   :  { %1126 = vst [vmem:[%s2264_s7 + $0x68] sm:$0xff] %v1110_v18 }

// kernel: forward.59
= control target key start
LH: loop header
LB: loop body
LE: loop exit
PB: predicated region body
PF: predicated region fallthrough
CT: control target
= control target key end

     0   :  { %s334_s1 = inlined_call_operand.vmem [shape: bf16[256,128], index: 1, kind: input, shape index: {}]   ;;  %s335_s0 = inlined_call_operand.vmem [shape: f32[8,256], index: 0, kind: input, shape index: {}]   ;;  %s336_s2 = inlined_call_operand.vmem [shape: f32[1,128], index: 2, kind: input, shape index: {}]   ;;  %s337_s3 = inlined_call_operand.vmem [shape: f32[8,128], index: 3, kind: output, shape index: {}]  }
   0x1   :  { %v238_v0 = vld [vmem:[%s334_s1 + $0x78] sm:$0xff]   ;;  %v240_v2 = vld [vmem:[%s334_s1 + $0x70] sm:$0xff]   ;;  %v242_v4 = vld [vmem:[%s334_s1 + $0x68] sm:$0xff]  }
   0x2   :  { %v239_v1 = vld [vmem:[%s334_s1 + $0x38] sm:$0xff]   ;;  %216 = vmatprep.subr.bf16.mxu0 %v238_v0  ;;  %v241_v3 = vld [vmem:[%s334_s1 + $0x30] sm:$0xff]   ;;  %v243_v5 = vld [vmem:[%s334_s1 + $0x28] sm:$0xff]  }
   0x3   :  { %217 = vmatpush3.bf16.msra.mxu0 %v239_v1  ;;  %v244_v6 = vld [vmem:[%s334_s1 + $0x60] sm:$0xff]   ;;  %v246_v8 = vld [vmem:[%s334_s1 + $0x58] sm:$0xff]   ;;  %v248_v10 = vld [vmem:[%s334_s1 + $0x50] sm:$0xff]  }
   0x4   :  { %218 = vmatprep.subr.bf16.mxu0 %v240_v2  ;;  %v245_v7 = vld [vmem:[%s334_s1 + $0x20] sm:$0xff]   ;;  %v247_v9 = vld [vmem:[%s334_s1 + $0x18] sm:$0xff]   ;;  %v16_v11 = vld [vmem:[%s335_s0 + $0x8] sm:$0xff] }
   0x5   :  { %v18_v12 = vpack.c.bf16 %v16_v11, %v16_v11  ;;  %v249_v13 = vld [vmem:[%s334_s1 + $0x10] sm:$0xff]   ;;  %v250_v14 = vld [vmem:[%s334_s1 + $0x48] sm:$0xff]   ;;  %v252_v16 = vld [vmem:[%s334_s1 + $0x40] sm:$0xff]  }
   0x6   :  { %v251_v15 = vld [vmem:[%s334_s1 + $0x8] sm:$0xff]   ;;  %v253_v17 = vld [vmem:[%s334_s1] sm:$0xff]  }
   0x7   :  { %219 = vmatpush3.bf16.msra.mxu0 %v241_v3  ;;  %186 = vmatprep.mubr.bf16.mxu0 %v18_v12  ;;  %v15_v18 = vld [vmem:[%s335_s0] sm:$0xff] }
   0x8   :  { %220 = vmatprep.subr.bf16.mxu0 %v242_v4  ;;  %v17_v19 = vpack.c.bf16 %v15_v18, %v15_v18  ;;  %v199_v21 = vld [vmem:[%s336_s2] ss:$0 sm:$0xff] }
   0xb   :  { %221 = vmatpush3.bf16.msra.mxu0 %v243_v5 }
   0xc   :  { %222 = vmatprep.subr.bf16.mxu0 %v244_v6 }
   0xf   :  { %223 = vmatpush3.bf16.msra.mxu0 %v245_v7 }
  0x10   :  { %224 = vmatprep.subr.bf16.mxu0 %v246_v8 }
  0x13   :  { %225 = vmatpush3.bf16.msra.mxu0 %v247_v9 }
  0x14   :  { %226 = vmatprep.subr.bf16.mxu0 %v248_v10 }
  0x17   :  { %227 = vmatpush3.bf16.msra.mxu0 %v249_v13 }
  0x18   :  { %228 = vmatprep.subr.bf16.mxu0 %v250_v14 }
  0x1b   :  { %229 = vmatpush3.bf16.msra.mxu0 %v251_v15 }
  0x1c   :  { %230 = vmatprep.subr.bf16.mxu0 %v252_v16 }
  0x1f   :  { %231 = vmatpush3.bf16.msra.mxu0 %v253_v17 }
  0x22   :  { %187 = vmatmul.mubr.bf16.vlgmr.msra.gmra.mxu0 %v17_v19 }
  0xe2   :  { %v232_v20 = vpop.f32.mrf.mxu0 }
  0xe4   :  { %v233_v22 = vpop.f32.mrf.mxu0 }
  0xe5   :  { %v234_v23 = vadd.f32 %v233_v22, %v232_v20 }
  0xe6   :  { %v235_v24 = vpop.f32.mrf.mxu0 }
  0xe7   :  { %v189_v25 = vadd.f32 %v234_v23, %v199_v21 }
  0xe8   :  { %v236_v26 = vpop.f32.mrf.mxu0 }
  0xe9   :  { %194 = vst [vmem:[%s337_s3] sm:$0xff] %v189_v25 }

// kernel: forward.61
= control target key start
LH: loop header
LB: loop body
LE: loop exit
PB: predicated region body
PF: predicated region fallthrough
CT: control target
= control target key end

     0   :  { %v631_v24 = vmov 0   ;;  %s842_s0 = inlined_call_operand.vmem [shape: f32[8,128], index: 0, kind: input, shape index: {}]   ;;  %s843_s1 = inlined_call_operand.vmem [shape: bf16[128,768], index: 1, kind: input, shape index: {}]   ;;  %s844_s3 = inlined_call_operand.vmem [shape: f32[1,128], index: 3, kind: input, shape index: {}]   ;;  %s845_s4 = inlined_call_operand.vmem [shape: f32[1,128], index: 4, kind: input, shape index: {}]   ;;  %s846_s2 = inlined_call_operand.vmem [shape: f32[1,768], index: 2, kind: input, shape index: {}]   ;;  %s847_s5 = inlined_call_operand.vmem [shape: f32[8,768], index: 5, kind: output, shape index: {}]  }
   0x1   :  { %v665_v0 = vld [vmem:[%s842_s0] sm:$0xff]  ;;  %v557_v2 = vld [vmem:[%s843_s1 + $0x154] ss:$24 sps:$4 sm:$0xff]   ;;  %v559_v3 = vld [vmem:[%s843_s1 + $0x150] ss:$24 sps:$4 sm:$0xff]   ;;  %405 = vmatprep.mubr.bf16.mxu0 %v631_v24  ;;  %446 = vmatprep.mubr.bf16.mxu1 %v631_v24 }
   0x2   :  { %24 = vadd.xlane.f32.xlu0 %v665_v0  ;;  %v27_v1 = vmul.f32 %v665_v0, %v665_v0  ;;  %373 = vmatprep.subr.bf16.mxu0 %v557_v2  ;;  %v560_v4 = vld [vmem:[%s843_s1 + $0x15c] ss:$24 sps:$4 sm:$0xff]   ;;  %v562_v5 = vld [vmem:[%s843_s1 + $0x158] ss:$24 sps:$4 sm:$0xff]   ;;  %v566_v8 = vld [vmem:[%s843_s1 + $0x12c] ss:$24 sps:$4 sm:$0xff]  }
   0x3   :  { %374 = vmatpush1.bf16.msra.mxu0 %v559_v3  ;;  %414 = vmatprep.subr.bf16.mxu1 %v560_v4  ;;  %v563_v6 = vld [vmem:[%s843_s1 + $0x124] ss:$24 sps:$4 sm:$0xff]   ;;  %v565_v7 = vld [vmem:[%s843_s1 + $0x120] ss:$24 sps:$4 sm:$0xff]   ;;  %v569_v10 = vld [vmem:[%s843_s1 + $0xf4] ss:$24 sps:$4 sm:$0xff]   ;;  %v103_v3 = vlaneseq }
   0x4   :  { %415 = vmatpush1.bf16.msra.mxu1 %v562_v5  ;;  %375 = vmatprep.subr.bf16.mxu0 %v563_v6  ;;  %v568_v9 = vld [vmem:[%s843_s1 + $0x128] ss:$24 sps:$4 sm:$0xff]   ;;  %v572_v12 = vld [vmem:[%s843_s1 + $0xfc] ss:$24 sps:$4 sm:$0xff]   ;;  %v574_v13 = vld [vmem:[%s843_s1 + $0xf8] ss:$24 sps:$4 sm:$0xff]  }
   0x5   :  { %416 = vmatprep.subr.bf16.mxu1 %v566_v8  ;;  %v571_v11 = vld [vmem:[%s843_s1 + $0xf0] ss:$24 sps:$4 sm:$0xff]   ;;  %v575_v14 = vld [vmem:[%s843_s1 + $0xc4] ss:$24 sps:$4 sm:$0xff]   ;;  %v577_v15 = vld [vmem:[%s843_s1 + $0xc0] ss:$24 sps:$4 sm:$0xff]  }
   0x6   :  { %28 = vadd.xlane.f32.xlu0 %v27_v1  ;;  %v578_v16 = vld [vmem:[%s843_s1 + $0xcc] ss:$24 sps:$4 sm:$0xff]   ;;  %v580_v17 = vld [vmem:[%s843_s1 + $0xc8] ss:$24 sps:$4 sm:$0xff]   ;;  %v584_v19 = vld [vmem:[%s843_s1 + $0x9c] ss:$24 sps:$4 sm:$0xff]  }
   0x7   :  { %376 = vmatpush1.bf16.msra.mxu0 %v565_v7  ;;  %v581_v18 = vld [vmem:[%s843_s1 + $0x94] ss:$24 sps:$4 sm:$0xff]   ;;  %v583_v20 = vld [vmem:[%s843_s1 + $0x90] ss:$24 sps:$4 sm:$0xff]   ;;  %v587_v21 = vld [vmem:[%s843_s1 + $0x64] ss:$24 sps:$4 sm:$0xff]  }
   0x8   :  { %417 = vmatpush1.bf16.msra.mxu1 %v568_v9  ;;  %377 = vmatprep.subr.bf16.mxu0 %v569_v10  ;;  %v586_v22 = vld [vmem:[%s843_s1 + $0x98] ss:$24 sps:$4 sm:$0xff]   ;;  %v590_v23 = vld [vmem:[%s843_s1 + $0x6c] ss:$24 sps:$4 sm:$0xff]   ;;  %v592_v27 = vld [vmem:[%s843_s1 + $0x68] ss:$24 sps:$4 sm:$0xff]  }
   0x9   :  { %418 = vmatprep.subr.bf16.mxu1 %v572_v12  ;;  %v589_v25 = vld [vmem:[%s843_s1 + $0x60] ss:$24 sps:$4 sm:$0xff]   ;;  %v593_v26 = vld [vmem:[%s843_s1 + $0x34] ss:$24 sps:$4 sm:$0xff]   ;;  %v595_v28 = vld [vmem:[%s843_s1 + $0x30] ss:$24 sps:$4 sm:$0xff]  }
   0xa   :  { %v596_v29 = vld [vmem:[%s843_s1 + $0x3c] ss:$24 sps:$4 sm:$0xff]   ;;  %v598_v30 = vld [vmem:[%s843_s1 + $0x38] ss:$24 sps:$4 sm:$0xff]   ;;  %v602_v32 = vld [vmem:[%s843_s1 + $0xc] ss:$24 sps:$4 sm:$0xff]  }
   0xb   :  { %378 = vmatpush1.bf16.msra.mxu0 %v571_v11  ;;  %v599_v31 = vld [vmem:[%s843_s1 + $0x4] ss:$24 sps:$4 sm:$0xff]   ;;  %v601_v33 = vld [vmem:[%s843_s1] ss:$24 sps:$4 sm:$0xff]   ;;  %v610_v53 = vld [vmem:[%s843_s1 + $0x134] ss:$24 sps:$4 sm:$0xff]  }
   0xc   :  { %419 = vmatpush1.bf16.msra.mxu1 %v574_v13  ;;  %379 = vmatprep.subr.bf16.mxu0 %v575_v14  ;;  %v607_v34 = vld [vmem:[%s843_s1 + $0x164] ss:$24 sps:$4 sm:$0xff]   ;;  %v604_v35 = vld [vmem:[%s843_s1 + $0x8] ss:$24 sps:$4 sm:$0xff]   ;;  %v616_v57 = vld [vmem:[%s843_s1 + $0xd4] ss:$24 sps:$4 sm:$0xff]  }
   0xd   :  { %420 = vmatprep.subr.bf16.mxu1 %v578_v16  ;;  %v506_v46 = vld [vmem:[%s844_s3] ss:$0 sm:$0xff]  ;;  %v608_v54 = vld [vmem:[%s843_s1 + $0x130] ss:$24 sps:$4 sm:$0xff]   ;;  %v613_v55 = vld [vmem:[%s843_s1 + $0x104] ss:$24 sps:$4 sm:$0xff]  }
   0xe   :  { %v507_v48 = vld [vmem:[%s845_s4] ss:$0 sm:$0xff]  ;;  %v614_v58 = vld [vmem:[%s843_s1 + $0xd0] ss:$24 sps:$4 sm:$0xff]   ;;  %v619_v59 = vld [vmem:[%s843_s1 + $0xa4] ss:$24 sps:$4 sm:$0xff]  }
   0xf   :  { %380 = vmatpush1.bf16.msra.mxu0 %v577_v15  ;;  %v605_v51 = vld [vmem:[%s843_s1 + $0x160] ss:$24 sps:$4 sm:$0xff]   ;;  %v622_v61 = vld [vmem:[%s843_s1 + $0x74] ss:$24 sps:$4 sm:$0xff]   ;;  %v620_v62 = vld [vmem:[%s843_s1 + $0x70] ss:$24 sps:$4 sm:$0xff]  }
  0x10   :  { %381 = vmatprep.subr.bf16.mxu0 %v581_v18  ;;  %421 = vmatpush1.bf16.msra.mxu1 %v580_v17  ;;  %v611_v56 = vld [vmem:[%s843_s1 + $0x100] ss:$24 sps:$4 sm:$0xff]   ;;  %v625_v63 = vld [vmem:[%s843_s1 + $0x44] ss:$24 sps:$4 sm:$0xff]   ;;  %v628_v1 = vld [vmem:[%s843_s1 + $0x14] ss:$24 sps:$4 sm:$0xff]  }
  0x11   :  { %422 = vmatprep.subr.bf16.mxu1 %v584_v19  ;;  %v617_v60 = vld [vmem:[%s843_s1 + $0xa0] ss:$24 sps:$4 sm:$0xff]   ;;  %v626_v2 = vld [vmem:[%s843_s1 + $0x10] ss:$24 sps:$4 sm:$0xff]   ;;  %v104_v4 = vshrl.u32 %v103_v3, 7 }
  0x12   :  { %v101_v7 = vld [vmem:[%s846_s2] sm:$0x3f] }
  0x13   :  { %382 = vmatpush1.bf16.msra.mxu0 %v583_v20  ;;  %v105_v5 = vsub.s32 0, %v104_v4  ;;  %v113_v6 = vsub.s32 2, %v104_v4  ;;  %v109_v8 = vsub.s32 1, %v104_v4  ;;  %v117_v9 = vsub.s32 3, %v104_v4 }
  0x14   :  { %383 = vmatprep.subr.bf16.mxu0 %v587_v21  ;;  %423 = vmatpush1.bf16.msra.mxu1 %v586_v22 }
  0x15   :  { %424 = vmatprep.subr.bf16.mxu1 %v590_v23  ;;  %v106_v10 = vrot.slane %v101_v7, %v105_v5  ;;  %v114_v11 = vrot.slane %v101_v7, %v113_v6  ;;  %v110_v12 = vrot.slane %v101_v7, %v109_v8  ;;  %v118_v13 = vrot.slane %v101_v7, %v117_v9 }
  0x17   :  { %384 = vmatpush1.bf16.msra.mxu0 %v589_v25 }
  0x18   :  { %385 = vmatprep.subr.bf16.mxu0 %v593_v26  ;;  %425 = vmatpush1.bf16.msra.mxu1 %v592_v27  ;;  %v121_v26 = vsub.s32 4, %v104_v4  ;;  %v125_v27 = vsub.s32 5, %v104_v4 }
  0x19   :  { %426 = vmatprep.subr.bf16.mxu1 %v596_v29 }
  0x1a   :  { %v126_v29 = vrot.slane %v101_v7, %v125_v27 }
  0x1b   :  { %386 = vmatpush1.bf16.msra.mxu0 %v595_v28  ;;  %v122_v28 = vrot.slane %v101_v7, %v121_v26 }
  0x1c   :  { %387 = vmatprep.subr.bf16.mxu0 %v599_v31  ;;  %427 = vmatpush1.bf16.msra.mxu1 %v598_v30 }
  0x1d   :  { %428 = vmatprep.subr.bf16.mxu1 %v602_v32 }
  0x1f   :  { %388 = vmatpush1.bf16.msra.mxu0 %v601_v33 }
  0x20   :  { %455 = vmatprep.subr.bf16.mxu0 %v607_v34  ;;  %429 = vmatpush1.bf16.msra.mxu1 %v604_v35 }
  0x8b   :  { %v25_v36 = vpop.xlane.xlu0 %24 }
  0x8c   :  { %v26_v37 = vmul.f32 0.0625, %v25_v36 }
  0x8e   :  { %v31_v39 = vmul.f32 %v26_v37, %v26_v37  ;;  %v34_v44 = vsub.f32 %v665_v0, %v26_v37  ;;  %v623_v0 = vld [vmem:[%s843_s1 + $0x40] ss:$24 sps:$4 sm:$0xff]  }
  0x8f   :  { %v29_v38 = vpop.xlane.xlu0 %28 }
  0x90   :  { %v30_v40 = vmul.f32 0.0625, %v29_v38 }
  0x92   :  { %v32_v41 = vsub.f32 %v30_v40, %v31_v39 }
  0x94   :  { %v33_v42 = vmax.f32 %v32_v41, 0.0 }
  0x96   :  { %v35_v43 = vadd.f32 1e-05, %v33_v42 }
  0x98   :  { %629 = vrsqrt.f32 %v35_v43 }
  0xa5   :  { %v630_v45 = vpop.eup %629 }
  0xa6   :  { %v37_v47 = vmul.f32 %v630_v45, %v34_v44 }
  0xa8   :  { %v44_v49 = vmul.f32 %v506_v46, %v37_v47 }
  0xaa   :  { %v51_v50 = vadd.f32 %v507_v48, %v44_v49 }
  0xac   :  { %v52_v52 = vpack.c.bf16 %v51_v50, %v51_v50 }
  0xae   :  { %406 = vmatmul.mubr.bf16.vlgmr.msra.gmra.mxu0 %v52_v52  ;;  %447 = vmatmul.mubr.bf16.vlgmr.msra.gmra.mxu1 %v52_v52 }
  0xaf   :  { %456 = vmatpush1.bf16.msra.mxu0 %v605_v51  ;;  %487 = vmatprep.mubr.bf16.mxu0 %v631_v24 }
  0xb0   :  { %457 = vmatprep.subr.bf16.mxu0 %v610_v53 }
  0xb3   :  { %458 = vmatpush1.bf16.msra.mxu0 %v608_v54 }
  0xb4   :  { %459 = vmatprep.subr.bf16.mxu0 %v613_v55 }
  0xb7   :  { %460 = vmatpush1.bf16.msra.mxu0 %v611_v56 }
  0xb8   :  { %461 = vmatprep.subr.bf16.mxu0 %v616_v57 }
  0xbb   :  { %462 = vmatpush1.bf16.msra.mxu0 %v614_v58 }
  0xbc   :  { %463 = vmatprep.subr.bf16.mxu0 %v619_v59 }
  0xbf   :  { %464 = vmatpush1.bf16.msra.mxu0 %v617_v60 }
  0xc0   :  { %465 = vmatprep.subr.bf16.mxu0 %v622_v61 }
  0xc3   :  { %466 = vmatpush1.bf16.msra.mxu0 %v620_v62 }
  0xc4   :  { %467 = vmatprep.subr.bf16.mxu0 %v625_v63 }
  0xc7   :  { %468 = vmatpush1.bf16.msra.mxu0 %v623_v0 }
  0xc8   :  { %469 = vmatprep.subr.bf16.mxu0 %v628_v1 }
  0xcb   :  { %470 = vmatpush1.bf16.msra.mxu0 %v626_v2 }
  0xce   :  { %488 = vmatmul.mubr.bf16.vlgmr.msra.gmra.mxu0 %v52_v52 }
 0x16e   :  { %v407_v14 = vpop.f32.mrf.mxu0  ;;  %v448_v15 = vpop.f32.mrf.mxu1 }
 0x16f   :  { %v408_v16 = vadd.f32 %v407_v14, %v106_v10  ;;  %v449_v17 = vadd.f32 %v448_v15, %v114_v11 }
 0x170   :  { %v409_v18 = vpop.f32.mrf.mxu0  ;;  %v450_v19 = vpop.f32.mrf.mxu1 }
 0x171   :  { %496 = vst [vmem:[%s847_s5] sm:$0xff] %v408_v16  ;;  %498 = vst [vmem:[%s847_s5 + $0x10] sm:$0xff] %v449_v17  ;;  %v410_v20 = vadd.f32 %v409_v18, %v110_v12  ;;  %v451_v21 = vadd.f32 %v450_v19, %v118_v13 }
 0x172   :  { %v411_v22 = vpop.f32.mrf.mxu0  ;;  %v452_v23 = vpop.f32.mrf.mxu1 }
 0x173   :  { %497 = vst [vmem:[%s847_s5 + $0x8] sm:$0xff] %v410_v20  ;;  %499 = vst [vmem:[%s847_s5 + $0x18] sm:$0xff] %v451_v21 }
 0x174   :  { %v412_v24 = vpop.f32.mrf.mxu0  ;;  %v453_v25 = vpop.f32.mrf.mxu1 }
 0x18e   :  { %v489_v30 = vpop.f32.mrf.mxu0 }
 0x18f   :  { %v490_v31 = vadd.f32 %v489_v30, %v122_v28 }
 0x190   :  { %v491_v32 = vpop.f32.mrf.mxu0 }
 0x191   :  { %500 = vst [vmem:[%s847_s5 + $0x20] sm:$0xff] %v490_v31  ;;  %v492_v33 = vadd.f32 %v491_v32, %v126_v29 }
 0x192   :  { %v493_v34 = vpop.f32.mrf.mxu0 }
 0x193   :  { %501 = vst [vmem:[%s847_s5 + $0x28] sm:$0xff] %v492_v33 }
 0x194   :  { %v494_v35 = vpop.f32.mrf.mxu0 }

// kernel: forward.62
= control target key start
LH: loop header
LB: loop body
LE: loop exit
PB: predicated region body
PF: predicated region fallthrough
CT: control target
= control target key end

     0   :  { %s512_s17 = smov 0   ;;  %s541_s0 = inlined_call_operand.<no memory space> [shape: f32[1], index: 0, kind: input, shape index: {}]   ;;  %s542_s1 = inlined_call_operand.vmem [shape: f32[8,4,64], index: 1, kind: input, shape index: {}]   ;;  %s543_s2 = inlined_call_operand.vmem [shape: f32[8,4,64], index: 2, kind: input, shape index: {}]   ;;  %s544_s3 = inlined_call_operand.vmem [shape: f32[8,4,64], index: 3, kind: input, shape index: {}]   ;;  %s545_s4 = inlined_call_operand.vmem [shape: f32[8,4,64], index: 4, kind: output, shape index: {}]  }
   0x1   :  { %9 = sst [smem:[#allocation2]] %s541_s0 }
   0x2 LB: > { %s431_s18 = sadd.s32 4294967295, %s480_s17   ;;  %p435_p0 = scmp.ge.s32.totalorder %s480_s17, 1  ;;  %s480_s17 = sphi %s512_s17, %s15_s17  }
   0x3   : > { %p180_p1 = scmp.lt.s32.totalorder %s480_s17, 9 }
   0x5   : > { %p181_p2 = pnand %p435_p0, %p180_p1 }
   0x6   : > { %p212_p3 = scmp.lt.s32.totalorder (!%p181_p2), %s431_s18, 7  ;;  %s235_s25 = sld [smem:[#allocation2]] (!%p181_p2) }
   0x7   : > { %184 = sbr.rel (%p181_p2) target bundleno = 735 (0x2df), region = 36 }
   0xc   : > { %v482_v0 = vmov 0.0   ;;  %vm483_vm0 = vmmov 0   ;;  %s547_s18 = smov (!%p212_p3, %s431_s18), 7  ;;  %vm236_vm1 = vcmask 523264   ;;  %v285_v6 = vlaneseq }
   0xd   : > { %448 = vmatprep.subr.bf16.mxu0 %v482_v0  ;;  %450 = vmatprep.mubr.msk.bf16.mxu0 %vm483_vm0, %v482_v0  ;;  %s520_s0 = sshll.u32 %s547_s18, 2  ;;  %v283_v9 = vstv %s235_s25  ;;  %vm291_vm3 = vcmask 27648   ;;  %vm308_vm4 = vcmask 1041408   ;;  %vm304_vm5 = vcmask 31744  }
   0xe   : > { %454 = vmatprep.subr.bf16.mxu1 %v482_v0  ;;  %456 = vmatprep.mubr.msk.bf16.mxu1 %vm483_vm0, %v482_v0  ;;  %s219_s21 = scalar_lea.vmem %s543_s2, %s520_s0  ;;  %s215_s24 = scalar_lea.vmem %s542_s1, %s520_s0  ;;  %v286_v7 = vshrl.u32 %v285_v6, 7  ;;  %v288_v8 = vand.u32 127, %v285_v6  ;;  %vm352_vm6 = vcmask 519168  }
   0xf   : > { %v231_v1 = vld [vmem:[%s219_s21] sm:$0xf]  ;;  %s223_s28 = scalar_lea.vmem %s544_s3, %s520_s0  ;;  %s227_s5 = scalar_lea.vmem %s545_s4, %s520_s0 }
  0x10   : > { %v232_v2 = vpack.c.bf16 %v231_v1, %v231_v1  ;;  %v229_v4 = vld [vmem:[%s215_s24] sm:$0xf]  ;;  %vm289_vm2 = vcmp.eq.s32.totalorder %v286_v7, %v288_v8 }
  0x11   : > { %v230_v5 = vpack.c.bf16 %v229_v4, %v229_v4  ;;  %v233_v22 = vld [vmem:[%s223_s28] sm:$0xf] }
  0x12   : > { %v241_v3 = vsel %vm236_vm1, %v232_v2, 0  ;;  %v234_v23 = vpack.c.bf16 %v233_v22, %v233_v22 }
  0x13   : > { %449 = vmatpush3.bf16.xpose.msra.mxu0 %v241_v3 }
  0x14   : > { %v310_v24 = vsel %vm308_vm4, %v234_v23, 0 }
  0x15   : > { %455 = vmatpush3.bf16.msra.mxu1 %v310_v24 }
  0x1a   : > { %451 = vmatmul.mubr.msk.bf16.vlgmr.msra.gmra.mxu0 %vm236_vm1, %v230_v5 }
  0xda   : > { %v277_v10 = vpop.f32.mrf.mxu0 }
  0xdb   : > { %v284_v11 = vmul.f32 %v283_v9, %v277_v10 }
  0xdc   : > { %v452_v12 = vpop.f32.mrf.mxu0 }
  0xdd   : > { %v290_v13 = vsel %vm289_vm2, -3.4028235e+38, %v284_v11 }
  0xde   : > { %v280_v14 = vpop.f32.mrf.mxu0  ;;  %v292_v15 = vsel %vm291_vm3, %v290_v13, -inf }
  0xdf   : > { %293 = vmax.xlane.f32.xlu0 %v292_v15 }
  0xe0   : > { %v453_v16 = vpop.f32.mrf.mxu0 }
 0x168   : > { %v294_v17 = vpop.xlane.xlu0 %293 }
 0x169   : > { %v295_v18 = vsub.f32 %v290_v13, %v294_v17 }
 0x16b   : > { %v296_v19 = vmul.f32 1.442695, %v295_v18 }
 0x16d   : > { %470 = vpow2.f32 %v296_v19 }
 0x17a   : > { %v471_v20 = vpop.eup %470 }
 0x17b   : > { %v298_v21 = vsel %vm291_vm3, %v471_v20, 0.0 }
 0x17c   : > { %299 = vadd.xlane.f32.xlu0 %v298_v21 }
 0x205   : > { %v300_v25 = vpop.xlane.xlu0 %299 }
 0x206   : > { %472 = vrcp.f32 %v300_v25 }
 0x213   : > { %v473_v26 = vpop.eup %472 }
 0x214   : > { %v302_v27 = vmul.f32 %v473_v26, %v471_v20 }
 0x216   : > { %v303_v28 = vpack.c.bf16 %v302_v27, %v302_v27 }
 0x218   : > { %457 = vmatmul.mubr.msk.bf16.vlgmr.msra.gmra.mxu1 %vm304_vm5, %v303_v28 }
 0x2d8   : > { %v346_v29 = vpop.f32.mrf.mxu1 }
 0x2d9   : > { %353 = vst.msk [vmem:[%s227_s5] sm:$0xf] %vm352_vm6, %v346_v29 }
 0x2da   : > { %v458_v30 = vpop.f32.mrf.mxu1 }
 0x2dc   : > { %v349_v31 = vpop.f32.mrf.mxu1 }
 0x2de   : > { %v459_v32 = vpop.f32.mrf.mxu1 }
 0x2df PF: > { %s15_s17 = sadd.s32 1, %s480_s17  }
 0x2e0   : > { %p12_p4 = scmp.ge.s32.totalorder %s15_s17, 10  }
 0x2e2   :  { %14 = sbr.rel (!%p12_p4) target bundleno = 2 (0x2), region = 72 }

// kernel: forward.63
= control target key start
LH: loop header
LB: loop body
LE: loop exit
PB: predicated region body
PF: predicated region fallthrough
CT: control target
= control target key end

     0   :  { %s347_s1 = inlined_call_operand.vmem [shape: bf16[256,128], index: 1, kind: input, shape index: {}]   ;;  %s348_s0 = inlined_call_operand.vmem [shape: f32[8,256], index: 0, kind: input, shape index: {}]   ;;  %s349_s2 = inlined_call_operand.vmem [shape: f32[1,128], index: 2, kind: input, shape index: {}]   ;;  %s350_s3 = inlined_call_operand.vmem [shape: f32[8,128], index: 3, kind: input, shape index: {}]   ;;  %s351_s4 = inlined_call_operand.vmem [shape: f32[8,128], index: 4, kind: output, shape index: {}]  }
   0x1   :  { %v243_v0 = vld [vmem:[%s347_s1 + $0x78] sm:$0xff]   ;;  %v245_v2 = vld [vmem:[%s347_s1 + $0x70] sm:$0xff]   ;;  %v247_v4 = vld [vmem:[%s347_s1 + $0x68] sm:$0xff]  }
   0x2   :  { %v244_v1 = vld [vmem:[%s347_s1 + $0x38] sm:$0xff]   ;;  %221 = vmatprep.subr.bf16.mxu0 %v243_v0  ;;  %v246_v3 = vld [vmem:[%s347_s1 + $0x30] sm:$0xff]   ;;  %v248_v5 = vld [vmem:[%s347_s1 + $0x28] sm:$0xff]  }
   0x3   :  { %222 = vmatpush3.bf16.msra.mxu0 %v244_v1  ;;  %v249_v6 = vld [vmem:[%s347_s1 + $0x60] sm:$0xff]   ;;  %v251_v8 = vld [vmem:[%s347_s1 + $0x58] sm:$0xff]   ;;  %v253_v10 = vld [vmem:[%s347_s1 + $0x50] sm:$0xff]  }
   0x4   :  { %223 = vmatprep.subr.bf16.mxu0 %v245_v2  ;;  %v250_v7 = vld [vmem:[%s347_s1 + $0x20] sm:$0xff]   ;;  %v252_v9 = vld [vmem:[%s347_s1 + $0x18] sm:$0xff]   ;;  %v19_v11 = vld [vmem:[%s348_s0 + $0x8] sm:$0xff] }
   0x5   :  { %v21_v12 = vpack.c.bf16 %v19_v11, %v19_v11  ;;  %v254_v13 = vld [vmem:[%s347_s1 + $0x10] sm:$0xff]   ;;  %v255_v14 = vld [vmem:[%s347_s1 + $0x48] sm:$0xff]   ;;  %v257_v16 = vld [vmem:[%s347_s1 + $0x40] sm:$0xff]  }
   0x6   :  { %v256_v15 = vld [vmem:[%s347_s1 + $0x8] sm:$0xff]   ;;  %v258_v17 = vld [vmem:[%s347_s1] sm:$0xff]  }
   0x7   :  { %224 = vmatpush3.bf16.msra.mxu0 %v246_v3  ;;  %189 = vmatprep.mubr.bf16.mxu0 %v21_v12  ;;  %v18_v18 = vld [vmem:[%s348_s0] sm:$0xff] }
   0x8   :  { %225 = vmatprep.subr.bf16.mxu0 %v247_v4  ;;  %v20_v19 = vpack.c.bf16 %v18_v18, %v18_v18  ;;  %v204_v21 = vld [vmem:[%s349_s2] ss:$0 sm:$0xff] }
   0x9   :  { %v197_v24 = vld [vmem:[%s350_s3] sm:$0xff] }
   0xb   :  { %226 = vmatpush3.bf16.msra.mxu0 %v248_v5 }
   0xc   :  { %227 = vmatprep.subr.bf16.mxu0 %v249_v6 }
   0xf   :  { %228 = vmatpush3.bf16.msra.mxu0 %v250_v7 }
  0x10   :  { %229 = vmatprep.subr.bf16.mxu0 %v251_v8 }
  0x13   :  { %230 = vmatpush3.bf16.msra.mxu0 %v252_v9 }
  0x14   :  { %231 = vmatprep.subr.bf16.mxu0 %v253_v10 }
  0x17   :  { %232 = vmatpush3.bf16.msra.mxu0 %v254_v13 }
  0x18   :  { %233 = vmatprep.subr.bf16.mxu0 %v255_v14 }
  0x1b   :  { %234 = vmatpush3.bf16.msra.mxu0 %v256_v15 }
  0x1c   :  { %235 = vmatprep.subr.bf16.mxu0 %v257_v16 }
  0x1f   :  { %236 = vmatpush3.bf16.msra.mxu0 %v258_v17 }
  0x22   :  { %190 = vmatmul.mubr.bf16.vlgmr.msra.gmra.mxu0 %v20_v19 }
  0xe2   :  { %v237_v20 = vpop.f32.mrf.mxu0 }
  0xe4   :  { %v238_v22 = vpop.f32.mrf.mxu0 }
  0xe5   :  { %v239_v23 = vadd.f32 %v238_v22, %v237_v20 }
  0xe6   :  { %v240_v25 = vpop.f32.mrf.mxu0 }
  0xe7   :  { %v192_v26 = vadd.f32 %v239_v23, %v204_v21 }
  0xe8   :  { %v241_v27 = vpop.f32.mrf.mxu0 }
  0xe9   :  { %v198_v28 = vadd.f32 %v197_v24, %v192_v26 }
  0xeb   :  { %199 = vst [vmem:[%s351_s4] sm:$0xff] %v198_v28 }

// kernel: forward.64
= control target key start
LH: loop header
LB: loop body
LE: loop exit
PB: predicated region body
PF: predicated region fallthrough
CT: control target
= control target key end

     0   :  { %v417_v3 = vmov 0.0   ;;  %vm418_vm0 = vmmov 0   ;;  %s550_s0 = inlined_call_operand.vmem [shape: f32[8,128], index: 0, kind: input, shape index: {}]   ;;  %s551_s3 = inlined_call_operand.vmem [shape: bf16[128,128], index: 3, kind: input, shape index: {}]   ;;  %s552_s1 = inlined_call_operand.vmem [shape: f32[1,128], index: 1, kind: input, shape index: {}]   ;;  %s553_s2 = inlined_call_operand.vmem [shape: f32[1,128], index: 2, kind: input, shape index: {}]   ;;  %s554_s5 = inlined_call_operand.vmem [shape: bf16[128,128], index: 5, kind: input, shape index: {}]   ;;  %s555_s4 = inlined_call_operand.vmem [shape: f32[1,128], index: 4, kind: input, shape index: {}]   ;;  %s556_s6 = inlined_call_operand.vmem [shape: f32[1,128], index: 6, kind: input, shape index: {}]   ;;  %s557_s7 = inlined_call_operand.vmem [shape: f32[8,128], index: 7, kind: output, shape index: {}]  }
   0x1   :  { %v462_v0 = vld [vmem:[%s550_s0] sm:$0xff]  ;;  %v395_v2 = vld [vmem:[%s551_s3 + $0x38] sm:$0xff]   ;;  %353 = vmatprep.subr.bf16.mxu0 %v417_v3  ;;  %373 = vmatprep.subr.bf16.mxu1 %v417_v3  ;;  %v396_v4 = vld [vmem:[%s551_s3 + $0x30] sm:$0xff]  }
   0x2   :  { %30 = vadd.xlane.f32.xlu0 %v462_v0  ;;  %v33_v1 = vmul.f32 %v462_v0, %v462_v0  ;;  %354 = vmatpush3.bf16.msra.mxu0 %v395_v2  ;;  %v397_v5 = vld [vmem:[%s551_s3 + $0x28] sm:$0xff]   ;;  %v398_v6 = vld [vmem:[%s551_s3 + $0x20] sm:$0xff]   ;;  %v399_v7 = vld [vmem:[%s551_s3 + $0x18] sm:$0xff]  }
   0x3   :  { %355 = vmatprep.subr.bf16.mxu0 %v417_v3  ;;  %369 = vmatprep.mubr.msk.bf16.mxu0 %vm418_vm0, %v417_v3  ;;  %v400_v8 = vld [vmem:[%s551_s3 + $0x10] sm:$0xff]   ;;  %v401_v9 = vld [vmem:[%s551_s3 + $0x8] sm:$0xff]   ;;  %v402_v10 = vld [vmem:[%s551_s3] sm:$0xff]  }
   0x4   :  { %389 = vmatprep.mubr.msk.bf16.mxu1 %vm418_vm0, %v417_v3  ;;  %v315_v21 = vld [vmem:[%s552_s1] ss:$0 sm:$0xff]  ;;  %v403_v27 = vld [vmem:[%s554_s5 + $0x38] sm:$0xff]   ;;  %v404_v28 = vld [vmem:[%s554_s5 + $0x30] sm:$0xff]  }
   0x5   :  { %v316_v23 = vld [vmem:[%s553_s2] ss:$0 sm:$0xff]  ;;  %374 = vmatpush3.bf16.msra.mxu1 %v403_v27  ;;  %v405_v29 = vld [vmem:[%s554_s5 + $0x28] sm:$0xff]   ;;  %v407_v31 = vld [vmem:[%s554_s5 + $0x18] sm:$0xff]  }
   0x6   :  { %34 = vadd.xlane.f32.xlu0 %v33_v1  ;;  %356 = vmatpush3.bf16.msra.mxu0 %v396_v4  ;;  %v406_v30 = vld [vmem:[%s554_s5 + $0x20] sm:$0xff]   ;;  %v408_v32 = vld [vmem:[%s554_s5 + $0x10] sm:$0xff]   ;;  %v409_v33 = vld [vmem:[%s554_s5 + $0x8] sm:$0xff]  }
   0x7   :  { %357 = vmatprep.subr.bf16.mxu0 %v417_v3  ;;  %375 = vmatprep.subr.bf16.mxu1 %v417_v3  ;;  %v410_v34 = vld [vmem:[%s554_s5] sm:$0xff]  }
   0x8   :  { %v317_v35 = vld [vmem:[%s555_s4] ss:$0 sm:$0xff] }
   0x9   :  { %376 = vmatpush3.bf16.msra.mxu1 %v404_v28  ;;  %v326_v4 = vld [vmem:[%s556_s6] ss:$0 sm:$0xff] }
   0xa   :  { %358 = vmatpush3.bf16.msra.mxu0 %v397_v5  ;;  %377 = vmatprep.subr.bf16.mxu1 %v417_v3 }
   0xb   :  { %359 = vmatprep.subr.bf16.mxu0 %v417_v3 }
   0xd   :  { %378 = vmatpush3.bf16.msra.mxu1 %v405_v29 }
   0xe   :  { %360 = vmatpush3.bf16.msra.mxu0 %v398_v6  ;;  %379 = vmatprep.subr.bf16.mxu1 %v417_v3 }
   0xf   :  { %361 = vmatprep.subr.bf16.mxu0 %v417_v3 }
  0x11   :  { %380 = vmatpush3.bf16.msra.mxu1 %v406_v30 }
  0x12   :  { %362 = vmatpush3.bf16.msra.mxu0 %v399_v7  ;;  %381 = vmatprep.subr.bf16.mxu1 %v417_v3 }
  0x13   :  { %363 = vmatprep.subr.bf16.mxu0 %v417_v3 }
  0x15   :  { %382 = vmatpush3.bf16.msra.mxu1 %v407_v31 }
  0x16   :  { %364 = vmatpush3.bf16.msra.mxu0 %v400_v8  ;;  %383 = vmatprep.subr.bf16.mxu1 %v417_v3 }
  0x17   :  { %365 = vmatprep.subr.bf16.mxu0 %v417_v3 }
  0x19   :  { %384 = vmatpush3.bf16.msra.mxu1 %v408_v32 }
  0x1a   :  { %366 = vmatpush3.bf16.msra.mxu0 %v401_v9  ;;  %385 = vmatprep.subr.bf16.mxu1 %v417_v3 }
  0x1b   :  { %367 = vmatprep.subr.bf16.mxu0 %v417_v3 }
  0x1d   :  { %386 = vmatpush3.bf16.msra.mxu1 %v409_v33 }
  0x1e   :  { %368 = vmatpush3.bf16.msra.mxu0 %v402_v10  ;;  %387 = vmatprep.subr.bf16.mxu1 %v417_v3 }
  0x21   :  { %388 = vmatpush3.bf16.msra.mxu1 %v410_v34 }
  0x8b   :  { %v31_v11 = vpop.xlane.xlu0 %30 }
  0x8c   :  { %v32_v12 = vmul.f32 0.0625, %v31_v11 }
  0x8e   :  { %v37_v14 = vmul.f32 %v32_v12, %v32_v12  ;;  %v40_v19 = vsub.f32 %v462_v0, %v32_v12 }
  0x8f   :  { %v35_v13 = vpop.xlane.xlu0 %34 }
  0x90   :  { %v36_v15 = vmul.f32 0.0625, %v35_v13 }
  0x92   :  { %v38_v16 = vsub.f32 %v36_v15, %v37_v14 }
  0x94   :  { %v39_v17 = vmax.f32 %v38_v16, 0.0 }
  0x96   :  { %v41_v18 = vadd.f32 1e-05, %v39_v17 }
  0x98   :  { %411 = vrsqrt.f32 %v41_v18 }
  0xa5   :  { %v412_v20 = vpop.eup %411 }
  0xa6   :  { %v43_v22 = vmul.f32 %v412_v20, %v40_v19 }
  0xa8   :  { %v50_v24 = vmul.f32 %v315_v21, %v43_v22 }
  0xaa   :  { %v57_v25 = vadd.f32 %v316_v23, %v50_v24 }
  0xac   :  { %v58_v26 = vpack.c.bf16 %v57_v25, %v57_v25 }
  0xae   :  { %370 = vmatmul.mubr.bf16.vlgmr.msra.gmra.mxu0 %v58_v26 }
 0x16e   :  { %v164_v36 = vpop.f32.mrf.mxu0 }
 0x16f   :  { %v165_v37 = vadd.f32 %v317_v35, %v164_v36 }
 0x170   :  { %v371_v38 = vpop.f32.mrf.mxu0 }
 0x171   :  { %v171_v39 = vmul.f32 0.70710677, %v165_v37  ;;  %v170_v63 = vmul.f32 0.5, %v165_v37 }
 0x172   :  { %v167_v40 = vpop.f32.mrf.mxu0 }
 0x173   :  { %v172_v41 = vand.u32 2147483647, %v171_v39  ;;  %vm192_vm1 = vcmp.ge.f32.partialorder %v171_v39, 0.0 }
 0x174   :  { %v372_v42 = vpop.f32.mrf.mxu0 }
 0x175   :  { %v173_v43 = vmul.f32 0.3275911, %v172_v41  ;;  %v186_v45 = vsub.f32 0.0, %v172_v41 }
 0x177   :  { %v174_v44 = vadd.f32 1.0, %v173_v43  ;;  %v187_v46 = vmul.f32 %v186_v45, %v172_v41 }
 0x179   :  { %413 = vrcp.f32 %v174_v44  ;;  %v188_v48 = vmul.f32 1.442695, %v187_v46 }
 0x17b   :  { %415 = vpow2.f32 %v188_v48 }
 0x186   :  { %v414_v47 = vpop.eup %413 }
 0x187   :  { %v177_v49 = vmul.f32 1.0614054, %v414_v47 }
 0x188   :  { %v416_v58 = vpop.eup %415 }
 0x189   :  { %v178_v50 = vadd.f32 -1.4531521, %v177_v49 }
 0x18b   :  { %v179_v51 = vmul.f32 %v414_v47, %v178_v50 }
 0x18d   :  { %v180_v52 = vadd.f32 1.4214138, %v179_v51 }
 0x18f   :  { %v181_v53 = vmul.f32 %v414_v47, %v180_v52 }
 0x191   :  { %v182_v54 = vadd.f32 -0.28449672, %v181_v53 }
 0x193   :  { %v183_v55 = vmul.f32 %v414_v47, %v182_v54 }
 0x195   :  { %v184_v56 = vadd.f32 0.2548296, %v183_v55 }
 0x197   :  { %v185_v57 = vmul.f32 %v414_v47, %v184_v56 }
 0x199   :  { %v190_v59 = vmul.f32 %v416_v58, %v185_v57 }
 0x19b   :  { %v191_v60 = vsub.f32 1.0, %v190_v59 }
 0x19d   :  { %v193_v61 = vsub.f32 0.0, %v191_v60 }
 0x19f   :  { %v194_v62 = vsel %vm192_vm1, %v191_v60, %v193_v61 }
 0x1a0   :  { %v195_v1 = vadd.f32 1.0, %v194_v62 }
 0x1a2   :  { %v196_v2 = vmul.f32 %v195_v1, %v170_v63 }
 0x1a4   :  { %v197_v3 = vpack.c.bf16 %v196_v2, %v196_v2 }
 0x1a6   :  { %390 = vmatmul.mubr.bf16.vlgmr.msra.gmra.mxu1 %v197_v3 }
 0x266   :  { %v303_v5 = vpop.f32.mrf.mxu1 }
 0x267   :  { %v304_v6 = vadd.f32 %v326_v4, %v303_v5 }
 0x268   :  { %v391_v7 = vpop.f32.mrf.mxu1 }
 0x269   :  { %v309_v8 = vadd.f32 %v304_v6, %v462_v0 }
 0x26a   :  { %v306_v9 = vpop.f32.mrf.mxu1 }
 0x26b   :  { %310 = vst [vmem:[%s557_s7] sm:$0xff] %v309_v8 }
 0x26c   :  { %v392_v10 = vpop.f32.mrf.mxu1 }

// kernel: forward.66
= control target key start
LH: loop header
LB: loop body
LE: loop exit
PB: predicated region body
PF: predicated region fallthrough
CT: control target
= control target key end

     0   :  { %v407_v0 = vmov 0.0   ;;  %vm408_vm0 = vmmov 0   ;;  %s516_s1 = inlined_call_operand.vmem [shape: bf16[384,128], index: 1, kind: input, shape index: {}]   ;;  %s517_s0 = inlined_call_operand.vmem [shape: f32[8,384], index: 0, kind: input, shape index: {}]   ;;  %s518_s2 = inlined_call_operand.vmem [shape: f32[1,128], index: 2, kind: input, shape index: {}]   ;;  %s519_s3 = inlined_call_operand.vmem [shape: f32[8,128], index: 3, kind: output, shape index: {}]  }
   0x1   :  { %361 = vmatprep.subr.bf16.mxu1 %v407_v0  ;;  %v383_v1 = vld [vmem:[%s516_s1 + $0x78] sm:$0xff]   ;;  %377 = vmatprep.mubr.msk.bf16.mxu1 %vm408_vm0, %v407_v0  ;;  %v386_v4 = vld [vmem:[%s516_s1 + $0x70] sm:$0xff]   ;;  %v389_v7 = vld [vmem:[%s516_s1 + $0x68] sm:$0xff]  }
   0x2   :  { %v384_v2 = vld [vmem:[%s516_s1 + $0xb8] sm:$0xff]   ;;  %330 = vmatprep.subr.bf16.mxu0 %v383_v1  ;;  %v387_v5 = vld [vmem:[%s516_s1 + $0xb0] sm:$0xff]   ;;  %v390_v8 = vld [vmem:[%s516_s1 + $0xa8] sm:$0xff]  }
   0x3   :  { %v385_v3 = vld [vmem:[%s516_s1 + $0x38] sm:$0xff]   ;;  %362 = vmatpush3.bf16.msra.mxu1 %v384_v2  ;;  %v388_v6 = vld [vmem:[%s516_s1 + $0x30] sm:$0xff]   ;;  %v391_v9 = vld [vmem:[%s516_s1 + $0x28] sm:$0xff]  }
   0x4   :  { %331 = vmatpush3.bf16.msra.mxu0 %v385_v3  ;;  %363 = vmatprep.subr.bf16.mxu1 %v407_v0  ;;  %v392_v10 = vld [vmem:[%s516_s1 + $0x60] sm:$0xff]   ;;  %v395_v13 = vld [vmem:[%s516_s1 + $0x58] sm:$0xff]   ;;  %v398_v16 = vld [vmem:[%s516_s1 + $0x50] sm:$0xff]  }
   0x5   :  { %332 = vmatprep.subr.bf16.mxu0 %v386_v4  ;;  %v393_v11 = vld [vmem:[%s516_s1 + $0xa0] sm:$0xff]   ;;  %v396_v14 = vld [vmem:[%s516_s1 + $0x98] sm:$0xff]   ;;  %v399_v17 = vld [vmem:[%s516_s1 + $0x90] sm:$0xff]  }
   0x6   :  { %v394_v12 = vld [vmem:[%s516_s1 + $0x20] sm:$0xff]   ;;  %v397_v15 = vld [vmem:[%s516_s1 + $0x18] sm:$0xff]   ;;  %v400_v18 = vld [vmem:[%s516_s1 + $0x10] sm:$0xff]  }
   0x7   :  { %364 = vmatpush3.bf16.msra.mxu1 %v387_v5  ;;  %v401_v19 = vld [vmem:[%s516_s1 + $0x48] sm:$0xff]   ;;  %v404_v23 = vld [vmem:[%s516_s1 + $0x40] sm:$0xff]   ;;  %v17_v26 = vld [vmem:[%s517_s0 + $0x10] sm:$0xff] }
   0x8   :  { %333 = vmatpush3.bf16.msra.mxu0 %v388_v6  ;;  %365 = vmatprep.subr.bf16.mxu1 %v407_v0  ;;  %v402_v20 = vld [vmem:[%s516_s1 + $0x88] sm:$0xff]   ;;  %v405_v25 = vld [vmem:[%s516_s1 + $0x80] sm:$0xff]   ;;  %v20_v29 = vpack.c.bf16 %v17_v26, %v17_v26 }
   0x9   :  { %334 = vmatprep.subr.bf16.mxu0 %v389_v7  ;;  %v403_v21 = vld [vmem:[%s516_s1 + $0x8] sm:$0xff]   ;;  %v406_v27 = vld [vmem:[%s516_s1] sm:$0xff]  }
   0xa   :  { %v16_v22 = vld [vmem:[%s517_s0 + $0x8] sm:$0xff]  ;;  %v15_v28 = vld [vmem:[%s517_s0] sm:$0xff] }
   0xb   :  { %366 = vmatpush3.bf16.msra.mxu1 %v390_v8  ;;  %v19_v24 = vpack.c.bf16 %v16_v22, %v16_v22  ;;  %v18_v30 = vpack.c.bf16 %v15_v28, %v15_v28  ;;  %v305_v34 = vld [vmem:[%s518_s2] ss:$0 sm:$0xff] }
   0xc   :  { %335 = vmatpush3.bf16.msra.mxu0 %v391_v9  ;;  %367 = vmatprep.subr.bf16.mxu1 %v407_v0 }
   0xd   :  { %336 = vmatprep.subr.bf16.mxu0 %v392_v10  ;;  %252 = vmatprep.mubr.bf16.mxu0 %v19_v24 }
   0xf   :  { %368 = vmatpush3.bf16.msra.mxu1 %v393_v11 }
  0x10   :  { %337 = vmatpush3.bf16.msra.mxu0 %v394_v12  ;;  %369 = vmatprep.subr.bf16.mxu1 %v407_v0 }
  0x11   :  { %338 = vmatprep.subr.bf16.mxu0 %v395_v13 }
  0x13   :  { %370 = vmatpush3.bf16.msra.mxu1 %v396_v14 }
  0x14   :  { %339 = vmatpush3.bf16.msra.mxu0 %v397_v15  ;;  %371 = vmatprep.subr.bf16.mxu1 %v407_v0 }
  0x15   :  { %340 = vmatprep.subr.bf16.mxu0 %v398_v16 }
  0x17   :  { %372 = vmatpush3.bf16.msra.mxu1 %v399_v17 }
  0x18   :  { %341 = vmatpush3.bf16.msra.mxu0 %v400_v18  ;;  %373 = vmatprep.subr.bf16.mxu1 %v407_v0 }
  0x19   :  { %342 = vmatprep.subr.bf16.mxu0 %v401_v19 }
  0x1b   :  { %374 = vmatpush3.bf16.msra.mxu1 %v402_v20 }
  0x1c   :  { %343 = vmatpush3.bf16.msra.mxu0 %v403_v21  ;;  %375 = vmatprep.subr.bf16.mxu1 %v407_v0 }
  0x1d   :  { %344 = vmatprep.subr.bf16.mxu0 %v404_v23 }
  0x1f   :  { %376 = vmatpush3.bf16.msra.mxu1 %v405_v25 }
  0x20   :  { %345 = vmatpush3.bf16.msra.mxu0 %v406_v27 }
  0x22   :  { %378 = vmatmul.mubr.bf16.vlgmr.msra.gmra.mxu1 %v20_v29 }
  0x23   :  { %253 = vmatmul.mubr.bf16.vlgmr.msra.gmra.mxu0 %v18_v30 }
  0xe2   :  { %v294_v31 = vpop.f32.mrf.mxu1 }
  0xe3   :  { %v346_v32 = vpop.f32.mrf.mxu0 }
  0xe4   :  { %v379_v33 = vpop.f32.mrf.mxu1 }
  0xe5   :  { %v347_v35 = vpop.f32.mrf.mxu0 }
  0xe6   :  { %v348_v36 = vadd.f32 %v347_v35, %v346_v32  ;;  %v297_v37 = vpop.f32.mrf.mxu1 }
  0xe7   :  { %v349_v38 = vpop.f32.mrf.mxu0 }
  0xe8   :  { %v255_v39 = vadd.f32 %v348_v36, %v305_v34  ;;  %v380_v40 = vpop.f32.mrf.mxu1 }
  0xe9   :  { %v350_v41 = vpop.f32.mrf.mxu0 }
  0xea   :  { %v295_v42 = vadd.f32 %v294_v31, %v255_v39 }
  0xec   :  { %300 = vst [vmem:[%s519_s3] sm:$0xff] %v295_v42 }

// kernel: forward.71
= control target key start
LH: loop header
LB: loop body
LE: loop exit
PB: predicated region body
PF: predicated region fallthrough
CT: control target
= control target key end

     0   :  { %s403_s1 = inlined_call_operand.vmem [shape: bf16[256,128], index: 1, kind: input, shape index: {}]   ;;  %s404_s0 = inlined_call_operand.vmem [shape: f32[32,256], index: 0, kind: input, shape index: {}]   ;;  %s405_s2 = inlined_call_operand.vmem [shape: f32[1,128], index: 2, kind: input, shape index: {}]   ;;  %s406_s3 = inlined_call_operand.vmem [shape: f32[32,128], index: 3, kind: output, shape index: {}]  }
   0x1   :  { %v280_v0 = vld [vmem:[%s403_s1 + $0x78] sm:$0xff]   ;;  %v282_v2 = vld [vmem:[%s403_s1 + $0x70] sm:$0xff]   ;;  %v284_v4 = vld [vmem:[%s403_s1 + $0x68] sm:$0xff]  }
   0x2   :  { %v281_v1 = vld [vmem:[%s403_s1 + $0x38] sm:$0xff]   ;;  %236 = vmatprep.subr.bf16.mxu0 %v280_v0  ;;  %264 = vmatprep.subr.bf16.mxu1 %v280_v0  ;;  %v283_v3 = vld [vmem:[%s403_s1 + $0x30] sm:$0xff]   ;;  %v285_v5 = vld [vmem:[%s403_s1 + $0x28] sm:$0xff]  }
   0x3   :  { %237 = vmatpush3.bf16.msra.mxu0 %v281_v1  ;;  %272 = vmatpush3.bf16.msra.mxu1 %v281_v1  ;;  %v286_v6 = vld [vmem:[%s403_s1 + $0x60] sm:$0xff]   ;;  %v288_v8 = vld [vmem:[%s403_s1 + $0x58] sm:$0xff]   ;;  %v290_v10 = vld [vmem:[%s403_s1 + $0x50] sm:$0xff]  }
   0x4   :  { %238 = vmatprep.subr.bf16.mxu0 %v282_v2  ;;  %265 = vmatprep.subr.bf16.mxu1 %v282_v2  ;;  %v287_v7 = vld [vmem:[%s403_s1 + $0x20] sm:$0xff]   ;;  %v289_v9 = vld [vmem:[%s403_s1 + $0x18] sm:$0xff]   ;;  %v16_v11 = vld [vmem:[%s404_s0 + $0x8] sm:$0xff] }
   0x5   :  { %v18_v12 = vld [vmem:[%s404_s0 + $0x18] sm:$0xff]  ;;  %v20_v13 = vld [vmem:[%s404_s0 + $0x28] sm:$0xff]  ;;  %v291_v17 = vld [vmem:[%s403_s1 + $0x10] sm:$0xff]  }
   0x6   :  { %v24_v14 = vpack.c.bf16 %v18_v12, %v16_v11  ;;  %v22_v15 = vld [vmem:[%s404_s0 + $0x38] sm:$0xff]  ;;  %v292_v18 = vld [vmem:[%s403_s1 + $0x48] sm:$0xff]   ;;  %v294_v20 = vld [vmem:[%s403_s1 + $0x40] sm:$0xff]  }
   0x7   :  { %239 = vmatpush3.bf16.msra.mxu0 %v283_v3  ;;  %273 = vmatpush3.bf16.msra.mxu1 %v283_v3  ;;  %v26_v16 = vpack.c.bf16 %v22_v15, %v20_v13  ;;  %v293_v19 = vld [vmem:[%s403_s1 + $0x8] sm:$0xff]   ;;  %v295_v21 = vld [vmem:[%s403_s1] sm:$0xff]   ;;  %v17_v23 = vld [vmem:[%s404_s0 + $0x10] sm:$0xff] }
   0x8   :  { %240 = vmatprep.subr.bf16.mxu0 %v284_v4  ;;  %266 = vmatprep.subr.bf16.mxu1 %v284_v4  ;;  %v15_v22 = vld [vmem:[%s404_s0] sm:$0xff]  ;;  %v21_v25 = vld [vmem:[%s404_s0 + $0x30] sm:$0xff] }
   0x9   :  { %194 = vmatprep.mubr.bf16.mxu0 %v24_v14  ;;  %202 = vmatprep.mubr.bf16.mxu1 %v26_v16  ;;  %v19_v24 = vld [vmem:[%s404_s0 + $0x20] sm:$0xff]  ;;  %v23_v26 = vpack.c.bf16 %v17_v23, %v15_v22 }
   0xa   :  { %v25_v27 = vpack.c.bf16 %v21_v25, %v19_v24  ;;  %v219_v30 = vld [vmem:[%s405_s2] ss:$0 sm:$0xff] }
   0xb   :  { %241 = vmatpush3.bf16.msra.mxu0 %v285_v5  ;;  %274 = vmatpush3.bf16.msra.mxu1 %v285_v5 }
   0xc   :  { %242 = vmatprep.subr.bf16.mxu0 %v286_v6  ;;  %267 = vmatprep.subr.bf16.mxu1 %v286_v6 }
   0xf   :  { %243 = vmatpush3.bf16.msra.mxu0 %v287_v7  ;;  %275 = vmatpush3.bf16.msra.mxu1 %v287_v7 }
  0x10   :  { %244 = vmatprep.subr.bf16.mxu0 %v288_v8  ;;  %268 = vmatprep.subr.bf16.mxu1 %v288_v8 }
  0x13   :  { %245 = vmatpush3.bf16.msra.mxu0 %v289_v9  ;;  %276 = vmatpush3.bf16.msra.mxu1 %v289_v9 }
  0x14   :  { %246 = vmatprep.subr.bf16.mxu0 %v290_v10  ;;  %269 = vmatprep.subr.bf16.mxu1 %v290_v10 }
  0x17   :  { %247 = vmatpush3.bf16.msra.mxu0 %v291_v17  ;;  %277 = vmatpush3.bf16.msra.mxu1 %v291_v17 }
  0x18   :  { %248 = vmatprep.subr.bf16.mxu0 %v292_v18  ;;  %270 = vmatprep.subr.bf16.mxu1 %v292_v18 }
  0x1b   :  { %249 = vmatpush3.bf16.msra.mxu0 %v293_v19  ;;  %278 = vmatpush3.bf16.msra.mxu1 %v293_v19 }
  0x1c   :  { %250 = vmatprep.subr.bf16.mxu0 %v294_v20  ;;  %271 = vmatprep.subr.bf16.mxu1 %v294_v20 }
  0x1f   :  { %251 = vmatpush3.bf16.msra.mxu0 %v295_v21  ;;  %279 = vmatpush3.bf16.msra.mxu1 %v295_v21 }
  0x22   :  { %195 = vmatmul.mubr.bf16.vlgmr.msra.gmra.mxu0 %v23_v26  ;;  %203 = vmatmul.mubr.bf16.vlgmr.msra.gmra.mxu1 %v25_v27 }
  0xe2   :  { %v252_v28 = vpop.f32.mrf.mxu0  ;;  %v258_v29 = vpop.f32.mrf.mxu1 }
  0xe4   :  { %v253_v31 = vpop.f32.mrf.mxu0  ;;  %v259_v32 = vpop.f32.mrf.mxu1 }
  0xe5   :  { %v254_v33 = vadd.f32 %v253_v31, %v252_v28  ;;  %v260_v34 = vadd.f32 %v259_v32, %v258_v29 }
  0xe6   :  { %v255_v35 = vpop.f32.mrf.mxu0  ;;  %v261_v36 = vpop.f32.mrf.mxu1 }
  0xe7   :  { %v197_v37 = vadd.f32 %v254_v33, %v219_v30  ;;  %v205_v38 = vadd.f32 %v260_v34, %v219_v30 }
  0xe8   :  { %v256_v39 = vpop.f32.mrf.mxu0  ;;  %v262_v40 = vpop.f32.mrf.mxu1 }
  0xe9   :  { %211 = vst [vmem:[%s406_s3] sm:$0xff] %v197_v37  ;;  %213 = vst [vmem:[%s406_s3 + $0x10] sm:$0xff] %v205_v38  ;;  %v257_v41 = vadd.f32 %v256_v39, %v255_v35  ;;  %v263_v42 = vadd.f32 %v262_v40, %v261_v36 }
  0xeb   :  { %v200_v43 = vadd.f32 %v257_v41, %v219_v30  ;;  %v208_v44 = vadd.f32 %v263_v42, %v219_v30 }
  0xed   :  { %212 = vst [vmem:[%s406_s3 + $0x8] sm:$0xff] %v200_v43  ;;  %214 = vst [vmem:[%s406_s3 + $0x18] sm:$0xff] %v208_v44 }

// kernel: forward.74
= control target key start
LH: loop header
LB: loop body
LE: loop exit
PB: predicated region body
PF: predicated region fallthrough
CT: control target
= control target key end

     0   :  { %s267_s1 = inlined_call_operand.vmem [shape: bf16[128,128], index: 1, kind: input, shape index: {}]   ;;  %s268_s0 = inlined_call_operand.vmem [shape: f32[32,128], index: 0, kind: input, shape index: {}]   ;;  %s269_s2 = inlined_call_operand.vmem [shape: f32[1,128], index: 2, kind: input, shape index: {}]   ;;  %s270_s3 = inlined_call_operand.vmem [shape: f32[32,128], index: 3, kind: output, shape index: {}]  }
   0x1   :  { %v188_v0 = vld [vmem:[%s267_s1 + $0x38] sm:$0xff]   ;;  %v189_v1 = vld [vmem:[%s267_s1 + $0x30] sm:$0xff]   ;;  %v190_v2 = vld [vmem:[%s267_s1 + $0x28] sm:$0xff]  }
   0x2   :  { %168 = vmatprep.subr.bf16.mxu0 %v188_v0  ;;  %v191_v3 = vld [vmem:[%s267_s1 + $0x20] sm:$0xff]   ;;  %v16_v5 = vld [vmem:[%s268_s0 + $0x8] sm:$0xff]  ;;  %v192_v7 = vld [vmem:[%s267_s1 + $0x18] sm:$0xff]  }
   0x3   :  { %169 = vmatpush3.bf16.msra.mxu0 %v188_v0  ;;  %v15_v4 = vld [vmem:[%s268_s0] sm:$0xff]  ;;  %v193_v8 = vld [vmem:[%s267_s1 + $0x10] sm:$0xff]   ;;  %v194_v9 = vld [vmem:[%s267_s1 + $0x8] sm:$0xff]  }
   0x4   :  { %170 = vmatprep.subr.bf16.mxu0 %v189_v1  ;;  %v19_v6 = vpack.c.bf16 %v16_v5, %v15_v4  ;;  %v195_v10 = vld [vmem:[%s267_s1] sm:$0xff]   ;;  %v17_v11 = vld [vmem:[%s268_s0 + $0x10] sm:$0xff]  ;;  %v18_v12 = vld [vmem:[%s268_s0 + $0x18] sm:$0xff] }
   0x5   :  { %v20_v13 = vpack.c.bf16 %v18_v12, %v17_v11  ;;  %v149_v14 = vld [vmem:[%s269_s2] ss:$0 sm:$0xff] }
   0x6   :  { %184 = vmatprep.mubr.bf16.mxu0 %v19_v6 }
   0x7   :  { %171 = vmatpush3.bf16.msra.mxu0 %v189_v1 }
   0x8   :  { %172 = vmatprep.subr.bf16.mxu0 %v190_v2 }
   0xb   :  { %173 = vmatpush3.bf16.msra.mxu0 %v190_v2 }
   0xc   :  { %174 = vmatprep.subr.bf16.mxu0 %v191_v3 }
   0xf   :  { %175 = vmatpush3.bf16.msra.mxu0 %v191_v3 }
  0x10   :  { %176 = vmatprep.subr.bf16.mxu0 %v192_v7 }
  0x13   :  { %177 = vmatpush3.bf16.msra.mxu0 %v192_v7 }
  0x14   :  { %178 = vmatprep.subr.bf16.mxu0 %v193_v8 }
  0x17   :  { %179 = vmatpush3.bf16.msra.mxu0 %v193_v8 }
  0x18   :  { %180 = vmatprep.subr.bf16.mxu0 %v194_v9 }
  0x1b   :  { %181 = vmatpush3.bf16.msra.mxu0 %v194_v9 }
  0x1c   :  { %182 = vmatprep.subr.bf16.mxu0 %v195_v10 }
  0x1f   :  { %183 = vmatpush3.bf16.msra.mxu0 %v195_v10 }
  0x22   :  { %185 = vmatmul.mubr.bf16.vlgmr.msra.gmra.mxu0 %v20_v13 }
  0xe2   :  { %v186_v15 = vpop.f32.mrf.mxu0 }
  0xe3   :  { %v135_v16 = vadd.f32 %v186_v15, %v149_v14 }
  0xe4   :  { %v126_v17 = vpop.f32.mrf.mxu0 }
  0xe5   :  { %143 = vst [vmem:[%s270_s3 + $0x10] sm:$0xff] %v135_v16  ;;  %v127_v18 = vadd.f32 %v149_v14, %v126_v17 }
  0xe6   :  { %v187_v19 = vpop.f32.mrf.mxu0 }
  0xe7   :  { %141 = vst [vmem:[%s270_s3] sm:$0xff] %v127_v18  ;;  %v138_v20 = vadd.f32 %v187_v19, %v149_v14 }
  0xe8   :  { %v129_v21 = vpop.f32.mrf.mxu0 }
  0xe9   :  { %144 = vst [vmem:[%s270_s3 + $0x18] sm:$0xff] %v138_v20  ;;  %v130_v22 = vadd.f32 %v149_v14, %v129_v21 }
  0xeb   :  { %142 = vst [vmem:[%s270_s3 + $0x8] sm:$0xff] %v130_v22 }

// kernel: forward.76
= control target key start
LH: loop header
LB: loop body
LE: loop exit
PB: predicated region body
PF: predicated region fallthrough
CT: control target
= control target key end

     0   :  { %s661_s1 = inlined_call_operand.vmem [shape: bf16[256,128], index: 1, kind: input, shape index: {}]   ;;  %s662_s0 = inlined_call_operand.vmem [shape: f32[128,256], index: 0, kind: input, shape index: {}]   ;;  %s663_s2 = inlined_call_operand.vmem [shape: f32[1,128], index: 2, kind: input, shape index: {}]   ;;  %s664_s3 = inlined_call_operand.vmem [shape: f32[128,128], index: 3, kind: output, shape index: {}]  }
   0x1   :  { %v412_v0 = vld [vmem:[%s661_s1 + $0x78] sm:$0xff]   ;;  %v414_v2 = vld [vmem:[%s661_s1 + $0x70] sm:$0xff]   ;;  %v416_v4 = vld [vmem:[%s661_s1 + $0x68] sm:$0xff]  }
   0x2   :  { %v413_v1 = vld [vmem:[%s661_s1 + $0x38] sm:$0xff]   ;;  %332 = vmatprep.subr.bf16.mxu0 %v412_v0  ;;  %396 = vmatprep.subr.bf16.mxu1 %v412_v0  ;;  %v415_v3 = vld [vmem:[%s661_s1 + $0x30] sm:$0xff]   ;;  %v417_v5 = vld [vmem:[%s661_s1 + $0x28] sm:$0xff]  }
   0x3   :  { %333 = vmatpush3.bf16.msra.mxu0 %v413_v1  ;;  %404 = vmatpush3.bf16.msra.mxu1 %v413_v1  ;;  %v418_v6 = vld [vmem:[%s661_s1 + $0x60] sm:$0xff]   ;;  %v420_v8 = vld [vmem:[%s661_s1 + $0x58] sm:$0xff]   ;;  %v422_v10 = vld [vmem:[%s661_s1 + $0x50] sm:$0xff]  }
   0x4   :  { %334 = vmatprep.subr.bf16.mxu0 %v414_v2  ;;  %397 = vmatprep.subr.bf16.mxu1 %v414_v2  ;;  %v419_v7 = vld [vmem:[%s661_s1 + $0x20] sm:$0xff]   ;;  %v421_v9 = vld [vmem:[%s661_s1 + $0x18] sm:$0xff]   ;;  %v16_v11 = vld [vmem:[%s662_s0 + $0x8] sm:$0xff] }
   0x5   :  { %v18_v12 = vld [vmem:[%s662_s0 + $0x18] sm:$0xff]  ;;  %v32_v13 = vld [vmem:[%s662_s0 + $0x88] sm:$0xff]  ;;  %v423_v17 = vld [vmem:[%s661_s1 + $0x10] sm:$0xff]  }
   0x6   :  { %v48_v14 = vpack.c.bf16 %v18_v12, %v16_v11  ;;  %v34_v15 = vld [vmem:[%s662_s0 + $0x98] sm:$0xff]  ;;  %v424_v18 = vld [vmem:[%s661_s1 + $0x48] sm:$0xff]   ;;  %v426_v20 = vld [vmem:[%s661_s1 + $0x40] sm:$0xff]  }
   0x7   :  { %335 = vmatpush3.bf16.msra.mxu0 %v415_v3  ;;  %405 = vmatpush3.bf16.msra.mxu1 %v415_v3  ;;  %v56_v16 = vpack.c.bf16 %v34_v15, %v32_v13  ;;  %v425_v19 = vld [vmem:[%s661_s1 + $0x8] sm:$0xff]   ;;  %v427_v21 = vld [vmem:[%s661_s1] sm:$0xff]   ;;  %v17_v23 = vld [vmem:[%s662_s0 + $0x10] sm:$0xff] }
   0x8   :  { %336 = vmatprep.subr.bf16.mxu0 %v416_v4  ;;  %398 = vmatprep.subr.bf16.mxu1 %v416_v4  ;;  %v15_v22 = vld [vmem:[%s662_s0] sm:$0xff]  ;;  %v33_v25 = vld [vmem:[%s662_s0 + $0x90] sm:$0xff]  ;;  %v20_v26 = vld [vmem:[%s662_s0 + $0x28] sm:$0xff] }
   0x9   :  { %230 = vmatprep.mubr.bf16.mxu0 %v48_v14  ;;  %262 = vmatprep.mubr.bf16.mxu1 %v56_v16  ;;  %v31_v24 = vld [vmem:[%s662_s0 + $0x80] sm:$0xff]  ;;  %v22_v27 = vld [vmem:[%s662_s0 + $0x38] sm:$0xff]  ;;  %v36_v28 = vld [vmem:[%s662_s0 + $0xa8] sm:$0xff]  ;;  %v47_v30 = vpack.c.bf16 %v17_v23, %v15_v22 }
   0xa   :  { %v38_v29 = vld [vmem:[%s662_s0 + $0xb8] sm:$0xff]  ;;  %v55_v31 = vpack.c.bf16 %v33_v25, %v31_v24  ;;  %v50_v32 = vpack.c.bf16 %v22_v27, %v20_v26  ;;  %v19_v34 = vld [vmem:[%s662_s0 + $0x20] sm:$0xff]  ;;  %v21_v35 = vld [vmem:[%s662_s0 + $0x30] sm:$0xff] }
   0xb   :  { %337 = vmatpush3.bf16.msra.mxu0 %v417_v5  ;;  %406 = vmatpush3.bf16.msra.mxu1 %v417_v5  ;;  %v58_v33 = vpack.c.bf16 %v38_v29, %v36_v28  ;;  %v35_v36 = vld [vmem:[%s662_s0 + $0xa0] sm:$0xff]  ;;  %v37_v37 = vld [vmem:[%s662_s0 + $0xb0] sm:$0xff]  ;;  %v24_v38 = vld [vmem:[%s662_s0 + $0x48] sm:$0xff]  ;;  %v49_v42 = vpack.c.bf16 %v21_v35, %v19_v34 }
   0xc   :  { %338 = vmatprep.subr.bf16.mxu0 %v418_v6  ;;  %399 = vmatprep.subr.bf16.mxu1 %v418_v6  ;;  %v26_v39 = vld [vmem:[%s662_s0 + $0x58] sm:$0xff]  ;;  %v40_v40 = vld [vmem:[%s662_s0 + $0xc8] sm:$0xff]  ;;  %v57_v43 = vpack.c.bf16 %v37_v37, %v35_v36  ;;  %v23_v46 = vld [vmem:[%s662_s0 + $0x40] sm:$0xff] }
   0xd   :  { %v42_v41 = vld [vmem:[%s662_s0 + $0xd8] sm:$0xff]  ;;  %v52_v44 = vpack.c.bf16 %v26_v39, %v24_v38  ;;  %v25_v47 = vld [vmem:[%s662_s0 + $0x50] sm:$0xff]  ;;  %v39_v48 = vld [vmem:[%s662_s0 + $0xc0] sm:$0xff] }
   0xe   :  { %v60_v45 = vpack.c.bf16 %v42_v41, %v40_v40  ;;  %v41_v49 = vld [vmem:[%s662_s0 + $0xd0] sm:$0xff]  ;;  %v28_v50 = vld [vmem:[%s662_s0 + $0x68] sm:$0xff]  ;;  %v30_v51 = vld [vmem:[%s662_s0 + $0x78] sm:$0xff]  ;;  %v51_v54 = vpack.c.bf16 %v25_v47, %v23_v46 }
   0xf   :  { %339 = vmatpush3.bf16.msra.mxu0 %v419_v7  ;;  %407 = vmatpush3.bf16.msra.mxu1 %v419_v7  ;;  %v44_v52 = vld [vmem:[%s662_s0 + $0xe8] sm:$0xff]  ;;  %v46_v53 = vld [vmem:[%s662_s0 + $0xf8] sm:$0xff]  ;;  %v59_v55 = vpack.c.bf16 %v41_v49, %v39_v48  ;;  %v54_v56 = vpack.c.bf16 %v30_v51, %v28_v50  ;;  %v27_v58 = vld [vmem:[%s662_s0 + $0x60] sm:$0xff] }
  0x10   :  { %340 = vmatprep.subr.bf16.mxu0 %v420_v8  ;;  %400 = vmatprep.subr.bf16.mxu1 %v420_v8  ;;  %v62_v57 = vpack.c.bf16 %v46_v53, %v44_v52  ;;  %v29_v59 = vld [vmem:[%s662_s0 + $0x70] sm:$0xff]  ;;  %v43_v60 = vld [vmem:[%s662_s0 + $0xe0] sm:$0xff] }
  0x11   :  { %v45_v61 = vld [vmem:[%s662_s0 + $0xf0] sm:$0xff]  ;;  %v53_v62 = vpack.c.bf16 %v29_v59, %v27_v58  ;;  %v595_v2 = vld [vmem:[%s663_s2] ss:$0 sm:$0xff] }
  0x12   :  { %v61_v63 = vpack.c.bf16 %v45_v61, %v43_v60 }
  0x13   :  { %341 = vmatpush3.bf16.msra.mxu0 %v421_v9  ;;  %408 = vmatpush3.bf16.msra.mxu1 %v421_v9 }
  0x14   :  { %342 = vmatprep.subr.bf16.mxu0 %v422_v10  ;;  %401 = vmatprep.subr.bf16.mxu1 %v422_v10 }
  0x17   :  { %343 = vmatpush3.bf16.msra.mxu0 %v423_v17  ;;  %409 = vmatpush3.bf16.msra.mxu1 %v423_v17 }
  0x18   :  { %344 = vmatprep.subr.bf16.mxu0 %v424_v18  ;;  %402 = vmatprep.subr.bf16.mxu1 %v424_v18 }
  0x1b   :  { %345 = vmatpush3.bf16.msra.mxu0 %v425_v19  ;;  %410 = vmatpush3.bf16.msra.mxu1 %v425_v19 }
  0x1c   :  { %346 = vmatprep.subr.bf16.mxu0 %v426_v20  ;;  %403 = vmatprep.subr.bf16.mxu1 %v426_v20 }
  0x1f   :  { %347 = vmatpush3.bf16.msra.mxu0 %v427_v21  ;;  %411 = vmatpush3.bf16.msra.mxu1 %v427_v21 }
  0x22   :  { %231 = vmatmul.mubr.bf16.vlgmr.msra.gmra.mxu0 %v47_v30  ;;  %263 = vmatmul.mubr.bf16.vlgmr.msra.gmra.mxu1 %v55_v31 }
  0x23   :  { %238 = vmatprep.mubr.bf16.mxu0 %v50_v32  ;;  %270 = vmatprep.mubr.bf16.mxu1 %v58_v33 }
  0x2a   :  { %239 = vmatmul.mubr.bf16.gmra.mxu0 %v49_v42  ;;  %271 = vmatmul.mubr.bf16.gmra.mxu1 %v57_v43 }
  0x2b   :  { %246 = vmatprep.mubr.bf16.mxu0 %v52_v44  ;;  %278 = vmatprep.mubr.bf16.mxu1 %v60_v45 }
  0x32   :  { %247 = vmatmul.mubr.bf16.gmra.mxu0 %v51_v54  ;;  %279 = vmatmul.mubr.bf16.gmra.mxu1 %v59_v55 }
  0x33   :  { %254 = vmatprep.mubr.bf16.mxu0 %v54_v56  ;;  %286 = vmatprep.mubr.bf16.mxu1 %v62_v57 }
  0x3a   :  { %255 = vmatmul.mubr.bf16.gmra.mxu0 %v53_v62  ;;  %287 = vmatmul.mubr.bf16.gmra.mxu1 %v61_v63 }
  0xe2   :  { %v348_v0 = vpop.f32.mrf.mxu0  ;;  %v372_v1 = vpop.f32.mrf.mxu1 }
  0xe4   :  { %v349_v3 = vpop.f32.mrf.mxu0  ;;  %v373_v4 = vpop.f32.mrf.mxu1 }
  0xe5   :  { %v350_v5 = vadd.f32 %v349_v3, %v348_v0  ;;  %v374_v6 = vadd.f32 %v373_v4, %v372_v1 }
  0xe6   :  { %v351_v7 = vpop.f32.mrf.mxu0  ;;  %v375_v8 = vpop.f32.mrf.mxu1 }
  0xe7   :  { %v233_v9 = vadd.f32 %v350_v5, %v595_v2  ;;  %v265_v10 = vadd.f32 %v374_v6, %v595_v2 }
  0xe8   :  { %v352_v11 = vpop.f32.mrf.mxu0  ;;  %v376_v12 = vpop.f32.mrf.mxu1 }
  0xe9   :  { %295 = vst [vmem:[%s664_s3] sm:$0xff] %v233_v9  ;;  %303 = vst [vmem:[%s664_s3 + $0x40] sm:$0xff] %v265_v10  ;;  %v353_v13 = vadd.f32 %v352_v11, %v351_v7  ;;  %v377_v14 = vadd.f32 %v376_v12, %v375_v8 }
  0xea   :  { %v354_v15 = vpop.f32.mrf.mxu0  ;;  %v378_v16 = vpop.f32.mrf.mxu1 }
  0xeb   :  { %v236_v17 = vadd.f32 %v353_v13, %v595_v2  ;;  %v268_v18 = vadd.f32 %v377_v14, %v595_v2 }
  0xec   :  { %v355_v19 = vpop.f32.mrf.mxu0  ;;  %v379_v20 = vpop.f32.mrf.mxu1 }
  0xed   :  { %296 = vst [vmem:[%s664_s3 + $0x8] sm:$0xff] %v236_v17  ;;  %304 = vst [vmem:[%s664_s3 + $0x48] sm:$0xff] %v268_v18  ;;  %v356_v21 = vadd.f32 %v355_v19, %v354_v15  ;;  %v380_v22 = vadd.f32 %v379_v20, %v378_v16 }
  0xee   :  { %v357_v23 = vpop.f32.mrf.mxu0  ;;  %v381_v24 = vpop.f32.mrf.mxu1 }
  0xef   :  { %v241_v25 = vadd.f32 %v356_v21, %v595_v2  ;;  %v273_v26 = vadd.f32 %v380_v22, %v595_v2 }
  0xf0   :  { %v358_v27 = vpop.f32.mrf.mxu0  ;;  %v382_v28 = vpop.f32.mrf.mxu1 }
  0xf1   :  { %297 = vst [vmem:[%s664_s3 + $0x10] sm:$0xff] %v241_v25  ;;  %305 = vst [vmem:[%s664_s3 + $0x50] sm:$0xff] %v273_v26  ;;  %v359_v29 = vadd.f32 %v358_v27, %v357_v23  ;;  %v383_v30 = vadd.f32 %v382_v28, %v381_v24 }
  0xf2   :  { %v360_v31 = vpop.f32.mrf.mxu0  ;;  %v384_v32 = vpop.f32.mrf.mxu1 }
  0xf3   :  { %v244_v33 = vadd.f32 %v359_v29, %v595_v2  ;;  %v276_v34 = vadd.f32 %v383_v30, %v595_v2 }
  0xf4   :  { %v361_v35 = vpop.f32.mrf.mxu0  ;;  %v385_v36 = vpop.f32.mrf.mxu1 }
  0xf5   :  { %298 = vst [vmem:[%s664_s3 + $0x18] sm:$0xff] %v244_v33  ;;  %306 = vst [vmem:[%s664_s3 + $0x58] sm:$0xff] %v276_v34  ;;  %v362_v37 = vadd.f32 %v361_v35, %v360_v31  ;;  %v386_v38 = vadd.f32 %v385_v36, %v384_v32 }
  0xf6   :  { %v363_v39 = vpop.f32.mrf.mxu0  ;;  %v387_v40 = vpop.f32.mrf.mxu1 }
  0xf7   :  { %v249_v41 = vadd.f32 %v362_v37, %v595_v2  ;;  %v281_v42 = vadd.f32 %v386_v38, %v595_v2 }
  0xf8   :  { %v364_v43 = vpop.f32.mrf.mxu0  ;;  %v388_v44 = vpop.f32.mrf.mxu1 }
  0xf9   :  { %299 = vst [vmem:[%s664_s3 + $0x20] sm:$0xff] %v249_v41  ;;  %307 = vst [vmem:[%s664_s3 + $0x60] sm:$0xff] %v281_v42  ;;  %v365_v45 = vadd.f32 %v364_v43, %v363_v39  ;;  %v389_v46 = vadd.f32 %v388_v44, %v387_v40 }
  0xfa   :  { %v366_v47 = vpop.f32.mrf.mxu0  ;;  %v390_v48 = vpop.f32.mrf.mxu1 }
  0xfb   :  { %v252_v49 = vadd.f32 %v365_v45, %v595_v2  ;;  %v284_v50 = vadd.f32 %v389_v46, %v595_v2 }
  0xfc   :  { %v367_v51 = vpop.f32.mrf.mxu0  ;;  %v391_v52 = vpop.f32.mrf.mxu1 }
  0xfd   :  { %300 = vst [vmem:[%s664_s3 + $0x28] sm:$0xff] %v252_v49  ;;  %308 = vst [vmem:[%s664_s3 + $0x68] sm:$0xff] %v284_v50  ;;  %v368_v53 = vadd.f32 %v367_v51, %v366_v47  ;;  %v392_v54 = vadd.f32 %v391_v52, %v390_v48 }
  0xfe   :  { %v369_v55 = vpop.f32.mrf.mxu0  ;;  %v393_v56 = vpop.f32.mrf.mxu1 }
  0xff   :  { %v257_v57 = vadd.f32 %v368_v53, %v595_v2  ;;  %v289_v58 = vadd.f32 %v392_v54, %v595_v2 }
 0x100   :  { %v370_v59 = vpop.f32.mrf.mxu0  ;;  %v394_v60 = vpop.f32.mrf.mxu1 }
 0x101   :  { %301 = vst [vmem:[%s664_s3 + $0x30] sm:$0xff] %v257_v57  ;;  %309 = vst [vmem:[%s664_s3 + $0x70] sm:$0xff] %v289_v58  ;;  %v371_v61 = vadd.f32 %v370_v59, %v369_v55  ;;  %v395_v62 = vadd.f32 %v394_v60, %v393_v56 }
 0x103   :  { %v260_v63 = vadd.f32 %v371_v61, %v595_v2  ;;  %v292_v0 = vadd.f32 %v395_v62, %v595_v2 }
 0x105   :  { %302 = vst [vmem:[%s664_s3 + $0x38] sm:$0xff] %v260_v63  ;;  %310 = vst [vmem:[%s664_s3 + $0x78] sm:$0xff] %v292_v0 }

// kernel: forward.81
= control target key start
LH: loop header
LB: loop body
LE: loop exit
PB: predicated region body
PF: predicated region fallthrough
CT: control target
= control target key end

     0   :  { %s695_s12 = smov 0   ;;  %s848_s0 = inlined_call_operand.vmem [shape: f32[512,128], index: 0, kind: input, shape index: {}]   ;;  %s849_s1 = inlined_call_operand.vmem [shape: bf16[128,128], index: 1, kind: input, shape index: {}]   ;;  %s850_s2 = inlined_call_operand.vmem [shape: f32[1,128], index: 2, kind: input, shape index: {}]   ;;  %s851_s3 = inlined_call_operand.vmem [shape: f32[512,128], index: 3, kind: output, shape index: {}]  }
   0x1 LB: > { %s543_s13 = sadd.s32 4294967295, %s673_s12   ;;  %p547_p0 = scmp.ge.s32.totalorder %s673_s12, 1  ;;  %s673_s12 = sphi %s695_s12, %s13_s12  }
   0x2   : > { %p138_p1 = scmp.lt.s32.totalorder %s673_s12, 3 }
   0x4   : > { %p139_p2 = pnand %p547_p0, %p138_p1 }
   0x5   : > { %s548_s16 = sshll.u32 (!%p139_p2), %s543_s13, 5 }
   0x6   : > { %142 = sbr.rel (%p139_p2) target bundleno = 270 (0x10e), region = 32  ;;  %p163_p3 = scmp.lt.s32.totalorder (!%p139_p2), %s548_s16, 63 }
   0xb   : > { %v659_v0 = vld [vmem:[%s849_s1 + $0x38] sm:$0xff]   ;;  %v660_v1 = vld [vmem:[%s849_s1 + $0x30] sm:$0xff]   ;;  %s853_s16 = smov (!%p163_p3, %s548_s16), 63  ;;  %v661_v2 = vld [vmem:[%s849_s1 + $0x28] sm:$0xff]  }
   0xc   : > { %587 = vmatprep.subr.bf16.mxu0 %v659_v0  ;;  %635 = vmatprep.subr.bf16.mxu1 %v659_v0  ;;  %s549_s21 = sshll.u32 %s853_s16, 3  ;;  %v662_v3 = vld [vmem:[%s849_s1 + $0x20] sm:$0xff]   ;;  %v663_v10 = vld [vmem:[%s849_s1 + $0x18] sm:$0xff]   ;;  %v664_v11 = vld [vmem:[%s849_s1 + $0x10] sm:$0xff]  }
   0xd   : > { %588 = vmatpush3.bf16.msra.mxu0 %v659_v0  ;;  %643 = vmatpush3.bf16.msra.mxu1 %v659_v0  ;;  %s720_s24 = scalar_lea.vmem %s848_s0, %s549_s21  ;;  %v665_v12 = vld [vmem:[%s849_s1 + $0x8] sm:$0xff]   ;;  %v666_v13 = vld [vmem:[%s849_s1] sm:$0xff]   ;;  %s779_s13 = scalar_lea.vmem %s851_s3, %s549_s21 }
   0xe   : > { %589 = vmatprep.subr.bf16.mxu0 %v660_v1  ;;  %636 = vmatprep.subr.bf16.mxu1 %v660_v1  ;;  %v175_v4 = vld [vmem:[%s720_s24] sm:$0xff]  ;;  %v176_v5 = vld [vmem:[%s720_s24 + $0x8] sm:$0xff]  ;;  %v177_v14 = vld [vmem:[%s720_s24 + $0x10] sm:$0xff] }
   0xf   : > { %v191_v6 = vld [vmem:[%s720_s24 + $0x80] sm:$0xff]  ;;  %v207_v7 = vpack.c.bf16 %v176_v5, %v175_v4  ;;  %v192_v8 = vld [vmem:[%s720_s24 + $0x88] sm:$0xff]  ;;  %v178_v15 = vld [vmem:[%s720_s24 + $0x18] sm:$0xff] }
  0x10   : > { %v215_v9 = vpack.c.bf16 %v192_v8, %v191_v6  ;;  %v193_v16 = vld [vmem:[%s720_s24 + $0x90] sm:$0xff]  ;;  %v194_v17 = vld [vmem:[%s720_s24 + $0x98] sm:$0xff]  ;;  %v179_v18 = vld [vmem:[%s720_s24 + $0x20] sm:$0xff]  ;;  %v208_v22 = vpack.c.bf16 %v178_v15, %v177_v14 }
  0x11   : > { %590 = vmatpush3.bf16.msra.mxu0 %v660_v1  ;;  %644 = vmatpush3.bf16.msra.mxu1 %v660_v1  ;;  %v180_v19 = vld [vmem:[%s720_s24 + $0x28] sm:$0xff]  ;;  %v195_v20 = vld [vmem:[%s720_s24 + $0xa0] sm:$0xff]  ;;  %v216_v23 = vpack.c.bf16 %v194_v17, %v193_v16  ;;  %v181_v26 = vld [vmem:[%s720_s24 + $0x30] sm:$0xff] }
  0x12   : > { %591 = vmatprep.subr.bf16.mxu0 %v661_v2  ;;  %637 = vmatprep.subr.bf16.mxu1 %v661_v2  ;;  %v196_v21 = vld [vmem:[%s720_s24 + $0xa8] sm:$0xff]  ;;  %v209_v24 = vpack.c.bf16 %v180_v19, %v179_v18  ;;  %v182_v27 = vld [vmem:[%s720_s24 + $0x38] sm:$0xff]  ;;  %v197_v28 = vld [vmem:[%s720_s24 + $0xb0] sm:$0xff] }
  0x13   : > { %603 = vmatprep.mubr.bf16.mxu0 %v207_v7  ;;  %619 = vmatprep.mubr.bf16.mxu1 %v215_v9  ;;  %v217_v25 = vpack.c.bf16 %v196_v21, %v195_v20  ;;  %v198_v29 = vld [vmem:[%s720_s24 + $0xb8] sm:$0xff]  ;;  %v183_v30 = vld [vmem:[%s720_s24 + $0x40] sm:$0xff]  ;;  %v184_v31 = vld [vmem:[%s720_s24 + $0x48] sm:$0xff]  ;;  %v210_v34 = vpack.c.bf16 %v182_v27, %v181_v26 }
  0x14   : > { %v199_v32 = vld [vmem:[%s720_s24 + $0xc0] sm:$0xff]  ;;  %v200_v33 = vld [vmem:[%s720_s24 + $0xc8] sm:$0xff]  ;;  %v218_v35 = vpack.c.bf16 %v198_v29, %v197_v28  ;;  %v211_v36 = vpack.c.bf16 %v184_v31, %v183_v30  ;;  %v185_v38 = vld [vmem:[%s720_s24 + $0x50] sm:$0xff] }
  0x15   : > { %592 = vmatpush3.bf16.msra.mxu0 %v661_v2  ;;  %645 = vmatpush3.bf16.msra.mxu1 %v661_v2  ;;  %v219_v37 = vpack.c.bf16 %v200_v33, %v199_v32  ;;  %v186_v39 = vld [vmem:[%s720_s24 + $0x58] sm:$0xff]  ;;  %v201_v40 = vld [vmem:[%s720_s24 + $0xd0] sm:$0xff]  ;;  %v187_v42 = vld [vmem:[%s720_s24 + $0x60] sm:$0xff] }
  0x16   : > { %593 = vmatprep.subr.bf16.mxu0 %v662_v3  ;;  %638 = vmatprep.subr.bf16.mxu1 %v662_v3  ;;  %v202_v41 = vld [vmem:[%s720_s24 + $0xd8] sm:$0xff]  ;;  %v188_v43 = vld [vmem:[%s720_s24 + $0x68] sm:$0xff]  ;;  %v203_v44 = vld [vmem:[%s720_s24 + $0xe0] sm:$0xff]  ;;  %v212_v46 = vpack.c.bf16 %v186_v39, %v185_v38 }
  0x17   : > { %v204_v45 = vld [vmem:[%s720_s24 + $0xe8] sm:$0xff]  ;;  %v220_v47 = vpack.c.bf16 %v202_v41, %v201_v40  ;;  %v213_v48 = vpack.c.bf16 %v188_v43, %v187_v42  ;;  %v189_v50 = vld [vmem:[%s720_s24 + $0x70] sm:$0xff]  ;;  %v190_v51 = vld [vmem:[%s720_s24 + $0x78] sm:$0xff] }
  0x18   : > { %v221_v49 = vpack.c.bf16 %v204_v45, %v203_v44  ;;  %v205_v52 = vld [vmem:[%s720_s24 + $0xf0] sm:$0xff]  ;;  %v206_v53 = vld [vmem:[%s720_s24 + $0xf8] sm:$0xff]  ;;  %v214_v54 = vpack.c.bf16 %v190_v51, %v189_v50  ;;  %v772_v56 = vld [vmem:[%s850_s2] ss:$0 sm:$0xff] }
  0x19   : > { %594 = vmatpush3.bf16.msra.mxu0 %v662_v3  ;;  %646 = vmatpush3.bf16.msra.mxu1 %v662_v3  ;;  %v222_v55 = vpack.c.bf16 %v206_v53, %v205_v52 }
  0x1a   : > { %595 = vmatprep.subr.bf16.mxu0 %v663_v10  ;;  %639 = vmatprep.subr.bf16.mxu1 %v663_v10 }
  0x1d   : > { %596 = vmatpush3.bf16.msra.mxu0 %v663_v10  ;;  %647 = vmatpush3.bf16.msra.mxu1 %v663_v10 }
  0x1e   : > { %597 = vmatprep.subr.bf16.mxu0 %v664_v11  ;;  %640 = vmatprep.subr.bf16.mxu1 %v664_v11 }
  0x21   : > { %598 = vmatpush3.bf16.msra.mxu0 %v664_v11  ;;  %648 = vmatpush3.bf16.msra.mxu1 %v664_v11 }
  0x22   : > { %599 = vmatprep.subr.bf16.mxu0 %v665_v12  ;;  %641 = vmatprep.subr.bf16.mxu1 %v665_v12 }
  0x25   : > { %600 = vmatpush3.bf16.msra.mxu0 %v665_v12  ;;  %649 = vmatpush3.bf16.msra.mxu1 %v665_v12 }
  0x26   : > { %601 = vmatprep.subr.bf16.mxu0 %v666_v13  ;;  %642 = vmatprep.subr.bf16.mxu1 %v666_v13 }
  0x29   : > { %602 = vmatpush3.bf16.msra.mxu0 %v666_v13  ;;  %650 = vmatpush3.bf16.msra.mxu1 %v666_v13 }
  0x2c   : > { %604 = vmatmul.mubr.bf16.vlgmr.msra.gmra.mxu0 %v208_v22  ;;  %620 = vmatmul.mubr.bf16.vlgmr.msra.gmra.mxu1 %v216_v23 }
  0x2d   : > { %607 = vmatprep.mubr.bf16.mxu0 %v209_v24  ;;  %623 = vmatprep.mubr.bf16.mxu1 %v217_v25 }
  0x34   : > { %608 = vmatmul.mubr.bf16.gmra.mxu0 %v210_v34  ;;  %624 = vmatmul.mubr.bf16.gmra.mxu1 %v218_v35 }
  0x35   : > { %611 = vmatprep.mubr.bf16.mxu0 %v211_v36  ;;  %627 = vmatprep.mubr.bf16.mxu1 %v219_v37 }
  0x3c   : > { %612 = vmatmul.mubr.bf16.gmra.mxu0 %v212_v46  ;;  %628 = vmatmul.mubr.bf16.gmra.mxu1 %v220_v47 }
  0x3d   : > { %615 = vmatprep.mubr.bf16.mxu0 %v213_v48  ;;  %631 = vmatprep.mubr.bf16.mxu1 %v221_v49 }
  0x44   : > { %616 = vmatmul.mubr.bf16.gmra.mxu0 %v214_v54  ;;  %632 = vmatmul.mubr.bf16.gmra.mxu1 %v222_v55 }
  0xec   : > { %v605_v57 = vpop.f32.mrf.mxu0  ;;  %v621_v58 = vpop.f32.mrf.mxu1 }
  0xed   : > { %v337_v59 = vadd.f32 %v605_v57, %v772_v56  ;;  %v401_v60 = vadd.f32 %v621_v58, %v772_v56 }
  0xee   : > { %v328_v61 = vpop.f32.mrf.mxu0  ;;  %v392_v62 = vpop.f32.mrf.mxu1 }
  0xef   : > { %457 = vst [vmem:[%s779_s13 + $0x10] sm:$0xff] %v337_v59  ;;  %473 = vst [vmem:[%s779_s13 + $0x90] sm:$0xff] %v401_v60  ;;  %v329_v63 = vadd.f32 %v772_v56, %v328_v61  ;;  %v393_v0 = vadd.f32 %v772_v56, %v392_v62 }
  0xf0   : > { %v606_v1 = vpop.f32.mrf.mxu0  ;;  %v622_v2 = vpop.f32.mrf.mxu1 }
  0xf1   : > { %455 = vst [vmem:[%s779_s13] sm:$0xff] %v329_v63  ;;  %471 = vst [vmem:[%s779_s13 + $0x80] sm:$0xff] %v393_v0  ;;  %v340_v3 = vadd.f32 %v606_v1, %v772_v56  ;;  %v404_v4 = vadd.f32 %v622_v2, %v772_v56 }
  0xf2   : > { %v331_v5 = vpop.f32.mrf.mxu0  ;;  %v395_v6 = vpop.f32.mrf.mxu1 }
  0xf3   : > { %458 = vst [vmem:[%s779_s13 + $0x18] sm:$0xff] %v340_v3  ;;  %474 = vst [vmem:[%s779_s13 + $0x98] sm:$0xff] %v404_v4  ;;  %v332_v7 = vadd.f32 %v772_v56, %v331_v5  ;;  %v396_v8 = vadd.f32 %v772_v56, %v395_v6 }
  0xf4   : > { %v609_v9 = vpop.f32.mrf.mxu0  ;;  %v625_v10 = vpop.f32.mrf.mxu1 }
  0xf5   : > { %456 = vst [vmem:[%s779_s13 + $0x8] sm:$0xff] %v332_v7  ;;  %472 = vst [vmem:[%s779_s13 + $0x88] sm:$0xff] %v396_v8  ;;  %v353_v11 = vadd.f32 %v609_v9, %v772_v56  ;;  %v417_v12 = vadd.f32 %v625_v10, %v772_v56 }
  0xf6   : > { %v344_v13 = vpop.f32.mrf.mxu0  ;;  %v408_v14 = vpop.f32.mrf.mxu1 }
  0xf7   : > { %461 = vst [vmem:[%s779_s13 + $0x30] sm:$0xff] %v353_v11  ;;  %477 = vst [vmem:[%s779_s13 + $0xb0] sm:$0xff] %v417_v12  ;;  %v345_v15 = vadd.f32 %v772_v56, %v344_v13  ;;  %v409_v16 = vadd.f32 %v772_v56, %v408_v14 }
  0xf8   : > { %v610_v17 = vpop.f32.mrf.mxu0  ;;  %v626_v18 = vpop.f32.mrf.mxu1 }
  0xf9   : > { %459 = vst [vmem:[%s779_s13 + $0x20] sm:$0xff] %v345_v15  ;;  %475 = vst [vmem:[%s779_s13 + $0xa0] sm:$0xff] %v409_v16  ;;  %v356_v19 = vadd.f32 %v610_v17, %v772_v56  ;;  %v420_v20 = vadd.f32 %v626_v18, %v772_v56 }
  0xfa   : > { %v347_v21 = vpop.f32.mrf.mxu0  ;;  %v411_v22 = vpop.f32.mrf.mxu1 }
  0xfb   : > { %462 = vst [vmem:[%s779_s13 + $0x38] sm:$0xff] %v356_v19  ;;  %478 = vst [vmem:[%s779_s13 + $0xb8] sm:$0xff] %v420_v20  ;;  %v348_v23 = vadd.f32 %v772_v56, %v347_v21  ;;  %v412_v24 = vadd.f32 %v772_v56, %v411_v22 }
  0xfc   : > { %v613_v25 = vpop.f32.mrf.mxu0  ;;  %v629_v26 = vpop.f32.mrf.mxu1 }
  0xfd   : > { %460 = vst [vmem:[%s779_s13 + $0x28] sm:$0xff] %v348_v23  ;;  %476 = vst [vmem:[%s779_s13 + $0xa8] sm:$0xff] %v412_v24  ;;  %v369_v27 = vadd.f32 %v613_v25, %v772_v56  ;;  %v433_v28 = vadd.f32 %v629_v26, %v772_v56 }
  0xfe   : > { %v360_v29 = vpop.f32.mrf.mxu0  ;;  %v424_v30 = vpop.f32.mrf.mxu1 }
  0xff   : > { %465 = vst [vmem:[%s779_s13 + $0x50] sm:$0xff] %v369_v27  ;;  %481 = vst [vmem:[%s779_s13 + $0xd0] sm:$0xff] %v433_v28  ;;  %v361_v31 = vadd.f32 %v772_v56, %v360_v29  ;;  %v425_v32 = vadd.f32 %v772_v56, %v424_v30 }
 0x100   : > { %v614_v33 = vpop.f32.mrf.mxu0  ;;  %v630_v34 = vpop.f32.mrf.mxu1 }
 0x101   : > { %463 = vst [vmem:[%s779_s13 + $0x40] sm:$0xff] %v361_v31  ;;  %479 = vst [vmem:[%s779_s13 + $0xc0] sm:$0xff] %v425_v32  ;;  %v372_v35 = vadd.f32 %v614_v33, %v772_v56  ;;  %v436_v36 = vadd.f32 %v630_v34, %v772_v56 }
 0x102   : > { %v363_v37 = vpop.f32.mrf.mxu0  ;;  %v427_v38 = vpop.f32.mrf.mxu1 }
 0x103   : > { %466 = vst [vmem:[%s779_s13 + $0x58] sm:$0xff] %v372_v35  ;;  %482 = vst [vmem:[%s779_s13 + $0xd8] sm:$0xff] %v436_v36  ;;  %v364_v39 = vadd.f32 %v772_v56, %v363_v37  ;;  %v428_v40 = vadd.f32 %v772_v56, %v427_v38 }
 0x104   : > { %v617_v41 = vpop.f32.mrf.mxu0  ;;  %v633_v42 = vpop.f32.mrf.mxu1 }
 0x105   : > { %464 = vst [vmem:[%s779_s13 + $0x48] sm:$0xff] %v364_v39  ;;  %480 = vst [vmem:[%s779_s13 + $0xc8] sm:$0xff] %v428_v40  ;;  %v385_v43 = vadd.f32 %v617_v41, %v772_v56  ;;  %v449_v44 = vadd.f32 %v633_v42, %v772_v56 }
 0x106   : > { %v376_v45 = vpop.f32.mrf.mxu0  ;;  %v440_v46 = vpop.f32.mrf.mxu1 }
 0x107   : > { %469 = vst [vmem:[%s779_s13 + $0x70] sm:$0xff] %v385_v43  ;;  %485 = vst [vmem:[%s779_s13 + $0xf0] sm:$0xff] %v449_v44  ;;  %v377_v47 = vadd.f32 %v772_v56, %v376_v45  ;;  %v441_v48 = vadd.f32 %v772_v56, %v440_v46 }
 0x108   : > { %v618_v49 = vpop.f32.mrf.mxu0  ;;  %v634_v50 = vpop.f32.mrf.mxu1 }
 0x109   : > { %467 = vst [vmem:[%s779_s13 + $0x60] sm:$0xff] %v377_v47  ;;  %483 = vst [vmem:[%s779_s13 + $0xe0] sm:$0xff] %v441_v48  ;;  %v388_v51 = vadd.f32 %v618_v49, %v772_v56  ;;  %v452_v52 = vadd.f32 %v634_v50, %v772_v56 }
 0x10a   : > { %v379_v53 = vpop.f32.mrf.mxu0  ;;  %v443_v54 = vpop.f32.mrf.mxu1 }
 0x10b   : > { %470 = vst [vmem:[%s779_s13 + $0x78] sm:$0xff] %v388_v51  ;;  %486 = vst [vmem:[%s779_s13 + $0xf8] sm:$0xff] %v452_v52  ;;  %v380_v55 = vadd.f32 %v772_v56, %v379_v53  ;;  %v444_v57 = vadd.f32 %v772_v56, %v443_v54 }
 0x10d   : > { %468 = vst [vmem:[%s779_s13 + $0x68] sm:$0xff] %v380_v55  ;;  %484 = vst [vmem:[%s779_s13 + $0xe8] sm:$0xff] %v444_v57 }
 0x10e PF: > { %s13_s12 = sadd.s32 1, %s673_s12  }
 0x10f   : > { %p10_p4 = scmp.ge.s32.totalorder %s13_s12, 4  }
 0x111   :  { %12 = sbr.rel (!%p10_p4) target bundleno = 1 (0x1), region = 62 }

</bundles_post_ra>
